<compile_context>
chip_gen: v7x
topology: tpu7x:2x2x1
jax: 0.10.0
libtpu: 0.0.40
codegen_flags: <defaults>
</compile_context>

<pallas_src>
import functools
import math

import jax
import jax.numpy as jnp
from jax.experimental import pallas as pl
from jax.experimental.pallas import tpu as pltpu


# ---------------------------------------------------------------------------
# helpers
# ---------------------------------------------------------------------------

_MIN_VMEM_LIMIT = 32 * 1024 * 1024     # raise the 16 MiB v5e default
_MAX_VMEM_LIMIT = 48 * 1024 * 1024     # stay under v7x's 64 MiB physical VMEM


def _compiler_params(parallel_axes, arbitrary_axes, vmem_need_bytes):
    limit = int(min(max(2 * vmem_need_bytes, _MIN_VMEM_LIMIT), _MAX_VMEM_LIMIT))
    sem = ("parallel",) * parallel_axes + ("arbitrary",) * arbitrary_axes
    return pltpu.CompilerParams(dimension_semantics=sem, vmem_limit_bytes=limit)


def _pick_batch_tile(bs, seq, c, *, target_rows=512, act_budget_bytes=8 << 20):
    """Largest batch tile that (a) keeps >=2 parallel grid blocks (megacore),
    (b) keeps the per-step f32 working set within `act_budget_bytes`, and
    (c) stops growing once matmul M reaches `target_rows` (256-512 rows feed
    the 256-deep v6e/v7x MXU; v5e's 128-deep MXU is already full earlier)."""
    bytes_per_row = 12 * 4 * c            # ~12 live f32 row-copies per layer step
    max_rows = max(seq, act_budget_bytes // bytes_per_row)
    best = 1
    for d in range(1, bs + 1):
        if bs % d:
            continue
        if d * seq > max_rows:
            break
        if bs >= 2 and bs // d < 2:        # keep >=2 parallel blocks
            break
        best = d
        if d * seq >= target_rows:
            break
    return best


def _pick_token_tile(n, *, target_rows=256, max_rows=2048):
    """Token tile for the patch-embedding matmul (multiple of 8 or full N)."""
    cands = [d for d in range(1, n + 1) if n % d == 0 and (d % 8 == 0 or d == n)]
    best = cands[0]
    for d in cands:
        if d > max_rows:
            break
        best = d
        if d >= target_rows:
            break
    return best


def _ln(x, g, b, eps=1e-5):
    mean = jnp.mean(x, axis=-1, keepdims=True)
    var = jnp.mean(jnp.square(x - mean), axis=-1, keepdims=True)
    return (x - mean) * jax.lax.rsqrt(var + eps) * g + b


def _gelu(x):
    # exact (erf) GELU -- matches PyTorch F.gelu default / activation='gelu'
    return 0.5 * x * (1.0 + jax.lax.erf(x * jnp.float32(1.0 / math.sqrt(2.0))))


# ---------------------------------------------------------------------------
# Kernel 1: patch embedding (Conv3d as matmul) + bias + positional encodings
# ---------------------------------------------------------------------------

def _patch_embed_kernel(xp_ref, w_ref, b_ref, pos_ref, o_ref):
    y = jnp.dot(xp_ref[0], w_ref[...], preferred_element_type=jnp.float32)
    o_ref[0] = (y + b_ref[...] + pos_ref[...]).astype(o_ref.dtype)


def patch_embed(xp, w, b, pos):
    """xp:(B,N,K) bf16, w:(K,C) bf16, b:(1,C) f32, pos:(N,C) f32 -> (B,N,C) bf16."""
    bsz, n, k = xp.shape
    c = w.shape[1]
    nt = _pick_token_tile(n)
    need = 2 * (nt * k * 2 + k * c * 2 + (nt + 1) * c * 4 + nt * c * 2)
    return pl.pallas_call(
        _patch_embed_kernel,
        out_shape=jax.ShapeDtypeStruct((bsz, n, c), jnp.bfloat16),
        grid=(bsz, n // nt),
        in_specs=[
            pl.BlockSpec((1, nt, k), lambda i, j: (i, j, 0)),
            pl.BlockSpec((k, c), lambda i, j: (0, 0)),
            pl.BlockSpec((1, c), lambda i, j: (0, 0)),
            pl.BlockSpec((nt, c), lambda i, j: (j, 0)),
        ],
        out_specs=pl.BlockSpec((1, nt, c), lambda i, j: (i, j, 0)),
        compiler_params=_compiler_params(2, 0, need),
    )(xp, w, b, pos)


# ---------------------------------------------------------------------------
# Kernel 2: fused transformer-encoder stack with per-layer weight streaming
#           grid = (batch_blocks [parallel], num_layers [arbitrary])
# ---------------------------------------------------------------------------

def _encoder_stack_kernel(x_ref,
                          ln1_g, ln1_b, wqkv, bqkv, wout, bout,
                          ln2_g, ln2_b, w1, b1, w2, b2,
                          fng, fnb,
                          o_ref, x_sc, att_sc,
                          *, num_heads, causal):
    nb, seq, c = x_ref.shape
    dh = c // num_heads
    scale = jnp.float32(1.0 / math.sqrt(dh))
    layer = pl.program_id(1)
    num_layers = pl.num_programs(1)

    # Residual stream lives in VMEM scratch across the (arbitrary) layer axis.
    @pl.when(layer == 0)
    def _():
        x_sc[...] = x_ref[...].astype(jnp.float32)

    x = x_sc[...].reshape(nb * seq, c)

    # ---- self-attention block (pre-norm) ----------------------------------
    h16 = _ln(x, ln1_g[0], ln1_b[0]).astype(jnp.bfloat16)
    qkv = jnp.dot(h16, wqkv[0], preferred_element_type=jnp.float32) + bqkv[0]
    qkv = qkv.reshape(nb, seq, 3 * c)
    q_all = qkv[:, :, :c]            # 0 / C / 2C offsets are 128-aligned (C%128==0)
    k_all = qkv[:, :, c:2 * c]
    v_all = qkv[:, :, 2 * c:]

    if causal:
        row = jax.lax.broadcasted_iota(jnp.int32, (seq, seq), 0)
        col = jax.lax.broadcasted_iota(jnp.int32, (seq, seq), 1)
        neg = jnp.where(col > row, jnp.float32(-1e30), jnp.float32(0.0))

    # TODO(synk): replace the head loop with one batched 'bqhd,bkhd->bhqk'
    # einsum pair once Mosaic supports multi-batch-dim dot_general.  Each
    # head's context is written straight into att_sc (no lane concat, head
    # results don't stay live), then one full-K out-projection runs on MXU.
    for hh in range(num_heads):
        sl = slice(hh * dh, (hh + 1) * dh)
        q = q_all[:, :, sl].astype(jnp.bfloat16)
        k = k_all[:, :, sl].astype(jnp.bfloat16)
        v = v_all[:, :, sl].astype(jnp.bfloat16)
        s = jnp.einsum('bqd,bkd->bqk', q, k,
                       preferred_element_type=jnp.float32) * scale
        if causal:
            s = s + neg[None]
        m = jnp.max(s, axis=-1, keepdims=True)
        p = jnp.exp(s - m)
        p = p * pl.reciprocal(jnp.sum(p, axis=-1, keepdims=True), approx=True)
        att_sc[:, :, sl] = jnp.einsum('bqk,bkd->bqd', p.astype(jnp.bfloat16), v,
                                      preferred_element_type=jnp.float32)

    att = att_sc[...].reshape(nb * seq, c).astype(jnp.bfloat16)
    x = x + jnp.dot(att, wout[0], preferred_element_type=jnp.float32) + bout[0]

    # ---- MLP block (pre-norm) ----------------------------------------------
    h16 = _ln(x, ln2_g[0], ln2_b[0]).astype(jnp.bfloat16)
    h = jnp.dot(h16, w1[0], preferred_element_type=jnp.float32) + b1[0]
    h = _gelu(h)
    h = jnp.dot(h.astype(jnp.bfloat16), w2[0],
                preferred_element_type=jnp.float32) + b2[0]
    x = x + h

    x_sc[...] = x.reshape(nb, seq, c)

    @pl.when(layer == num_layers - 1)
    def _():
        y = _ln(x, fng[...], fnb[...])                # final stack LayerNorm
        o_ref[...] = y.reshape(nb, seq, c).astype(o_ref.dtype)


_PARAM_ORDER = ["ln1_g", "ln1_b", "wqkv", "bqkv", "wout", "bout",
                "ln2_g", "ln2_b", "w1", "b1", "w2", "b2"]


def _stack_layer_params(layers):
    nl = len(layers)
    c = layers[0]["norm1_g"].shape[0]
    f32, bf16 = jnp.float32, jnp.bfloat16
    st = lambda name: jnp.stack([p[name] for p in layers])
    return dict(
        ln1_g=st("norm1_g").astype(f32).reshape(nl, 1, c),
        ln1_b=st("norm1_b").astype(f32).reshape(nl, 1, c),
        wqkv=jnp.stack([p["in_proj_w"].T for p in layers]).astype(bf16),
        bqkv=st("in_proj_b").astype(f32).reshape(nl, 1, 3 * c),
        wout=jnp.stack([p["out_proj_w"].T for p in layers]).astype(bf16),
        bout=st("out_proj_b").astype(f32).reshape(nl, 1, c),
        ln2_g=st("norm2_g").astype(f32).reshape(nl, 1, c),
        ln2_b=st("norm2_b").astype(f32).reshape(nl, 1, c),
        w1=jnp.stack([p["lin1_w"].T for p in layers]).astype(bf16),
        b1=st("lin1_b").astype(f32).reshape(nl, 1, 4 * c),
        w2=jnp.stack([p["lin2_w"].T for p in layers]).astype(bf16),
        b2=st("lin2_b").astype(f32).reshape(nl, 1, c),
    )


def encoder_stack(x, layers, norm_g, norm_b, *, num_heads, causal,
                  out_dtype=jnp.bfloat16):
    """x: (BS, L, C) -> full nn.TransformerEncoder (num_layers layers + final LN)."""
    bs, seq, c = x.shape
    nl = len(layers)
    tb = _pick_batch_tile(bs, seq, c)
    sp = _stack_layer_params(layers)
    fng = norm_g.astype(jnp.float32).reshape(1, c)
    fnb = norm_b.astype(jnp.float32).reshape(1, c)

    weights = [sp[k] for k in _PARAM_ORDER]
    # Stream one layer's weights per layer-grid step (double-buffered by Pallas
    # -> at most ~2 layers of weights resident, regardless of num_layers).
    w_specs = [pl.BlockSpec((1,) + w.shape[1:],
                            lambda i, l, nz=w.ndim - 1: (l,) + (0,) * nz)
               for w in weights]
    fn_specs = [pl.BlockSpec((1, c), lambda i, l: (0, 0)),
                pl.BlockSpec((1, c), lambda i, l: (0, 0))]

    rows = tb * seq
    per_layer_w_bytes = sum(int(w.nbytes) for w in weights) // nl
    vmem_need = (2 * per_layer_w_bytes         # streamed weights (double-buffered)
                 + 4 * rows * c * 4            # x / out blocks
                 + 2 * rows * c * 4            # residual + attention scratches
                 + 12 * rows * c * 4)          # live f32 intermediates

    return pl.pallas_call(
        functools.partial(_encoder_stack_kernel, num_heads=num_heads,
                          causal=causal),
        out_shape=jax.ShapeDtypeStruct((bs, seq, c), out_dtype),
        grid=(bs // tb, nl),
        in_specs=[pl.BlockSpec((tb, seq, c), lambda i, l: (i, 0, 0))]
                 + w_specs + fn_specs,
        out_specs=pl.BlockSpec((tb, seq, c), lambda i, l: (i, 0, 0)),
        scratch_shapes=[pltpu.VMEM((tb, seq, c), jnp.float32),   # residual stream
                        pltpu.VMEM((tb, seq, c), jnp.float32)],  # attention assembly
        compiler_params=_compiler_params(1, 1, vmem_need),
    )(x, *weights, fng, fnb)


# ---------------------------------------------------------------------------
# Forward pass (glue: patch extraction / permutes between stacks)
# ---------------------------------------------------------------------------

def encoder_forward(x, params, *, patch_size, num_heads):
    # x: (B, T, Cin, H, W)  ->  (B, T//pt, (H//ph)*(W//pw), hidden)
    b, t, cin, h, w = x.shape
    pt, ph, pw = patch_size
    tn, hn, wn = t // pt, h // ph, w // pw
    s = hn * wn
    hidden = params["conv_b"].shape[0]
    attn = params["attn"]

    # Non-overlapping Conv3d == patch-flatten + matmul (patch order: c, dt, dh, dw)
    # TODO(synk): for production video sizes fold this im2col gather into the
    # patch_embed BlockSpec / manual strided DMA instead of an XLA transpose.
    xp = x.transpose(0, 2, 1, 3, 4).reshape(b, cin, tn, pt, hn, ph, wn, pw)
    xp = xp.transpose(0, 2, 4, 6, 1, 3, 5, 7).reshape(b, tn * s, cin * pt * ph * pw)
    w_flat = params["conv_w"].reshape(hidden, -1).T.astype(jnp.bfloat16)
    # fold pos-encoding add into the embedding kernel: pos[(t,s)] broadcast over B
    pos = (attn["spatial_pos"] + attn["temporal_pos"]).reshape(tn * s, hidden)
    emb = patch_embed(xp.astype(jnp.bfloat16), w_flat,
                      params["conv_b"].reshape(1, hidden).astype(jnp.float32),
                      pos.astype(jnp.float32))                 # (B, Tn*S, C) bf16

    # spatial attention over S, batched across (B*Tn) -- one fused kernel
    xs = emb.reshape(b * tn, s, hidden)
    xs = encoder_stack(xs, attn["spatial_layers"],
                       attn["spatial_norm_g"], attn["spatial_norm_b"],
                       num_heads=num_heads, causal=False, out_dtype=jnp.bfloat16)

    # causal temporal attention over Tn, batched across (B*S) -- one fused kernel
    # TODO(synk): this bf16 permute (and its inverse) could be folded into the
    # temporal kernel's BlockSpec with an in-kernel tile transpose.
    xt = xs.reshape(b, tn, s, hidden).transpose(0, 2, 1, 3).reshape(b * s, tn, hidden)
    xt = encoder_stack(xt, attn["temporal_layers"],
                       attn["temporal_norm_g"], attn["temporal_norm_b"],
                       num_heads=num_heads, causal=True, out_dtype=jnp.float32)
    return xt.reshape(b, s, tn, hidden).transpose(0, 2, 1, 3)


# ---------------------------------------------------------------------------
# Deterministic parameter init (synthetic; shapes match the nn.Module __init__)
# ---------------------------------------------------------------------------

def _dense(key, shape, scale=0.02):
    return scale * jax.random.normal(key, shape, dtype=jnp.float32)


def init_layer_params(key, c):
    ks = jax.random.split(key, 6)
    return dict(
        norm1_g=jnp.ones((c,), jnp.float32), norm1_b=jnp.zeros((c,), jnp.float32),
        in_proj_w=_dense(ks[0], (3 * c, c)),
        in_proj_b=_dense(ks[1], (3 * c,)),
        out_proj_w=_dense(ks[2], (c, c)),
        out_proj_b=jnp.zeros((c,), jnp.float32),
        norm2_g=jnp.ones((c,), jnp.float32), norm2_b=jnp.zeros((c,), jnp.float32),
        lin1_w=_dense(ks[3], (4 * c, c)),
        lin1_b=_dense(ks[4], (4 * c,)),
        lin2_w=_dense(ks[5], (c, 4 * c)),
        lin2_b=jnp.zeros((c,), jnp.float32),
    )


def init_encoder_params(key, patch_size, in_ch, hidden, size, frames, num_layers):
    pt, ph, pw = patch_size
    keys = jax.random.split(key, 5)
    # nn.TransformerEncoder deep-copies the single encoder_layer, so at init
    # every layer (in BOTH the spatial and temporal stacks) shares identical weights.
    layer = init_layer_params(keys[0], hidden)
    attn = dict(
        spatial_layers=[layer] * num_layers,
        temporal_layers=[layer] * num_layers,
        spatial_norm_g=jnp.ones((hidden,), jnp.float32),
        spatial_norm_b=jnp.zeros((hidden,), jnp.float32),
        temporal_norm_g=jnp.ones((hidden,), jnp.float32),
        temporal_norm_b=jnp.zeros((hidden,), jnp.float32),
        spatial_pos=jax.random.normal(keys[1], (1, 1, size * size, hidden),
                                      jnp.float32) / math.sqrt(hidden),
        temporal_pos=jax.random.normal(keys[2], (1, frames, 1, hidden),
                                       jnp.float32) / math.sqrt(hidden),
    )
    return dict(
        conv_w=_dense(keys[3], (hidden, in_ch, pt, ph, pw)),
        conv_b=_dense(keys[4], (hidden,)),
        attn=attn,
    )


# ---------------------------------------------------------------------------

if __name__ == "__main__":
    # Small shapes consistent with the module's forward; hidden kept lane-dense.
    patch_size = (2, 4, 4)
    in_ch = 3
    hidden = 128    # C % 128 == 0 -> lane-dense activations, dh = 32
    size = 4        # spatial grid after patching: 4x4 -> 16 spatial tokens
    frames = 2      # compressed frames after patching
    num_layers = 2
    num_heads = 4
    B = 2
    T = frames * patch_size[0]      # 4
    H = W = size * patch_size[1]    # 16

    key = jax.random.PRNGKey(0)
    k_params, k_x = jax.random.split(key)
    params = init_encoder_params(k_params, patch_size, in_ch, hidden,
                                 size, frames, num_layers)
    x = jax.random.normal(k_x, (B, T, in_ch, H, W), dtype=jnp.float32)

    @jax.jit
    def fwd(x_in, p):
        return encoder_forward(x_in, p, patch_size=patch_size, num_heads=num_heads)

    out = fwd(x, params)
    out = jax.block_until_ready(out)
    assert out.shape == (B, frames, size * size, hidden), out.shape
    assert bool(jnp.all(jnp.isfinite(out)))
    print("KERNEL_OK")
</pallas_src>

<mosaic_0001>
module attributes {stable_mosaic.version = 11 : i64} {
  func.func @_patch_embed_kernel(%arg0: i32, %arg1: i32, %arg2: memref<1x32x96xbf16, #tpu.memory_space<vmem>>, %arg3: memref<96x128xbf16, #tpu.memory_space<vmem>>, %arg4: memref<1x128xf32, #tpu.memory_space<vmem>>, %arg5: memref<32x128xf32, #tpu.memory_space<vmem>>, %arg6: memref<1x32x128xbf16, #tpu.memory_space<vmem>>) attributes {dimension_semantics = [#tpu.dimension_semantics<parallel>, #tpu.dimension_semantics<parallel>], iteration_bounds = array<i64: 2, 1>, scalar_prefetch = 0 : i64, scratch_operands = 0 : i64, tpu.core_type = #tpu.core_type<tc>, window_params = [{transform_indices = @transform_0, window_bounds = array<i64: 1, 32, 96>}, {pipeline_mode = #tpu.pipeline_mode<synchronous>, transform_indices = @transform_1, window_bounds = array<i64: 96, 128>}, {pipeline_mode = #tpu.pipeline_mode<synchronous>, transform_indices = @transform_2, window_bounds = array<i64: 1, 128>}, {transform_indices = @transform_3, window_bounds = array<i64: 32, 128>}, {transform_indices = @transform_4, window_bounds = array<i64: 1, 32, 128>}]} {
    %c0 = arith.constant 0 : index
    %c0_0 = arith.constant 0 : index
    %c0_1 = arith.constant 0 : index
    %0 = vector.load %arg2[%c0, %c0_0, %c0_1] : memref<1x32x96xbf16, #tpu.memory_space<vmem>>, vector<1x32x96xbf16>
    %1 = vector.shape_cast %0 : vector<1x32x96xbf16> to vector<32x96xbf16>
    %c0_2 = arith.constant 0 : index
    %c0_3 = arith.constant 0 : index
    %2 = vector.load %arg3[%c0_2, %c0_3] : memref<96x128xbf16, #tpu.memory_space<vmem>>, vector<96x128xbf16>
    %cst = arith.constant dense<0.000000e+00> : vector<32x128xf32>
    %3 = tpu.matmul %1, %2, %cst {dimension_numbers = #tpu.dot_dimension_numbers<[1], [0], [0], [1], [0, 0, 1, 1], [], []>} : vector<32x96xbf16>, vector<96x128xbf16>, vector<32x128xf32> -> vector<32x128xf32>
    %c0_4 = arith.constant 0 : index
    %c0_5 = arith.constant 0 : index
    %4 = vector.load %arg4[%c0_4, %c0_5] : memref<1x128xf32, #tpu.memory_space<vmem>>, vector<1x128xf32>
    %5 = vector.broadcast %4 : vector<1x128xf32> to vector<32x128xf32>
    %6 = arith.addf %3, %5 : vector<32x128xf32>
    %c0_6 = arith.constant 0 : index
    %c0_7 = arith.constant 0 : index
    %7 = vector.load %arg5[%c0_6, %c0_7] : memref<32x128xf32, #tpu.memory_space<vmem>>, vector<32x128xf32>
    %8 = arith.addf %6, %7 : vector<32x128xf32>
    %9 = arith.truncf %8 : vector<32x128xf32> to vector<32x128xbf16>
    %c0_8 = arith.constant 0 : index
    %c0_9 = arith.constant 0 : index
    %c0_10 = arith.constant 0 : index
    %10 = vector.load %arg6[%c0_8, %c0_9, %c0_10] : memref<1x32x128xbf16, #tpu.memory_space<vmem>>, vector<1x32x128xbf16>
    %11 = vector.shape_cast %10 : vector<1x32x128xbf16> to vector<32x128xbf16>
    %12 = vector.shape_cast %9 : vector<32x128xbf16> to vector<1x32x128xbf16>
    tpu.vector_store %arg6[%c0_8, %c0_9, %c0_10], %12 {strides = array<i32>} : memref<1x32x128xbf16, #tpu.memory_space<vmem>>, vector<1x32x128xbf16>,
    return
  }
  func.func @transform_0(%arg0: i32, %arg1: i32) -> (i32, i32, i32) {
    %c0_i32 = arith.constant 0 : i32
    %c0_i32_0 = arith.constant 0 : i32
    return %arg0, %arg1, %c0_i32 : i32, i32, i32
  }
  func.func @transform_1(%arg0: i32, %arg1: i32) -> (i32, i32) {
    %c0_i32 = arith.constant 0 : i32
    %c0_i32_0 = arith.constant 0 : i32
    %c0_i32_1 = arith.constant 0 : i32
    return %c0_i32, %c0_i32_0 : i32, i32
  }
  func.func @transform_2(%arg0: i32, %arg1: i32) -> (i32, i32) {
    %c0_i32 = arith.constant 0 : i32
    %c0_i32_0 = arith.constant 0 : i32
    %c0_i32_1 = arith.constant 0 : i32
    return %c0_i32, %c0_i32_0 : i32, i32
  }
  func.func @transform_3(%arg0: i32, %arg1: i32) -> (i32, i32) {
    %c0_i32 = arith.constant 0 : i32
    %c0_i32_0 = arith.constant 0 : i32
    return %arg1, %c0_i32 : i32, i32
  }
  func.func @transform_4(%arg0: i32, %arg1: i32) -> (i32, i32, i32) {
    %c0_i32 = arith.constant 0 : i32
    %c0_i32_0 = arith.constant 0 : i32
    return %arg0, %arg1, %c0_i32 : i32, i32, i32
  }
}

module attributes {stable_mosaic.version = 11 : i64} {
  func.func @_encoder_stack_kernel(%arg0: i32, %arg1: i32, %arg2: memref<2x16x128xbf16, #tpu.memory_space<vmem>>, %arg3: memref<1x1x128xf32, #tpu.memory_space<vmem>>, %arg4: memref<1x1x128xf32, #tpu.memory_space<vmem>>, %arg5: memref<1x128x384xbf16, #tpu.memory_space<vmem>>, %arg6: memref<1x1x384xf32, #tpu.memory_space<vmem>>, %arg7: memref<1x128x128xbf16, #tpu.memory_space<vmem>>, %arg8: memref<1x1x128xf32, #tpu.memory_space<vmem>>, %arg9: memref<1x1x128xf32, #tpu.memory_space<vmem>>, %arg10: memref<1x1x128xf32, #tpu.memory_space<vmem>>, %arg11: memref<1x128x512xbf16, #tpu.memory_space<vmem>>, %arg12: memref<1x1x512xf32, #tpu.memory_space<vmem>>, %arg13: memref<1x512x128xbf16, #tpu.memory_space<vmem>>, %arg14: memref<1x1x128xf32, #tpu.memory_space<vmem>>, %arg15: memref<1x128xf32, #tpu.memory_space<vmem>>, %arg16: memref<1x128xf32, #tpu.memory_space<vmem>>, %arg17: memref<2x16x128xbf16, #tpu.memory_space<vmem>>, %arg18: memref<2x16x128xf32, #tpu.memory_space<vmem>>, %arg19: memref<2x16x128xf32, #tpu.memory_space<vmem>>) attributes {dimension_semantics = [#tpu.dimension_semantics<parallel>, #tpu.dimension_semantics<arbitrary>], iteration_bounds = array<i64: 2, 2>, scalar_prefetch = 0 : i64, scratch_operands = 2 : i64, tpu.core_type = #tpu.core_type<tc>, window_params = [{transform_indices = @transform_0, window_bounds = array<i64: 2, 16, 128>}, {transform_indices = @transform_1, window_bounds = array<i64: 1, 1, 128>}, {transform_indices = @transform_2, window_bounds = array<i64: 1, 1, 128>}, {transform_indices = @transform_3, window_bounds = array<i64: 1, 128, 384>}, {transform_indices = @transform_4, window_bounds = array<i64: 1, 1, 384>}, {transform_indices = @transform_5, window_bounds = array<i64: 1, 128, 128>}, {transform_indices = @transform_6, window_bounds = array<i64: 1, 1, 128>}, {transform_indices = @transform_7, window_bounds = array<i64: 1, 1, 128>}, {transform_indices = @transform_8, window_bounds = array<i64: 1, 1, 128>}, {transform_indices = @transform_9, window_bounds = array<i64: 1, 128, 512>}, {transform_indices = @transform_10, window_bounds = array<i64: 1, 1, 512>}, {transform_indices = @transform_11, window_bounds = array<i64: 1, 512, 128>}, {transform_indices = @transform_12, window_bounds = array<i64: 1, 1, 128>}, {pipeline_mode = #tpu.pipeline_mode<synchronous>, transform_indices = @transform_13, window_bounds = array<i64: 1, 128>}, {pipeline_mode = #tpu.pipeline_mode<synchronous>, transform_indices = @transform_14, window_bounds = array<i64: 1, 128>}, {transform_indices = @transform_15, window_bounds = array<i64: 2, 16, 128>}]} {
    %c0_i32 = arith.constant 0 : i32
    %0 = arith.cmpi eq, %arg1, %c0_i32 : i32
    %1 = arith.extui %0 : i1 to i32
    %c0_i32_0 = arith.constant 0 : i32
    %2 = arith.cmpi ne, %1, %c0_i32_0 : i32
    scf.if %2 {
      %c0_91 = arith.constant 0 : index
      %c0_92 = arith.constant 0 : index
      %c0_93 = arith.constant 0 : index
      %198 = vector.load %arg2[%c0_91, %c0_92, %c0_93] : memref<2x16x128xbf16, #tpu.memory_space<vmem>>, vector<2x16x128xbf16>
      %199 = arith.extf %198 : vector<2x16x128xbf16> to vector<2x16x128xf32>
      %c0_94 = arith.constant 0 : index
      %c0_95 = arith.constant 0 : index
      %c0_96 = arith.constant 0 : index
      %200 = vector.load %arg18[%c0_94, %c0_95, %c0_96] : memref<2x16x128xf32, #tpu.memory_space<vmem>>, vector<2x16x128xf32>
      tpu.vector_store %arg18[%c0_94, %c0_95, %c0_96], %199 {strides = array<i32>} : memref<2x16x128xf32, #tpu.memory_space<vmem>>, vector<2x16x128xf32>,
    } else {
    }
    %c0 = arith.constant 0 : index
    %c0_1 = arith.constant 0 : index
    %c0_2 = arith.constant 0 : index
    %3 = vector.load %arg18[%c0, %c0_1, %c0_2] : memref<2x16x128xf32, #tpu.memory_space<vmem>>, vector<2x16x128xf32>
    %4 = vector.shape_cast %3 : vector<2x16x128xf32> to vector<32x128xf32>
    %c0_3 = arith.constant 0 : index
    %c0_4 = arith.constant 0 : index
    %c0_5 = arith.constant 0 : index
    %5 = vector.load %arg3[%c0_3, %c0_4, %c0_5] : memref<1x1x128xf32, #tpu.memory_space<vmem>>, vector<1x1x128xf32>
    %6 = vector.shape_cast %5 : vector<1x1x128xf32> to vector<1x128xf32>
    %c0_6 = arith.constant 0 : index
    %c0_7 = arith.constant 0 : index
    %c0_8 = arith.constant 0 : index
    %7 = vector.load %arg4[%c0_6, %c0_7, %c0_8] : memref<1x1x128xf32, #tpu.memory_space<vmem>>, vector<1x1x128xf32>
    %8 = vector.shape_cast %7 : vector<1x1x128xf32> to vector<1x128xf32>
    %cst = arith.constant dense<0.000000e+00> : vector<32xf32>
    %9 = vector.multi_reduction <add>, %4, %cst [1] : vector<32x128xf32> to vector<32xf32>
    %10 = vector.shape_cast %9 : vector<32xf32> to vector<32x1xf32>
    %cst_9 = arith.constant 1.280000e+02 : f32
    %11 = vector.broadcast %cst_9 : f32 to vector<32x1xf32>
    %12 = arith.divf %10, %11 : vector<32x1xf32>
    %13 = vector.broadcast %12 : vector<32x1xf32> to vector<32x128xf32>
    %14 = arith.subf %4, %13 : vector<32x128xf32>
    %15 = arith.mulf %14, %14 : vector<32x128xf32>
    %cst_10 = arith.constant dense<0.000000e+00> : vector<32xf32>
    %16 = vector.multi_reduction <add>, %15, %cst_10 [1] : vector<32x128xf32> to vector<32xf32>
    %17 = vector.shape_cast %16 : vector<32xf32> to vector<32x1xf32>
    %cst_11 = arith.constant 1.280000e+02 : f32
    %18 = vector.broadcast %cst_11 : f32 to vector<32x1xf32>
    %19 = arith.divf %17, %18 : vector<32x1xf32>
    %20 = vector.broadcast %12 : vector<32x1xf32> to vector<32x128xf32>
    %21 = arith.subf %4, %20 : vector<32x128xf32>
    %cst_12 = arith.constant 9.99999974E-6 : f32
    %22 = vector.broadcast %cst_12 : f32 to vector<32x1xf32>
    %23 = arith.addf %19, %22 : vector<32x1xf32>
    %24 = math.rsqrt %23 : vector<32x1xf32>
    %25 = vector.broadcast %24 : vector<32x1xf32> to vector<32x128xf32>
    %26 = arith.mulf %21, %25 : vector<32x128xf32>
    %27 = vector.broadcast %6 : vector<1x128xf32> to vector<32x128xf32>
    %28 = arith.mulf %26, %27 : vector<32x128xf32>
    %29 = vector.broadcast %8 : vector<1x128xf32> to vector<32x128xf32>
    %30 = arith.addf %28, %29 : vector<32x128xf32>
    %31 = arith.truncf %30 : vector<32x128xf32> to vector<32x128xbf16>
    %c0_13 = arith.constant 0 : index
    %c0_14 = arith.constant 0 : index
    %c0_15 = arith.constant 0 : index
    %32 = vector.load %arg5[%c0_13, %c0_14, %c0_15] : memref<1x128x384xbf16, #tpu.memory_space<vmem>>, vector<1x128x384xbf16>
    %33 = vector.shape_cast %32 : vector<1x128x384xbf16> to vector<128x384xbf16>
    %cst_16 = arith.constant dense<0.000000e+00> : vector<32x384xf32>
    %34 = tpu.matmul %31, %33, %cst_16 {dimension_numbers = #tpu.dot_dimension_numbers<[1], [0], [0], [1], [0, 0, 1, 1], [], []>} : vector<32x128xbf16>, vector<128x384xbf16>, vector<32x384xf32> -> vector<32x384xf32>
    %c0_17 = arith.constant 0 : index
    %c0_18 = arith.constant 0 : index
    %c0_19 = arith.constant 0 : index
    %35 = vector.load %arg6[%c0_17, %c0_18, %c0_19] : memref<1x1x384xf32, #tpu.memory_space<vmem>>, vector<1x1x384xf32>
    %36 = vector.shape_cast %35 : vector<1x1x384xf32> to vector<1x384xf32>
    %37 = vector.broadcast %36 : vector<1x384xf32> to vector<32x384xf32>
    %38 = arith.addf %34, %37 : vector<32x384xf32>
    %39 = vector.shape_cast %38 : vector<32x384xf32> to vector<2x16x384xf32>
    %40 = vector.extract_strided_slice %39 {offsets = [0, 0, 0], sizes = [2, 16, 128], strides = [1, 1, 1]} : vector<2x16x384xf32> to vector<2x16x128xf32>
    %41 = vector.extract_strided_slice %39 {offsets = [0, 0, 128], sizes = [2, 16, 128], strides = [1, 1, 1]} : vector<2x16x384xf32> to vector<2x16x128xf32>
    %42 = vector.extract_strided_slice %39 {offsets = [0, 0, 256], sizes = [2, 16, 128], strides = [1, 1, 1]} : vector<2x16x384xf32> to vector<2x16x128xf32>
    %43 = vector.extract_strided_slice %40 {offsets = [0, 0, 0], sizes = [2, 16, 32], strides = [1, 1, 1]} : vector<2x16x128xf32> to vector<2x16x32xf32>
    %44 = arith.truncf %43 : vector<2x16x32xf32> to vector<2x16x32xbf16>
    %45 = vector.extract_strided_slice %41 {offsets = [0, 0, 0], sizes = [2, 16, 32], strides = [1, 1, 1]} : vector<2x16x128xf32> to vector<2x16x32xf32>
    %46 = arith.truncf %45 : vector<2x16x32xf32> to vector<2x16x32xbf16>
    %47 = vector.extract_strided_slice %42 {offsets = [0, 0, 0], sizes = [2, 16, 32], strides = [1, 1, 1]} : vector<2x16x128xf32> to vector<2x16x32xf32>
    %48 = arith.truncf %47 : vector<2x16x32xf32> to vector<2x16x32xbf16>
    "tpu.trace_start"() <{level = 10 : i32, message = "bqd,bkd->bqk"}> : () -> ()
    %cst_20 = arith.constant dense<0.000000e+00> : vector<2x16x16xf32>
    %49 = tpu.matmul %44, %46, %cst_20 {dimension_numbers = #tpu.dot_dimension_numbers<[2], [2], [1], [1], [0, 0, 0, 1, 1, 1], [0], [0]>} : vector<2x16x32xbf16>, vector<2x16x32xbf16>, vector<2x16x16xf32> -> vector<2x16x16xf32>
    "tpu.trace_stop"() : () -> ()
    %cst_21 = arith.constant 0.176776692 : f32
    %50 = vector.broadcast %cst_21 : f32 to vector<2x16x16xf32>
    %51 = arith.mulf %49, %50 : vector<2x16x16xf32>
    %cst_22 = arith.constant dense<0xFF800000> : vector<2x16xf32>
    %52 = vector.multi_reduction <maximumf>, %51, %cst_22 [2] : vector<2x16x16xf32> to vector<2x16xf32>
    %53 = vector.shape_cast %52 : vector<2x16xf32> to vector<2x16x1xf32>
    %54 = vector.broadcast %53 : vector<2x16x1xf32> to vector<2x16x16xf32>
    %55 = arith.subf %51, %54 : vector<2x16x16xf32>
    %56 = math.exp %55 : vector<2x16x16xf32>
    %cst_23 = arith.constant dense<0.000000e+00> : vector<2x16xf32>
    %57 = vector.multi_reduction <add>, %56, %cst_23 [2] : vector<2x16x16xf32> to vector<2x16xf32>
    %58 = vector.shape_cast %57 : vector<2x16xf32> to vector<2x16x1xf32>
    %59 = tpu.reciprocal %58 {approx = true} : vector<2x16x1xf32> -> vector<2x16x1xf32>
    %60 = vector.broadcast %59 : vector<2x16x1xf32> to vector<2x16x16xf32>
    %61 = arith.mulf %56, %60 : vector<2x16x16xf32>
    %62 = arith.truncf %61 : vector<2x16x16xf32> to vector<2x16x16xbf16>
    "tpu.trace_start"() <{level = 10 : i32, message = "bqk,bkd->bqd"}> : () -> ()
    %cst_24 = arith.constant dense<0.000000e+00> : vector<2x16x32xf32>
    %63 = tpu.matmul %62, %48, %cst_24 {dimension_numbers = #tpu.dot_dimension_numbers<[2], [1], [1], [2], [0, 0, 0, 1, 1, 2], [0], [0]>} : vector<2x16x16xbf16>, vector<2x16x32xbf16>, vector<2x16x32xf32> -> vector<2x16x32xf32>
    "tpu.trace_stop"() : () -> ()
    %c0_25 = arith.constant 0 : index
    %c0_26 = arith.constant 0 : index
    %c0_27 = arith.constant 0 : index
    %64 = vector.load %arg19[%c0_25, %c0_26, %c0_27] : memref<2x16x128xf32, #tpu.memory_space<vmem>>, vector<2x16x32xf32>
    tpu.vector_store %arg19[%c0_25, %c0_26, %c0_27], %63 {strides = array<i32>} : memref<2x16x128xf32, #tpu.memory_space<vmem>>, vector<2x16x32xf32>,
    %65 = vector.extract_strided_slice %40 {offsets = [0, 0, 32], sizes = [2, 16, 32], strides = [1, 1, 1]} : vector<2x16x128xf32> to vector<2x16x32xf32>
    %66 = arith.truncf %65 : vector<2x16x32xf32> to vector<2x16x32xbf16>
    %67 = vector.extract_strided_slice %41 {offsets = [0, 0, 32], sizes = [2, 16, 32], strides = [1, 1, 1]} : vector<2x16x128xf32> to vector<2x16x32xf32>
    %68 = arith.truncf %67 : vector<2x16x32xf32> to vector<2x16x32xbf16>
    %69 = vector.extract_strided_slice %42 {offsets = [0, 0, 32], sizes = [2, 16, 32], strides = [1, 1, 1]} : vector<2x16x128xf32> to vector<2x16x32xf32>
    %70 = arith.truncf %69 : vector<2x16x32xf32> to vector<2x16x32xbf16>
    "tpu.trace_start"() <{level = 10 : i32, message = "bqd,bkd->bqk"}> : () -> ()
    %cst_28 = arith.constant dense<0.000000e+00> : vector<2x16x16xf32>
    %71 = tpu.matmul %66, %68, %cst_28 {dimension_numbers = #tpu.dot_dimension_numbers<[2], [2], [1], [1], [0, 0, 0, 1, 1, 1], [0], [0]>} : vector<2x16x32xbf16>, vector<2x16x32xbf16>, vector<2x16x16xf32> -> vector<2x16x16xf32>
    "tpu.trace_stop"() : () -> ()
    %cst_29 = arith.constant 0.176776692 : f32
    %72 = vector.broadcast %cst_29 : f32 to vector<2x16x16xf32>
    %73 = arith.mulf %71, %72 : vector<2x16x16xf32>
    %cst_30 = arith.constant dense<0xFF800000> : vector<2x16xf32>
    %74 = vector.multi_reduction <maximumf>, %73, %cst_30 [2] : vector<2x16x16xf32> to vector<2x16xf32>
    %75 = vector.shape_cast %74 : vector<2x16xf32> to vector<2x16x1xf32>
    %76 = vector.broadcast %75 : vector<2x16x1xf32> to vector<2x16x16xf32>
    %77 = arith.subf %73, %76 : vector<2x16x16xf32>
    %78 = math.exp %77 : vector<2x16x16xf32>
    %cst_31 = arith.constant dense<0.000000e+00> : vector<2x16xf32>
    %79 = vector.multi_reduction <add>, %78, %cst_31 [2] : vector<2x16x16xf32> to vector<2x16xf32>
    %80 = vector.shape_cast %79 : vector<2x16xf32> to vector<2x16x1xf32>
    %81 = tpu.reciprocal %80 {approx = true} : vector<2x16x1xf32> -> vector<2x16x1xf32>
    %82 = vector.broadcast %81 : vector<2x16x1xf32> to vector<2x16x16xf32>
    %83 = arith.mulf %78, %82 : vector<2x16x16xf32>
    %84 = arith.truncf %83 : vector<2x16x16xf32> to vector<2x16x16xbf16>
    "tpu.trace_start"() <{level = 10 : i32, message = "bqk,bkd->bqd"}> : () -> ()
    %cst_32 = arith.constant dense<0.000000e+00> : vector<2x16x32xf32>
    %85 = tpu.matmul %84, %70, %cst_32 {dimension_numbers = #tpu.dot_dimension_numbers<[2], [1], [1], [2], [0, 0, 0, 1, 1, 2], [0], [0]>} : vector<2x16x16xbf16>, vector<2x16x32xbf16>, vector<2x16x32xf32> -> vector<2x16x32xf32>
    "tpu.trace_stop"() : () -> ()
    %c0_33 = arith.constant 0 : index
    %c0_34 = arith.constant 0 : index
    %c32 = arith.constant 32 : index
    %86 = vector.load %arg19[%c0_33, %c0_34, %c32] : memref<2x16x128xf32, #tpu.memory_space<vmem>>, vector<2x16x32xf32>
    tpu.vector_store %arg19[%c0_33, %c0_34, %c32], %85 {strides = array<i32>} : memref<2x16x128xf32, #tpu.memory_space<vmem>>, vector<2x16x32xf32>,
    %87 = vector.extract_strided_slice %40 {offsets = [0, 0, 64], sizes = [2, 16, 32], strides = [1, 1, 1]} : vector<2x16x128xf32> to vector<2x16x32xf32>
    %88 = arith.truncf %87 : vector<2x16x32xf32> to vector<2x16x32xbf16>
    %89 = vector.extract_strided_slice %41 {offsets = [0, 0, 64], sizes = [2, 16, 32], strides = [1, 1, 1]} : vector<2x16x128xf32> to vector<2x16x32xf32>
    %90 = arith.truncf %89 : vector<2x16x32xf32> to vector<2x16x32xbf16>
    %91 = vector.extract_strided_slice %42 {offsets = [0, 0, 64], sizes = [2, 16, 32], strides = [1, 1, 1]} : vector<2x16x128xf32> to vector<2x16x32xf32>
    %92 = arith.truncf %91 : vector<2x16x32xf32> to vector<2x16x32xbf16>
    "tpu.trace_start"() <{level = 10 : i32, message = "bqd,bkd->bqk"}> : () -> ()
    %cst_35 = arith.constant dense<0.000000e+00> : vector<2x16x16xf32>
    %93 = tpu.matmul %88, %90, %cst_35 {dimension_numbers = #tpu.dot_dimension_numbers<[2], [2], [1], [1], [0, 0, 0, 1, 1, 1], [0], [0]>} : vector<2x16x32xbf16>, vector<2x16x32xbf16>, vector<2x16x16xf32> -> vector<2x16x16xf32>
    "tpu.trace_stop"() : () -> ()
    %cst_36 = arith.constant 0.176776692 : f32
    %94 = vector.broadcast %cst_36 : f32 to vector<2x16x16xf32>
    %95 = arith.mulf %93, %94 : vector<2x16x16xf32>
    %cst_37 = arith.constant dense<0xFF800000> : vector<2x16xf32>
    %96 = vector.multi_reduction <maximumf>, %95, %cst_37 [2] : vector<2x16x16xf32> to vector<2x16xf32>
    %97 = vector.shape_cast %96 : vector<2x16xf32> to vector<2x16x1xf32>
    %98 = vector.broadcast %97 : vector<2x16x1xf32> to vector<2x16x16xf32>
    %99 = arith.subf %95, %98 : vector<2x16x16xf32>
    %100 = math.exp %99 : vector<2x16x16xf32>
    %cst_38 = arith.constant dense<0.000000e+00> : vector<2x16xf32>
    %101 = vector.multi_reduction <add>, %100, %cst_38 [2] : vector<2x16x16xf32> to vector<2x16xf32>
    %102 = vector.shape_cast %101 : vector<2x16xf32> to vector<2x16x1xf32>
    %103 = tpu.reciprocal %102 {approx = true} : vector<2x16x1xf32> -> vector<2x16x1xf32>
    %104 = vector.broadcast %103 : vector<2x16x1xf32> to vector<2x16x16xf32>
    %105 = arith.mulf %100, %104 : vector<2x16x16xf32>
    %106 = arith.truncf %105 : vector<2x16x16xf32> to vector<2x16x16xbf16>
    "tpu.trace_start"() <{level = 10 : i32, message = "bqk,bkd->bqd"}> : () -> ()
    %cst_39 = arith.constant dense<0.000000e+00> : vector<2x16x32xf32>
    %107 = tpu.matmul %106, %92, %cst_39 {dimension_numbers = #tpu.dot_dimension_numbers<[2], [1], [1], [2], [0, 0, 0, 1, 1, 2], [0], [0]>} : vector<2x16x16xbf16>, vector<2x16x32xbf16>, vector<2x16x32xf32> -> vector<2x16x32xf32>
    "tpu.trace_stop"() : () -> ()
    %c0_40 = arith.constant 0 : index
    %c0_41 = arith.constant 0 : index
    %c64 = arith.constant 64 : index
    %108 = vector.load %arg19[%c0_40, %c0_41, %c64] : memref<2x16x128xf32, #tpu.memory_space<vmem>>, vector<2x16x32xf32>
    tpu.vector_store %arg19[%c0_40, %c0_41, %c64], %107 {strides = array<i32>} : memref<2x16x128xf32, #tpu.memory_space<vmem>>, vector<2x16x32xf32>,
    %109 = vector.extract_strided_slice %40 {offsets = [0, 0, 96], sizes = [2, 16, 32], strides = [1, 1, 1]} : vector<2x16x128xf32> to vector<2x16x32xf32>
    %110 = arith.truncf %109 : vector<2x16x32xf32> to vector<2x16x32xbf16>
    %111 = vector.extract_strided_slice %41 {offsets = [0, 0, 96], sizes = [2, 16, 32], strides = [1, 1, 1]} : vector<2x16x128xf32> to vector<2x16x32xf32>
    %112 = arith.truncf %111 : vector<2x16x32xf32> to vector<2x16x32xbf16>
    %113 = vector.extract_strided_slice %42 {offsets = [0, 0, 96], sizes = [2, 16, 32], strides = [1, 1, 1]} : vector<2x16x128xf32> to vector<2x16x32xf32>
    %114 = arith.truncf %113 : vector<2x16x32xf32> to vector<2x16x32xbf16>
    "tpu.trace_start"() <{level = 10 : i32, message = "bqd,bkd->bqk"}> : () -> ()
    %cst_42 = arith.constant dense<0.000000e+00> : vector<2x16x16xf32>
    %115 = tpu.matmul %110, %112, %cst_42 {dimension_numbers = #tpu.dot_dimension_numbers<[2], [2], [1], [1], [0, 0, 0, 1, 1, 1], [0], [0]>} : vector<2x16x32xbf16>, vector<2x16x32xbf16>, vector<2x16x16xf32> -> vector<2x16x16xf32>
    "tpu.trace_stop"() : () -> ()
    %cst_43 = arith.constant 0.176776692 : f32
    %116 = vector.broadcast %cst_43 : f32 to vector<2x16x16xf32>
    %117 = arith.mulf %115, %116 : vector<2x16x16xf32>
    %cst_44 = arith.constant dense<0xFF800000> : vector<2x16xf32>
    %118 = vector.multi_reduction <maximumf>, %117, %cst_44 [2] : vector<2x16x16xf32> to vector<2x16xf32>
    %119 = vector.shape_cast %118 : vector<2x16xf32> to vector<2x16x1xf32>
    %120 = vector.broadcast %119 : vector<2x16x1xf32> to vector<2x16x16xf32>
    %121 = arith.subf %117, %120 : vector<2x16x16xf32>
    %122 = math.exp %121 : vector<2x16x16xf32>
    %cst_45 = arith.constant dense<0.000000e+00> : vector<2x16xf32>
    %123 = vector.multi_reduction <add>, %122, %cst_45 [2] : vector<2x16x16xf32> to vector<2x16xf32>
    %124 = vector.shape_cast %123 : vector<2x16xf32> to vector<2x16x1xf32>
    %125 = tpu.reciprocal %124 {approx = true} : vector<2x16x1xf32> -> vector<2x16x1xf32>
    %126 = vector.broadcast %125 : vector<2x16x1xf32> to vector<2x16x16xf32>
    %127 = arith.mulf %122, %126 : vector<2x16x16xf32>
    %128 = arith.truncf %127 : vector<2x16x16xf32> to vector<2x16x16xbf16>
    "tpu.trace_start"() <{level = 10 : i32, message = "bqk,bkd->bqd"}> : () -> ()
    %cst_46 = arith.constant dense<0.000000e+00> : vector<2x16x32xf32>
    %129 = tpu.matmul %128, %114, %cst_46 {dimension_numbers = #tpu.dot_dimension_numbers<[2], [1], [1], [2], [0, 0, 0, 1, 1, 2], [0], [0]>} : vector<2x16x16xbf16>, vector<2x16x32xbf16>, vector<2x16x32xf32> -> vector<2x16x32xf32>
    "tpu.trace_stop"() : () -> ()
    %c0_47 = arith.constant 0 : index
    %c0_48 = arith.constant 0 : index
    %c96 = arith.constant 96 : index
    %130 = vector.load %arg19[%c0_47, %c0_48, %c96] : memref<2x16x128xf32, #tpu.memory_space<vmem>>, vector<2x16x32xf32>
    tpu.vector_store %arg19[%c0_47, %c0_48, %c96], %129 {strides = array<i32>} : memref<2x16x128xf32, #tpu.memory_space<vmem>>, vector<2x16x32xf32>,
    %c0_49 = arith.constant 0 : index
    %c0_50 = arith.constant 0 : index
    %c0_51 = arith.constant 0 : index
    %131 = vector.load %arg19[%c0_49, %c0_50, %c0_51] : memref<2x16x128xf32, #tpu.memory_space<vmem>>, vector<2x16x128xf32>
    %132 = vector.shape_cast %131 : vector<2x16x128xf32> to vector<32x128xf32>
    %133 = arith.truncf %132 : vector<32x128xf32> to vector<32x128xbf16>
    %c0_52 = arith.constant 0 : index
    %c0_53 = arith.constant 0 : index
    %c0_54 = arith.constant 0 : index
    %134 = vector.load %arg7[%c0_52, %c0_53, %c0_54] : memref<1x128x128xbf16, #tpu.memory_space<vmem>>, vector<1x128x128xbf16>
    %135 = vector.shape_cast %134 : vector<1x128x128xbf16> to vector<128x128xbf16>
    %cst_55 = arith.constant dense<0.000000e+00> : vector<32x128xf32>
    %136 = tpu.matmul %133, %135, %cst_55 {dimension_numbers = #tpu.dot_dimension_numbers<[1], [0], [0], [1], [0, 0, 1, 1], [], []>} : vector<32x128xbf16>, vector<128x128xbf16>, vector<32x128xf32> -> vector<32x128xf32>
    %137 = arith.addf %4, %136 : vector<32x128xf32>
    %c0_56 = arith.constant 0 : index
    %c0_57 = arith.constant 0 : index
    %c0_58 = arith.constant 0 : index
    %138 = vector.load %arg8[%c0_56, %c0_57, %c0_58] : memref<1x1x128xf32, #tpu.memory_space<vmem>>, vector<1x1x128xf32>
    %139 = vector.shape_cast %138 : vector<1x1x128xf32> to vector<1x128xf32>
    %140 = vector.broadcast %139 : vector<1x128xf32> to vector<32x128xf32>
    %141 = arith.addf %137, %140 : vector<32x128xf32>
    %c0_59 = arith.constant 0 : index
    %c0_60 = arith.constant 0 : index
    %c0_61 = arith.constant 0 : index
    %142 = vector.load %arg9[%c0_59, %c0_60, %c0_61] : memref<1x1x128xf32, #tpu.memory_space<vmem>>, vector<1x1x128xf32>
    %143 = vector.shape_cast %142 : vector<1x1x128xf32> to vector<1x128xf32>
    %c0_62 = arith.constant 0 : index
    %c0_63 = arith.constant 0 : index
    %c0_64 = arith.constant 0 : index
    %144 = vector.load %arg10[%c0_62, %c0_63, %c0_64] : memref<1x1x128xf32, #tpu.memory_space<vmem>>, vector<1x1x128xf32>
    %145 = vector.shape_cast %144 : vector<1x1x128xf32> to vector<1x128xf32>
    %cst_65 = arith.constant dense<0.000000e+00> : vector<32xf32>
    %146 = vector.multi_reduction <add>, %141, %cst_65 [1] : vector<32x128xf32> to vector<32xf32>
    %147 = vector.shape_cast %146 : vector<32xf32> to vector<32x1xf32>
    %cst_66 = arith.constant 1.280000e+02 : f32
    %148 = vector.broadcast %cst_66 : f32 to vector<32x1xf32>
    %149 = arith.divf %147, %148 : vector<32x1xf32>
    %150 = vector.broadcast %149 : vector<32x1xf32> to vector<32x128xf32>
    %151 = arith.subf %141, %150 : vector<32x128xf32>
    %152 = arith.mulf %151, %151 : vector<32x128xf32>
    %cst_67 = arith.constant dense<0.000000e+00> : vector<32xf32>
    %153 = vector.multi_reduction <add>, %152, %cst_67 [1] : vector<32x128xf32> to vector<32xf32>
    %154 = vector.shape_cast %153 : vector<32xf32> to vector<32x1xf32>
    %cst_68 = arith.constant 1.280000e+02 : f32
    %155 = vector.broadcast %cst_68 : f32 to vector<32x1xf32>
    %156 = arith.divf %154, %155 : vector<32x1xf32>
    %157 = vector.broadcast %149 : vector<32x1xf32> to vector<32x128xf32>
    %158 = arith.subf %141, %157 : vector<32x128xf32>
    %cst_69 = arith.constant 9.99999974E-6 : f32
    %159 = vector.broadcast %cst_69 : f32 to vector<32x1xf32>
    %160 = arith.addf %156, %159 : vector<32x1xf32>
    %161 = math.rsqrt %160 : vector<32x1xf32>
    %162 = vector.broadcast %161 : vector<32x1xf32> to vector<32x128xf32>
    %163 = arith.mulf %158, %162 : vector<32x128xf32>
    %164 = vector.broadcast %143 : vector<1x128xf32> to vector<32x128xf32>
    %165 = arith.mulf %163, %164 : vector<32x128xf32>
    %166 = vector.broadcast %145 : vector<1x128xf32> to vector<32x128xf32>
    %167 = arith.addf %165, %166 : vector<32x128xf32>
    %168 = arith.truncf %167 : vector<32x128xf32> to vector<32x128xbf16>
    %c0_70 = arith.constant 0 : index
    %c0_71 = arith.constant 0 : index
    %c0_72 = arith.constant 0 : index
    %169 = vector.load %arg11[%c0_70, %c0_71, %c0_72] : memref<1x128x512xbf16, #tpu.memory_space<vmem>>, vector<1x128x512xbf16>
    %170 = vector.shape_cast %169 : vector<1x128x512xbf16> to vector<128x512xbf16>
    %cst_73 = arith.constant dense<0.000000e+00> : vector<32x512xf32>
    %171 = tpu.matmul %168, %170, %cst_73 {dimension_numbers = #tpu.dot_dimension_numbers<[1], [0], [0], [1], [0, 0, 1, 1], [], []>} : vector<32x128xbf16>, vector<128x512xbf16>, vector<32x512xf32> -> vector<32x512xf32>
    %c0_74 = arith.constant 0 : index
    %c0_75 = arith.constant 0 : index
    %c0_76 = arith.constant 0 : index
    %172 = vector.load %arg12[%c0_74, %c0_75, %c0_76] : memref<1x1x512xf32, #tpu.memory_space<vmem>>, vector<1x1x512xf32>
    %173 = vector.shape_cast %172 : vector<1x1x512xf32> to vector<1x512xf32>
    %174 = vector.broadcast %173 : vector<1x512xf32> to vector<32x512xf32>
    %175 = arith.addf %171, %174 : vector<32x512xf32>
    %cst_77 = arith.constant 5.000000e-01 : f32
    %176 = vector.broadcast %cst_77 : f32 to vector<32x512xf32>
    %177 = arith.mulf %176, %175 : vector<32x512xf32>
    %cst_78 = arith.constant 0.707106769 : f32
    %178 = vector.broadcast %cst_78 : f32 to vector<32x512xf32>
    %179 = arith.mulf %175, %178 : vector<32x512xf32>
    %180 = math.erf %179 : vector<32x512xf32>
    %cst_79 = arith.constant 1.000000e+00 : f32
    %181 = vector.broadcast %cst_79 : f32 to vector<32x512xf32>
    %182 = arith.addf %181, %180 : vector<32x512xf32>
    %183 = arith.mulf %177, %182 : vector<32x512xf32>
    %184 = arith.truncf %183 : vector<32x512xf32> to vector<32x512xbf16>
    %c0_80 = arith.constant 0 : index
    %c0_81 = arith.constant 0 : index
    %c0_82 = arith.constant 0 : index
    %185 = vector.load %arg13[%c0_80, %c0_81, %c0_82] : memref<1x512x128xbf16, #tpu.memory_space<vmem>>, vector<1x512x128xbf16>
    %186 = vector.shape_cast %185 : vector<1x512x128xbf16> to vector<512x128xbf16>
    %cst_83 = arith.constant dense<0.000000e+00> : vector<32x128xf32>
    %187 = tpu.matmul %184, %186, %cst_83 {dimension_numbers = #tpu.dot_dimension_numbers<[1], [0], [0], [1], [0, 0, 1, 1], [], []>} : vector<32x512xbf16>, vector<512x128xbf16>, vector<32x128xf32> -> vector<32x128xf32>
    %c0_84 = arith.constant 0 : index
    %c0_85 = arith.constant 0 : index
    %c0_86 = arith.constant 0 : index
    %188 = vector.load %arg14[%c0_84, %c0_85, %c0_86] : memref<1x1x128xf32, #tpu.memory_space<vmem>>, vector<1x1x128xf32>
    %189 = vector.shape_cast %188 : vector<1x1x128xf32> to vector<1x128xf32>
    %190 = vector.broadcast %189 : vector<1x128xf32> to vector<32x128xf32>
    %191 = arith.addf %187, %190 : vector<32x128xf32>
    %192 = arith.addf %141, %191 : vector<32x128xf32>
    %193 = vector.shape_cast %192 : vector<32x128xf32> to vector<2x16x128xf32>
    %c0_87 = arith.constant 0 : index
    %c0_88 = arith.constant 0 : index
    %c0_89 = arith.constant 0 : index
    %194 = vector.load %arg18[%c0_87, %c0_88, %c0_89] : memref<2x16x128xf32, #tpu.memory_space<vmem>>, vector<2x16x128xf32>
    tpu.vector_store %arg18[%c0_87, %c0_88, %c0_89], %193 {strides = array<i32>} : memref<2x16x128xf32, #tpu.memory_space<vmem>>, vector<2x16x128xf32>,
    %c1_i32 = arith.constant 1 : i32
    %195 = arith.cmpi eq, %arg1, %c1_i32 : i32
    %196 = arith.extui %195 : i1 to i32
    %c0_i32_90 = arith.constant 0 : i32
    %197 = arith.cmpi ne, %196, %c0_i32_90 : i32
    scf.if %197 {
      %c0_91 = arith.constant 0 : index
      %c0_92 = arith.constant 0 : index
      %198 = vector.load %arg15[%c0_91, %c0_92] : memref<1x128xf32, #tpu.memory_space<vmem>>, vector<1x128xf32>
      %c0_93 = arith.constant 0 : index
      %c0_94 = arith.constant 0 : index
      %199 = vector.load %arg16[%c0_93, %c0_94] : memref<1x128xf32, #tpu.memory_space<vmem>>, vector<1x128xf32>
      %cst_95 = arith.constant dense<0.000000e+00> : vector<32xf32>
      %200 = vector.multi_reduction <add>, %192, %cst_95 [1] : vector<32x128xf32> to vector<32xf32>
      %201 = vector.shape_cast %200 : vector<32xf32> to vector<32x1xf32>
      %cst_96 = arith.constant 1.280000e+02 : f32
      %202 = vector.broadcast %cst_96 : f32 to vector<32x1xf32>
      %203 = arith.divf %201, %202 : vector<32x1xf32>
      %204 = vector.broadcast %203 : vector<32x1xf32> to vector<32x128xf32>
      %205 = arith.subf %192, %204 : vector<32x128xf32>
      %206 = arith.mulf %205, %205 : vector<32x128xf32>
      %cst_97 = arith.constant dense<0.000000e+00> : vector<32xf32>
      %207 = vector.multi_reduction <add>, %206, %cst_97 [1] : vector<32x128xf32> to vector<32xf32>
      %208 = vector.shape_cast %207 : vector<32xf32> to vector<32x1xf32>
      %cst_98 = arith.constant 1.280000e+02 : f32
      %209 = vector.broadcast %cst_98 : f32 to vector<32x1xf32>
      %210 = arith.divf %208, %209 : vector<32x1xf32>
      %211 = vector.broadcast %203 : vector<32x1xf32> to vector<32x128xf32>
      %212 = arith.subf %192, %211 : vector<32x128xf32>
      %cst_99 = arith.constant 9.99999974E-6 : f32
      %213 = vector.broadcast %cst_99 : f32 to vector<32x1xf32>
      %214 = arith.addf %210, %213 : vector<32x1xf32>
      %215 = math.rsqrt %214 : vector<32x1xf32>
      %216 = vector.broadcast %215 : vector<32x1xf32> to vector<32x128xf32>
      %217 = arith.mulf %212, %216 : vector<32x128xf32>
      %218 = vector.broadcast %198 : vector<1x128xf32> to vector<32x128xf32>
      %219 = arith.mulf %217, %218 : vector<32x128xf32>
      %220 = vector.broadcast %199 : vector<1x128xf32> to vector<32x128xf32>
      %221 = arith.addf %219, %220 : vector<32x128xf32>
      %222 = vector.shape_cast %221 : vector<32x128xf32> to vector<2x16x128xf32>
      %223 = arith.truncf %222 : vector<2x16x128xf32> to vector<2x16x128xbf16>
      %c0_100 = arith.constant 0 : index
      %c0_101 = arith.constant 0 : index
      %c0_102 = arith.constant 0 : index
      %224 = vector.load %arg17[%c0_100, %c0_101, %c0_102] : memref<2x16x128xbf16, #tpu.memory_space<vmem>>, vector<2x16x128xbf16>
      tpu.vector_store %arg17[%c0_100, %c0_101, %c0_102], %223 {strides = array<i32>} : memref<2x16x128xbf16, #tpu.memory_space<vmem>>, vector<2x16x128xbf16>,
    } else {
    }
    return
  }
  func.func @transform_0(%arg0: i32, %arg1: i32) -> (i32, i32, i32) {
    %c0_i32 = arith.constant 0 : i32
    %c0_i32_0 = arith.constant 0 : i32
    %c0_i32_1 = arith.constant 0 : i32
    return %arg0, %c0_i32, %c0_i32_0 : i32, i32, i32
  }
  func.func @transform_1(%arg0: i32, %arg1: i32) -> (i32, i32, i32) {
    %c0_i32 = arith.constant 0 : i32
    %c0_i32_0 = arith.constant 0 : i32
    %c0_i32_1 = arith.constant 0 : i32
    return %arg1, %c0_i32, %c0_i32_0 : i32, i32, i32
  }
  func.func @transform_2(%arg0: i32, %arg1: i32) -> (i32, i32, i32) {
    %c0_i32 = arith.constant 0 : i32
    %c0_i32_0 = arith.constant 0 : i32
    %c0_i32_1 = arith.constant 0 : i32
    return %arg1, %c0_i32, %c0_i32_0 : i32, i32, i32
  }
  func.func @transform_3(%arg0: i32, %arg1: i32) -> (i32, i32, i32) {
    %c0_i32 = arith.constant 0 : i32
    %c0_i32_0 = arith.constant 0 : i32
    %c0_i32_1 = arith.constant 0 : i32
    return %arg1, %c0_i32, %c0_i32_0 : i32, i32, i32
  }
  func.func @transform_4(%arg0: i32, %arg1: i32) -> (i32, i32, i32) {
    %c0_i32 = arith.constant 0 : i32
    %c0_i32_0 = arith.constant 0 : i32
    %c0_i32_1 = arith.constant 0 : i32
    return %arg1, %c0_i32, %c0_i32_0 : i32, i32, i32
  }
  func.func @transform_5(%arg0: i32, %arg1: i32) -> (i32, i32, i32) {
    %c0_i32 = arith.constant 0 : i32
    %c0_i32_0 = arith.constant 0 : i32
    %c0_i32_1 = arith.constant 0 : i32
    return %arg1, %c0_i32, %c0_i32_0 : i32, i32, i32
  }
  func.func @transform_6(%arg0: i32, %arg1: i32) -> (i32, i32, i32) {
    %c0_i32 = arith.constant 0 : i32
    %c0_i32_0 = arith.constant 0 : i32
    %c0_i32_1 = arith.constant 0 : i32
    return %arg1, %c0_i32, %c0_i32_0 : i32, i32, i32
  }
  func.func @transform_7(%arg0: i32, %arg1: i32) -> (i32, i32, i32) {
    %c0_i32 = arith.constant 0 : i32
    %c0_i32_0 = arith.constant 0 : i32
    %c0_i32_1 = arith.constant 0 : i32
    return %arg1, %c0_i32, %c0_i32_0 : i32, i32, i32
  }
  func.func @transform_8(%arg0: i32, %arg1: i32) -> (i32, i32, i32) {
    %c0_i32 = arith.constant 0 : i32
    %c0_i32_0 = arith.constant 0 : i32
    %c0_i32_1 = arith.constant 0 : i32
    return %arg1, %c0_i32, %c0_i32_0 : i32, i32, i32
  }
  func.func @transform_9(%arg0: i32, %arg1: i32) -> (i32, i32, i32) {
    %c0_i32 = arith.constant 0 : i32
    %c0_i32_0 = arith.constant 0 : i32
    %c0_i32_1 = arith.constant 0 : i32
    return %arg1, %c0_i32, %c0_i32_0 : i32, i32, i32
  }
  func.func @transform_10(%arg0: i32, %arg1: i32) -> (i32, i32, i32) {
    %c0_i32 = arith.constant 0 : i32
    %c0_i32_0 = arith.constant 0 : i32
    %c0_i32_1 = arith.constant 0 : i32
    return %arg1, %c0_i32, %c0_i32_0 : i32, i32, i32
  }
  func.func @transform_11(%arg0: i32, %arg1: i32) -> (i32, i32, i32) {
    %c0_i32 = arith.constant 0 : i32
    %c0_i32_0 = arith.constant 0 : i32
    %c0_i32_1 = arith.constant 0 : i32
    return %arg1, %c0_i32, %c0_i32_0 : i32, i32, i32
  }
  func.func @transform_12(%arg0: i32, %arg1: i32) -> (i32, i32, i32) {
    %c0_i32 = arith.constant 0 : i32
    %c0_i32_0 = arith.constant 0 : i32
    %c0_i32_1 = arith.constant 0 : i32
    return %arg1, %c0_i32, %c0_i32_0 : i32, i32, i32
  }
  func.func @transform_13(%arg0: i32, %arg1: i32) -> (i32, i32) {
    %c0_i32 = arith.constant 0 : i32
    %c0_i32_0 = arith.constant 0 : i32
    %c0_i32_1 = arith.constant 0 : i32
    return %c0_i32, %c0_i32_0 : i32, i32
  }
  func.func @transform_14(%arg0: i32, %arg1: i32) -> (i32, i32) {
    %c0_i32 = arith.constant 0 : i32
    %c0_i32_0 = arith.constant 0 : i32
    %c0_i32_1 = arith.constant 0 : i32
    return %c0_i32, %c0_i32_0 : i32, i32
  }
  func.func @transform_15(%arg0: i32, %arg1: i32) -> (i32, i32, i32) {
    %c0_i32 = arith.constant 0 : i32
    %c0_i32_0 = arith.constant 0 : i32
    %c0_i32_1 = arith.constant 0 : i32
    return %arg0, %c0_i32, %c0_i32_0 : i32, i32, i32
  }
}

module attributes {stable_mosaic.version = 11 : i64} {
  func.func @_encoder_stack_kernel(%arg0: i32, %arg1: i32, %arg2: memref<16x2x128xbf16, #tpu.memory_space<vmem>>, %arg3: memref<1x1x128xf32, #tpu.memory_space<vmem>>, %arg4: memref<1x1x128xf32, #tpu.memory_space<vmem>>, %arg5: memref<1x128x384xbf16, #tpu.memory_space<vmem>>, %arg6: memref<1x1x384xf32, #tpu.memory_space<vmem>>, %arg7: memref<1x128x128xbf16, #tpu.memory_space<vmem>>, %arg8: memref<1x1x128xf32, #tpu.memory_space<vmem>>, %arg9: memref<1x1x128xf32, #tpu.memory_space<vmem>>, %arg10: memref<1x1x128xf32, #tpu.memory_space<vmem>>, %arg11: memref<1x128x512xbf16, #tpu.memory_space<vmem>>, %arg12: memref<1x1x512xf32, #tpu.memory_space<vmem>>, %arg13: memref<1x512x128xbf16, #tpu.memory_space<vmem>>, %arg14: memref<1x1x128xf32, #tpu.memory_space<vmem>>, %arg15: memref<1x128xf32, #tpu.memory_space<vmem>>, %arg16: memref<1x128xf32, #tpu.memory_space<vmem>>, %arg17: memref<16x2x128xf32, #tpu.memory_space<vmem>>, %arg18: memref<16x2x128xf32, #tpu.memory_space<vmem>>, %arg19: memref<16x2x128xf32, #tpu.memory_space<vmem>>) attributes {dimension_semantics = [#tpu.dimension_semantics<parallel>, #tpu.dimension_semantics<arbitrary>], iteration_bounds = array<i64: 2, 2>, scalar_prefetch = 0 : i64, scratch_operands = 2 : i64, tpu.core_type = #tpu.core_type<tc>, window_params = [{transform_indices = @transform_0, window_bounds = array<i64: 16, 2, 128>}, {transform_indices = @transform_1, window_bounds = array<i64: 1, 1, 128>}, {transform_indices = @transform_2, window_bounds = array<i64: 1, 1, 128>}, {transform_indices = @transform_3, window_bounds = array<i64: 1, 128, 384>}, {transform_indices = @transform_4, window_bounds = array<i64: 1, 1, 384>}, {transform_indices = @transform_5, window_bounds = array<i64: 1, 128, 128>}, {transform_indices = @transform_6, window_bounds = array<i64: 1, 1, 128>}, {transform_indices = @transform_7, window_bounds = array<i64: 1, 1, 128>}, {transform_indices = @transform_8, window_bounds = array<i64: 1, 1, 128>}, {transform_indices = @transform_9, window_bounds = array<i64: 1, 128, 512>}, {transform_indices = @transform_10, window_bounds = array<i64: 1, 1, 512>}, {transform_indices = @transform_11, window_bounds = array<i64: 1, 512, 128>}, {transform_indices = @transform_12, window_bounds = array<i64: 1, 1, 128>}, {pipeline_mode = #tpu.pipeline_mode<synchronous>, transform_indices = @transform_13, window_bounds = array<i64: 1, 128>}, {pipeline_mode = #tpu.pipeline_mode<synchronous>, transform_indices = @transform_14, window_bounds = array<i64: 1, 128>}, {transform_indices = @transform_15, window_bounds = array<i64: 16, 2, 128>}]} {
    %c0_i32 = arith.constant 0 : i32
    %0 = arith.cmpi eq, %arg1, %c0_i32 : i32
    %1 = arith.extui %0 : i1 to i32
    %c0_i32_0 = arith.constant 0 : i32
    %2 = arith.cmpi ne, %1, %c0_i32_0 : i32
    scf.if %2 {
      %c0_93 = arith.constant 0 : index
      %c0_94 = arith.constant 0 : index
      %c0_95 = arith.constant 0 : index
      %216 = vector.load %arg2[%c0_93, %c0_94, %c0_95] : memref<16x2x128xbf16, #tpu.memory_space<vmem>>, vector<16x2x128xbf16>
      %217 = arith.extf %216 : vector<16x2x128xbf16> to vector<16x2x128xf32>
      %c0_96 = arith.constant 0 : index
      %c0_97 = arith.constant 0 : index
      %c0_98 = arith.constant 0 : index
      %218 = vector.load %arg18[%c0_96, %c0_97, %c0_98] : memref<16x2x128xf32, #tpu.memory_space<vmem>>, vector<16x2x128xf32>
      tpu.vector_store %arg18[%c0_96, %c0_97, %c0_98], %217 {strides = array<i32>} : memref<16x2x128xf32, #tpu.memory_space<vmem>>, vector<16x2x128xf32>,
    } else {
    }
    %c0 = arith.constant 0 : index
    %c0_1 = arith.constant 0 : index
    %c0_2 = arith.constant 0 : index
    %3 = vector.load %arg18[%c0, %c0_1, %c0_2] : memref<16x2x128xf32, #tpu.memory_space<vmem>>, vector<16x2x128xf32>
    %4 = vector.shape_cast %3 : vector<16x2x128xf32> to vector<32x128xf32>
    %c0_3 = arith.constant 0 : index
    %c0_4 = arith.constant 0 : index
    %c0_5 = arith.constant 0 : index
    %5 = vector.load %arg3[%c0_3, %c0_4, %c0_5] : memref<1x1x128xf32, #tpu.memory_space<vmem>>, vector<1x1x128xf32>
    %6 = vector.shape_cast %5 : vector<1x1x128xf32> to vector<1x128xf32>
    %c0_6 = arith.constant 0 : index
    %c0_7 = arith.constant 0 : index
    %c0_8 = arith.constant 0 : index
    %7 = vector.load %arg4[%c0_6, %c0_7, %c0_8] : memref<1x1x128xf32, #tpu.memory_space<vmem>>, vector<1x1x128xf32>
    %8 = vector.shape_cast %7 : vector<1x1x128xf32> to vector<1x128xf32>
    %cst = arith.constant dense<0.000000e+00> : vector<32xf32>
    %9 = vector.multi_reduction <add>, %4, %cst [1] : vector<32x128xf32> to vector<32xf32>
    %10 = vector.shape_cast %9 : vector<32xf32> to vector<32x1xf32>
    %cst_9 = arith.constant 1.280000e+02 : f32
    %11 = vector.broadcast %cst_9 : f32 to vector<32x1xf32>
    %12 = arith.divf %10, %11 : vector<32x1xf32>
    %13 = vector.broadcast %12 : vector<32x1xf32> to vector<32x128xf32>
    %14 = arith.subf %4, %13 : vector<32x128xf32>
    %15 = arith.mulf %14, %14 : vector<32x128xf32>
    %cst_10 = arith.constant dense<0.000000e+00> : vector<32xf32>
    %16 = vector.multi_reduction <add>, %15, %cst_10 [1] : vector<32x128xf32> to vector<32xf32>
    %17 = vector.shape_cast %16 : vector<32xf32> to vector<32x1xf32>
    %cst_11 = arith.constant 1.280000e+02 : f32
    %18 = vector.broadcast %cst_11 : f32 to vector<32x1xf32>
    %19 = arith.divf %17, %18 : vector<32x1xf32>
    %20 = vector.broadcast %12 : vector<32x1xf32> to vector<32x128xf32>
    %21 = arith.subf %4, %20 : vector<32x128xf32>
    %cst_12 = arith.constant 9.99999974E-6 : f32
    %22 = vector.broadcast %cst_12 : f32 to vector<32x1xf32>
    %23 = arith.addf %19, %22 : vector<32x1xf32>
    %24 = math.rsqrt %23 : vector<32x1xf32>
    %25 = vector.broadcast %24 : vector<32x1xf32> to vector<32x128xf32>
    %26 = arith.mulf %21, %25 : vector<32x128xf32>
    %27 = vector.broadcast %6 : vector<1x128xf32> to vector<32x128xf32>
    %28 = arith.mulf %26, %27 : vector<32x128xf32>
    %29 = vector.broadcast %8 : vector<1x128xf32> to vector<32x128xf32>
    %30 = arith.addf %28, %29 : vector<32x128xf32>
    %31 = arith.truncf %30 : vector<32x128xf32> to vector<32x128xbf16>
    %c0_13 = arith.constant 0 : index
    %c0_14 = arith.constant 0 : index
    %c0_15 = arith.constant 0 : index
    %32 = vector.load %arg5[%c0_13, %c0_14, %c0_15] : memref<1x128x384xbf16, #tpu.memory_space<vmem>>, vector<1x128x384xbf16>
    %33 = vector.shape_cast %32 : vector<1x128x384xbf16> to vector<128x384xbf16>
    %cst_16 = arith.constant dense<0.000000e+00> : vector<32x384xf32>
    %34 = tpu.matmul %31, %33, %cst_16 {dimension_numbers = #tpu.dot_dimension_numbers<[1], [0], [0], [1], [0, 0, 1, 1], [], []>} : vector<32x128xbf16>, vector<128x384xbf16>, vector<32x384xf32> -> vector<32x384xf32>
    %c0_17 = arith.constant 0 : index
    %c0_18 = arith.constant 0 : index
    %c0_19 = arith.constant 0 : index
    %35 = vector.load %arg6[%c0_17, %c0_18, %c0_19] : memref<1x1x384xf32, #tpu.memory_space<vmem>>, vector<1x1x384xf32>
    %36 = vector.shape_cast %35 : vector<1x1x384xf32> to vector<1x384xf32>
    %37 = vector.broadcast %36 : vector<1x384xf32> to vector<32x384xf32>
    %38 = arith.addf %34, %37 : vector<32x384xf32>
    %39 = vector.shape_cast %38 : vector<32x384xf32> to vector<16x2x384xf32>
    %40 = vector.extract_strided_slice %39 {offsets = [0, 0, 0], sizes = [16, 2, 128], strides = [1, 1, 1]} : vector<16x2x384xf32> to vector<16x2x128xf32>
    %41 = vector.extract_strided_slice %39 {offsets = [0, 0, 128], sizes = [16, 2, 128], strides = [1, 1, 1]} : vector<16x2x384xf32> to vector<16x2x128xf32>
    %42 = vector.extract_strided_slice %39 {offsets = [0, 0, 256], sizes = [16, 2, 128], strides = [1, 1, 1]} : vector<16x2x384xf32> to vector<16x2x128xf32>
    %43 = tpu.iota {dimensions = array<i32: 0>} : vector<2x2xi32>
    %44 = tpu.iota {dimensions = array<i32: 1>} : vector<2x2xi32>
    %45 = arith.cmpi sgt, %44, %43 : vector<2x2xi32>
    %cst_20 = arith.constant -1.000000e+30 : f32
    %cst_21 = arith.constant 0.000000e+00 : f32
    %46 = vector.broadcast %cst_20 : f32 to vector<2x2xf32>
    %47 = vector.broadcast %cst_21 : f32 to vector<2x2xf32>
    %48 = arith.select %45, %46, %47 : vector<2x2xi1>, vector<2x2xf32>
    %49 = vector.extract_strided_slice %40 {offsets = [0, 0, 0], sizes = [16, 2, 32], strides = [1, 1, 1]} : vector<16x2x128xf32> to vector<16x2x32xf32>
    %50 = arith.truncf %49 : vector<16x2x32xf32> to vector<16x2x32xbf16>
    %51 = vector.extract_strided_slice %41 {offsets = [0, 0, 0], sizes = [16, 2, 32], strides = [1, 1, 1]} : vector<16x2x128xf32> to vector<16x2x32xf32>
    %52 = arith.truncf %51 : vector<16x2x32xf32> to vector<16x2x32xbf16>
    %53 = vector.extract_strided_slice %42 {offsets = [0, 0, 0], sizes = [16, 2, 32], strides = [1, 1, 1]} : vector<16x2x128xf32> to vector<16x2x32xf32>
    %54 = arith.truncf %53 : vector<16x2x32xf32> to vector<16x2x32xbf16>
    "tpu.trace_start"() <{level = 10 : i32, message = "bqd,bkd->bqk"}> : () -> ()
    %cst_22 = arith.constant dense<0.000000e+00> : vector<16x2x2xf32>
    %55 = tpu.matmul %50, %52, %cst_22 {dimension_numbers = #tpu.dot_dimension_numbers<[2], [2], [1], [1], [0, 0, 0, 1, 1, 1], [0], [0]>} : vector<16x2x32xbf16>, vector<16x2x32xbf16>, vector<16x2x2xf32> -> vector<16x2x2xf32>
    "tpu.trace_stop"() : () -> ()
    %cst_23 = arith.constant 0.176776692 : f32
    %56 = vector.broadcast %cst_23 : f32 to vector<16x2x2xf32>
    %57 = arith.mulf %55, %56 : vector<16x2x2xf32>
    %58 = vector.shape_cast %48 : vector<2x2xf32> to vector<1x2x2xf32>
    %59 = vector.broadcast %58 : vector<1x2x2xf32> to vector<16x2x2xf32>
    %60 = arith.addf %57, %59 : vector<16x2x2xf32>
    %cst_24 = arith.constant dense<0xFF800000> : vector<16x2xf32>
    %61 = vector.multi_reduction <maximumf>, %60, %cst_24 [2] : vector<16x2x2xf32> to vector<16x2xf32>
    %62 = vector.shape_cast %61 : vector<16x2xf32> to vector<16x2x1xf32>
    %63 = vector.broadcast %62 : vector<16x2x1xf32> to vector<16x2x2xf32>
    %64 = arith.subf %60, %63 : vector<16x2x2xf32>
    %65 = math.exp %64 : vector<16x2x2xf32>
    %cst_25 = arith.constant dense<0.000000e+00> : vector<16x2xf32>
    %66 = vector.multi_reduction <add>, %65, %cst_25 [2] : vector<16x2x2xf32> to vector<16x2xf32>
    %67 = vector.shape_cast %66 : vector<16x2xf32> to vector<16x2x1xf32>
    %68 = tpu.reciprocal %67 {approx = true} : vector<16x2x1xf32> -> vector<16x2x1xf32>
    %69 = vector.broadcast %68 : vector<16x2x1xf32> to vector<16x2x2xf32>
    %70 = arith.mulf %65, %69 : vector<16x2x2xf32>
    %71 = arith.truncf %70 : vector<16x2x2xf32> to vector<16x2x2xbf16>
    "tpu.trace_start"() <{level = 10 : i32, message = "bqk,bkd->bqd"}> : () -> ()
    %cst_26 = arith.constant dense<0.000000e+00> : vector<16x2x32xf32>
    %72 = tpu.matmul %71, %54, %cst_26 {dimension_numbers = #tpu.dot_dimension_numbers<[2], [1], [1], [2], [0, 0, 0, 1, 1, 2], [0], [0]>} : vector<16x2x2xbf16>, vector<16x2x32xbf16>, vector<16x2x32xf32> -> vector<16x2x32xf32>
    "tpu.trace_stop"() : () -> ()
    %c0_27 = arith.constant 0 : index
    %c0_28 = arith.constant 0 : index
    %c0_29 = arith.constant 0 : index
    %73 = vector.load %arg19[%c0_27, %c0_28, %c0_29] : memref<16x2x128xf32, #tpu.memory_space<vmem>>, vector<16x2x32xf32>
    tpu.vector_store %arg19[%c0_27, %c0_28, %c0_29], %72 {strides = array<i32>} : memref<16x2x128xf32, #tpu.memory_space<vmem>>, vector<16x2x32xf32>,
    %74 = vector.extract_strided_slice %40 {offsets = [0, 0, 32], sizes = [16, 2, 32], strides = [1, 1, 1]} : vector<16x2x128xf32> to vector<16x2x32xf32>
    %75 = arith.truncf %74 : vector<16x2x32xf32> to vector<16x2x32xbf16>
    %76 = vector.extract_strided_slice %41 {offsets = [0, 0, 32], sizes = [16, 2, 32], strides = [1, 1, 1]} : vector<16x2x128xf32> to vector<16x2x32xf32>
    %77 = arith.truncf %76 : vector<16x2x32xf32> to vector<16x2x32xbf16>
    %78 = vector.extract_strided_slice %42 {offsets = [0, 0, 32], sizes = [16, 2, 32], strides = [1, 1, 1]} : vector<16x2x128xf32> to vector<16x2x32xf32>
    %79 = arith.truncf %78 : vector<16x2x32xf32> to vector<16x2x32xbf16>
    "tpu.trace_start"() <{level = 10 : i32, message = "bqd,bkd->bqk"}> : () -> ()
    %cst_30 = arith.constant dense<0.000000e+00> : vector<16x2x2xf32>
    %80 = tpu.matmul %75, %77, %cst_30 {dimension_numbers = #tpu.dot_dimension_numbers<[2], [2], [1], [1], [0, 0, 0, 1, 1, 1], [0], [0]>} : vector<16x2x32xbf16>, vector<16x2x32xbf16>, vector<16x2x2xf32> -> vector<16x2x2xf32>
    "tpu.trace_stop"() : () -> ()
    %cst_31 = arith.constant 0.176776692 : f32
    %81 = vector.broadcast %cst_31 : f32 to vector<16x2x2xf32>
    %82 = arith.mulf %80, %81 : vector<16x2x2xf32>
    %83 = vector.shape_cast %48 : vector<2x2xf32> to vector<1x2x2xf32>
    %84 = vector.broadcast %83 : vector<1x2x2xf32> to vector<16x2x2xf32>
    %85 = arith.addf %82, %84 : vector<16x2x2xf32>
    %cst_32 = arith.constant dense<0xFF800000> : vector<16x2xf32>
    %86 = vector.multi_reduction <maximumf>, %85, %cst_32 [2] : vector<16x2x2xf32> to vector<16x2xf32>
    %87 = vector.shape_cast %86 : vector<16x2xf32> to vector<16x2x1xf32>
    %88 = vector.broadcast %87 : vector<16x2x1xf32> to vector<16x2x2xf32>
    %89 = arith.subf %85, %88 : vector<16x2x2xf32>
    %90 = math.exp %89 : vector<16x2x2xf32>
    %cst_33 = arith.constant dense<0.000000e+00> : vector<16x2xf32>
    %91 = vector.multi_reduction <add>, %90, %cst_33 [2] : vector<16x2x2xf32> to vector<16x2xf32>
    %92 = vector.shape_cast %91 : vector<16x2xf32> to vector<16x2x1xf32>
    %93 = tpu.reciprocal %92 {approx = true} : vector<16x2x1xf32> -> vector<16x2x1xf32>
    %94 = vector.broadcast %93 : vector<16x2x1xf32> to vector<16x2x2xf32>
    %95 = arith.mulf %90, %94 : vector<16x2x2xf32>
    %96 = arith.truncf %95 : vector<16x2x2xf32> to vector<16x2x2xbf16>
    "tpu.trace_start"() <{level = 10 : i32, message = "bqk,bkd->bqd"}> : () -> ()
    %cst_34 = arith.constant dense<0.000000e+00> : vector<16x2x32xf32>
    %97 = tpu.matmul %96, %79, %cst_34 {dimension_numbers = #tpu.dot_dimension_numbers<[2], [1], [1], [2], [0, 0, 0, 1, 1, 2], [0], [0]>} : vector<16x2x2xbf16>, vector<16x2x32xbf16>, vector<16x2x32xf32> -> vector<16x2x32xf32>
    "tpu.trace_stop"() : () -> ()
    %c0_35 = arith.constant 0 : index
    %c0_36 = arith.constant 0 : index
    %c32 = arith.constant 32 : index
    %98 = vector.load %arg19[%c0_35, %c0_36, %c32] : memref<16x2x128xf32, #tpu.memory_space<vmem>>, vector<16x2x32xf32>
    tpu.vector_store %arg19[%c0_35, %c0_36, %c32], %97 {strides = array<i32>} : memref<16x2x128xf32, #tpu.memory_space<vmem>>, vector<16x2x32xf32>,
    %99 = vector.extract_strided_slice %40 {offsets = [0, 0, 64], sizes = [16, 2, 32], strides = [1, 1, 1]} : vector<16x2x128xf32> to vector<16x2x32xf32>
    %100 = arith.truncf %99 : vector<16x2x32xf32> to vector<16x2x32xbf16>
    %101 = vector.extract_strided_slice %41 {offsets = [0, 0, 64], sizes = [16, 2, 32], strides = [1, 1, 1]} : vector<16x2x128xf32> to vector<16x2x32xf32>
    %102 = arith.truncf %101 : vector<16x2x32xf32> to vector<16x2x32xbf16>
    %103 = vector.extract_strided_slice %42 {offsets = [0, 0, 64], sizes = [16, 2, 32], strides = [1, 1, 1]} : vector<16x2x128xf32> to vector<16x2x32xf32>
    %104 = arith.truncf %103 : vector<16x2x32xf32> to vector<16x2x32xbf16>
    "tpu.trace_start"() <{level = 10 : i32, message = "bqd,bkd->bqk"}> : () -> ()
    %cst_37 = arith.constant dense<0.000000e+00> : vector<16x2x2xf32>
    %105 = tpu.matmul %100, %102, %cst_37 {dimension_numbers = #tpu.dot_dimension_numbers<[2], [2], [1], [1], [0, 0, 0, 1, 1, 1], [0], [0]>} : vector<16x2x32xbf16>, vector<16x2x32xbf16>, vector<16x2x2xf32> -> vector<16x2x2xf32>
    "tpu.trace_stop"() : () -> ()
    %cst_38 = arith.constant 0.176776692 : f32
    %106 = vector.broadcast %cst_38 : f32 to vector<16x2x2xf32>
    %107 = arith.mulf %105, %106 : vector<16x2x2xf32>
    %108 = vector.shape_cast %48 : vector<2x2xf32> to vector<1x2x2xf32>
    %109 = vector.broadcast %108 : vector<1x2x2xf32> to vector<16x2x2xf32>
    %110 = arith.addf %107, %109 : vector<16x2x2xf32>
    %cst_39 = arith.constant dense<0xFF800000> : vector<16x2xf32>
    %111 = vector.multi_reduction <maximumf>, %110, %cst_39 [2] : vector<16x2x2xf32> to vector<16x2xf32>
    %112 = vector.shape_cast %111 : vector<16x2xf32> to vector<16x2x1xf32>
    %113 = vector.broadcast %112 : vector<16x2x1xf32> to vector<16x2x2xf32>
    %114 = arith.subf %110, %113 : vector<16x2x2xf32>
    %115 = math.exp %114 : vector<16x2x2xf32>
    %cst_40 = arith.constant dense<0.000000e+00> : vector<16x2xf32>
    %116 = vector.multi_reduction <add>, %115, %cst_40 [2] : vector<16x2x2xf32> to vector<16x2xf32>
    %117 = vector.shape_cast %116 : vector<16x2xf32> to vector<16x2x1xf32>
    %118 = tpu.reciprocal %117 {approx = true} : vector<16x2x1xf32> -> vector<16x2x1xf32>
    %119 = vector.broadcast %118 : vector<16x2x1xf32> to vector<16x2x2xf32>
    %120 = arith.mulf %115, %119 : vector<16x2x2xf32>
    %121 = arith.truncf %120 : vector<16x2x2xf32> to vector<16x2x2xbf16>
    "tpu.trace_start"() <{level = 10 : i32, message = "bqk,bkd->bqd"}> : () -> ()
    %cst_41 = arith.constant dense<0.000000e+00> : vector<16x2x32xf32>
    %122 = tpu.matmul %121, %104, %cst_41 {dimension_numbers = #tpu.dot_dimension_numbers<[2], [1], [1], [2], [0, 0, 0, 1, 1, 2], [0], [0]>} : vector<16x2x2xbf16>, vector<16x2x32xbf16>, vector<16x2x32xf32> -> vector<16x2x32xf32>
    "tpu.trace_stop"() : () -> ()
    %c0_42 = arith.constant 0 : index
    %c0_43 = arith.constant 0 : index
    %c64 = arith.constant 64 : index
    %123 = vector.load %arg19[%c0_42, %c0_43, %c64] : memref<16x2x128xf32, #tpu.memory_space<vmem>>, vector<16x2x32xf32>
    tpu.vector_store %arg19[%c0_42, %c0_43, %c64], %122 {strides = array<i32>} : memref<16x2x128xf32, #tpu.memory_space<vmem>>, vector<16x2x32xf32>,
    %124 = vector.extract_strided_slice %40 {offsets = [0, 0, 96], sizes = [16, 2, 32], strides = [1, 1, 1]} : vector<16x2x128xf32> to vector<16x2x32xf32>
    %125 = arith.truncf %124 : vector<16x2x32xf32> to vector<16x2x32xbf16>
    %126 = vector.extract_strided_slice %41 {offsets = [0, 0, 96], sizes = [16, 2, 32], strides = [1, 1, 1]} : vector<16x2x128xf32> to vector<16x2x32xf32>
    %127 = arith.truncf %126 : vector<16x2x32xf32> to vector<16x2x32xbf16>
    %128 = vector.extract_strided_slice %42 {offsets = [0, 0, 96], sizes = [16, 2, 32], strides = [1, 1, 1]} : vector<16x2x128xf32> to vector<16x2x32xf32>
    %129 = arith.truncf %128 : vector<16x2x32xf32> to vector<16x2x32xbf16>
    "tpu.trace_start"() <{level = 10 : i32, message = "bqd,bkd->bqk"}> : () -> ()
    %cst_44 = arith.constant dense<0.000000e+00> : vector<16x2x2xf32>
    %130 = tpu.matmul %125, %127, %cst_44 {dimension_numbers = #tpu.dot_dimension_numbers<[2], [2], [1], [1], [0, 0, 0, 1, 1, 1], [0], [0]>} : vector<16x2x32xbf16>, vector<16x2x32xbf16>, vector<16x2x2xf32> -> vector<16x2x2xf32>
    "tpu.trace_stop"() : () -> ()
    %cst_45 = arith.constant 0.176776692 : f32
    %131 = vector.broadcast %cst_45 : f32 to vector<16x2x2xf32>
    %132 = arith.mulf %130, %131 : vector<16x2x2xf32>
    %133 = vector.shape_cast %48 : vector<2x2xf32> to vector<1x2x2xf32>
    %134 = vector.broadcast %133 : vector<1x2x2xf32> to vector<16x2x2xf32>
    %135 = arith.addf %132, %134 : vector<16x2x2xf32>
    %cst_46 = arith.constant dense<0xFF800000> : vector<16x2xf32>
    %136 = vector.multi_reduction <maximumf>, %135, %cst_46 [2] : vector<16x2x2xf32> to vector<16x2xf32>
    %137 = vector.shape_cast %136 : vector<16x2xf32> to vector<16x2x1xf32>
    %138 = vector.broadcast %137 : vector<16x2x1xf32> to vector<16x2x2xf32>
    %139 = arith.subf %135, %138 : vector<16x2x2xf32>
    %140 = math.exp %139 : vector<16x2x2xf32>
    %cst_47 = arith.constant dense<0.000000e+00> : vector<16x2xf32>
    %141 = vector.multi_reduction <add>, %140, %cst_47 [2] : vector<16x2x2xf32> to vector<16x2xf32>
    %142 = vector.shape_cast %141 : vector<16x2xf32> to vector<16x2x1xf32>
    %143 = tpu.reciprocal %142 {approx = true} : vector<16x2x1xf32> -> vector<16x2x1xf32>
    %144 = vector.broadcast %143 : vector<16x2x1xf32> to vector<16x2x2xf32>
    %145 = arith.mulf %140, %144 : vector<16x2x2xf32>
    %146 = arith.truncf %145 : vector<16x2x2xf32> to vector<16x2x2xbf16>
    "tpu.trace_start"() <{level = 10 : i32, message = "bqk,bkd->bqd"}> : () -> ()
    %cst_48 = arith.constant dense<0.000000e+00> : vector<16x2x32xf32>
    %147 = tpu.matmul %146, %129, %cst_48 {dimension_numbers = #tpu.dot_dimension_numbers<[2], [1], [1], [2], [0, 0, 0, 1, 1, 2], [0], [0]>} : vector<16x2x2xbf16>, vector<16x2x32xbf16>, vector<16x2x32xf32> -> vector<16x2x32xf32>
    "tpu.trace_stop"() : () -> ()
    %c0_49 = arith.constant 0 : index
    %c0_50 = arith.constant 0 : index
    %c96 = arith.constant 96 : index
    %148 = vector.load %arg19[%c0_49, %c0_50, %c96] : memref<16x2x128xf32, #tpu.memory_space<vmem>>, vector<16x2x32xf32>
    tpu.vector_store %arg19[%c0_49, %c0_50, %c96], %147 {strides = array<i32>} : memref<16x2x128xf32, #tpu.memory_space<vmem>>, vector<16x2x32xf32>,
    %c0_51 = arith.constant 0 : index
    %c0_52 = arith.constant 0 : index
    %c0_53 = arith.constant 0 : index
    %149 = vector.load %arg19[%c0_51, %c0_52, %c0_53] : memref<16x2x128xf32, #tpu.memory_space<vmem>>, vector<16x2x128xf32>
    %150 = vector.shape_cast %149 : vector<16x2x128xf32> to vector<32x128xf32>
    %151 = arith.truncf %150 : vector<32x128xf32> to vector<32x128xbf16>
    %c0_54 = arith.constant 0 : index
    %c0_55 = arith.constant 0 : index
    %c0_56 = arith.constant 0 : index
    %152 = vector.load %arg7[%c0_54, %c0_55, %c0_56] : memref<1x128x128xbf16, #tpu.memory_space<vmem>>, vector<1x128x128xbf16>
    %153 = vector.shape_cast %152 : vector<1x128x128xbf16> to vector<128x128xbf16>
    %cst_57 = arith.constant dense<0.000000e+00> : vector<32x128xf32>
    %154 = tpu.matmul %151, %153, %cst_57 {dimension_numbers = #tpu.dot_dimension_numbers<[1], [0], [0], [1], [0, 0, 1, 1], [], []>} : vector<32x128xbf16>, vector<128x128xbf16>, vector<32x128xf32> -> vector<32x128xf32>
    %155 = arith.addf %4, %154 : vector<32x128xf32>
    %c0_58 = arith.constant 0 : index
    %c0_59 = arith.constant 0 : index
    %c0_60 = arith.constant 0 : index
    %156 = vector.load %arg8[%c0_58, %c0_59, %c0_60] : memref<1x1x128xf32, #tpu.memory_space<vmem>>, vector<1x1x128xf32>
    %157 = vector.shape_cast %156 : vector<1x1x128xf32> to vector<1x128xf32>
    %158 = vector.broadcast %157 : vector<1x128xf32> to vector<32x128xf32>
    %159 = arith.addf %155, %158 : vector<32x128xf32>
    %c0_61 = arith.constant 0 : index
    %c0_62 = arith.constant 0 : index
    %c0_63 = arith.constant 0 : index
    %160 = vector.load %arg9[%c0_61, %c0_62, %c0_63] : memref<1x1x128xf32, #tpu.memory_space<vmem>>, vector<1x1x128xf32>
    %161 = vector.shape_cast %160 : vector<1x1x128xf32> to vector<1x128xf32>
    %c0_64 = arith.constant 0 : index
    %c0_65 = arith.constant 0 : index
    %c0_66 = arith.constant 0 : index
    %162 = vector.load %arg10[%c0_64, %c0_65, %c0_66] : memref<1x1x128xf32, #tpu.memory_space<vmem>>, vector<1x1x128xf32>
    %163 = vector.shape_cast %162 : vector<1x1x128xf32> to vector<1x128xf32>
    %cst_67 = arith.constant dense<0.000000e+00> : vector<32xf32>
    %164 = vector.multi_reduction <add>, %159, %cst_67 [1] : vector<32x128xf32> to vector<32xf32>
    %165 = vector.shape_cast %164 : vector<32xf32> to vector<32x1xf32>
    %cst_68 = arith.constant 1.280000e+02 : f32
    %166 = vector.broadcast %cst_68 : f32 to vector<32x1xf32>
    %167 = arith.divf %165, %166 : vector<32x1xf32>
    %168 = vector.broadcast %167 : vector<32x1xf32> to vector<32x128xf32>
    %169 = arith.subf %159, %168 : vector<32x128xf32>
    %170 = arith.mulf %169, %169 : vector<32x128xf32>
    %cst_69 = arith.constant dense<0.000000e+00> : vector<32xf32>
    %171 = vector.multi_reduction <add>, %170, %cst_69 [1] : vector<32x128xf32> to vector<32xf32>
    %172 = vector.shape_cast %171 : vector<32xf32> to vector<32x1xf32>
    %cst_70 = arith.constant 1.280000e+02 : f32
    %173 = vector.broadcast %cst_70 : f32 to vector<32x1xf32>
    %174 = arith.divf %172, %173 : vector<32x1xf32>
    %175 = vector.broadcast %167 : vector<32x1xf32> to vector<32x128xf32>
    %176 = arith.subf %159, %175 : vector<32x128xf32>
    %cst_71 = arith.constant 9.99999974E-6 : f32
    %177 = vector.broadcast %cst_71 : f32 to vector<32x1xf32>
    %178 = arith.addf %174, %177 : vector<32x1xf32>
    %179 = math.rsqrt %178 : vector<32x1xf32>
    %180 = vector.broadcast %179 : vector<32x1xf32> to vector<32x128xf32>
    %181 = arith.mulf %176, %180 : vector<32x128xf32>
    %182 = vector.broadcast %161 : vector<1x128xf32> to vector<32x128xf32>
    %183 = arith.mulf %181, %182 : vector<32x128xf32>
    %184 = vector.broadcast %163 : vector<1x128xf32> to vector<32x128xf32>
    %185 = arith.addf %183, %184 : vector<32x128xf32>
    %186 = arith.truncf %185 : vector<32x128xf32> to vector<32x128xbf16>
    %c0_72 = arith.constant 0 : index
    %c0_73 = arith.constant 0 : index
    %c0_74 = arith.constant 0 : index
    %187 = vector.load %arg11[%c0_72, %c0_73, %c0_74] : memref<1x128x512xbf16, #tpu.memory_space<vmem>>, vector<1x128x512xbf16>
    %188 = vector.shape_cast %187 : vector<1x128x512xbf16> to vector<128x512xbf16>
    %cst_75 = arith.constant dense<0.000000e+00> : vector<32x512xf32>
    %189 = tpu.matmul %186, %188, %cst_75 {dimension_numbers = #tpu.dot_dimension_numbers<[1], [0], [0], [1], [0, 0, 1, 1], [], []>} : vector<32x128xbf16>, vector<128x512xbf16>, vector<32x512xf32> -> vector<32x512xf32>
    %c0_76 = arith.constant 0 : index
    %c0_77 = arith.constant 0 : index
    %c0_78 = arith.constant 0 : index
    %190 = vector.load %arg12[%c0_76, %c0_77, %c0_78] : memref<1x1x512xf32, #tpu.memory_space<vmem>>, vector<1x1x512xf32>
    %191 = vector.shape_cast %190 : vector<1x1x512xf32> to vector<1x512xf32>
    %192 = vector.broadcast %191 : vector<1x512xf32> to vector<32x512xf32>
    %193 = arith.addf %189, %192 : vector<32x512xf32>
    %cst_79 = arith.constant 5.000000e-01 : f32
    %194 = vector.broadcast %cst_79 : f32 to vector<32x512xf32>
    %195 = arith.mulf %194, %193 : vector<32x512xf32>
    %cst_80 = arith.constant 0.707106769 : f32
    %196 = vector.broadcast %cst_80 : f32 to vector<32x512xf32>
    %197 = arith.mulf %193, %196 : vector<32x512xf32>
    %198 = math.erf %197 : vector<32x512xf32>
    %cst_81 = arith.constant 1.000000e+00 : f32
    %199 = vector.broadcast %cst_81 : f32 to vector<32x512xf32>
    %200 = arith.addf %199, %198 : vector<32x512xf32>
    %201 = arith.mulf %195, %200 : vector<32x512xf32>
    %202 = arith.truncf %201 : vector<32x512xf32> to vector<32x512xbf16>
    %c0_82 = arith.constant 0 : index
    %c0_83 = arith.constant 0 : index
    %c0_84 = arith.constant 0 : index
    %203 = vector.load %arg13[%c0_82, %c0_83, %c0_84] : memref<1x512x128xbf16, #tpu.memory_space<vmem>>, vector<1x512x128xbf16>
    %204 = vector.shape_cast %203 : vector<1x512x128xbf16> to vector<512x128xbf16>
    %cst_85 = arith.constant dense<0.000000e+00> : vector<32x128xf32>
    %205 = tpu.matmul %202, %204, %cst_85 {dimension_numbers = #tpu.dot_dimension_numbers<[1], [0], [0], [1], [0, 0, 1, 1], [], []>} : vector<32x512xbf16>, vector<512x128xbf16>, vector<32x128xf32> -> vector<32x128xf32>
    %c0_86 = arith.constant 0 : index
    %c0_87 = arith.constant 0 : index
    %c0_88 = arith.constant 0 : index
    %206 = vector.load %arg14[%c0_86, %c0_87, %c0_88] : memref<1x1x128xf32, #tpu.memory_space<vmem>>, vector<1x1x128xf32>
    %207 = vector.shape_cast %206 : vector<1x1x128xf32> to vector<1x128xf32>
    %208 = vector.broadcast %207 : vector<1x128xf32> to vector<32x128xf32>
    %209 = arith.addf %205, %208 : vector<32x128xf32>
    %210 = arith.addf %159, %209 : vector<32x128xf32>
    %211 = vector.shape_cast %210 : vector<32x128xf32> to vector<16x2x128xf32>
    %c0_89 = arith.constant 0 : index
    %c0_90 = arith.constant 0 : index
    %c0_91 = arith.constant 0 : index
    %212 = vector.load %arg18[%c0_89, %c0_90, %c0_91] : memref<16x2x128xf32, #tpu.memory_space<vmem>>, vector<16x2x128xf32>
    tpu.vector_store %arg18[%c0_89, %c0_90, %c0_91], %211 {strides = array<i32>} : memref<16x2x128xf32, #tpu.memory_space<vmem>>, vector<16x2x128xf32>,
    %c1_i32 = arith.constant 1 : i32
    %213 = arith.cmpi eq, %arg1, %c1_i32 : i32
    %214 = arith.extui %213 : i1 to i32
    %c0_i32_92 = arith.constant 0 : i32
    %215 = arith.cmpi ne, %214, %c0_i32_92 : i32
    scf.if %215 {
      %c0_93 = arith.constant 0 : index
      %c0_94 = arith.constant 0 : index
      %216 = vector.load %arg15[%c0_93, %c0_94] : memref<1x128xf32, #tpu.memory_space<vmem>>, vector<1x128xf32>
      %c0_95 = arith.constant 0 : index
      %c0_96 = arith.constant 0 : index
      %217 = vector.load %arg16[%c0_95, %c0_96] : memref<1x128xf32, #tpu.memory_space<vmem>>, vector<1x128xf32>
      %cst_97 = arith.constant dense<0.000000e+00> : vector<32xf32>
      %218 = vector.multi_reduction <add>, %210, %cst_97 [1] : vector<32x128xf32> to vector<32xf32>
      %219 = vector.shape_cast %218 : vector<32xf32> to vector<32x1xf32>
      %cst_98 = arith.constant 1.280000e+02 : f32
      %220 = vector.broadcast %cst_98 : f32 to vector<32x1xf32>
      %221 = arith.divf %219, %220 : vector<32x1xf32>
      %222 = vector.broadcast %221 : vector<32x1xf32> to vector<32x128xf32>
      %223 = arith.subf %210, %222 : vector<32x128xf32>
      %224 = arith.mulf %223, %223 : vector<32x128xf32>
      %cst_99 = arith.constant dense<0.000000e+00> : vector<32xf32>
      %225 = vector.multi_reduction <add>, %224, %cst_99 [1] : vector<32x128xf32> to vector<32xf32>
      %226 = vector.shape_cast %225 : vector<32xf32> to vector<32x1xf32>
      %cst_100 = arith.constant 1.280000e+02 : f32
      %227 = vector.broadcast %cst_100 : f32 to vector<32x1xf32>
      %228 = arith.divf %226, %227 : vector<32x1xf32>
      %229 = vector.broadcast %221 : vector<32x1xf32> to vector<32x128xf32>
      %230 = arith.subf %210, %229 : vector<32x128xf32>
      %cst_101 = arith.constant 9.99999974E-6 : f32
      %231 = vector.broadcast %cst_101 : f32 to vector<32x1xf32>
      %232 = arith.addf %228, %231 : vector<32x1xf32>
      %233 = math.rsqrt %232 : vector<32x1xf32>
      %234 = vector.broadcast %233 : vector<32x1xf32> to vector<32x128xf32>
      %235 = arith.mulf %230, %234 : vector<32x128xf32>
      %236 = vector.broadcast %216 : vector<1x128xf32> to vector<32x128xf32>
      %237 = arith.mulf %235, %236 : vector<32x128xf32>
      %238 = vector.broadcast %217 : vector<1x128xf32> to vector<32x128xf32>
      %239 = arith.addf %237, %238 : vector<32x128xf32>
      %240 = vector.shape_cast %239 : vector<32x128xf32> to vector<16x2x128xf32>
      %c0_102 = arith.constant 0 : index
      %c0_103 = arith.constant 0 : index
      %c0_104 = arith.constant 0 : index
      %241 = vector.load %arg17[%c0_102, %c0_103, %c0_104] : memref<16x2x128xf32, #tpu.memory_space<vmem>>, vector<16x2x128xf32>
      tpu.vector_store %arg17[%c0_102, %c0_103, %c0_104], %240 {strides = array<i32>} : memref<16x2x128xf32, #tpu.memory_space<vmem>>, vector<16x2x128xf32>,
    } else {
    }
    return
  }
  func.func @transform_0(%arg0: i32, %arg1: i32) -> (i32, i32, i32) {
    %c0_i32 = arith.constant 0 : i32
    %c0_i32_0 = arith.constant 0 : i32
    %c0_i32_1 = arith.constant 0 : i32
    return %arg0, %c0_i32, %c0_i32_0 : i32, i32, i32
  }
  func.func @transform_1(%arg0: i32, %arg1: i32) -> (i32, i32, i32) {
    %c0_i32 = arith.constant 0 : i32
    %c0_i32_0 = arith.constant 0 : i32
    %c0_i32_1 = arith.constant 0 : i32
    return %arg1, %c0_i32, %c0_i32_0 : i32, i32, i32
  }
  func.func @transform_2(%arg0: i32, %arg1: i32) -> (i32, i32, i32) {
    %c0_i32 = arith.constant 0 : i32
    %c0_i32_0 = arith.constant 0 : i32
    %c0_i32_1 = arith.constant 0 : i32
    return %arg1, %c0_i32, %c0_i32_0 : i32, i32, i32
  }
  func.func @transform_3(%arg0: i32, %arg1: i32) -> (i32, i32, i32) {
    %c0_i32 = arith.constant 0 : i32
    %c0_i32_0 = arith.constant 0 : i32
    %c0_i32_1 = arith.constant 0 : i32
    return %arg1, %c0_i32, %c0_i32_0 : i32, i32, i32
  }
  func.func @transform_4(%arg0: i32, %arg1: i32) -> (i32, i32, i32) {
    %c0_i32 = arith.constant 0 : i32
    %c0_i32_0 = arith.constant 0 : i32
    %c0_i32_1 = arith.constant 0 : i32
    return %arg1, %c0_i32, %c0_i32_0 : i32, i32, i32
  }
  func.func @transform_5(%arg0: i32, %arg1: i32) -> (i32, i32, i32) {
    %c0_i32 = arith.constant 0 : i32
    %c0_i32_0 = arith.constant 0 : i32
    %c0_i32_1 = arith.constant 0 : i32
    return %arg1, %c0_i32, %c0_i32_0 : i32, i32, i32
  }
  func.func @transform_6(%arg0: i32, %arg1: i32) -> (i32, i32, i32) {
    %c0_i32 = arith.constant 0 : i32
    %c0_i32_0 = arith.constant 0 : i32
    %c0_i32_1 = arith.constant 0 : i32
    return %arg1, %c0_i32, %c0_i32_0 : i32, i32, i32
  }
  func.func @transform_7(%arg0: i32, %arg1: i32) -> (i32, i32, i32) {
    %c0_i32 = arith.constant 0 : i32
    %c0_i32_0 = arith.constant 0 : i32
    %c0_i32_1 = arith.constant 0 : i32
    return %arg1, %c0_i32, %c0_i32_0 : i32, i32, i32
  }
  func.func @transform_8(%arg0: i32, %arg1: i32) -> (i32, i32, i32) {
    %c0_i32 = arith.constant 0 : i32
    %c0_i32_0 = arith.constant 0 : i32
    %c0_i32_1 = arith.constant 0 : i32
    return %arg1, %c0_i32, %c0_i32_0 : i32, i32, i32
  }
  func.func @transform_9(%arg0: i32, %arg1: i32) -> (i32, i32, i32) {
    %c0_i32 = arith.constant 0 : i32
    %c0_i32_0 = arith.constant 0 : i32
    %c0_i32_1 = arith.constant 0 : i32
    return %arg1, %c0_i32, %c0_i32_0 : i32, i32, i32
  }
  func.func @transform_10(%arg0: i32, %arg1: i32) -> (i32, i32, i32) {
    %c0_i32 = arith.constant 0 : i32
    %c0_i32_0 = arith.constant 0 : i32
    %c0_i32_1 = arith.constant 0 : i32
    return %arg1, %c0_i32, %c0_i32_0 : i32, i32, i32
  }
  func.func @transform_11(%arg0: i32, %arg1: i32) -> (i32, i32, i32) {
    %c0_i32 = arith.constant 0 : i32
    %c0_i32_0 = arith.constant 0 : i32
    %c0_i32_1 = arith.constant 0 : i32
    return %arg1, %c0_i32, %c0_i32_0 : i32, i32, i32
  }
  func.func @transform_12(%arg0: i32, %arg1: i32) -> (i32, i32, i32) {
    %c0_i32 = arith.constant 0 : i32
    %c0_i32_0 = arith.constant 0 : i32
    %c0_i32_1 = arith.constant 0 : i32
    return %arg1, %c0_i32, %c0_i32_0 : i32, i32, i32
  }
  func.func @transform_13(%arg0: i32, %arg1: i32) -> (i32, i32) {
    %c0_i32 = arith.constant 0 : i32
    %c0_i32_0 = arith.constant 0 : i32
    %c0_i32_1 = arith.constant 0 : i32
    return %c0_i32, %c0_i32_0 : i32, i32
  }
  func.func @transform_14(%arg0: i32, %arg1: i32) -> (i32, i32) {
    %c0_i32 = arith.constant 0 : i32
    %c0_i32_0 = arith.constant 0 : i32
    %c0_i32_1 = arith.constant 0 : i32
    return %c0_i32, %c0_i32_0 : i32, i32
  }
  func.func @transform_15(%arg0: i32, %arg1: i32) -> (i32, i32, i32) {
    %c0_i32 = arith.constant 0 : i32
    %c0_i32_0 = arith.constant 0 : i32
    %c0_i32_1 = arith.constant 0 : i32
    return %arg0, %c0_i32, %c0_i32_0 : i32, i32, i32
  }
}

</mosaic_0001>

<bundles_post_ra>
// kernel: fwd.3
= control target key start
LH: loop header
LB: loop body
LE: loop exit
PB: predicated region body
PF: predicated region fallthrough
CT: control target
= control target key end

     0   :  { %s664_s15 = smov 0   ;;  %s666_s16 = smov 0   ;;  %s739_s0 = inlined_call_operand.vmem [shape: bf16[2,32,96], index: 0, kind: input, shape index: {}]   ;;  %s740_s1 = inlined_call_operand.vmem [shape: bf16[96,128], index: 1, kind: input, shape index: {}]   ;;  %s741_s2 = inlined_call_operand.vmem [shape: f32[1,128], index: 2, kind: input, shape index: {}]   ;;  %s742_s3 = inlined_call_operand.vmem [shape: f32[32,128], index: 3, kind: input, shape index: {}]   ;;  %s743_s4 = inlined_call_operand.vmem [shape: bf16[2,32,128], index: 4, kind: output, shape index: {}]  }
   0x1   :  { %s668_s17 = smov 0  }
   0x2 LB: > { %s26_s18 = sadd.s32 1, %s633_s16  ;;  %p520_p0 = scmp.ge.s32.totalorder %s637_s17, 1  ;;  %s637_s17 = sphi %s668_s17, %s14_s17   ;;  %s633_s16 = sphi %s666_s16, %s745_s16   ;;  %s629_s15 = sphi %s664_s15, %s744_s15  }
   0x3   : > { %p28_p1 = scmp.ge.s32.totalorder %s26_s18, 2  ;;  %p194_p2 = scmp.lt.s32.totalorder %s637_s17, 3 }
   0x5   : > { %s747_s18 = smov (%p28_p1, %s26_s18), 0  ;;  %p195_p3 = pnand %p520_p0, %p194_p2 }
   0x6   : > { %v607_v0 = vld [vmem:[%s740_s1] sm:$0xff] (!%p195_p3)   ;;  %p234_p4 = scmp.lt.s32.totalorder (!%p195_p3), %s629_s15, 1  ;;  %v608_v1 = vld [vmem:[%s740_s1 + $0x8] sm:$0xff] (!%p195_p3)   ;;  %v609_v2 = vld [vmem:[%s740_s1 + $0x10] sm:$0xff] (!%p195_p3)   ;;  %vm329_vm0 = vcmask (!%p195_p3), 785408  }
   0x7   : > { %198 = sbr.rel (%p195_p3) target bundleno = 253 (0xfd), region = 36  ;;  %567 = vmatprep.subr.bf16.mxu0 (!%p195_p3), %v607_v0  ;;  %v610_v4 = vld [vmem:[%s740_s1 + $0x18] sm:$0xff] (!%p195_p3)   ;;  %v611_v5 = vld [vmem:[%s740_s1 + $0x20] sm:$0xff] (!%p195_p3)   ;;  %v612_v6 = vld [vmem:[%s740_s1 + $0x28] sm:$0xff] (!%p195_p3)  }
   0x8   : > { %568 = vmatpush3.bf16.msra.mxu0 (!%p195_p3), %v607_v0  ;;  %v525_v8 = vld [vmem:[%s741_s2] ss:$0 sm:$0xff] (!%p195_p3)  ;;  %v387_v12 = vld [vmem:[%s742_s3 + $0x10] sm:$0xff] (!%p195_p3)  ;;  %v388_v15 = vld [vmem:[%s742_s3 + $0x18] sm:$0xff] (!%p195_p3) }
   0x9   : > { %569 = vmatprep.subr.bf16.mxu0 (!%p195_p3), %v608_v1  ;;  %v385_v16 = vld [vmem:[%s742_s3] sm:$0xff] (!%p195_p3)  ;;  %v386_v19 = vld [vmem:[%s742_s3 + $0x8] sm:$0xff] (!%p195_p3) }
   0xc   : > { %570 = vmatpush3.bf16.msra.mxu0 (!%p195_p3), %v608_v1 }
   0xd   : > { %571 = vmatprep.subr.bf16.mxu0 (!%p195_p3), %v609_v2 }
   0xe   : > { %s749_s15 = smov (!%p234_p4, %s629_s15), 1 }
   0xf   : > { %s542_s25 = sshll.u32 %s749_s15, 4 }
  0x10   : > { %s241_s28 = scalar_lea.vmem %s739_s0, %s542_s25  ;;  %572 = vmatpush3.bf16.msra.mxu0 %v609_v2  ;;  %s257_s26 = scalar_lea.vmem %s743_s4, %s542_s25 }
  0x11   : > { %v613_v3 = vld [vmem:[%s241_s28] sm:$0xff]   ;;  %573 = vmatprep.subr.bf16.mxu0 %v610_v4  ;;  %v614_v7 = vld [vmem:[%s241_s28 + $0x8] sm:$0xff]  }
  0x12   : > { %579 = vmatprep.mubr.msk.bf16.mxu0 %vm329_vm0, %v613_v3 }
  0x14   : > { %574 = vmatpush3.bf16.msra.mxu0 %v610_v4 }
  0x15   : > { %575 = vmatprep.subr.bf16.mxu0 %v611_v5 }
  0x18   : > { %576 = vmatpush3.bf16.msra.mxu0 %v611_v5 }
  0x19   : > { %577 = vmatprep.subr.bf16.mxu0 %v612_v6 }
  0x1c   : > { %578 = vmatpush3.bf16.msra.mxu0 %v612_v6 }
  0x1f   : > { %580 = vmatmul.mubr.msk.bf16.vlgmr.msra.gmra.mrb[0].mxu0 %vm329_vm0, %v614_v7 }
  0xf2   : > { %v581_v9 = vpop.f32.mrb[0].mxu0 }
  0xf3   : > { %v379_v10 = vadd.f32 %v581_v9, %v525_v8  ;;  %v370_v11 = vpop.f32.mrb[1].mxu0 }
  0xf4   : > { %v371_v13 = vadd.f32 %v525_v8, %v370_v11  ;;  %v582_v14 = vpop.f32.mrb[2].mxu0 }
  0xf5   : > { %v382_v17 = vadd.f32 %v582_v14, %v525_v8  ;;  %v373_v18 = vpop.f32.mrb[3].mxu0  ;;  %v391_v21 = vadd.f32 %v387_v12, %v379_v10 }
  0xf6   : > { %v374_v20 = vadd.f32 %v525_v8, %v373_v18  ;;  %v389_v23 = vadd.f32 %v385_v16, %v371_v13 }
  0xf7   : > { %v392_v22 = vadd.f32 %v388_v15, %v382_v17 }
  0xf8   : > { %v390_v24 = vadd.f32 %v386_v19, %v374_v20 }
  0xf9   : > { %v556_v25 = vpack.c.bf16 %v392_v22, %v391_v21 }
  0xfa   : > { %v551_v26 = vpack.c.bf16 %v390_v24, %v389_v23 }
  0xfb   : > { %558 = vst [vmem:[%s257_s26 + $0x8] sm:$0xff] %v556_v25  }
  0xfc   : > { %552 = vst [vmem:[%s257_s26] sm:$0xff] %v551_v26  }
  0xfd PF: > { %s14_s17 = sadd.s32 1, %s637_s17   ;;  %s744_s15 = smov %s633_s16 }
  0xfe   : > { %p11_p5 = scmp.ge.s32.totalorder %s14_s17, 4   ;;  %s745_s16 = smov %s747_s18 }
 0x100   :  { %13 = sbr.rel (!%p11_p5) target bundleno = 2 (0x2), region = 69 }

// kernel: fwd.4
= control target key start
LH: loop header
LB: loop body
LE: loop exit
PB: predicated region body
PF: predicated region fallthrough
CT: control target
= control target key end

     0   :  { %s4236_s18 = smov 0   ;;  %s4238_s19 = smov 0   ;;  %s4806_s0 = inlined_call_operand.vmem [shape: bf16[4,16,128], index: 0, kind: input, shape index: {}]   ;;  %s4807_s1 = inlined_call_operand.vmem [shape: f32[2,1,128], index: 1, kind: input, shape index: {}]   ;;  %s4808_s2 = inlined_call_operand.vmem [shape: f32[2,1,128], index: 2, kind: input, shape index: {}]   ;;  %s4809_s3 = inlined_call_operand.vmem [shape: bf16[2,128,384], index: 3, kind: input, shape index: {}]   ;;  %s4810_s4 = inlined_call_operand.vmem [shape: f32[2,1,384], index: 4, kind: input, shape index: {}]   ;;  %s4811_s5 = inlined_call_operand.vmem [shape: bf16[2,128,128], index: 5, kind: input, shape index: {}]   ;;  %s4812_s6 = inlined_call_operand.vmem [shape: f32[2,1,128], index: 6, kind: input, shape index: {}]   ;;  %s4813_s7 = inlined_call_operand.vmem [shape: f32[2,1,128], index: 7, kind: input, shape index: {}]   ;;  %s4814_s8 = inlined_call_operand.vmem [shape: f32[2,1,128], index: 8, kind: input, shape index: {}]   ;;  %s4815_s9 = inlined_call_operand.vmem [shape: bf16[2,128,512], index: 9, kind: input, shape index: {}]   ;;  %s4816_s10 = inlined_call_operand.vmem [shape: f32[2,1,512], index: 10, kind: input, shape index: {}]   ;;  %s4817_s11 = inlined_call_operand.vmem [shape: bf16[2,512,128], index: 11, kind: input, shape index: {}]   ;;  %s4818_s12 = inlined_call_operand.vmem [shape: f32[2,1,128], index: 12, kind: input, shape index: {}]   ;;  %s4819_s13 = inlined_call_operand.vmem [shape: f32[1,128], index: 13, kind: input, shape index: {}]   ;;  %s4820_s14 = inlined_call_operand.vmem [shape: f32[1,128], index: 14, kind: input, shape index: {}]   ;;  %s4821_s15 = inlined_call_operand.vmem [shape: bf16[4,16,128], index: 15, kind: output, shape index: {}]  }
   0x1   :  { %4826 = sst [smem:[#allocation10_spill]] %s4806_s0  ;;  %s4240_s20 = smov 0  }
   0x2   :  { %4827 = sst [smem:[#allocation11_spill]] %s4807_s1  ;;  %s4242_s21 = smov 0  }
   0x3   :  { %4828 = sst [smem:[#allocation12_spill]] %s4808_s2  ;;  %s4244_s22 = smov 0  }
   0x4   :  { %4829 = sst [smem:[#allocation13_spill]] %s4809_s3 }
   0x5   :  { %4830 = sst [smem:[#allocation14_spill]] %s4810_s4 }
   0x6   :  { %4831 = sst [smem:[#allocation15_spill]] %s4819_s13 }
   0x7   :  { %4832 = sst [smem:[#allocation16_spill]] %s4820_s14 }
   0x8 LB: > { %4833 = sst [smem:[#allocation4_spill]] %s4132_s18  ;;  %s34_s23 = sadd.s32 1, %s4140_s20  ;;  %s4148_s22 = sphi %s4244_s22, %s25_s22   ;;  %s4144_s21 = sphi %s4242_s21, %s4859_s21   ;;  %s4140_s20 = sphi %s4240_s20, %s4858_s20   ;;  %s4136_s19 = sphi %s4238_s19, %s4857_s19   ;;  %s4132_s18 = sphi %s4236_s18, %s4856_s18  }
   0x9   : > { %4834 = sst [smem:[#allocation5_spill]] %s4140_s20  ;;  %s37_s24 = sadd.s32 1, %s4144_s21 }
   0xa   : > { %4835 = sst [smem:[#allocation6_spill]] %s4144_s21  ;;  %p35_p0 = scmp.ge.s32.totalorder %s34_s23, 2 }
   0xb   : > { %4836 = sst [smem:[#allocation7_spill]] %s4148_s22  ;;  %p3402_p1 = scmp.ge.s32.totalorder %s4148_s22, 1 }
   0xc   : > { %p557_p2 = scmp.lt.s32.totalorder %s4148_s22, 5  ;;  %s4861_s23 = smov (%p35_p0, %s34_s23), 0 }
   0xd   : > { %4837 = sst [smem:[#allocation8_spill]] %s4861_s23  ;;  %s4863_s24 = smov (!%p35_p0, %s37_s24), %s4144_s21 }
   0xe   : > { %p558_p3 = pnand %p3402_p1, %p557_p2  ;;  %p39_p4 = scmp.ge.s32.totalorder %s4863_s24, 2 }
   0xf   : > { %s3403_s25 = sshll.u32 (!%p558_p3), %s4136_s19, 1  ;;  %p660_p5 = scmp.lt.s32.totalorder (!%p558_p3), %s4132_s18, 1 }
  0x10   : > { %s4865_s24 = smov (%p39_p4, %s4863_s24), 0  ;;  %561 = sbr.rel (%p558_p3) target bundleno = 4505 (0x1199), region = 80 }
  0x11   : > { %4838 = sst [smem:[#allocation9_spill]] %s4865_s24  ;;  %p654_p6 = scmp.lt.s32.totalorder (!%p558_p3), %s3403_s25, 3 }
  0x12   : > { %s4841_s0 = sld [smem:[#allocation10_spill]] (!%p558_p3)  ;;  %s4842_s3 = sld [smem:[#allocation13_spill]] (!%p558_p3) }
  0x13   : > { %s4843_s4 = sld [smem:[#allocation14_spill]] (!%p558_p3)  ;;  %s4844_s28 = sld [smem:[#allocation4_spill]] (!%p558_p3) }
  0x17   : > { %s4270_s26 = scalar_select %p660_p5, %s4132_s18, 1 }
  0x18   : > { %s4867_s25 = smov (!%p654_p6, %s3403_s25), 3 }
  0x19   : > { %s3545_s19 = sshll.u32 %s4867_s25, 3  ;;  %s3818_s24 = smul.u32 192, %s4270_s26 }
  0x1a   : > { %s658_s20 = scalar_lea.vmem %s4841_s0, %s3545_s19  ;;  %s3819_s22 = smul.u32 3, %s4270_s26 }
  0x1b   : > { %s4288_s18 = scalar_lea.vmem %s4842_s3, %s3818_s24  ;;  %s3546_s27 = sshll.u32 %s4270_s26, 6 }
  0x1c   : > { %s4294_s1 = scalar_lea.vmem %s4843_s4, %s3819_s22  ;;  %s4299_s16 = scalar_lea.vmem %s4811_s5, %s3546_s27 }
  0x1d   : > { %s3547_s29 = sshll.u32 %s4270_s26, 8  ;;  %s3411_s27 = sshll.u32 %s4270_s26, 2 }
  0x1e   : > { %s4317_s4 = scalar_lea.vmem %s4815_s9, %s3547_s29  ;;  %s4323_s17 = scalar_lea.vmem %s4816_s10, %s3411_s27 }
  0x1f   : > { %s4328_s0 = scalar_lea.vmem %s4817_s11, %s3547_s29  ;;  %s705_s24 = scalar_lea.vmem %s4818_s12, %s4270_s26 }
  0x20   : > { %s4337_s22 = scalar_lea.vmem %s4821_s15, %s3545_s19  ;;  %p3417_p7 = scmp.ne.s32.totalorder %s4844_s28, 0 }
  0x21   : > { %v3555_v0 = vld [vmem:[%s658_s20] sm:$0xff] (!%p3417_p7)   ;;  %v3572_v1 = vld [vmem:[%s658_s20 + $0x8] sm:$0xff] (!%p3417_p7)  }
  0x22   : > { %717 = sbr.rel (%p3417_p7) target bundleno = 41 (0x29), region = 84  ;;  %v3556_v2 = vunpack.c.l.bf16 (!%p3417_p7), %v3555_v0  ;;  %v3557_v3 = vunpack.c.h.bf16 (!%p3417_p7), %v3555_v0  ;;  %v3560_v4 = vunpack.c.l.bf16 (!%p3417_p7), %v3572_v1  ;;  %v3561_v5 = vunpack.c.h.bf16 (!%p3417_p7), %v3572_v1 }
  0x24   : > { %726 = vst [vmem:[#allocation2] sm:$0xff] (!%p3417_p7), %v3556_v2  ;;  %727 = vst [vmem:[#allocation2 + $0x8] sm:$0xff] (!%p3417_p7), %v3557_v3 }
  0x25   : > { %728 = vst [vmem:[#allocation2 + $0x10] sm:$0xff] (!%p3417_p7), %v3560_v4  ;;  %729 = vst [vmem:[#allocation2 + $0x18] sm:$0xff] (!%p3417_p7), %v3561_v5 }
  0x29 PF: > { %v3866_v10 = vld [vmem:[%s4288_s18 + $0x4] ss:$12 sps:$4 sm:$0xff]   ;;  %v3868_v11 = vld [vmem:[%s4288_s18] ss:$12 sps:$4 sm:$0xff]   ;;  %v3869_v12 = vld [vmem:[%s4288_s18 + $0x1c] ss:$12 sps:$4 sm:$0xff]   ;;  %s4849_s2 = scalar_lea.vmem %s4812_s6, %s4270_s26  ;;  %s4850_s28 = scalar_lea.vmem %s4813_s7, %s4270_s26 }
  0x2a   : > { %v3871_v13 = vld [vmem:[%s4288_s18 + $0x8] ss:$12 sps:$4 sm:$0xff]   ;;  %980 = vmatprep.subr.bf16.mxu0 %v3866_v10  ;;  %v3872_v30 = vld [vmem:[%s4288_s18 + $0x18] ss:$12 sps:$4 sm:$0xff]   ;;  %v3875_v32 = vld [vmem:[%s4288_s18 + $0x20] ss:$12 sps:$4 sm:$0xff]  }
  0x2b   : > { %v730_v6 = vld [vmem:[#allocation2] sm:$0xff]  ;;  %v731_v8 = vld [vmem:[#allocation2 + $0x8] sm:$0xff]  ;;  %981 = vmatpush1.bf16.msra.mxu0 %v3868_v11  ;;  %3682 = vmatprep.subr.bf16.mxu1 %v3871_v13  ;;  %v3876_v33 = vld [vmem:[%s4288_s18 + $0x30] ss:$12 sps:$4 sm:$0xff]   ;;  %v4150_v45 = vmov 0   ;;  %s4845_s20 = sld [smem:[#allocation11_spill]] }
  0x2c   : > { %v732_v7 = vld [vmem:[#allocation2 + $0x10] sm:$0xff]  ;;  %736 = vadd.xlane.f32.xlu0 %v730_v6  ;;  %v733_v9 = vld [vmem:[#allocation2 + $0x18] sm:$0xff]  ;;  %982 = vmatprep.subr.bf16.mxu0 %v3869_v12  ;;  %v3884_v39 = vld [vmem:[%s4288_s18 + $0x60] ss:$12 sps:$4 sm:$0xff]   ;;  %s4847_s29 = sld [smem:[#allocation12_spill]]  ;;  %vm4152_vm0 = vmmov 0  }
  0x2d   : > { %740 = vadd.xlane.f32.xlu1 %v732_v7  ;;  %3683 = vmatpush3.bf16.msra.mxu1 %v3871_v13  ;;  %v3873_v31 = vld [vmem:[%s4288_s18 + $0x34] ss:$12 sps:$4 sm:$0xff]   ;;  %v3877_v34 = vld [vmem:[%s4288_s18 + $0x4c] ss:$12 sps:$4 sm:$0xff]   ;;  %v3881_v37 = vld [vmem:[%s4288_s18 + $0x64] ss:$12 sps:$4 sm:$0xff]  }
  0x2e   : > { %3684 = vmatprep.subr.bf16.mxu1 %v3875_v32  ;;  %v3879_v35 = vld [vmem:[%s4288_s18 + $0x38] ss:$12 sps:$4 sm:$0xff]   ;;  %v3880_v36 = vld [vmem:[%s4288_s18 + $0x48] ss:$12 sps:$4 sm:$0xff]   ;;  %v3883_v38 = vld [vmem:[%s4288_s18 + $0x50] ss:$12 sps:$4 sm:$0xff]   ;;  %1012 = vmatprep.mubr.bf16.mxu0 %v4150_v45 }
  0x2f   : > { %983 = vmatpush1.bf16.msra.mxu0 %v3872_v30  ;;  %v3885_v40 = vld [vmem:[%s4288_s18 + $0x7c] ss:$12 sps:$4 sm:$0xff]   ;;  %v3888_v42 = vld [vmem:[%s4288_s18 + $0x78] ss:$12 sps:$4 sm:$0xff]   ;;  %v3889_v43 = vld [vmem:[%s4288_s18 + $0x94] ss:$12 sps:$4 sm:$0xff]  }
  0x30   : > { %738 = vadd.xlane.f32.xlu0 %v731_v8  ;;  %984 = vmatprep.subr.bf16.mxu0 %v3873_v31  ;;  %v3887_v41 = vld [vmem:[%s4288_s18 + $0x68] ss:$12 sps:$4 sm:$0xff]   ;;  %v3891_v44 = vld [vmem:[%s4288_s18 + $0x80] ss:$12 sps:$4 sm:$0xff]   ;;  %v3892_v46 = vld [vmem:[%s4288_s18 + $0x90] ss:$12 sps:$4 sm:$0xff]  }
  0x31   : > { %742 = vadd.xlane.f32.xlu1 %v733_v9  ;;  %3685 = vmatpush3.bf16.msra.mxu1 %v3875_v32  ;;  %v3893_v47 = vld [vmem:[%s4288_s18 + $0xac] ss:$12 sps:$4 sm:$0xff]   ;;  %v3896_v49 = vld [vmem:[%s4288_s18 + $0xa8] ss:$12 sps:$4 sm:$0xff]   ;;  %v3897_v50 = vld [vmem:[%s4288_s18 + $0xb0] ss:$12 sps:$4 sm:$0xff]   ;;  %s4846_s19 = scalar_lea.vmem %s4845_s20, %s4270_s26  ;;  %s4851_s20 = scalar_lea.vmem %s4814_s8, %s4270_s26 }
  0x32   : > { %3686 = vmatprep.subr.bf16.mxu1 %v3879_v35  ;;  %v3895_v48 = vld [vmem:[%s4288_s18 + $0x98] ss:$12 sps:$4 sm:$0xff]   ;;  %v3418_v1 = vld [vmem:[%s4846_s19] ss:$0 sm:$0xff]  ;;  %s4848_s27 = scalar_lea.vmem %s4847_s29, %s4270_s26  ;;  %vm1088_vm1 = vcmask 261120   ;;  %vm1187_vm2 = vcmask 130048  }
  0x33   : > { %985 = vmatpush1.bf16.msra.mxu0 %v3876_v33  ;;  %s4154_s30 = smov 64   ;;  %s4155_s25 = smov 32   ;;  %vm1594_vm3 = vcmask 523520   ;;  %vm1861_vm4 = vcmask 785920   ;;  %vm2128_vm5 = vcmask 1048320  }
  0x34   : > { %986 = vmatprep.subr.bf16.mxu0 %v3877_v34  ;;  %s4852_s26 = sld [smem:[#allocation4_spill]] }
  0x35   : > { %3687 = vmatpush3.bf16.msra.mxu1 %v3879_v35 }
  0x36   : > { %3688 = vmatprep.subr.bf16.mxu1 %v3883_v38 }
  0x37   : > { %987 = vmatpush1.bf16.msra.mxu0 %v3880_v36 }
  0x38   : > { %988 = vmatprep.subr.bf16.mxu0 %v3881_v37 }
  0x39   : > { %3689 = vmatpush3.bf16.msra.mxu1 %v3883_v38 }
  0x3a   : > { %3690 = vmatprep.subr.bf16.mxu1 %v3887_v41  ;;  %p3536_p8 = scmp.ne.s32.totalorder %s4852_s26, 1 }
  0x3b   : > { %989 = vmatpush1.bf16.msra.mxu0 %v3884_v39  ;;  %s4853_s23 = sld [smem:[#allocation15_spill]] (!%p3536_p8) }
  0x3c   : > { %990 = vmatprep.subr.bf16.mxu0 %v3885_v40 }
  0x3d   : > { %3691 = vmatpush3.bf16.msra.mxu1 %v3887_v41 }
  0x3e   : > { %3692 = vmatprep.subr.bf16.mxu1 %v3891_v44 }
  0x3f   : > { %991 = vmatpush1.bf16.msra.mxu0 %v3888_v42 }
  0x40   : > { %992 = vmatprep.subr.bf16.mxu0 %v3889_v43 }
  0x41   : > { %3693 = vmatpush3.bf16.msra.mxu1 %v3891_v44 }
  0x42   : > { %3694 = vmatprep.subr.bf16.mxu1 %v3895_v48 }
  0x43   : > { %993 = vmatpush1.bf16.msra.mxu0 %v3892_v46 }
  0x44   : > { %994 = vmatprep.subr.bf16.mxu0 %v3893_v47 }
  0x45   : > { %3695 = vmatpush3.bf16.msra.mxu1 %v3895_v48 }
  0x46   : > { %3696 = vmatprep.subr.bf16.mxu1 %v3897_v50 }
  0x47   : > { %995 = vmatpush1.bf16.msra.mxu0 %v3896_v49 }
  0x49   : > { %3697 = vmatpush3.bf16.msra.mxu1 %v3897_v50 }
  0xb9   : > { %v737_v14 = vpop.xlane.xlu0 %736 }
  0xba   : > { %v741_v15 = vpop.xlane.xlu1 %740  ;;  %v745_v16 = vmul.f32 0.0078125, %v737_v14 }
  0xbb   : > { %v747_v17 = vmul.f32 0.0078125, %v741_v15 }
  0xbc   : > { %v4344_v18 = vsub.f32 %v730_v6, %v745_v16  ;;  %v3419_v6 = vld [vmem:[%s4848_s27] ss:$0 sm:$0xff]  ;;  %s4854_s27 = sld [smem:[#allocation16_spill]] (!%p3536_p8) }
  0xbd   : > { %v4346_v19 = vsub.f32 %v732_v7, %v747_v17  ;;  %v739_v20 = vpop.xlane.xlu0 %738 }
  0xbe   : > { %v743_v21 = vpop.xlane.xlu1 %742  ;;  %v746_v22 = vmul.f32 0.0078125, %v739_v20  ;;  %v753_v23 = vmul.f32 %v4344_v18, %v4344_v18  ;;  %v837_v20 = vlaneseq }
  0xbf   : > { %v748_v24 = vmul.f32 0.0078125, %v743_v21  ;;  %v755_v27 = vmul.f32 %v4346_v19, %v4346_v19 }
  0xc0   : > { %v4350_v25 = vsub.f32 %v731_v8, %v746_v22  ;;  %757 = vadd.xlane.f32.xlu0 %v753_v23  ;;  %v4402_v21 = vshrl.u32 %v837_v20, 7  ;;  %v835_v23 = vld [vmem:[%s4294_s1] sm:$0x7]  ;;  %s4153_s1 = smov 96  }
  0xc1   : > { %v4352_v26 = vsub.f32 %v733_v9, %v748_v24 }
  0xc2   : > { %v754_v28 = vmul.f32 %v4350_v25, %v4350_v25  ;;  %v839_v22 = vsub.s32 0, %v4402_v21  ;;  %v843_v24 = vsub.s32 1, %v4402_v21 }
  0xc3   : > { %v756_v29 = vmul.f32 %v4352_v26, %v4352_v26 }
  0xc4   : > { %761 = vadd.xlane.f32.xlu0 %v755_v27  ;;  %759 = vadd.xlane.f32.xlu1 %v754_v28  ;;  %v844_v28 = vrot.slane %v835_v23, %v843_v24 }
  0xc8   : > { %763 = vadd.xlane.f32.xlu1 %v756_v29 }
 0x14d   : > { %v758_v51 = vpop.xlane.xlu0 %757 }
 0x14e   : > { %v765_v52 = vmul.f32 0.0078125, %v758_v51 }
 0x150   : > { %v769_v53 = vadd.f32 1e-05, %v765_v52 }
 0x151   : > { %v760_v54 = vpop.xlane.xlu1 %759  ;;  %v762_v55 = vpop.xlane.xlu0 %761 }
 0x152   : > { %3986 = vrsqrt.f32 %v769_v53  ;;  %v766_v56 = vmul.f32 0.0078125, %v760_v54  ;;  %v767_v57 = vmul.f32 0.0078125, %v762_v55 }
 0x154   : > { %v770_v58 = vadd.f32 1e-05, %v766_v56  ;;  %v771_v59 = vadd.f32 1e-05, %v767_v57 }
 0x155   : > { %v764_v60 = vpop.xlane.xlu1 %763 }
 0x156   : > { %3988 = vrsqrt.f32 %v770_v58  ;;  %v768_v61 = vmul.f32 0.0078125, %v764_v60 }
 0x157   : > { %3990 = vrsqrt.f32 %v771_v59 }
 0x158   : > { %v772_v62 = vadd.f32 1e-05, %v768_v61 }
 0x15a   : > { %3992 = vrsqrt.f32 %v772_v62 }
 0x15c   : > { %v3987_v63 = vpop.eup %3986 }
 0x15d   : > { %v777_v0 = vmul.f32 %v3987_v63, %v4344_v18 }
 0x15f   : > { %v787_v5 = vmul.f32 %v3418_v1, %v777_v0 }
 0x160   : > { %v3989_v2 = vpop.eup %3988 }
 0x161   : > { %v3991_v3 = vpop.eup %3990  ;;  %v778_v4 = vmul.f32 %v3989_v2, %v4350_v25  ;;  %v797_v10 = vadd.f32 %v3419_v6, %v787_v5  ;;  %v840_v25 = vrot.slane %v835_v23, %v839_v22 }
 0x162   : > { %v779_v7 = vmul.f32 %v3991_v3, %v4346_v19  ;;  %v4151_v19 = vmov 0.0  }
 0x163   : > { %v788_v8 = vmul.f32 %v3418_v1, %v778_v4  ;;  %3702 = vmatprep.subr.bf16.mxu0 %v4151_v19  ;;  %3714 = vmatprep.subr.bf16.mxu1 %v4151_v19 }
 0x164   : > { %v3993_v9 = vpop.eup %3992  ;;  %v789_v13 = vmul.f32 %v3418_v1, %v779_v7 }
 0x165   : > { %v798_v11 = vadd.f32 %v3419_v6, %v788_v8  ;;  %v780_v12 = vmul.f32 %v3993_v9, %v4352_v26  ;;  %v847_v26 = vsub.s32 2, %v4402_v21 }
 0x166   : > { %v799_v16 = vadd.f32 %v3419_v6, %v789_v13 }
 0x167   : > { %v801_v14 = vpack.c.bf16 %v798_v11, %v797_v10  ;;  %v790_v15 = vmul.f32 %v3418_v1, %v780_v12  ;;  %v848_v34 = vrot.slane %v835_v23, %v847_v26 }
 0x169   : > { %1013 = vmatmul.mubr.bf16.vlgmr.msra.gmra.mrb[0].mxu0 %v801_v14  ;;  %3698 = vmatprep.mubr.bf16.mxu1 %v801_v14  ;;  %v800_v17 = vadd.f32 %v3419_v6, %v790_v15 }
 0x16a   : > { %1022 = vmatprep.mubr.bf16.mxu0 %v4150_v45 }
 0x16b   : > { %v802_v18 = vpack.c.bf16 %v800_v17, %v799_v16 }
 0x16d   : > { %3699 = vmatmul.mubr.bf16.vlgmr.msra.gmra.mrb[0].mxu1 %v802_v18 }
 0x16e   : > { %3716 = vmatprep.mubr.msk.bf16.mxu1 %vm4152_vm0, %v4151_v19 }
 0x171   : > { %1023 = vmatmul.mubr.bf16.gmra.mrb[4].mxu0 %v802_v18 }
 0x172   : > { %3704 = vmatprep.mubr.msk.bf16.mxu0 %vm4152_vm0, %v4151_v19 }
 0x23c   : > { %v1014_v27 = vpop.f32.mrb[0].mxu0 }
 0x23d   : > { %v1016_v29 = vpop.f32.mrb[1].mxu0  ;;  %v1015_v31 = vadd.f32 %v1014_v27, %v840_v25 }
 0x23e   : > { %v1018_v30 = vpop.f32.mrb[2].mxu0  ;;  %v1017_v35 = vadd.f32 %v1016_v29, %v844_v28 }
 0x23f   : > { %v1019_v32 = vadd.f32 %v1018_v30, %v840_v25  ;;  %v1020_v33 = vpop.f32.mrb[3].mxu0 }
 0x240   : > { %v1021_v36 = vadd.f32 %v1020_v33, %v844_v28  ;;  %v3700_v37 = vpop.f32.mrb[0].mxu1 }
 0x241   : > { %v4414_v38 = vpack.c.bf16 %v1019_v32, %v1015_v31  ;;  %v1067_v39 = vpop.f32.mrb[1].mxu1  ;;  %v1076_v42 = vadd.f32 %v3700_v37, %v848_v34 }
 0x242   : > { %v4416_v40 = vpack.c.bf16 %v1021_v36, %v1017_v35  ;;  %v3701_v41 = vpop.f32.mrb[2].mxu1  ;;  %v1068_v46 = vadd.f32 %v1067_v39, %v848_v34 }
 0x243   : > { %v1079_v43 = vadd.f32 %v3701_v41, %v848_v34  ;;  %v1070_v44 = vpop.f32.mrb[3].mxu1 }
 0x244   : > { %v1071_v47 = vadd.f32 %v1070_v44, %v848_v34  ;;  %v1024_v48 = vpop.f32.mrb[4].mxu0  ;;  %v1093_v49 = vsel %vm1088_vm1, %v4416_v40, 0 }
 0x245   : > { %v4420_v50 = vpack.c.bf16 %v1079_v43, %v1076_v42  ;;  %v1026_v51 = vpop.f32.mrb[5].mxu0  ;;  %3703 = vmatpush3.bf16.xpose.msra.mxu0 %v1093_v49  ;;  %v1025_v54 = vadd.f32 %v1024_v48, %v840_v25 }
 0x246   : > { %v4422_v52 = vpack.c.bf16 %v1071_v47, %v1068_v46  ;;  %v1028_v53 = vpop.f32.mrb[6].mxu0  ;;  %3708 = vmatprep.subr.bf16.mxu0 %v4151_v19  ;;  %v1027_v57 = vadd.f32 %v1026_v51, %v844_v28 }
 0x247   : > { %v1029_v55 = vadd.f32 %v1028_v53, %v840_v25  ;;  %v1030_v56 = vpop.f32.mrb[7].mxu0 }
 0x248   : > { %v1031_v58 = vadd.f32 %v1030_v56, %v844_v28  ;;  %3715 = vmatpush3.bf16.msra.mxu1 %v4422_v52 }
 0x249   : > { %v4426_v59 = vpack.c.bf16 %v1029_v55, %v1025_v54  ;;  %3726 = vmatprep.subr.bf16.mxu1 %v4151_v19 }
 0x24a   : > { %v4429_v60 = vpack.c.bf16 %v1031_v58, %v1027_v57 }
 0x24c   : > { %3705 = vmatmul.mubr.msk.bf16.vlgmr.msra.gmra.mrb[8].mxu0 %vm1088_vm1, %v4414_v38  ;;  %v1140_v61 = vsel %vm1088_vm1, %v4429_v60, 0 }
 0x24d   : > { %3709 = vmatpush3.bf16.xpose.msra.mxu0 %v1140_v61  ;;  %3710 = vmatprep.mubr.msk.bf16.mxu0 %vm4152_vm0, %v4151_v19 }
 0x24e   : > { %3720 = vmatprep.subr.bf16.mxu0 %v4151_v19 }
 0x254   : > { %3711 = vmatmul.mubr.msk.bf16.vlgmr.msra.gmra.mrb[12].mxu0 %vm1088_vm1, %v4426_v59 }
 0x255   : > { %3721 = vmatpush3.bf16.msra.mxu0 %v4420_v50  ;;  %3722 = vmatprep.mubr.msk.bf16.mxu0 %vm4152_vm0, %v4151_v19 }
 0x256   : > { %3732 = vmatprep.subr.bf16.mxu0 %v4151_v19 }
 0x31f   : > { %v1129_v62 = vpop.f32.mrb[8].mxu0 }
 0x320   : > { %v1183_v63 = vmul.f32 0.17677669, %v1129_v62  ;;  %v3706_v0 = vpop.f32.mrb[9].mxu0 }
 0x321   : > { %v1132_v1 = vpop.f32.mrb[10].mxu0 }
 0x322   : > { %v1184_v2 = vmul.f32 0.17677669, %v1132_v1  ;;  %v3707_v3 = vpop.f32.mrb[11].mxu0  ;;  %v1188_v4 = vsel %vm1187_vm2, %v1183_v63, -inf }
 0x323   : > { %1189 = vmax.xlane.f32.xlu0 %v1188_v4 }
 0x324   : > { %v1191_v5 = vsel %vm1187_vm2, %v1184_v2, -inf }
 0x325   : > { %1192 = vmax.xlane.f32.xlu1 %v1191_v5 }
 0x327   : > { %v1176_v6 = vpop.f32.mrb[12].mxu0 }
 0x328   : > { %v1185_v7 = vmul.f32 0.17677669, %v1176_v6  ;;  %v3712_v8 = vpop.f32.mrb[13].mxu0 }
 0x329   : > { %v1179_v9 = vpop.f32.mrb[14].mxu0 }
 0x32a   : > { %v1186_v10 = vmul.f32 0.17677669, %v1179_v9  ;;  %v3713_v11 = vpop.f32.mrb[15].mxu0  ;;  %v1194_v12 = vsel %vm1187_vm2, %v1185_v7, -inf }
 0x32b   : > { %1195 = vmax.xlane.f32.xlu0 %v1194_v12 }
 0x32c   : > { %v1197_v13 = vsel %vm1187_vm2, %v1186_v10, -inf }
 0x32d   : > { %1198 = vmax.xlane.f32.xlu1 %v1197_v13 }
 0x3b0   : > { %v1190_v14 = vpop.xlane.xlu0 %1189 }
 0x3b1   : > { %v1200_v15 = vsub.f32 %v1183_v63, %v1190_v14 }
 0x3b2   : > { %v1193_v16 = vpop.xlane.xlu1 %1192 }
 0x3b3   : > { %v1204_v17 = vmul.f32 1.442695, %v1200_v15  ;;  %v1201_v18 = vsub.f32 %v1184_v2, %v1193_v16 }
 0x3b5   : > { %3994 = vpow2.f32 %v1204_v17  ;;  %v1206_v20 = vmul.f32 1.442695, %v1201_v18 }
 0x3b7   : > { %3996 = vpow2.f32 %v1206_v20 }
 0x3b8   : > { %v1196_v23 = vpop.xlane.xlu0 %1195 }
 0x3b9   : > { %v1202_v25 = vsub.f32 %v1185_v7, %v1196_v23 }
 0x3ba   : > { %v1199_v34 = vpop.xlane.xlu1 %1198 }
 0x3bb   : > { %v1208_v27 = vmul.f32 1.442695, %v1202_v25  ;;  %v1203_v35 = vsub.f32 %v1186_v10, %v1199_v34 }
 0x3bd   : > { %3998 = vpow2.f32 %v1208_v27  ;;  %v1210_v36 = vmul.f32 1.442695, %v1203_v35 }
 0x3bf   : > { %v3995_v28 = vpop.eup %3994  ;;  %4000 = vpow2.f32 %v1210_v36 }
 0x3c0   : > { %v1212_v29 = vsel %vm1187_vm2, %v3995_v28, 0.0 }
 0x3c1   : > { %v3997_v30 = vpop.eup %3996  ;;  %1213 = vadd.xlane.f32.xlu0 %v1212_v29 }
 0x3c2   : > { %v1215_v31 = vsel %vm1187_vm2, %v3997_v30, 0.0 }
 0x3c3   : > { %1216 = vadd.xlane.f32.xlu1 %v1215_v31 }
 0x3c7   : > { %v3999_v32 = vpop.eup %3998 }
 0x3c8   : > { %v1218_v33 = vsel %vm1187_vm2, %v3999_v32, 0.0 }
 0x3c9   : > { %1219 = vadd.xlane.f32.xlu0 %v1218_v33  ;;  %v4001_v37 = vpop.eup %4000 }
 0x3ca   : > { %v1221_v39 = vsel %vm1187_vm2, %v4001_v37, 0.0 }
 0x3d4   : > { %1383 = vrot.lane.b32.xlu1 %v4429_v60, %s4153_s1 }
 0x3df   : > { %1330 = vrot.lane.b32.xlu0 %v4416_v40, %s4153_s1 }
 0x3f8   : > { %1222 = vadd.xlane.f32.xlu1 %v1221_v39 }
 0x409   : > { %1327 = vrot.lane.b32.xlu1 %v4414_v38, %s4153_s1 }
 0x40d   : > { %1380 = vrot.lane.b32.xlu1 %v4426_v59, %s4153_s1 }
 0x44e   : > { %v1214_v41 = vpop.xlane.xlu0 %1213 }
 0x44f   : > { %4002 = vrcp.f32 %v1214_v41 }
 0x450   : > { %v1217_v42 = vpop.xlane.xlu1 %1216 }
 0x451   : > { %4004 = vrcp.f32 %v1217_v42 }
 0x454   : > { %v1384_v54 = vpop.permute.xlu1 %1383 }
 0x455   : > { %v1389_v0 = vsel %vm1088_vm1, %v1384_v54, 0 }
 0x456   : > { %v1220_v43 = vpop.xlane.xlu0 %1219 }
 0x457   : > { %4006 = vrcp.f32 %v1220_v43 }
 0x459   : > { %v4003_v44 = vpop.eup %4002 }
 0x45a   : > { %v1228_v47 = vmul.f32 %v4003_v44, %v3995_v28  ;;  %v1331_v49 = vpop.permute.xlu0 %1330 }
 0x45b   : > { %v4005_v46 = vpop.eup %4004  ;;  %v1336_v53 = vsel %vm1088_vm1, %v1331_v49, 0 }
 0x45c   : > { %v1229_v48 = vmul.f32 %v4005_v46, %v3997_v30 }
 0x45e   : > { %v1232_v51 = vpack.c.bf16 %v1229_v48, %v1228_v47 }
 0x460   : > { %3717 = vmatmul.mubr.msk.bf16.vlgmr.msra.gmra.mrb[4].mxu1 %vm1187_vm2, %v1232_v51 }
 0x461   : > { %3727 = vmatpush3.bf16.xpose.msra.mxu1 %v1336_v53  ;;  %3728 = vmatprep.mubr.msk.bf16.mxu1 %vm4152_vm0, %v4151_v19  ;;  %v4007_v57 = vpop.eup %4006 }
 0x462   : > { %3738 = vmatprep.subr.bf16.mxu1 %v4151_v19  ;;  %v1230_v61 = vmul.f32 %v4007_v57, %v3999_v32 }
 0x485   : > { %v1223_v55 = vpop.xlane.xlu1 %1222 }
 0x486   : > { %4008 = vrcp.f32 %v1223_v55 }
 0x489   : > { %v1328_v56 = vpop.permute.xlu1 %1327 }
 0x48a   : > { %3729 = vmatmul.mubr.msk.bf16.vlgmr.msra.gmra.mrb[8].mxu1 %vm1088_vm1, %v1328_v56 }
 0x48b   : > { %3740 = vmatprep.mubr.msk.bf16.mxu1 %vm4152_vm0, %v4151_v19 }
 0x48d   : > { %v1381_v1 = vpop.permute.xlu1 %1380 }
 0x490   : > { %v4009_v58 = vpop.eup %4008 }
 0x491   : > { %v1231_v62 = vmul.f32 %v4009_v58, %v4001_v37 }
 0x493   : > { %v1233_v63 = vpack.c.bf16 %v1231_v62, %v1230_v61 }
 0x495   : > { %3723 = vmatmul.mubr.msk.bf16.vlgmr.msra.gmra.mrb[16].mxu0 %vm1187_vm2, %v1233_v63 }
 0x496   : > { %3733 = vmatpush3.bf16.xpose.msra.mxu0 %v1389_v0  ;;  %3734 = vmatprep.mubr.msk.bf16.mxu0 %vm4152_vm0, %v4151_v19 }
 0x497   : > { %3744 = vmatprep.subr.bf16.mxu0 %v4151_v19 }
 0x49d   : > { %3735 = vmatmul.mubr.msk.bf16.vlgmr.msra.gmra.mrb[20].mxu0 %vm1088_vm1, %v1381_v1 }
 0x49e   : > { %3746 = vmatprep.mubr.msk.bf16.mxu0 %vm4152_vm0, %v4151_v19 }
 0x533   : > { %v1271_v2 = vpop.f32.mrb[4].mxu1 }
 0x534   : > { %1322 = vst.msk [vmem:[#allocation3] sm:$0xff] %vm1088_vm1, %v1271_v2  ;;  %v3718_v3 = vpop.f32.mrb[5].mxu1 }
 0x535   : > { %v1274_v4 = vpop.f32.mrb[6].mxu1 }
 0x536   : > { %1323 = vst.msk [vmem:[#allocation3 + $0x8] sm:$0xff] %vm1088_vm1, %v1274_v4  ;;  %v3719_v5 = vpop.f32.mrb[7].mxu1 }
 0x55d   : > { %v1372_v6 = vpop.f32.mrb[8].mxu1 }
 0x55e   : > { %v1432_v7 = vmul.f32 0.17677669, %v1372_v6  ;;  %v3730_v8 = vpop.f32.mrb[9].mxu1 }
 0x55f   : > { %v1375_v9 = vpop.f32.mrb[10].mxu1 }
 0x560   : > { %v1433_v10 = vmul.f32 0.17677669, %v1375_v9  ;;  %v3731_v11 = vpop.f32.mrb[11].mxu1  ;;  %v1436_v12 = vsel %vm1187_vm2, %v1432_v7, -inf }
 0x561   : > { %1437 = vmax.xlane.f32.xlu0 %v1436_v12 }
 0x562   : > { %v1439_v13 = vsel %vm1187_vm2, %v1433_v10, -inf }
 0x563   : > { %1440 = vmax.xlane.f32.xlu1 %v1439_v13 }
 0x568   : > { %v1315_v14 = vpop.f32.mrb[16].mxu0 }
 0x569   : > { %1324 = vst.msk [vmem:[#allocation3 + $0x10] sm:$0xff] %vm1088_vm1, %v1315_v14  ;;  %v3724_v15 = vpop.f32.mrb[17].mxu0 }
 0x56a   : > { %v1318_v16 = vpop.f32.mrb[18].mxu0 }
 0x56b   : > { %1325 = vst.msk [vmem:[#allocation3 + $0x18] sm:$0xff] %vm1088_vm1, %v1318_v16  ;;  %v3725_v17 = vpop.f32.mrb[19].mxu0 }
 0x570   : > { %v1425_v18 = vpop.f32.mrb[20].mxu0 }
 0x571   : > { %v1434_v20 = vmul.f32 0.17677669, %v1425_v18  ;;  %v3736_v23 = vpop.f32.mrb[21].mxu0 }
 0x572   : > { %v1428_v25 = vpop.f32.mrb[22].mxu0 }
 0x573   : > { %v1435_v27 = vmul.f32 0.17677669, %v1428_v25  ;;  %v3737_v28 = vpop.f32.mrb[23].mxu0  ;;  %v1442_v29 = vsel %vm1187_vm2, %v1434_v20, -inf }
 0x574   : > { %1443 = vmax.xlane.f32.xlu0 %v1442_v29 }
 0x575   : > { %v1445_v30 = vsel %vm1187_vm2, %v1435_v27, -inf }
 0x578   : > { %1446 = vmax.xlane.f32.xlu0 %v1445_v30 }
 0x5ee   : > { %v1438_v31 = vpop.xlane.xlu0 %1437 }
 0x5ef   : > { %v1448_v32 = vsub.f32 %v1432_v7, %v1438_v31 }
 0x5f0   : > { %v1441_v33 = vpop.xlane.xlu1 %1440 }
 0x5f1   : > { %v1452_v34 = vmul.f32 1.442695, %v1448_v32  ;;  %v1449_v35 = vsub.f32 %v1433_v10, %v1441_v33 }
 0x5f3   : > { %4010 = vpow2.f32 %v1452_v34  ;;  %v1454_v36 = vmul.f32 1.442695, %v1449_v35 }
 0x5f5   : > { %4012 = vpow2.f32 %v1454_v36 }
 0x5fd   : > { %v4011_v37 = vpop.eup %4010 }
 0x5fe   : > { %v1460_v39 = vsel %vm1187_vm2, %v4011_v37, 0.0 }
 0x5ff   : > { %v4013_v41 = vpop.eup %4012  ;;  %1461 = vadd.xlane.f32.xlu0 %v1460_v39 }
 0x600   : > { %v1463_v42 = vsel %vm1187_vm2, %v4013_v41, 0.0 }
 0x601   : > { %1464 = vadd.xlane.f32.xlu1 %v1463_v42  ;;  %v1444_v43 = vpop.xlane.xlu0 %1443 }
 0x602   : > { %v1450_v44 = vsub.f32 %v1434_v20, %v1444_v43 }
 0x604   : > { %v1456_v46 = vmul.f32 1.442695, %v1450_v44 }
 0x605   : > { %v1447_v49 = vpop.xlane.xlu0 %1446 }
 0x606   : > { %4014 = vpow2.f32 %v1456_v46  ;;  %v1451_v51 = vsub.f32 %v1435_v27, %v1447_v49 }
 0x608   : > { %v1458_v53 = vmul.f32 1.442695, %v1451_v51 }
 0x60a   : > { %4016 = vpow2.f32 %v1458_v53 }
 0x610   : > { %v4015_v47 = vpop.eup %4014 }
 0x611   : > { %v1466_v48 = vsel %vm1187_vm2, %v4015_v47, 0.0 }
 0x612   : > { %1531 = vrot.lane.b32.xlu1 %v4420_v50, %s4153_s1  ;;  %1467 = vadd.xlane.f32.xlu0 %v1466_v48 }
 0x614   : > { %v4017_v54 = vpop.eup %4016 }
 0x615   : > { %v1469_v55 = vsel %vm1187_vm2, %v4017_v54, 0.0 }
 0x616   : > { %1601 = vrot.lane.b32.xlu1 %v4416_v40, %s4154_s30 }
 0x628   : > { %1483 = vrot.lane.b32.xlu0 %v4422_v52, %s4153_s1 }
 0x62c   : > { %1599 = vrot.lane.b32.xlu0 %v4414_v38, %s4154_s30 }
 0x63a   : > { %1470 = vadd.xlane.f32.xlu1 %v1469_v55 }
 0x64b   : > { %1652 = vrot.lane.b32.xlu1 %v4429_v60, %s4154_s30 }
 0x64f   : > { %1650 = vrot.lane.b32.xlu1 %v4426_v59, %s4154_s30 }
 0x68c   : > { %v1462_v58 = vpop.xlane.xlu0 %1461 }
 0x68e   : > { %v1465_v56 = vpop.xlane.xlu1 %1464 }
 0x68f   : > { %4018 = vrcp.f32 %v1465_v56 }
 0x690   : > { %4020 = vrcp.f32 %v1462_v58 }
 0x692   : > { %v1532_v57 = vpop.permute.xlu1 %1531 }
 0x693   : > { %3745 = vmatpush3.bf16.msra.mxu0 %v1532_v57 }
 0x694   : > { %3756 = vmatprep.subr.bf16.mxu0 %v4151_v19 }
 0x696   : > { %v1602_v4 = vpop.permute.xlu1 %1601 }
 0x697   : > { %v1607_v5 = vsel %vm1088_vm1, %v1602_v4, 0 }
 0x699   : > { %v4019_v61 = vpop.eup %4018 }
 0x69a   : > { %v4021_v63 = vpop.eup %4020  ;;  %v1477_v0 = vmul.f32 %v4019_v61, %v4013_v41 }
 0x69b   : > { %v1476_v1 = vmul.f32 %v4021_v63, %v4011_v37 }
 0x69d   : > { %v1480_v3 = vpack.c.bf16 %v1477_v0, %v1476_v1 }
 0x69f   : > { %v1468_v62 = vpop.xlane.xlu0 %1467 }
 0x6a0   : > { %4022 = vrcp.f32 %v1468_v62 }
 0x6a3   : > { %v1484_v2 = vpop.permute.xlu0 %1483 }
 0x6a4   : > { %3739 = vmatpush3.bf16.msra.mxu1 %v1484_v2 }
 0x6a5   : > { %3750 = vmatprep.subr.bf16.mxu1 %v4151_v19 }
 0x6a7   : > { %3741 = vmatmul.mubr.msk.bf16.vlgmr.msra.gmra.mrb[12].mxu1 %vm1187_vm2, %v1480_v3  ;;  %v1600_v6 = vpop.permute.xlu0 %1599 }
 0x6a8   : > { %3752 = vmatprep.mubr.msk.bf16.mxu1 %vm4152_vm0, %v4151_v19 }
 0x6aa   : > { %v4023_v8 = vpop.eup %4022 }
 0x6ab   : > { %v1478_v10 = vmul.f32 %v4023_v8, %v4015_v47 }
 0x6ad   : > { %3751 = vmatpush3.bf16.xpose.msra.mxu1 %v1607_v5 }
 0x6ae   : > { %3762 = vmatprep.subr.bf16.mxu1 %v4151_v19 }
 0x6b4   : > { %3753 = vmatmul.mubr.msk.bf16.vlgmr.msra.gmra.mrb[16].mxu1 %vm1088_vm1, %v1600_v6 }
 0x6b5   : > { %3764 = vmatprep.mubr.msk.bf16.mxu1 %vm4152_vm0, %v4151_v19 }
 0x6c7   : > { %v1471_v7 = vpop.xlane.xlu1 %1470 }
 0x6c8   : > { %4024 = vrcp.f32 %v1471_v7 }
 0x6cb   : > { %v1653_v12 = vpop.permute.xlu1 %1652 }
 0x6cc   : > { %v1658_v14 = vsel %vm1088_vm1, %v1653_v12, 0 }
 0x6cf   : > { %v1651_v15 = vpop.permute.xlu1 %1650 }
 0x6d2   : > { %v4025_v9 = vpop.eup %4024 }
 0x6d3   : > { %v1479_v11 = vmul.f32 %v4025_v9, %v4017_v54 }
 0x6d5   : > { %v1481_v13 = vpack.c.bf16 %v1479_v11, %v1478_v10 }
 0x6d7   : > { %3747 = vmatmul.mubr.msk.bf16.vlgmr.msra.gmra.mrb[24].mxu0 %vm1187_vm2, %v1481_v13 }
 0x6d8   : > { %3757 = vmatpush3.bf16.xpose.msra.mxu0 %v1658_v14  ;;  %3758 = vmatprep.mubr.msk.bf16.mxu0 %vm4152_vm0, %v4151_v19 }
 0x6d9   : > { %3768 = vmatprep.subr.bf16.mxu0 %v4151_v19 }
 0x6df   : > { %3759 = vmatmul.mubr.msk.bf16.vlgmr.msra.gmra.mrb[28].mxu0 %vm1088_vm1, %v1651_v15 }
 0x6e0   : > { %3770 = vmatprep.mubr.msk.bf16.mxu0 %vm4152_vm0, %v4151_v19 }
 0x77a   : > { %v4518_v16 = vpop.f32.mrb[12].mxu1 }
 0x77b   : > { %v3742_v17 = vpop.f32.mrb[13].mxu1 }
 0x77c   : > { %v4520_v18 = vpop.f32.mrb[14].mxu1 }
 0x77d   : > { %v3743_v20 = vpop.f32.mrb[15].mxu1 }
 0x787   : > { %v1643_v23 = vpop.f32.mrb[16].mxu1 }
 0x788   : > { %v1701_v25 = vmul.f32 0.17677669, %v1643_v23  ;;  %v3754_v27 = vpop.f32.mrb[17].mxu1 }
 0x789   : > { %v1646_v28 = vpop.f32.mrb[18].mxu1 }
 0x78a   : > { %v1702_v29 = vmul.f32 0.17677669, %v1646_v28  ;;  %v3755_v30 = vpop.f32.mrb[19].mxu1  ;;  %v1705_v31 = vsel %vm1187_vm2, %v1701_v25, -inf }
 0x78b   : > { %1706 = vmax.xlane.f32.xlu0 %v1705_v31 }
 0x78c   : > { %v1708_v32 = vsel %vm1187_vm2, %v1702_v29, -inf }
 0x78d   : > { %1709 = vmax.xlane.f32.xlu1 %v1708_v32 }
 0x7aa   : > { %v4524_v33 = vpop.f32.mrb[24].mxu0 }
 0x7ab   : > { %v3748_v34 = vpop.f32.mrb[25].mxu0 }
 0x7ac   : > { %v4526_v35 = vpop.f32.mrb[26].mxu0 }
 0x7ad   : > { %v3749_v36 = vpop.f32.mrb[27].mxu0 }
 0x7b2   : > { %v1694_v37 = vpop.f32.mrb[28].mxu0 }
 0x7b3   : > { %v1703_v39 = vmul.f32 0.17677669, %v1694_v37  ;;  %v3760_v41 = vpop.f32.mrb[29].mxu0 }
 0x7b4   : > { %v1697_v42 = vpop.f32.mrb[30].mxu0 }
 0x7b5   : > { %v1704_v43 = vmul.f32 0.17677669, %v1697_v42  ;;  %v3761_v44 = vpop.f32.mrb[31].mxu0  ;;  %v1711_v46 = vsel %vm1187_vm2, %v1703_v39, -inf }
 0x7b6   : > { %1712 = vmax.xlane.f32.xlu0 %v1711_v46 }
 0x7b7   : > { %v1714_v47 = vsel %vm1187_vm2, %v1704_v43, -inf }
 0x7ba   : > { %1715 = vmax.xlane.f32.xlu0 %v1714_v47 }
 0x818   : > { %v1707_v48 = vpop.xlane.xlu0 %1706 }
 0x819   : > { %v1717_v49 = vsub.f32 %v1701_v25, %v1707_v48 }
 0x81a   : > { %v1710_v51 = vpop.xlane.xlu1 %1709 }
 0x81b   : > { %v1721_v53 = vmul.f32 1.442695, %v1717_v49  ;;  %v1718_v54 = vsub.f32 %v1702_v29, %v1710_v51 }
 0x81d   : > { %4026 = vpow2.f32 %v1721_v53  ;;  %v1723_v55 = vmul.f32 1.442695, %v1718_v54 }
 0x81f   : > { %4028 = vpow2.f32 %v1723_v55 }
 0x827   : > { %v4027_v56 = vpop.eup %4026 }
 0x828   : > { %v1729_v57 = vsel %vm1187_vm2, %v4027_v56, 0.0 }
 0x829   : > { %v4029_v58 = vpop.eup %4028  ;;  %1730 = vadd.xlane.f32.xlu0 %v1729_v57 }
 0x82a   : > { %v1732_v61 = vsel %vm1187_vm2, %v4029_v58, 0.0 }
 0x82b   : > { %1733 = vadd.xlane.f32.xlu1 %v1732_v61 }
 0x83c   : > { %1798 = vrot.lane.b32.xlu1 %v4420_v50, %s4154_s30 }
 0x840   : > { %1868 = vrot.lane.b32.xlu1 %v4416_v40, %s4155_s25 }
 0x843   : > { %v1713_v62 = vpop.xlane.xlu0 %1712 }
 0x844   : > { %v1719_v63 = vsub.f32 %v1703_v39, %v1713_v62 }
 0x846   : > { %v1725_v0 = vmul.f32 1.442695, %v1719_v63 }
 0x847   : > { %v1716_v1 = vpop.xlane.xlu0 %1715 }
 0x848   : > { %4030 = vpow2.f32 %v1725_v0  ;;  %v1720_v2 = vsub.f32 %v1704_v43, %v1716_v1 }
 0x84a   : > { %v1727_v4 = vmul.f32 1.442695, %v1720_v2 }
 0x84c   : > { %4032 = vpow2.f32 %v1727_v4 }
 0x852   : > { %v4031_v3 = vpop.eup %4030 }
 0x853   : > { %v1735_v5 = vsel %vm1187_vm2, %v4031_v3, 0.0 }
 0x854   : > { %1736 = vadd.xlane.f32.xlu0 %v1735_v5 }
 0x856   : > { %v4033_v6 = vpop.eup %4032 }
 0x857   : > { %v1738_v7 = vsel %vm1187_vm2, %v4033_v6, 0.0 }
 0x864   : > { %1739 = vadd.xlane.f32.xlu1 %v1738_v7 }
 0x86a   : > { %1751 = vrot.lane.b32.xlu0 %v4422_v52, %s4154_s30 }
 0x86e   : > { %1866 = vrot.lane.b32.xlu0 %v4414_v38, %s4155_s25 }
 0x875   : > { %1919 = vrot.lane.b32.xlu1 %v4429_v60, %s4155_s25 }
 0x879   : > { %1917 = vrot.lane.b32.xlu1 %v4426_v59, %s4155_s25 }
 0x8b6   : > { %v1731_v9 = vpop.xlane.xlu0 %1730 }
 0x8b8   : > { %v1734_v40 = vpop.xlane.xlu1 %1733 }
 0x8b9   : > { %4034 = vrcp.f32 %v1734_v40 }
 0x8ba   : > { %4036 = vrcp.f32 %v1731_v9 }
 0x8bc   : > { %v1799_v8 = vpop.permute.xlu1 %1798 }
 0x8bd   : > { %3769 = vmatpush3.bf16.msra.mxu0 %v1799_v8 }
 0x8be   : > { %3780 = vmatprep.subr.bf16.mxu0 %v4151_v19 }
 0x8c0   : > { %v1869_v59 = vpop.permute.xlu1 %1868 }
 0x8c1   : > { %v1874_v60 = vsel %vm1088_vm1, %v1869_v59, 0 }
 0x8c3   : > { %v4035_v10 = vpop.eup %4034 }
 0x8c4   : > { %v4037_v12 = vpop.eup %4036  ;;  %v1746_v13 = vmul.f32 %v4035_v10, %v4029_v58 }
 0x8c5   : > { %v1745_v14 = vmul.f32 %v4037_v12, %v4027_v56 }
 0x8c7   : > { %v1749_v15 = vpack.c.bf16 %v1746_v13, %v1745_v14 }
 0x8e1   : > { %v1737_v11 = vpop.xlane.xlu0 %1736 }
 0x8e2   : > { %4038 = vrcp.f32 %v1737_v11 }
 0x8e5   : > { %v1752_v38 = vpop.permute.xlu0 %1751 }
 0x8e6   : > { %3763 = vmatpush3.bf16.msra.mxu1 %v1752_v38 }
 0x8e7   : > { %3774 = vmatprep.subr.bf16.mxu1 %v4151_v19 }
 0x8e9   : > { %3765 = vmatmul.mubr.msk.bf16.vlgmr.msra.gmra.mrb[20].mxu1 %vm1187_vm2, %v1749_v15  ;;  %v1867_v20 = vpop.permute.xlu0 %1866 }
 0x8ea   : > { %3776 = vmatprep.mubr.msk.bf16.mxu1 %vm4152_vm0, %v4151_v19 }
 0x8ec   : > { %v4039_v23 = vpop.eup %4038 }
 0x8ed   : > { %v1747_v27 = vmul.f32 %v4039_v23, %v4031_v3 }
 0x8ef   : > { %3775 = vmatpush3.bf16.xpose.msra.mxu1 %v1874_v60 }
 0x8f0   : > { %3786 = vmatprep.subr.bf16.mxu1 %v4151_v19 }
 0x8f1   : > { %v1740_v17 = vpop.xlane.xlu1 %1739 }
 0x8f2   : > { %4040 = vrcp.f32 %v1740_v17 }
 0x8f5   : > { %v1920_v29 = vpop.permute.xlu1 %1919 }
 0x8f6   : > { %3777 = vmatmul.mubr.msk.bf16.vlgmr.msra.gmra.mrb[24].mxu1 %vm1088_vm1, %v1867_v20  ;;  %v1925_v31 = vsel %vm1088_vm1, %v1920_v29, 0 }
 0x8f7   : > { %3788 = vmatprep.mubr.msk.bf16.mxu1 %vm4152_vm0, %v4151_v19 }
 0x8f9   : > { %v1918_v32 = vpop.permute.xlu1 %1917 }
 0x8fc   : > { %v4041_v25 = vpop.eup %4040 }
 0x8fd   : > { %v1748_v28 = vmul.f32 %v4041_v25, %v4033_v6 }
 0x8ff   : > { %v1750_v30 = vpack.c.bf16 %v1748_v28, %v1747_v27 }
 0x901   : > { %3771 = vmatmul.mubr.msk.bf16.vlgmr.msra.gmra.mrb[32].mxu0 %vm1187_vm2, %v1750_v30 }
 0x902   : > { %3781 = vmatpush3.bf16.xpose.msra.mxu0 %v1925_v31  ;;  %3782 = vmatprep.mubr.msk.bf16.mxu0 %vm4152_vm0, %v4151_v19 }
 0x903   : > { %3792 = vmatprep.subr.bf16.mxu0 %v4151_v19 }
 0x909   : > { %3783 = vmatmul.mubr.msk.bf16.vlgmr.msra.gmra.mrb[36].mxu0 %vm1088_vm1, %v1918_v32 }
 0x90a   : > { %3794 = vmatprep.mubr.msk.bf16.mxu0 %vm4152_vm0, %v4151_v19 }
 0x9bc   : > { %v1791_v34 = vpop.f32.mrb[20].mxu1 }
 0x9bd   : > { %v3766_v36 = vpop.f32.mrb[21].mxu1 }
 0x9be   : > { %v1794_v37 = vpop.f32.mrb[22].mxu1 }
 0x9bf   : > { %v3767_v39 = vpop.f32.mrb[23].mxu1 }
 0x9c9   : > { %v1910_v41 = vpop.f32.mrb[24].mxu1 }
 0x9ca   : > { %v1968_v42 = vmul.f32 0.17677669, %v1910_v41  ;;  %v3778_v43 = vpop.f32.mrb[25].mxu1 }
 0x9cb   : > { %v1913_v44 = vpop.f32.mrb[26].mxu1 }
 0x9cc   : > { %v1969_v46 = vmul.f32 0.17677669, %v1913_v44  ;;  %v3779_v47 = vpop.f32.mrb[27].mxu1  ;;  %v1972_v48 = vsel %vm1187_vm2, %v1968_v42, -inf }
 0x9cd   : > { %1973 = vmax.xlane.f32.xlu0 %v1972_v48  ;;  %v3898_v47 = vld [vmem:[%s4299_s16] sm:$0xff]   ;;  %v3899_v48 = vld [vmem:[%s4299_s16 + $0x8] sm:$0xff]  }
 0x9ce   : > { %v1975_v49 = vsel %vm1187_vm2, %v1969_v46, -inf }
 0x9cf   : > { %1976 = vmax.xlane.f32.xlu1 %v1975_v49  ;;  %v3900_v49 = vld [vmem:[%s4299_s16 + $0x10] sm:$0xff]  }
 0x9d4   : > { %v1838_v51 = vpop.f32.mrb[32].mxu0 }
 0x9d5   : > { %v3772_v53 = vpop.f32.mrb[33].mxu0 }
 0x9d6   : > { %v1841_v54 = vpop.f32.mrb[34].mxu0  ;;  %v3902_v53 = vld [vmem:[%s4299_s16 + $0x20] sm:$0xff]  }
 0x9d7   : > { %v3773_v19 = vpop.f32.mrb[35].mxu0 }
 0x9dc   : > { %v1961_v55 = vpop.f32.mrb[36].mxu0 }
 0x9dd   : > { %v1970_v56 = vmul.f32 0.17677669, %v1961_v55  ;;  %v3784_v57 = vpop.f32.mrb[37].mxu0 }
 0x9de   : > { %v1964_v58 = vpop.f32.mrb[38].mxu0  ;;  %v3904_v57 = vld [vmem:[%s4299_s16 + $0x30] sm:$0xff]  }
 0x9df   : > { %v1971_v61 = vmul.f32 0.17677669, %v1964_v58  ;;  %v3785_v62 = vpop.f32.mrb[39].mxu0  ;;  %v1978_v63 = vsel %vm1187_vm2, %v1970_v56, -inf }
 0x9e0   : > { %1979 = vmax.xlane.f32.xlu0 %v1978_v63 }
 0x9e1   : > { %v1981_v0 = vsel %vm1187_vm2, %v1971_v61, -inf }
 0x9e4   : > { %1982 = vmax.xlane.f32.xlu0 %v1981_v0 }
 0xa5a   : > { %v1974_v1 = vpop.xlane.xlu0 %1973 }
 0xa5b   : > { %v1984_v2 = vsub.f32 %v1968_v42, %v1974_v1 }
 0xa5c   : > { %v1977_v3 = vpop.xlane.xlu1 %1976 }
 0xa5d   : > { %v1988_v4 = vmul.f32 1.442695, %v1984_v2  ;;  %v1985_v5 = vsub.f32 %v1969_v46, %v1977_v3 }
 0xa5f   : > { %4042 = vpow2.f32 %v1988_v4  ;;  %v1990_v6 = vmul.f32 1.442695, %v1985_v5 }
 0xa61   : > { %4044 = vpow2.f32 %v1990_v6 }
 0xa69   : > { %v4043_v7 = vpop.eup %4042 }
 0xa6a   : > { %v1996_v40 = vsel %vm1187_vm2, %v4043_v7, 0.0 }
 0xa6b   : > { %v4045_v8 = vpop.eup %4044  ;;  %1997 = vadd.xlane.f32.xlu0 %v1996_v40 }
 0xa6c   : > { %v1999_v9 = vsel %vm1187_vm2, %v4045_v8, 0.0 }
 0xa6d   : > { %2000 = vadd.xlane.f32.xlu1 %v1999_v9  ;;  %v1980_v10 = vpop.xlane.xlu0 %1979 }
 0xa6e   : > { %v1986_v11 = vsub.f32 %v1970_v56, %v1980_v10 }
 0xa70   : > { %v1992_v12 = vmul.f32 1.442695, %v1986_v11 }
 0xa71   : > { %v1983_v13 = vpop.xlane.xlu0 %1982 }
 0xa72   : > { %4046 = vpow2.f32 %v1992_v12  ;;  %v1987_v14 = vsub.f32 %v1971_v61, %v1983_v13  ;;  %v3905_v61 = vld [vmem:[%s4299_s16 + $0x38] sm:$0xff]   ;;  %v3468_v12 = vld [vmem:[%s4849_s2] ss:$0 sm:$0xff] }
 0xa74   : > { %v1994_v38 = vmul.f32 1.442695, %v1987_v14  ;;  %v4098_v14 = vld [vmem:[#allocation2] sm:$0xff] }
 0xa76   : > { %4048 = vpow2.f32 %v1994_v38 }
 0xa7c   : > { %v4047_v15 = vpop.eup %4046 }
 0xa7d   : > { %v2002_v59 = vsel %vm1187_vm2, %v4047_v15, 0.0 }
 0xa7e   : > { %2003 = vadd.xlane.f32.xlu0 %v2002_v59 }
 0xa80   : > { %v4049_v60 = vpop.eup %4048 }
 0xa81   : > { %v2005_v17 = vsel %vm1187_vm2, %v4049_v60, 0.0 }
 0xa82   : > { %2006 = vadd.xlane.f32.xlu1 %v2005_v17 }
 0xa93   : > { %2065 = vrot.lane.b32.xlu1 %v4420_v50, %s4155_s25 }
 0xa94   : > { %2018 = vrot.lane.b32.xlu0 %v4422_v52, %s4155_s25 }
 0xa97   : > { %1582 = vrot.lane.b32.xlu1 %v4518_v16, %s4155_s25 }
 0xa98   : > { %1586 = vrot.lane.b32.xlu0 %v4524_v33, %s4155_s25 }
 0xa9b   : > { %1584 = vrot.lane.b32.xlu1 %v4520_v18, %s4155_s25 }
 0xa9c   : > { %1849 = vrot.lane.b32.xlu0 %v1791_v34, %s4154_s30 }
 0xa9f   : > { %1588 = vrot.lane.b32.xlu1 %v4526_v35, %s4155_s25 }
 0xaa0   : > { %1853 = vrot.lane.b32.xlu0 %v1838_v51, %s4154_s30  ;;  %v3901_v51 = vld [vmem:[%s4299_s16 + $0x18] sm:$0xff]  }
 0xaa3   : > { %1851 = vrot.lane.b32.xlu1 %v1794_v37, %s4154_s30 }
 0xaa7   : > { %1855 = vrot.lane.b32.xlu1 %v1841_v54, %s4154_s30  ;;  %v3903_v54 = vld [vmem:[%s4299_s16 + $0x28] sm:$0xff]  }
 0xaf8   : > { %v1998_v52 = vpop.xlane.xlu0 %1997 }
 0xafa   : > { %v2001_v50 = vpop.xlane.xlu1 %2000 }
 0xafb   : > { %4050 = vrcp.f32 %v2001_v50 }
 0xafc   : > { %4052 = vrcp.f32 %v1998_v52  ;;  %v4100_v52 = vld [vmem:[#allocation2 + $0x8] sm:$0xff] }
 0xb05   : > { %v4051_v16 = vpop.eup %4050 }
 0xb06   : > { %v4053_v20 = vpop.eup %4052  ;;  %v2013_v23 = vmul.f32 %v4051_v16, %v4045_v8 }
 0xb07   : > { %v2012_v18 = vmul.f32 %v4053_v20, %v4043_v7 }
 0xb09   : > { %v2016_v35 = vpack.c.bf16 %v2013_v23, %v2012_v18  ;;  %v4101_v23 = vld [vmem:[#allocation2 + $0x18] sm:$0xff] }
 0xb0b   : > { %v2004_v33 = vpop.xlane.xlu0 %2003 }
 0xb0c   : > { %4054 = vrcp.f32 %v2004_v33 }
 0xb0f   : > { %v2007_v25 = vpop.xlane.xlu1 %2006  ;;  %v2019_v27 = vpop.permute.xlu0 %2018 }
 0xb10   : > { %4056 = vrcp.f32 %v2007_v25  ;;  %3787 = vmatpush3.bf16.msra.mxu1 %v2019_v27  ;;  %v3906_v27 = vld [vmem:[%s4317_s4] ss:$16 sps:$4 sm:$0xff]  }
 0xb11   : > { %3798 = vmatprep.subr.bf16.mxu1 %v3898_v47 }
 0xb13   : > { %v2066_v28 = vpop.permute.xlu1 %2065  ;;  %3789 = vmatmul.mubr.msk.bf16.vlgmr.msra.gmra.mrb[28].mxu1 %vm1187_vm2, %v2016_v35  ;;  %v1587_v29 = vpop.permute.xlu0 %1586  ;;  %v3908_v35 = vld [vmem:[%s4317_s4 + $0x4] ss:$16 sps:$4 sm:$0xff]  }
 0xb14   : > { %1597 = vst.msk [vmem:[#allocation3 + $0x10] sm:$0xff] %vm1594_vm3, %v1587_v29  ;;  %3793 = vmatpush3.bf16.msra.mxu0 %v2066_v28  ;;  %3799 = vmatpush3.bf16.msra.mxu1 %v3898_v47  ;;  %v3909_v28 = vld [vmem:[%s4317_s4 + $0x8] ss:$16 sps:$4 sm:$0xff]   ;;  %v3911_v29 = vld [vmem:[%s4317_s4 + $0xc] ss:$16 sps:$4 sm:$0xff]  }
 0xb15   : > { %3800 = vmatprep.subr.bf16.mxu1 %v3899_v48  ;;  %2549 = vmatprep.subr.bf16.mxu0 %v3908_v35 }
 0xb16   : > { %v4055_v32 = vpop.eup %4054 }
 0xb17   : > { %v1583_v30 = vpop.permute.xlu1 %1582  ;;  %v1850_v31 = vpop.permute.xlu0 %1849  ;;  %v2014_v36 = vmul.f32 %v4055_v32, %v4047_v15  ;;  %v3912_v32 = vld [vmem:[%s4317_s4 + $0x20] ss:$16 sps:$4 sm:$0xff]  }
 0xb18   : > { %1595 = vst.msk [vmem:[#allocation3] sm:$0xff] %vm1594_vm3, %v1583_v30  ;;  %3801 = vmatpush3.bf16.msra.mxu1 %v3899_v48  ;;  %v3914_v30 = vld [vmem:[%s4317_s4 + $0x24] ss:$16 sps:$4 sm:$0xff]  }
 0xb19   : > { %1862 = vst.msk [vmem:[#allocation3] sm:$0xff] %vm1861_vm4, %v1850_v31  ;;  %3802 = vmatprep.subr.bf16.mxu1 %v3900_v49  ;;  %v3917_v31 = vld [vmem:[%s4317_s4 + $0x2c] ss:$16 sps:$4 sm:$0xff]  }
 0xb1a   : > { %v4057_v34 = vpop.eup %4056 }
 0xb1b   : > { %v2015_v37 = vmul.f32 %v4057_v34, %v4049_v60  ;;  %v1585_v39 = vpop.permute.xlu1 %1584  ;;  %v1854_v41 = vpop.permute.xlu0 %1853  ;;  %v4099_v60 = vld [vmem:[#allocation2 + $0x10] sm:$0xff]  ;;  %v3915_v34 = vld [vmem:[%s4317_s4 + $0x28] ss:$16 sps:$4 sm:$0xff]  }
 0xb1c   : > { %1596 = vst.msk [vmem:[#allocation3 + $0x8] sm:$0xff] %vm1594_vm3, %v1585_v39  ;;  %3803 = vmatpush3.bf16.msra.mxu1 %v3900_v49 }
 0xb1d   : > { %1864 = vst.msk [vmem:[#allocation3 + $0x10] sm:$0xff] %vm1861_vm4, %v1854_v41  ;;  %v2017_v42 = vpack.c.bf16 %v2015_v37, %v2014_v36  ;;  %3804 = vmatprep.subr.bf16.mxu1 %v3901_v51 }
 0xb1f   : > { %v1589_v43 = vpop.permute.xlu1 %1588  ;;  %3795 = vmatmul.mubr.msk.bf16.vlgmr.msra.gmra.mrb[40].mxu0 %vm1187_vm2, %v2017_v42 }
 0xb20   : > { %1598 = vst.msk [vmem:[#allocation3 + $0x18] sm:$0xff] %vm1594_vm3, %v1589_v43  ;;  %2581 = vmatprep.mubr.bf16.mxu0 %v4150_v45  ;;  %3805 = vmatpush3.bf16.msra.mxu1 %v3901_v51 }
 0xb21   : > { %3806 = vmatprep.subr.bf16.mxu1 %v3902_v53  ;;  %2550 = vmatpush1.bf16.msra.mxu0 %v3906_v27 }
 0xb22   : > { %2551 = vmatprep.subr.bf16.mxu0 %v3914_v30 }
 0xb23   : > { %v1852_v44 = vpop.permute.xlu1 %1851 }
 0xb24   : > { %1863 = vst.msk [vmem:[#allocation3 + $0x8] sm:$0xff] %vm1861_vm4, %v1852_v44  ;;  %3807 = vmatpush3.bf16.msra.mxu1 %v3902_v53 }
 0xb25   : > { %3808 = vmatprep.subr.bf16.mxu1 %v3903_v54  ;;  %2552 = vmatpush1.bf16.msra.mxu0 %v3912_v32 }
 0xb27   : > { %v1856_v46 = vpop.permute.xlu1 %1855 }
 0xb28   : > { %1865 = vst.msk [vmem:[#allocation3 + $0x18] sm:$0xff] %vm1861_vm4, %v1856_v46  ;;  %3809 = vmatpush3.bf16.msra.mxu1 %v3903_v54 }
 0xb29   : > { %3810 = vmatprep.subr.bf16.mxu1 %v3904_v57 }
 0xb2c   : > { %3811 = vmatpush3.bf16.msra.mxu1 %v3904_v57  ;;  %v3923_v57 = vld [vmem:[%s4317_s4 + $0x4c] ss:$16 sps:$4 sm:$0xff]  }
 0xb2d   : > { %3812 = vmatprep.subr.bf16.mxu1 %v3905_v61 }
 0xb30   : > { %3813 = vmatpush3.bf16.msra.mxu1 %v3905_v61  ;;  %v3921_v61 = vld [vmem:[%s4317_s4 + $0x48] ss:$16 sps:$4 sm:$0xff]  }
 0xb31   : > { %2602 = vmatprep.subr.bf16.mxu1 %v3911_v29 }
 0xbe6   : > { %v2058_v19 = vpop.f32.mrb[28].mxu1 }
 0xbe7   : > { %2116 = vrot.lane.b32.xlu0 %v2058_v19, %s4153_s1  ;;  %v3790_v55 = vpop.f32.mrb[29].mxu1 }
 0xbe8   : > { %v2061_v56 = vpop.f32.mrb[30].mxu1 }
 0xbe9   : > { %2118 = vrot.lane.b32.xlu1 %v2061_v56, %s4153_s1  ;;  %v3791_v58 = vpop.f32.mrb[31].mxu1  ;;  %v3920_v56 = vld [vmem:[%s4317_s4 + $0x44] ss:$16 sps:$4 sm:$0xff]  }
 0xbea   : > { %v3918_v58 = vld [vmem:[%s4317_s4 + $0x40] ss:$16 sps:$4 sm:$0xff]   ;;  %2553 = vmatprep.subr.bf16.mxu0 %v3920_v56 }
 0xbeb   : > { %2554 = vmatpush1.bf16.msra.mxu0 %v3918_v58  ;;  %v3958_v58 = vld [vmem:[%s4328_s0 + $0x48] sm:$0xff]  }
 0xbf2   : > { %v2105_v62 = vpop.f32.mrb[40].mxu0 }
 0xbf3   : > { %2120 = vrot.lane.b32.xlu0 %v2105_v62, %s4153_s1  ;;  %v3796_v63 = vpop.f32.mrb[41].mxu0  ;;  %v3926_v62 = vld [vmem:[%s4317_s4 + $0x64] ss:$16 sps:$4 sm:$0xff]  }
 0xbf4   : > { %v2108_v0 = vpop.f32.mrb[42].mxu0  ;;  %v3929_v63 = vld [vmem:[%s4317_s4 + $0x6c] ss:$16 sps:$4 sm:$0xff]   ;;  %2555 = vmatprep.subr.bf16.mxu0 %v3926_v62 }
 0xbf5   : > { %2122 = vrot.lane.b32.xlu1 %v2108_v0, %s4153_s1  ;;  %v3797_v1 = vpop.f32.mrb[43].mxu0  ;;  %v3924_v0 = vld [vmem:[%s4317_s4 + $0x60] ss:$16 sps:$4 sm:$0xff]  }
 0xbf6   : > { %v3927_v1 = vld [vmem:[%s4317_s4 + $0x68] ss:$16 sps:$4 sm:$0xff]   ;;  %2556 = vmatpush1.bf16.msra.mxu0 %v3924_v0 }
 0xbf7   : > { %v3961_v0 = vld [vmem:[%s4328_s0 + $0x88] sm:$0xff]  }
 0xc59   : > { %v2117_v2 = vpop.permute.xlu0 %2116 }
 0xc5a   : > { %2129 = vst.msk [vmem:[#allocation3] sm:$0xff] %vm2128_vm5, %v2117_v2  ;;  %v3932_v2 = vld [vmem:[%s4317_s4 + $0x84] ss:$16 sps:$4 sm:$0xff]  }
 0xc5b   : > { %v2119_v3 = vpop.permute.xlu1 %2118  ;;  %2557 = vmatprep.subr.bf16.mxu0 %v3932_v2 }
 0xc5c   : > { %2130 = vst.msk [vmem:[#allocation3 + $0x8] sm:$0xff] %vm2128_vm5, %v2119_v3  ;;  %v3935_v3 = vld [vmem:[%s4317_s4 + $0x8c] ss:$16 sps:$4 sm:$0xff]  }
 0xc61   : > { %v2133_v4 = vld [vmem:[#allocation3] sm:$0xff] }
 0xc63   : > { %v2134_v5 = vld [vmem:[#allocation3 + $0x8] sm:$0xff] }
 0xc64   : > { %v2137_v6 = vpack.c.bf16 %v2134_v5, %v2133_v4  ;;  %v3930_v4 = vld [vmem:[%s4317_s4 + $0x80] ss:$16 sps:$4 sm:$0xff]   ;;  %v3933_v5 = vld [vmem:[%s4317_s4 + $0x88] ss:$16 sps:$4 sm:$0xff]  }
 0xc65   : > { %v2121_v7 = vpop.permute.xlu0 %2120  ;;  %2558 = vmatpush1.bf16.msra.mxu0 %v3930_v4  ;;  %v3964_v4 = vld [vmem:[%s4328_s0 + $0x10] sm:$0xff]  }
 0xc66   : > { %2131 = vst.msk [vmem:[#allocation3 + $0x10] sm:$0xff] %vm2128_vm5, %v2121_v7  ;;  %3814 = vmatprep.mubr.bf16.mxu1 %v2137_v6  ;;  %v3938_v6 = vld [vmem:[%s4317_s4 + $0xa4] ss:$16 sps:$4 sm:$0xff]   ;;  %v3941_v7 = vld [vmem:[%s4317_s4 + $0xac] ss:$16 sps:$4 sm:$0xff]  }
 0xc67   : > { %v2123_v40 = vpop.permute.xlu1 %2122  ;;  %2559 = vmatprep.subr.bf16.mxu0 %v3938_v6  ;;  %v3966_v6 = vld [vmem:[%s4328_s0 + $0x58] sm:$0xff]  }
 0xc68   : > { %2132 = vst.msk [vmem:[#allocation3 + $0x18] sm:$0xff] %vm2128_vm5, %v2123_v40  ;;  %v3936_v40 = vld [vmem:[%s4317_s4 + $0xa0] ss:$16 sps:$4 sm:$0xff]  }
 0xc69   : > { %2560 = vmatpush1.bf16.msra.mxu0 %v3936_v40  ;;  %v3968_v40 = vld [vmem:[%s4328_s0 + $0x18] sm:$0xff]  }
 0xc6d   : > { %v2135_v8 = vld [vmem:[#allocation3 + $0x10] sm:$0xff] }
 0xc6f   : > { %v2136_v9 = vld [vmem:[#allocation3 + $0x18] sm:$0xff] }
 0xc70   : > { %v2138_v10 = vpack.c.bf16 %v2136_v9, %v2135_v8  ;;  %v3939_v8 = vld [vmem:[%s4317_s4 + $0xa8] ss:$16 sps:$4 sm:$0xff]   ;;  %v3944_v9 = vld [vmem:[%s4317_s4 + $0xc4] ss:$16 sps:$4 sm:$0xff]  }
 0xc71   : > { %2561 = vmatprep.subr.bf16.mxu0 %v3944_v9  ;;  %v3970_v9 = vld [vmem:[%s4328_s0 + $0x60] sm:$0xff]  }
 0xc72   : > { %3815 = vmatmul.mubr.bf16.vlgmr.msra.gmra.mrb[32].mxu1 %v2138_v10  ;;  %v3947_v10 = vld [vmem:[%s4317_s4 + $0xcc] ss:$16 sps:$4 sm:$0xff]  }
 0xc73   : > { %2634 = vmatprep.mubr.bf16.mxu1 %v4150_v45  ;;  %2603 = vmatpush1.bf16.msra.mxu1 %v3909_v28 }
 0xc74   : > { %2604 = vmatprep.subr.bf16.mxu1 %v3917_v31 }
 0xc77   : > { %2605 = vmatpush1.bf16.msra.mxu1 %v3915_v34 }
 0xc78   : > { %2606 = vmatprep.subr.bf16.mxu1 %v3923_v57  ;;  %v3956_v57 = vld [vmem:[%s4328_s0] sm:$0xff]  }
 0xc7b   : > { %2607 = vmatpush1.bf16.msra.mxu1 %v3921_v61  ;;  %v3959_v61 = vld [vmem:[%s4328_s0 + $0xc8] sm:$0xff]  }
 0xc7c   : > { %2608 = vmatprep.subr.bf16.mxu1 %v3929_v63 }
 0xc7f   : > { %2609 = vmatpush1.bf16.msra.mxu1 %v3927_v1 }
 0xc80   : > { %2610 = vmatprep.subr.bf16.mxu1 %v3935_v3  ;;  %v3963_v3 = vld [vmem:[%s4328_s0 + $0xd0] sm:$0xff]  }
 0xc83   : > { %2611 = vmatpush1.bf16.msra.mxu1 %v3933_v5  ;;  %v3965_v5 = vld [vmem:[%s4328_s0 + $0x90] sm:$0xff]  }
 0xc84   : > { %2612 = vmatprep.subr.bf16.mxu1 %v3941_v7  ;;  %v3967_v7 = vld [vmem:[%s4328_s0 + $0xd8] sm:$0xff]  }
 0xc87   : > { %2613 = vmatpush1.bf16.msra.mxu1 %v3939_v8  ;;  %v3969_v8 = vld [vmem:[%s4328_s0 + $0x98] sm:$0xff]  }
 0xc88   : > { %2614 = vmatprep.subr.bf16.mxu1 %v3947_v10  ;;  %v3971_v10 = vld [vmem:[%s4328_s0 + $0xe0] sm:$0xff]  }
 0xd45   : > { %v3816_v11 = vpop.f32.mrb[32].mxu1 }
 0xd46   : > { %v2237_v13 = vpop.f32.mrb[33].mxu1  ;;  %v2254_v17 = vadd.f32 %v4099_v60, %v3816_v11  ;;  %v3942_v11 = vld [vmem:[%s4317_s4 + $0xc0] ss:$16 sps:$4 sm:$0xff]  }
 0xd47   : > { %v2252_v38 = vadd.f32 %v4098_v14, %v2237_v13  ;;  %v3817_v15 = vpop.f32.mrb[34].mxu1  ;;  %v3950_v13 = vld [vmem:[%s4317_s4 + $0xe4] ss:$16 sps:$4 sm:$0xff]   ;;  %v3953_v14 = vld [vmem:[%s4317_s4 + $0xec] ss:$16 sps:$4 sm:$0xff]   ;;  %2562 = vmatpush1.bf16.msra.mxu0 %v3942_v11 }
 0xd48   : > { %v2240_v59 = vpop.f32.mrb[35].mxu1  ;;  %v4622_v20 = vadd.f32 %v3468_v12, %v2254_v17  ;;  %v2255_v18 = vadd.f32 %v4101_v23, %v3817_v15  ;;  %v3951_v15 = vld [vmem:[%s4317_s4 + $0xe8] ss:$16 sps:$4 sm:$0xff]   ;;  %2563 = vmatprep.subr.bf16.mxu0 %v3950_v13  ;;  %v3955_v60 = vld [vmem:[%s4328_s0 + $0xc0] sm:$0xff]  }
 0xd49   : > { %v4617_v50 = vadd.f32 %v3468_v12, %v2252_v38  ;;  %v2253_v16 = vadd.f32 %v4100_v52, %v2240_v59  ;;  %v3948_v38 = vld [vmem:[%s4317_s4 + $0xe0] ss:$16 sps:$4 sm:$0xff]   ;;  %v3974_v13 = vld [vmem:[%s4328_s0 + $0x68] sm:$0xff]  }
 0xd4a   : > { %v4626_v25 = vadd.f32 %v3468_v12, %v2255_v18  ;;  %v3954_v59 = vld [vmem:[%s4328_s0 + $0x40] sm:$0xff]  }
 0xd4b   : > { %v4619_v33 = vadd.f32 %v3468_v12, %v2253_v16  ;;  %2269 = vadd.xlane.f32.xlu0 %v4617_v50  ;;  %v3945_v12 = vld [vmem:[%s4317_s4 + $0xc8] ss:$16 sps:$4 sm:$0xff]   ;;  %2564 = vmatpush1.bf16.msra.mxu0 %v3948_v38  ;;  %v3972_v11 = vld [vmem:[%s4328_s0 + $0x20] sm:$0xff]  }
 0xd4c   : > { %2615 = vmatpush1.bf16.msra.mxu1 %v3945_v12  ;;  %3626 = vmatprep.subr.bf16.mxu0 %v3954_v59  ;;  %v3973_v12 = vld [vmem:[%s4328_s0 + $0xa0] sm:$0xff]   ;;  %v3976_v38 = vld [vmem:[%s4328_s0 + $0x28] sm:$0xff]   ;;  %v3978_v59 = vld [vmem:[%s4328_s0 + $0x70] sm:$0xff]  }
 0xd4d   : > { %2271 = vadd.xlane.f32.xlu1 %v4619_v33  ;;  %2616 = vmatprep.subr.bf16.mxu1 %v3953_v14  ;;  %v3975_v14 = vld [vmem:[%s4328_s0 + $0xe8] sm:$0xff]  }
 0xd4f   : > { %2273 = vadd.xlane.f32.xlu0 %v4622_v20 }
 0xd50   : > { %2617 = vmatpush1.bf16.msra.mxu1 %v3951_v15  ;;  %v3977_v15 = vld [vmem:[%s4328_s0 + $0xa8] sm:$0xff]  }
 0xd51   : > { %3654 = vmatprep.subr.bf16.mxu1 %v3955_v60  ;;  %v3979_v60 = vld [vmem:[%s4328_s0 + $0xf0] sm:$0xff]  }
 0xd53   : > { %2275 = vadd.xlane.f32.xlu0 %v4626_v25 }
 0xdd8   : > { %v2270_v36 = vpop.xlane.xlu0 %2269 }
 0xdd9   : > { %v2277_v37 = vmul.f32 0.0078125, %v2270_v36  ;;  %v3469_v36 = vld [vmem:[%s4850_s28] ss:$0 sm:$0xff] }
 0xdda   : > { %v2272_v39 = vpop.xlane.xlu1 %2271 }
 0xddb   : > { %v4638_v41 = vsub.f32 %v4617_v50, %v2277_v37  ;;  %v2278_v42 = vmul.f32 0.0078125, %v2272_v39 }
 0xddc   : > { %v2274_v43 = vpop.xlane.xlu0 %2273 }
 0xddd   : > { %v4641_v44 = vsub.f32 %v4619_v33, %v2278_v42  ;;  %v2279_v46 = vmul.f32 0.0078125, %v2274_v43  ;;  %v2285_v47 = vmul.f32 %v4638_v41, %v4638_v41 }
 0xddf   : > { %v4646_v48 = vsub.f32 %v4622_v20, %v2279_v46  ;;  %2289 = vadd.xlane.f32.xlu0 %v2285_v47  ;;  %v2286_v49 = vmul.f32 %v4641_v44, %v4641_v44  ;;  %v3470_v47 = vld [vmem:[%s4851_s20] ss:$0 sm:$0xff] }
 0xde0   : > { %v2276_v51 = vpop.xlane.xlu0 %2275 }
 0xde1   : > { %v2280_v53 = vmul.f32 0.0078125, %v2276_v51  ;;  %2291 = vadd.xlane.f32.xlu1 %v2286_v49  ;;  %v2287_v54 = vmul.f32 %v4646_v48, %v4646_v48 }
 0xde3   : > { %v4653_v19 = vsub.f32 %v4626_v25, %v2280_v53  ;;  %2293 = vadd.xlane.f32.xlu0 %v2287_v54 }
 0xde5   : > { %v2288_v55 = vmul.f32 %v4653_v19, %v4653_v19 }
 0xde7   : > { %2295 = vadd.xlane.f32.xlu1 %v2288_v55 }
 0xe6c   : > { %v2290_v17 = vpop.xlane.xlu0 %2289 }
 0xe6d   : > { %v2297_v52 = vmul.f32 0.0078125, %v2290_v17  ;;  %v3980_v17 = vld [vmem:[%s4328_s0 + $0x30] sm:$0xff]  }
 0xe6e   : > { %v2292_v16 = vpop.xlane.xlu1 %2291 }
 0xe6f   : > { %v2301_v23 = vadd.f32 1e-05, %v2297_v52  ;;  %v2298_v18 = vmul.f32 0.0078125, %v2292_v16  ;;  %v3981_v52 = vld [vmem:[%s4328_s0 + $0xb0] sm:$0xff]   ;;  %v3982_v16 = vld [vmem:[%s4328_s0 + $0x78] sm:$0xff]  }
 0xe70   : > { %v2294_v27 = vpop.xlane.xlu0 %2293 }
 0xe71   : > { %4058 = vrsqrt.f32 %v2301_v23  ;;  %v2302_v35 = vadd.f32 1e-05, %v2298_v18  ;;  %v2299_v28 = vmul.f32 0.0078125, %v2294_v27  ;;  %v3983_v23 = vld [vmem:[%s4328_s0 + $0xf8] sm:$0xff]  }
 0xe72   : > { %v3984_v18 = vld [vmem:[%s4328_s0 + $0x38] sm:$0xff]  }
 0xe73   : > { %4060 = vrsqrt.f32 %v2302_v35  ;;  %v2303_v29 = vadd.f32 1e-05, %v2299_v28  ;;  %v3985_v27 = vld [vmem:[%s4328_s0 + $0xb8] sm:$0xff]   ;;  %v2367_v35 = vld [vmem:[%s4323_s17] sm:$0xf]  ;;  %v2383_v28 = vsub.s32 3, %v4402_v21 }
 0xe74   : > { %v2296_v30 = vpop.xlane.xlu1 %2295 }
 0xe75   : > { %4062 = vrsqrt.f32 %v2303_v29  ;;  %v2300_v31 = vmul.f32 0.0078125, %v2296_v30  ;;  %v2372_v29 = vrot.slane %v2367_v35, %v839_v22  ;;  %v2380_v30 = vrot.slane %v2367_v35, %v847_v26 }
 0xe77   : > { %v2304_v32 = vadd.f32 1e-05, %v2300_v31  ;;  %v2376_v31 = vrot.slane %v2367_v35, %v843_v24 }
 0xe79   : > { %4064 = vrsqrt.f32 %v2304_v32  ;;  %v2384_v32 = vrot.slane %v2367_v35, %v2383_v28 }
 0xe7b   : > { %v4059_v34 = vpop.eup %4058 }
 0xe7c   : > { %v2309_v37 = vmul.f32 %v4059_v34, %v4638_v41 }
 0xe7d   : > { %v4061_v39 = vpop.eup %4060 }
 0xe7e   : > { %v2310_v42 = vmul.f32 %v4061_v39, %v4641_v44  ;;  %v2319_v43 = vmul.f32 %v3469_v36, %v2309_v37  ;;  %v3957_v44 = vld [vmem:[%s4328_s0 + $0x80] sm:$0xff]  }
 0xe7f   : > { %v4063_v46 = vpop.eup %4062 }
 0xe80   : > { %v2320_v49 = vmul.f32 %v3469_v36, %v2310_v42  ;;  %v2329_v51 = vadd.f32 %v3470_v47, %v2319_v43  ;;  %v2311_v54 = vmul.f32 %v4063_v46, %v4646_v48 }
 0xe82   : > { %v2330_v53 = vadd.f32 %v3470_v47, %v2320_v49  ;;  %v2321_v62 = vmul.f32 %v3469_v36, %v2311_v54 }
 0xe83   : > { %v4065_v55 = vpop.eup %4064 }
 0xe84   : > { %v2333_v56 = vpack.c.bf16 %v2330_v53, %v2329_v51  ;;  %v2312_v41 = vmul.f32 %v4065_v55, %v4653_v19  ;;  %v3960_v19 = vld [vmem:[%s4328_s0 + $0x8] sm:$0xff]   ;;  %v2331_v1 = vadd.f32 %v3470_v47, %v2321_v62 }
 0xe86   : > { %2582 = vmatmul.mubr.bf16.vlgmr.msra.gmra.mrb[44].mxu0 %v2333_v56  ;;  %2635 = vmatmul.mubr.bf16.vlgmr.msra.gmra.mrb[36].mxu1 %v2333_v56  ;;  %v2322_v63 = vmul.f32 %v3469_v36, %v2312_v41 }
 0xe87   : > { %2591 = vmatprep.mubr.bf16.mxu0 %v4150_v45  ;;  %2644 = vmatprep.mubr.bf16.mxu1 %v4150_v45  ;;  %v3962_v45 = vld [vmem:[%s4328_s0 + $0x50] sm:$0xff]  }
 0xe88   : > { %v2332_v48 = vadd.f32 %v3470_v47, %v2322_v63  ;;  %3627 = vmatpush3.bf16.msra.mxu0 %v3956_v57  ;;  %3655 = vmatpush3.bf16.msra.mxu1 %v3957_v44 }
 0xe89   : > { %3628 = vmatprep.subr.bf16.mxu0 %v3958_v58  ;;  %3656 = vmatprep.subr.bf16.mxu1 %v3959_v61 }
 0xe8a   : > { %v2334_v2 = vpack.c.bf16 %v2332_v48, %v2331_v1 }
 0xe8c   : > { %3629 = vmatpush3.bf16.msra.mxu0 %v3960_v19  ;;  %3657 = vmatpush3.bf16.msra.mxu1 %v3961_v0 }
 0xe8d   : > { %3630 = vmatprep.subr.bf16.mxu0 %v3962_v45  ;;  %3658 = vmatprep.subr.bf16.mxu1 %v3963_v3 }
 0xe8e   : > { %2592 = vmatmul.mubr.bf16.gmra.mrb[48].mxu0 %v2334_v2  ;;  %2645 = vmatmul.mubr.bf16.gmra.mrb[40].mxu1 %v2334_v2 }
 0xe90   : > { %3631 = vmatpush3.bf16.msra.mxu0 %v3964_v4  ;;  %3659 = vmatpush3.bf16.msra.mxu1 %v3965_v5 }
 0xe91   : > { %3632 = vmatprep.subr.bf16.mxu0 %v3966_v6  ;;  %3660 = vmatprep.subr.bf16.mxu1 %v3967_v7 }
 0xe94   : > { %3633 = vmatpush3.bf16.msra.mxu0 %v3968_v40  ;;  %3661 = vmatpush3.bf16.msra.mxu1 %v3969_v8 }
 0xe95   : > { %3634 = vmatprep.subr.bf16.mxu0 %v3970_v9  ;;  %3662 = vmatprep.subr.bf16.mxu1 %v3971_v10 }
 0xe98   : > { %3635 = vmatpush3.bf16.msra.mxu0 %v3972_v11  ;;  %3663 = vmatpush3.bf16.msra.mxu1 %v3973_v12 }
 0xe99   : > { %3636 = vmatprep.subr.bf16.mxu0 %v3974_v13  ;;  %3664 = vmatprep.subr.bf16.mxu1 %v3975_v14 }
 0xe9c   : > { %3637 = vmatpush3.bf16.msra.mxu0 %v3976_v38  ;;  %3665 = vmatpush3.bf16.msra.mxu1 %v3977_v15 }
 0xe9d   : > { %3638 = vmatprep.subr.bf16.mxu0 %v3978_v59  ;;  %3666 = vmatprep.subr.bf16.mxu1 %v3979_v60 }
 0xea0   : > { %3639 = vmatpush3.bf16.msra.mxu0 %v3980_v17  ;;  %3667 = vmatpush3.bf16.msra.mxu1 %v3981_v52 }
 0xea1   : > { %3640 = vmatprep.subr.bf16.mxu0 %v3982_v16  ;;  %3668 = vmatprep.subr.bf16.mxu1 %v3983_v23 }
 0xea4   : > { %3641 = vmatpush3.bf16.msra.mxu0 %v3984_v18  ;;  %3669 = vmatpush3.bf16.msra.mxu1 %v3985_v27 }
 0xf59   : > { %v2583_v34 = vpop.f32.mrb[44].mxu0  ;;  %v2636_v36 = vpop.f32.mrb[36].mxu1 }
 0xf5a   : > { %v2584_v37 = vadd.f32 %v2583_v34, %v2372_v29  ;;  %v2637_v39 = vadd.f32 %v2636_v36, %v2380_v30  ;;  %v2585_v42 = vpop.f32.mrb[45].mxu0  ;;  %v2638_v43 = vpop.f32.mrb[37].mxu1 }
 0xf5b   : > { %v2586_v46 = vadd.f32 %v2585_v42, %v2376_v31  ;;  %v2639_v47 = vadd.f32 %v2638_v43, %v2384_v32  ;;  %v2587_v49 = vpop.f32.mrb[46].mxu0  ;;  %v2640_v51 = vpop.f32.mrb[38].mxu1 }
 0xf5c   : > { %v2671_v53 = vmul.f32 0.70710677, %v2584_v37  ;;  %v2673_v54 = vmul.f32 0.70710677, %v2637_v39  ;;  %v2588_v26 = vadd.f32 %v2587_v49, %v2372_v29  ;;  %v4737_v56 = vadd.f32 %v2640_v51, %v2380_v30  ;;  %v2589_v21 = vpop.f32.mrb[47].mxu0  ;;  %v2642_v24 = vpop.f32.mrb[39].mxu1 }
 0xf5d   : > { %v2672_v22 = vmul.f32 0.70710677, %v2586_v46  ;;  %v2674_v55 = vmul.f32 0.70710677, %v2639_v47  ;;  %v2590_v41 = vadd.f32 %v2589_v21, %v2376_v31  ;;  %v4739_v57 = vadd.f32 %v2642_v24, %v2384_v32 }
 0xf5e   : > { %4066 = verf.f32 %v2671_v53  ;;  %v2675_v44 = vmul.f32 0.70710677, %v2588_v26  ;;  %v2677_v58 = vmul.f32 0.70710677, %v4737_v56  ;;  %v2655_v17 = vmul.f32 0.5, %v2584_v37 }
 0xf5f   : > { %4068 = verf.f32 %v2673_v54  ;;  %v2676_v61 = vmul.f32 0.70710677, %v2590_v41  ;;  %v2678_v63 = vmul.f32 0.70710677, %v4739_v57  ;;  %v2657_v52 = vmul.f32 0.5, %v2637_v39 }
 0xf60   : > { %4070 = verf.f32 %v2672_v22  ;;  %v2656_v27 = vmul.f32 0.5, %v2586_v46  ;;  %v2661_v43 = vmul.f32 0.5, %v4737_v56  ;;  %v2660_v46 = vmul.f32 0.5, %v2590_v41 }
 0xf61   : > { %4072 = verf.f32 %v2674_v55  ;;  %v2593_v62 = vpop.f32.mrb[48].mxu0  ;;  %v2646_v19 = vpop.f32.mrb[40].mxu1 }
 0xf62   : > { %4074 = verf.f32 %v2675_v44  ;;  %v4743_v48 = vadd.f32 %v2593_v62, %v2372_v29  ;;  %v2595_v0 = vpop.f32.mrb[49].mxu0  ;;  %v4745_v1 = vadd.f32 %v2646_v19, %v2380_v30  ;;  %v2648_v45 = vpop.f32.mrb[41].mxu1 }
 0xf63   : > { %4076 = verf.f32 %v2677_v58  ;;  %v4747_v2 = vadd.f32 %v2595_v0, %v2376_v31  ;;  %v2597_v3 = vpop.f32.mrb[50].mxu0  ;;  %v4750_v5 = vadd.f32 %v2648_v45, %v2384_v32  ;;  %v2650_v6 = vpop.f32.mrb[42].mxu1 }
 0xf64   : > { %4078 = verf.f32 %v2676_v61  ;;  %v2679_v4 = vmul.f32 0.70710677, %v4743_v48  ;;  %v2599_v7 = vpop.f32.mrb[51].mxu0  ;;  %v2681_v40 = vmul.f32 0.70710677, %v4745_v1  ;;  %v2652_v8 = vpop.f32.mrb[43].mxu1  ;;  %v2598_v11 = vadd.f32 %v2597_v3, %v2372_v29 }
 0xf65   : > { %4080 = verf.f32 %v2678_v63  ;;  %v2680_v9 = vmul.f32 0.70710677, %v4747_v2  ;;  %v2682_v10 = vmul.f32 0.70710677, %v4750_v5  ;;  %v4755_v12 = vadd.f32 %v2650_v6, %v2380_v30 }
 0xf66   : > { %4082 = verf.f32 %v2679_v4  ;;  %v4757_v13 = vadd.f32 %v2599_v7, %v2376_v31  ;;  %v2683_v15 = vmul.f32 0.70710677, %v2598_v11  ;;  %v4759_v59 = vadd.f32 %v2652_v8, %v2384_v32 }
 0xf67   : > { %4084 = verf.f32 %v2681_v40  ;;  %v2685_v16 = vmul.f32 0.70710677, %v4755_v12  ;;  %v2658_v30 = vmul.f32 0.5, %v2639_v47  ;;  %v2659_v31 = vmul.f32 0.5, %v2588_v26 }
 0xf68   : > { %v4067_v14 = vpop.eup %4066  ;;  %4086 = verf.f32 %v2680_v9  ;;  %v2684_v35 = vmul.f32 0.70710677, %v4757_v13  ;;  %v2686_v37 = vmul.f32 0.70710677, %v4759_v59  ;;  %v2662_v26 = vmul.f32 0.5, %v4739_v57 }
 0xf69   : > { %v4069_v38 = vpop.eup %4068  ;;  %4088 = verf.f32 %v2682_v10  ;;  %v2703_v18 = vadd.f32 1.0, %v4067_v14  ;;  %v2663_v7 = vmul.f32 0.5, %v4743_v48  ;;  %v2665_v8 = vmul.f32 0.5, %v4745_v1 }
 0xf6a   : > { %v4071_v60 = vpop.eup %4070  ;;  %4090 = verf.f32 %v2683_v15  ;;  %v2705_v29 = vadd.f32 1.0, %v4069_v38  ;;  %v2667_v10 = vmul.f32 0.5, %v2598_v11  ;;  %v2664_v15 = vmul.f32 0.5, %v4747_v2 }
 0xf6b   : > { %v4073_v23 = vpop.eup %4072  ;;  %4092 = verf.f32 %v2685_v16  ;;  %v2704_v32 = vadd.f32 1.0, %v4071_v60  ;;  %v2719_v53 = vmul.f32 %v2703_v18, %v2655_v17  ;;  %v2669_v60 = vmul.f32 0.5, %v4755_v12 }
 0xf6c   : > { %v4075_v28 = vpop.eup %4074  ;;  %4094 = verf.f32 %v2684_v35  ;;  %v2706_v42 = vadd.f32 1.0, %v4073_v23  ;;  %v2721_v47 = vmul.f32 %v2705_v29, %v2657_v52  ;;  %v2668_v52 = vmul.f32 0.5, %v4757_v13 }
 0xf6d   : > { %v4077_v34 = vpop.eup %4076  ;;  %v2707_v36 = vadd.f32 1.0, %v4075_v28  ;;  %4096 = verf.f32 %v2686_v37  ;;  %v2720_v44 = vmul.f32 %v2704_v32, %v2656_v27  ;;  %v2666_v11 = vmul.f32 0.5, %v4750_v5  ;;  %v3503_v5 = vld [vmem:[%s705_s24] ss:$0 sm:$0xff] }
 0xf6e   : > { %v4079_v39 = vpop.eup %4078  ;;  %v2709_v49 = vadd.f32 1.0, %v4077_v34  ;;  %v2722_v63 = vmul.f32 %v2706_v42, %v2658_v30  ;;  %v2670_v28 = vmul.f32 0.5, %v4759_v59 }
 0xf6f   : > { %v4081_v51 = vpop.eup %4080  ;;  %v2723_v54 = vmul.f32 %v2707_v36, %v2659_v31  ;;  %v2708_v22 = vadd.f32 1.0, %v4079_v39 }
 0xf70   : > { %v2725_v55 = vmul.f32 %v2709_v49, %v2661_v43  ;;  %v2710_v21 = vadd.f32 1.0, %v4081_v51  ;;  %v4083_v24 = vpop.eup %4082 }
 0xf71   : > { %v2735_v58 = vpack.c.bf16 %v2723_v54, %v2719_v53  ;;  %v2724_v61 = vmul.f32 %v2708_v22, %v2660_v46  ;;  %v4085_v62 = vpop.eup %4084  ;;  %v2711_v3 = vadd.f32 1.0, %v4083_v24 }
 0xf72   : > { %v2737_v19 = vpack.c.bf16 %v2725_v55, %v2721_v47  ;;  %v2726_v56 = vmul.f32 %v2710_v21, %v2662_v26  ;;  %v4087_v0 = vpop.eup %4086  ;;  %v2713_v40 = vadd.f32 1.0, %v4085_v62 }
 0xf73   : > { %v2736_v41 = vpack.c.bf16 %v2724_v61, %v2720_v44  ;;  %v4089_v45 = vpop.eup %4088  ;;  %v2712_v9 = vadd.f32 1.0, %v4087_v0  ;;  %v2727_v48 = vmul.f32 %v2711_v3, %v2663_v7 }
 0xf74   : > { %v2738_v4 = vpack.c.bf16 %v2726_v56, %v2722_v63  ;;  %v4091_v6 = vpop.eup %4090  ;;  %v2714_v16 = vadd.f32 1.0, %v4089_v45  ;;  %v2729_v1 = vmul.f32 %v2713_v40, %v2665_v8 }
 0xf75   : > { %3038 = vmatprep.mubr.bf16.mxu0 %v2736_v41  ;;  %v4093_v57 = vpop.eup %4092  ;;  %v2715_v14 = vadd.f32 1.0, %v4091_v6  ;;  %v2728_v29 = vmul.f32 %v2712_v9, %v2664_v15 }
 0xf76   : > { %3087 = vmatprep.mubr.bf16.mxu1 %v2738_v4  ;;  %3039 = vmatmul.mubr.bf16.vlgmr.msra.gmra.mrb[52].mxu0 %v2735_v58  ;;  %v4095_v38 = vpop.eup %4094  ;;  %v2717_v17 = vadd.f32 1.0, %v4093_v57  ;;  %v2730_v34 = vmul.f32 %v2714_v16, %v2666_v11 }
 0xf77   : > { %3088 = vmatmul.mubr.bf16.vlgmr.msra.gmra.mrb[44].mxu1 %v2737_v19  ;;  %v2731_v23 = vmul.f32 %v2715_v14, %v2667_v10  ;;  %v2716_v18 = vadd.f32 1.0, %v4095_v38  ;;  %v4097_v27 = vpop.eup %4096 }
 0xf78   : > { %v2733_v35 = vmul.f32 %v2717_v17, %v2669_v60  ;;  %v2718_v30 = vadd.f32 1.0, %v4097_v27 }
 0xf79   : > { %v2732_v2 = vmul.f32 %v2716_v18, %v2668_v52  ;;  %v2739_v12 = vpack.c.bf16 %v2731_v23, %v2727_v48 }
 0xf7a   : > { %v2741_v31 = vpack.c.bf16 %v2733_v35, %v2729_v1  ;;  %v2734_v13 = vmul.f32 %v2718_v30, %v2670_v28 }
 0xf7b   : > { %v2740_v32 = vpack.c.bf16 %v2732_v2, %v2728_v29 }
 0xf7c   : > { %v2742_v36 = vpack.c.bf16 %v2734_v13, %v2730_v34 }
 0xf7d   : > { %3046 = vmatprep.mubr.bf16.mxu0 %v2740_v32 }
 0xf7e   : > { %3047 = vmatmul.mubr.bf16.gmra.mrb[56].mxu0 %v2739_v12  ;;  %3095 = vmatprep.mubr.bf16.mxu1 %v2742_v36 }
 0xf7f   : > { %3096 = vmatmul.mubr.bf16.gmra.mrb[48].mxu1 %v2741_v31 }
0x1049   : > { %v3642_v37 = vpop.f32.mrb[52].mxu0 }
0x104a   : > { %v3670_v39 = vpop.f32.mrb[44].mxu1  ;;  %v3643_v59 = vpop.f32.mrb[53].mxu0 }
0x104b   : > { %v3644_v42 = vadd.f32 %v3643_v59, %v3642_v37  ;;  %v3671_v43 = vpop.f32.mrb[45].mxu1  ;;  %v3645_v49 = vpop.f32.mrb[54].mxu0  ;;  %v3537_v59 = vld [vmem:[%s4853_s23] ss:$0 sm:$0xff] (!%p3536_p8) }
0x104c   : > { %v3672_v46 = vadd.f32 %v3671_v43, %v3670_v39  ;;  %v3673_v51 = vpop.f32.mrb[46].mxu1  ;;  %v3646_v53 = vpop.f32.mrb[55].mxu0 }
0x104d   : > { %v3041_v54 = vadd.f32 %v3644_v42, %v3503_v5  ;;  %v3647_v22 = vadd.f32 %v3646_v53, %v3645_v49  ;;  %v3674_v47 = vpop.f32.mrb[47].mxu1 }
0x104e   : > { %v3675_v55 = vadd.f32 %v3674_v47, %v3673_v51  ;;  %v3538_v51 = vld [vmem:[%s4854_s27] ss:$0 sm:$0xff] (!%p3536_p8) }
0x104f   : > { %v3090_v26 = vadd.f32 %v3672_v46, %v3041_v54  ;;  %v3044_v21 = vadd.f32 %v3647_v22, %v3503_v5 }
0x1051   : > { %v3104_v24 = vadd.f32 %v3090_v26, %v4617_v50  ;;  %v3093_v44 = vadd.f32 %v3675_v55, %v3044_v21  ;;  %v3648_v58 = vpop.f32.mrb[56].mxu0 }
0x1052   : > { %v3649_v62 = vpop.f32.mrb[57].mxu0  ;;  %v3676_v63 = vpop.f32.mrb[48].mxu1 }
0x1053   : > { %3108 = vst [vmem:[#allocation2] sm:$0xff] %v3104_v24  ;;  %v3105_v61 = vadd.f32 %v3093_v44, %v4619_v33  ;;  %v3650_v19 = vadd.f32 %v3649_v62, %v3648_v58  ;;  %v3651_v56 = vpop.f32.mrb[58].mxu0  ;;  %v3677_v0 = vpop.f32.mrb[49].mxu1  ;;  %3118 = vadd.xlane.f32.xlu0 (!%p3536_p8), %v3104_v24 }
0x1054   : > { %v3652_v41 = vpop.f32.mrb[59].mxu0  ;;  %v3678_v3 = vadd.f32 %v3677_v0, %v3676_v63  ;;  %v3679_v4 = vpop.f32.mrb[50].mxu1 }
0x1055   : > { %3109 = vst [vmem:[#allocation2 + $0x8] sm:$0xff] %v3105_v61  ;;  %v3049_v45 = vadd.f32 %v3650_v19, %v3503_v5  ;;  %v3653_v6 = vadd.f32 %v3652_v41, %v3651_v56  ;;  %v3680_v7 = vpop.f32.mrb[51].mxu1 }
0x1056   : > { %v3681_v50 = vadd.f32 %v3680_v7, %v3679_v4 }
0x1057   : > { %v3098_v40 = vadd.f32 %v3678_v3, %v3049_v45  ;;  %v3052_v57 = vadd.f32 %v3653_v6, %v3503_v5  ;;  %3115 = sbr.rel (%p3536_p8) target bundleno = 4505 (0x1199), region = 88  ;;  %3120 = vadd.xlane.f32.xlu0 (!%p3536_p8), %v3105_v61 }
0x1059   : > { %v3106_v8 = vadd.f32 %v3098_v40, %v4622_v20  ;;  %v3101_v9 = vadd.f32 %v3681_v50, %v3052_v57 }
0x105b   : > { %3110 = vst [vmem:[#allocation2 + $0x10] sm:$0xff] %v3106_v8  ;;  %v3107_v33 = vadd.f32 %v3101_v9, %v4626_v25  ;;  %3122 = vadd.xlane.f32.xlu1 (!%p3536_p8), %v3106_v8 }
0x105d   : > { %3111 = vst [vmem:[#allocation2 + $0x18] sm:$0xff] %v3107_v33 }
0x105f   : > { %3124 = vadd.xlane.f32.xlu1 %v3107_v33 }
0x10e0   : > { %v3119_v10 = vpop.xlane.xlu0 %3118 }
0x10e1   : > { %v3126_v38 = vmul.f32 0.0078125, %v3119_v10 }
0x10e3   : > { %v3130_v60 = vsub.f32 %v3104_v24, %v3126_v38 }
0x10e4   : > { %v3121_v52 = vpop.xlane.xlu0 %3120 }
0x10e5   : > { %v3127_v48 = vmul.f32 0.0078125, %v3121_v52  ;;  %v3134_v16 = vmul.f32 %v3130_v60, %v3130_v60 }
0x10e7   : > { %v3131_v25 = vsub.f32 %v3105_v61, %v3127_v48  ;;  %3138 = vadd.xlane.f32.xlu0 %v3134_v16 }
0x10e8   : > { %v3123_v14 = vpop.xlane.xlu1 %3122 }
0x10e9   : > { %v3128_v15 = vmul.f32 0.0078125, %v3123_v14  ;;  %v3135_v1 = vmul.f32 %v3131_v25, %v3131_v25 }
0x10eb   : > { %v3132_v17 = vsub.f32 %v3106_v8, %v3128_v15  ;;  %3140 = vadd.xlane.f32.xlu1 %v3135_v1 }
0x10ec   : > { %v3125_v20 = vpop.xlane.xlu1 %3124 }
0x10ed   : > { %v3129_v23 = vmul.f32 0.0078125, %v3125_v20  ;;  %v3136_v27 = vmul.f32 %v3132_v17, %v3132_v17 }
0x10ef   : > { %v3133_v18 = vsub.f32 %v3107_v33, %v3129_v23  ;;  %3142 = vadd.xlane.f32.xlu0 %v3136_v27 }
0x10f1   : > { %v3137_v11 = vmul.f32 %v3133_v18, %v3133_v18 }
0x10f3   : > { %3144 = vadd.xlane.f32.xlu1 %v3137_v11 }
0x1174   : > { %v3139_v35 = vpop.xlane.xlu0 %3138 }
0x1175   : > { %v3146_v28 = vmul.f32 0.0078125, %v3139_v35 }
0x1177   : > { %v3150_v29 = vadd.f32 1e-05, %v3146_v28 }
0x1178   : > { %v3141_v2 = vpop.xlane.xlu1 %3140 }
0x1179   : > { %4102 = vrsqrt.f32 %v3150_v29  ;;  %v3147_v12 = vmul.f32 0.0078125, %v3141_v2 }
0x117b   : > { %v3151_v34 = vadd.f32 1e-05, %v3147_v12 }
0x117c   : > { %v3143_v30 = vpop.xlane.xlu0 %3142 }
0x117d   : > { %v3148_v31 = vmul.f32 0.0078125, %v3143_v30  ;;  %4104 = vrsqrt.f32 %v3151_v34 }
0x117f   : > { %v3152_v13 = vadd.f32 1e-05, %v3148_v31 }
0x1180   : > { %v3145_v32 = vpop.xlane.xlu1 %3144 }
0x1181   : > { %v3149_v36 = vmul.f32 0.0078125, %v3145_v32  ;;  %4106 = vrsqrt.f32 %v3152_v13 }
0x1183   : > { %v3153_v37 = vadd.f32 1e-05, %v3149_v36  ;;  %v4103_v39 = vpop.eup %4102 }
0x1184   : > { %v3158_v5 = vmul.f32 %v4103_v39, %v3130_v60 }
0x1185   : > { %4108 = vrsqrt.f32 %v3153_v37 }
0x1186   : > { %v3168_v49 = vmul.f32 %v3537_v59, %v3158_v5 }
0x1187   : > { %v4105_v42 = vpop.eup %4104 }
0x1188   : > { %v3159_v46 = vmul.f32 %v4105_v42, %v3131_v25  ;;  %v3178_v47 = vadd.f32 %v3538_v51, %v3168_v49 }
0x118a   : > { %v3169_v54 = vmul.f32 %v3537_v59, %v3159_v46 }
0x118b   : > { %v4107_v43 = vpop.eup %4106 }
0x118c   : > { %v3160_v53 = vmul.f32 %v4107_v43, %v3132_v17  ;;  %v3179_v55 = vadd.f32 %v3538_v51, %v3169_v54 }
0x118e   : > { %v3170_v26 = vmul.f32 %v3537_v59, %v3160_v53  ;;  %v3565_v24 = vpack.c.bf16 %v3179_v55, %v3178_v47 }
0x118f   : > { %v4109_v22 = vpop.eup %4108 }
0x1190   : > { %v3161_v21 = vmul.f32 %v4109_v22, %v3133_v18  ;;  %3566 = vst [vmem:[%s4337_s22] sm:$0xff] %v3565_v24   ;;  %v3180_v58 = vadd.f32 %v3538_v51, %v3170_v26 }
0x1192   : > { %v3171_v44 = vmul.f32 %v3537_v59, %v3161_v21 }
0x1194   : > { %v3181_v61 = vadd.f32 %v3538_v51, %v3171_v44 }
0x1196   : > { %v3570_v62 = vpack.c.bf16 %v3181_v61, %v3180_v58 }
0x1198   : > { %3573 = vst [vmem:[%s4337_s22 + $0x8] sm:$0xff] %v3570_v62  }
0x1199 PF: > { %s4855_s1 = sld [smem:[#allocation7_spill]]  ;;  %s4856_s18 = sld [smem:[#allocation5_spill]] }
0x119a   : > { %s4857_s19 = sld [smem:[#allocation6_spill]]  ;;  %s4858_s20 = sld [smem:[#allocation8_spill]] }
0x119b   : > { %s4859_s21 = sld [smem:[#allocation9_spill]] }
0x119f   : > { %s25_s22 = sadd.s32 1, %s4855_s1  }
0x11a0   : > { %p22_p9 = scmp.ge.s32.totalorder %s25_s22, 6  }
0x11a2   :  { %24 = sbr.rel (!%p22_p9) target bundleno = 8 (0x8), region = 154 }

// kernel: fwd.5
= control target key start
LH: loop header
LB: loop body
LE: loop exit
PB: predicated region body
PF: predicated region fallthrough
CT: control target
= control target key end

     0   :  { %s14855_s18 = smov 0   ;;  %s14857_s19 = smov 0   ;;  %s18272_s0 = inlined_call_operand.vmem [shape: bf16[32,2,128], index: 0, kind: input, shape index: {}]   ;;  %s18273_s1 = inlined_call_operand.vmem [shape: f32[2,1,128], index: 1, kind: input, shape index: {}]   ;;  %s18274_s2 = inlined_call_operand.vmem [shape: f32[2,1,128], index: 2, kind: input, shape index: {}]   ;;  %s18275_s3 = inlined_call_operand.vmem [shape: bf16[2,128,384], index: 3, kind: input, shape index: {}]   ;;  %s18276_s4 = inlined_call_operand.vmem [shape: f32[2,1,384], index: 4, kind: input, shape index: {}]   ;;  %s18277_s5 = inlined_call_operand.vmem [shape: bf16[2,128,128], index: 5, kind: input, shape index: {}]   ;;  %s18278_s6 = inlined_call_operand.vmem [shape: f32[2,1,128], index: 6, kind: input, shape index: {}]   ;;  %s18279_s7 = inlined_call_operand.vmem [shape: f32[2,1,128], index: 7, kind: input, shape index: {}]   ;;  %s18280_s8 = inlined_call_operand.vmem [shape: f32[2,1,128], index: 8, kind: input, shape index: {}]   ;;  %s18281_s9 = inlined_call_operand.vmem [shape: bf16[2,128,512], index: 9, kind: input, shape index: {}]   ;;  %s18282_s10 = inlined_call_operand.vmem [shape: f32[2,1,512], index: 10, kind: input, shape index: {}]   ;;  %s18283_s11 = inlined_call_operand.vmem [shape: bf16[2,512,128], index: 11, kind: input, shape index: {}]   ;;  %s18284_s12 = inlined_call_operand.vmem [shape: f32[2,1,128], index: 12, kind: input, shape index: {}]   ;;  %s18285_s13 = inlined_call_operand.vmem [shape: f32[1,128], index: 13, kind: input, shape index: {}]   ;;  %s18286_s14 = inlined_call_operand.vmem [shape: f32[1,128], index: 14, kind: input, shape index: {}]   ;;  %s18287_s15 = inlined_call_operand.vmem [shape: f32[32,2,128], index: 15, kind: output, shape index: {}]  }
   0x1   :  { %18334 = sst [smem:[#allocation35_spill]] %s18272_s0  ;;  %s14859_s20 = smov 0  }
   0x2   :  { %18335 = sst [smem:[#allocation36_spill]] %s18273_s1  ;;  %s14861_s21 = smov 0  }
   0x3   :  { %18336 = sst [smem:[#allocation37_spill]] %s18274_s2  ;;  %s14863_s22 = smov 0  }
   0x4   :  { %18337 = sst [smem:[#allocation38_spill]] %s18275_s3 }
   0x5   :  { %18338 = sst [smem:[#allocation39_spill]] %s18276_s4 }
   0x6   :  { %18339 = sst [smem:[#allocation40_spill]] %s18277_s5 }
   0x7   :  { %18340 = sst [smem:[#allocation41_spill]] %s18285_s13 }
   0x8   :  { %18341 = sst [smem:[#allocation42_spill]] %s18286_s14 }
   0x9 LB: > { %18342 = sst [smem:[#allocation4_spill]] %s14746_s18  ;;  %s34_s23 = sadd.s32 1, %s14754_s20  ;;  %s14762_s22 = sphi %s14863_s22, %s25_s22   ;;  %s14758_s21 = sphi %s14861_s21, %s18453_s21   ;;  %s14754_s20 = sphi %s14859_s20, %s18452_s20   ;;  %s14750_s19 = sphi %s14857_s19, %s18451_s19   ;;  %s14746_s18 = sphi %s14855_s18, %s18450_s18  }
   0xa   : > { %18343 = sst [smem:[#allocation5_spill]] %s14754_s20  ;;  %s37_s24 = sadd.s32 1, %s14758_s21 }
   0xb   : > { %18344 = sst [smem:[#allocation6_spill]] %s14758_s21  ;;  %p35_p0 = scmp.ge.s32.totalorder %s34_s23, 2 }
   0xc   : > { %18345 = sst [smem:[#allocation7_spill]] %s14762_s22  ;;  %p12576_p1 = scmp.ge.s32.totalorder %s14762_s22, 1 }
   0xd   : > { %p555_p2 = scmp.lt.s32.totalorder %s14762_s22, 5  ;;  %s18455_s23 = smov (%p35_p0, %s34_s23), 0 }
   0xe   : > { %18346 = sst [smem:[#allocation8_spill]] %s18455_s23  ;;  %s18457_s24 = smov (!%p35_p0, %s37_s24), %s14758_s21 }
   0xf   : > { %p556_p3 = pnand %p12576_p1, %p555_p2  ;;  %p39_p4 = scmp.ge.s32.totalorder %s18457_s24, 2 }
  0x11   : > { %s18459_s24 = smov (%p39_p4, %s18457_s24), 0  ;;  %559 = sbr.rel (%p556_p3) target bundleno = 5008 (0x1390), region = 80 }
  0x12   : > { %18347 = sst [smem:[#allocation9_spill]] %s18459_s24 }
  0x18   : > { %s12577_s25 = sshll.u32 %s14750_s19, 4  ;;  %p653_p5 = scmp.lt.s32.totalorder %s14746_s18, 1 }
  0x19   : > { %p649_p6 = scmp.lt.s32.totalorder %s12577_s25, 31  ;;  %s18350_s0 = sld [smem:[#allocation35_spill]] }
  0x1a   : > { %s14889_s26 = scalar_select %p653_p5, %s14746_s18, 1 }
  0x1b   : > { %s18461_s25 = smov (!%p649_p6, %s12577_s25), 31  ;;  %s18351_s3 = sld [smem:[#allocation38_spill]] }
  0x1c   : > { %s13983_s21 = smul.u32 192, %s14889_s26  ;;  %s12840_s22 = sshll.u32 %s14889_s26, 6 }
  0x1d   : > { %s13984_s20 = smul.u32 3, %s14889_s26  ;;  %s18352_s5 = sld [smem:[#allocation40_spill]] }
  0x1e   : > { %s18353_s4 = sld [smem:[#allocation39_spill]]  ;;  %s12841_s27 = sshll.u32 %s14889_s26, 8 }
  0x1f   : > { %s14902_s23 = scalar_lea.vmem %s18350_s0, %s18461_s25  ;;  %s14939_s30 = scalar_lea.vmem %s18281_s9, %s12841_s27 }
  0x20   : > { %s14949_s1 = scalar_lea.vmem %s18283_s11, %s12841_s27  ;;  %s18354_s28 = sld [smem:[#allocation4_spill]] }
  0x21   : > { %s14910_s18 = scalar_lea.vmem %s18351_s3, %s13983_s21  ;;  %s698_s21 = scalar_lea.vmem %s18284_s12, %s14889_s26 }
  0x22   : > { %s12587_s3 = sshll.u32 %s18461_s25, 1 }
  0x23   : > { %s14915_s29 = scalar_lea.vmem %s18352_s5, %s12840_s22  ;;  %s12583_s22 = sshll.u32 %s14889_s26, 2 }
  0x24   : > { %s14920_s24 = scalar_lea.vmem %s18353_s4, %s13984_s20  ;;  %s14944_s17 = scalar_lea.vmem %s18282_s10, %s12583_s22 }
  0x25   : > { %s14958_s5 = scalar_lea.vmem %s18287_s15, %s12587_s3 }
  0x26   : > { %p12588_p7 = scmp.ne.s32.totalorder %s18354_s28, 0 }
  0x27   : > { %v710_v0 = vld [vmem:[%s14902_s23] sm:$0x1] (!%p12588_p7)  ;;  %v711_v1 = vld [vmem:[%s14902_s23 + $0x1] sm:$0x1] (!%p12588_p7)  ;;  %v712_v2 = vld [vmem:[%s14902_s23 + $0x2] sm:$0x1] (!%p12588_p7) }
  0x28   : > { %709 = sbr.rel (%p12588_p7) target bundleno = 51 (0x33), region = 84  ;;  %v726_v3 = vunpack.c.l.bf16 (!%p12588_p7), %v710_v0  ;;  %v727_v4 = vunpack.c.l.bf16 (!%p12588_p7), %v711_v1  ;;  %v728_v5 = vunpack.c.l.bf16 (!%p12588_p7), %v712_v2  ;;  %v713_v6 = vld [vmem:[%s14902_s23 + $0x3] sm:$0x1] (!%p12588_p7)  ;;  %v714_v7 = vld [vmem:[%s14902_s23 + $0x4] sm:$0x1] (!%p12588_p7) }
  0x29   : > { %v715_v8 = vld [vmem:[%s14902_s23 + $0x5] sm:$0x1] (!%p12588_p7)  ;;  %v729_v9 = vunpack.c.l.bf16 (!%p12588_p7), %v713_v6  ;;  %v730_v10 = vunpack.c.l.bf16 (!%p12588_p7), %v714_v7  ;;  %v716_v12 = vld [vmem:[%s14902_s23 + $0x6] sm:$0x1] (!%p12588_p7)  ;;  %v717_v13 = vld [vmem:[%s14902_s23 + $0x7] sm:$0x1] (!%p12588_p7) }
  0x2a   : > { %v731_v11 = vunpack.c.l.bf16 (!%p12588_p7), %v715_v8  ;;  %v718_v14 = vld [vmem:[%s14902_s23 + $0x8] sm:$0x1] (!%p12588_p7)  ;;  %742 = vst [vmem:[#allocation2] sm:$0x3] (!%p12588_p7), %v726_v3  ;;  %743 = vst [vmem:[#allocation2 + $0x2] sm:$0x3] (!%p12588_p7), %v727_v4  ;;  %v732_v15 = vunpack.c.l.bf16 (!%p12588_p7), %v716_v12  ;;  %v733_v16 = vunpack.c.l.bf16 (!%p12588_p7), %v717_v13 }
  0x2b   : > { %744 = vst [vmem:[#allocation2 + $0x4] sm:$0x3] (!%p12588_p7), %v728_v5  ;;  %v734_v17 = vunpack.c.l.bf16 (!%p12588_p7), %v718_v14  ;;  %v719_v18 = vld [vmem:[%s14902_s23 + $0x9] sm:$0x1] (!%p12588_p7)  ;;  %v720_v19 = vld [vmem:[%s14902_s23 + $0xa] sm:$0x1] (!%p12588_p7) }
  0x2c   : > { %v721_v20 = vld [vmem:[%s14902_s23 + $0xb] sm:$0x1] (!%p12588_p7)  ;;  %745 = vst [vmem:[#allocation2 + $0x6] sm:$0x3] (!%p12588_p7), %v729_v9  ;;  %746 = vst [vmem:[#allocation2 + $0x8] sm:$0x3] (!%p12588_p7), %v730_v10  ;;  %v735_v21 = vunpack.c.l.bf16 (!%p12588_p7), %v719_v18  ;;  %v736_v22 = vunpack.c.l.bf16 (!%p12588_p7), %v720_v19 }
  0x2d   : > { %747 = vst [vmem:[#allocation2 + $0xa] sm:$0x3] (!%p12588_p7), %v731_v11  ;;  %v737_v23 = vunpack.c.l.bf16 (!%p12588_p7), %v721_v20  ;;  %v722_v24 = vld [vmem:[%s14902_s23 + $0xc] sm:$0x1] (!%p12588_p7)  ;;  %v723_v25 = vld [vmem:[%s14902_s23 + $0xd] sm:$0x1] (!%p12588_p7) }
  0x2e   : > { %v724_v26 = vld [vmem:[%s14902_s23 + $0xe] sm:$0x1] (!%p12588_p7)  ;;  %748 = vst [vmem:[#allocation2 + $0xc] sm:$0x3] (!%p12588_p7), %v732_v15  ;;  %749 = vst [vmem:[#allocation2 + $0xe] sm:$0x3] (!%p12588_p7), %v733_v16  ;;  %v738_v27 = vunpack.c.l.bf16 (!%p12588_p7), %v722_v24  ;;  %v739_v28 = vunpack.c.l.bf16 (!%p12588_p7), %v723_v25 }
  0x2f   : > { %750 = vst [vmem:[#allocation2 + $0x10] sm:$0x3] %v734_v17  ;;  %v740_v29 = vunpack.c.l.bf16 %v724_v26  ;;  %v725_v30 = vld [vmem:[%s14902_s23 + $0xf] sm:$0x1]  ;;  %751 = vst [vmem:[#allocation2 + $0x12] sm:$0x3] %v735_v21 }
  0x30   : > { %752 = vst [vmem:[#allocation2 + $0x14] sm:$0x3] %v736_v22  ;;  %753 = vst [vmem:[#allocation2 + $0x16] sm:$0x3] %v737_v23  ;;  %v741_v31 = vunpack.c.l.bf16 %v725_v30 }
  0x31   : > { %754 = vst [vmem:[#allocation2 + $0x18] sm:$0x3] %v738_v27  ;;  %755 = vst [vmem:[#allocation2 + $0x1a] sm:$0x3] %v739_v28 }
  0x32   : > { %756 = vst [vmem:[#allocation2 + $0x1c] sm:$0x3] %v740_v29  ;;  %757 = vst [vmem:[#allocation2 + $0x1e] sm:$0x3] %v741_v31 }
  0x33 PF: > { %v18297_v35 = vlaneseq  ;;  %v14764_v38 = vmov 1983009808   ;;  %v14765_v10 = vmov 269488144   ;;  %v14766_v12 = vmov 842150450   ;;  %s18430_s19 = scalar_lea.vmem %s18278_s6, %s14889_s26  ;;  %s18435_s28 = scalar_lea.vmem %s18279_s7, %s14889_s26 }
  0x34   : > { %v795_v39 = vunpack.c.l.s4 %v14764_v38  ;;  %v882_v11 = vunpack.c.l.s4 %v14765_v10  ;;  %v889_v13 = vunpack.c.l.s4 %v14766_v12  ;;  %v14767_v14 = vmov 1414812756   ;;  %s18361_s4 = sld [smem:[#allocation36_spill]]  ;;  %s14773_s22 = smov 64  }
  0x35   : > { %v14977_v32 = vld [vmem:[#allocation2] sm:$0x3]  ;;  %v14979_v33 = vld [vmem:[#allocation2 + $0x2] sm:$0x3]  ;;  %v14988_v40 = vshrl.u32 %v18297_v35, 7  ;;  %v896_v15 = vunpack.c.l.s4 %v14767_v14  ;;  %vm14771_vm0 = vmmov 0   ;;  %s18436_s3 = scalar_lea.vmem %s18280_s8, %s14889_s26 }
  0x36   : > { %v14981_v34 = vld [vmem:[#allocation2 + $0x4] sm:$0x3]  ;;  %v792_v43 = vcombine.low %v14977_v32, %v14979_v33  ;;  %v796_v48 = vunpack.c.0.s8 %v795_v39  ;;  %v14768_v16 = vmov 1987475062   ;;  %v883_v18 = vunpack.c.0.s8 %v882_v11  ;;  %s14774_s20 = smov 32  }
  0x37   : > { %v14983_v36 = vld [vmem:[#allocation2 + $0x6] sm:$0x3]  ;;  %18355 = vst [vmem:[#allocation10_spill] sm:$0xff] %v14988_v40  ;;  %v14992_v42 = vld [vmem:[#allocation2 + $0x14] sm:$0x3]  ;;  %v903_v17 = vunpack.c.l.s4 %v14768_v16  ;;  %v890_v19 = vunpack.c.0.s8 %v889_v13  ;;  %v897_v20 = vunpack.c.0.s8 %v896_v15  ;;  %vm2260_vm1 = vcmask 261120  }
  0x38   : > { %v14996_v44 = vld [vmem:[#allocation2 + $0x16] sm:$0x3]  ;;  %v14998_v45 = vld [vmem:[#allocation2 + $0x8] sm:$0x3]  ;;  %v15000_v46 = vld [vmem:[#allocation2 + $0xa] sm:$0x3]  ;;  %v793_v47 = vcombine.low %v14981_v34, %v14983_v36  ;;  %v15025_v59 = vsub.s32 %v796_v48, %v14988_v40  ;;  %v15040_v22 = vsub.s32 %v883_v18, %v14988_v40 }
  0x39   : > { %v827_v50 = vcombine.low %v14992_v42, %v14996_v44  ;;  %v15008_v51 = vld [vmem:[#allocation2 + $0xc] sm:$0x3]  ;;  %v15010_v52 = vld [vmem:[#allocation2 + $0xe] sm:$0x3]  ;;  %v15012_v53 = vld [vmem:[#allocation2 + $0x18] sm:$0x3]  ;;  %v809_v54 = vcombine.low %v14998_v45, %v15000_v46  ;;  %v904_v21 = vunpack.c.0.s8 %v903_v17  ;;  %v15043_v23 = vsub.s32 %v890_v19, %v14988_v40 }
  0x3a   : > { %v14985_v37 = vld [vmem:[#allocation2 + $0x10] sm:$0x3]  ;;  %v14990_v41 = vld [vmem:[#allocation2 + $0x12] sm:$0x3]  ;;  %v810_v55 = vcombine.low %v15008_v51, %v15010_v52  ;;  %v15018_v56 = vld [vmem:[#allocation2 + $0x1a] sm:$0x3]  ;;  %v800_v62 = vrot.slane %v792_v43, %v15025_v59  ;;  %v807_v63 = vrot.slane %v793_v47, %v15025_v59  ;;  %v15046_v24 = vsub.s32 %v897_v20, %v14988_v40  ;;  %s18362_s23 = scalar_lea.vmem %s18361_s4, %s14889_s26 }
  0x3b   : > { %v826_v49 = vcombine.low %v14985_v37, %v14990_v41  ;;  %v15020_v57 = vld [vmem:[#allocation2 + $0x1c] sm:$0x3]  ;;  %v15022_v58 = vld [vmem:[#allocation2 + $0x1e] sm:$0x3]  ;;  %18356 = vst [vmem:[#allocation11_spill] sm:$0xff] %v15025_v59  ;;  %v843_v60 = vcombine.low %v15012_v53, %v15018_v56  ;;  %v841_v1 = vrot.slane %v827_v50, %v15025_v59  ;;  %v817_v2 = vrot.slane %v809_v54, %v15025_v59 }
  0x3c   : > { %v844_v61 = vcombine.low %v15020_v57, %v15022_v58  ;;  %v824_v3 = vrot.slane %v810_v55, %v15025_v59  ;;  %v808_v6 = vcombine.low %v800_v62, %v807_v63  ;;  %18357 = vst [vmem:[#allocation12_spill] sm:$0xff] %v15040_v22  ;;  %18358 = vst [vmem:[#allocation13_spill] sm:$0xff] %v15043_v23  ;;  %vm3226_vm2 = vcmask 1040384  }
  0x3d   : > { %v834_v0 = vrot.slane %v826_v49, %v15025_v59  ;;  %v851_v4 = vrot.slane %v843_v60, %v15025_v59  ;;  %18359 = vst [vmem:[#allocation14_spill] sm:$0xff] %v15046_v24  ;;  %v15049_v25 = vsub.s32 %v904_v21, %v14988_v40  ;;  %vm3029_vm4 = vcmask 9216  }
  0x3e   : > { %v858_v5 = vrot.slane %v844_v61, %v15025_v59  ;;  %864 = vadd.xlane.f32.xlu0 %v808_v6  ;;  %v825_v8 = vcombine.low %v817_v2, %v824_v3  ;;  %vm3222_vm5 = vcmask 15360   ;;  %vm3960_vm6 = vcmask 254976  }
  0x3f   : > { %v842_v7 = vcombine.low %v834_v0, %v841_v1  ;;  %18360 = vst [vmem:[#allocation15_spill] sm:$0xff] %v15049_v25  ;;  %vm5913_vm7 = vcmask 517376   ;;  %vm7850_vm8 = vcmask 779776   ;;  %vm9787_vm9 = vcmask 1042176  }
  0x40   : > { %v859_v9 = vcombine.low %v851_v4, %v858_v5 }
  0x41   : > { %868 = vadd.xlane.f32.xlu1 %v842_v7 }
  0x42   : > { %866 = vadd.xlane.f32.xlu0 %v825_v8 }
  0x45   : > { %870 = vadd.xlane.f32.xlu1 %v859_v9 }
  0xcb   : > { %v865_v26 = vpop.xlane.xlu0 %864 }
  0xcc   : > { %v873_v28 = vmul.f32 0.0078125, %v865_v26 }
  0xce   : > { %v869_v27 = vpop.xlane.xlu1 %868  ;;  %v887_v30 = vrot.slane %v873_v28, %v15040_v22  ;;  %v894_v31 = vrot.slane %v873_v28, %v15043_v23  ;;  %v901_v38 = vrot.slane %v873_v28, %v15046_v24  ;;  %v908_v39 = vrot.slane %v873_v28, %v15049_v25 }
  0xcf   : > { %v875_v29 = vmul.f32 0.0078125, %v869_v27  ;;  %v867_v50 = vpop.xlane.xlu0 %866 }
  0xd0   : > { %v874_v55 = vmul.f32 0.0078125, %v867_v50  ;;  %v15060_v61 = vsub.f32 %v14977_v32, %v887_v30  ;;  %v15063_v62 = vsub.f32 %v14979_v33, %v894_v31  ;;  %v15066_v63 = vsub.f32 %v14981_v34, %v901_v38 }
  0xd1   : > { %v943_v43 = vrot.slane %v875_v29, %v15040_v22  ;;  %v950_v47 = vrot.slane %v875_v29, %v15043_v23  ;;  %v957_v48 = vrot.slane %v875_v29, %v15046_v24  ;;  %v964_v49 = vrot.slane %v875_v29, %v15049_v25 }
  0xd2   : > { %v871_v54 = vpop.xlane.xlu1 %870  ;;  %v15069_v0 = vsub.f32 %v14983_v36, %v908_v39  ;;  %v915_v3 = vrot.slane %v874_v55, %v15040_v22  ;;  %v922_v32 = vrot.slane %v874_v55, %v15043_v23  ;;  %v929_v4 = vrot.slane %v874_v55, %v15046_v24 }
  0xd3   : > { %v876_v60 = vmul.f32 0.0078125, %v871_v54  ;;  %v15072_v1 = vsub.f32 %v14985_v37, %v943_v43  ;;  %v15075_v2 = vsub.f32 %v14990_v41, %v950_v47  ;;  %v936_v33 = vrot.slane %v874_v55, %v15049_v25 }
  0xd4   : > { %v1025_v41 = vmul.f32 %v15060_v61, %v15060_v61  ;;  %v1026_v6 = vmul.f32 %v15063_v62, %v15063_v62  ;;  %v1027_v7 = vmul.f32 %v15066_v63, %v15066_v63  ;;  %v1028_v8 = vmul.f32 %v15069_v0, %v15069_v0 }
  0xd5   : > { %v971_v34 = vrot.slane %v876_v60, %v15040_v22  ;;  %v978_v5 = vrot.slane %v876_v60, %v15043_v23  ;;  %v985_v36 = vrot.slane %v876_v60, %v15046_v24  ;;  %v992_v37 = vrot.slane %v876_v60, %v15049_v25 }
  0xd6   : > { %v15094_v9 = vsub.f32 %v14992_v42, %v957_v48  ;;  %v15097_v10 = vsub.f32 %v14996_v44, %v964_v49  ;;  %v1033_v11 = vmul.f32 %v15072_v1, %v15072_v1  ;;  %v1034_v12 = vmul.f32 %v15075_v2, %v15075_v2 }
  0xd7   : > { %v1057_v13 = vcombine.low %v1025_v41, %v1026_v6  ;;  %v1058_v14 = vcombine.low %v1027_v7, %v1028_v8  ;;  %v15104_v15 = vsub.f32 %v14998_v45, %v915_v3  ;;  %v15107_v16 = vsub.f32 %v15000_v46, %v922_v32  ;;  %v14283_v41 = vld [vmem:[%s14910_s18 + $0x34] ss:$12 sps:$4 sm:$0xff]   ;;  %v14286_v7 = vld [vmem:[%s14910_s18 + $0x30] ss:$12 sps:$4 sm:$0xff]   ;;  %v14287_v8 = vld [vmem:[%s14910_s18 + $0x4c] ss:$12 sps:$4 sm:$0xff]  }
  0xd8   : > { %v1035_v42 = vmul.f32 %v15094_v9, %v15094_v9  ;;  %v1036_v44 = vmul.f32 %v15097_v10, %v15097_v10  ;;  %v1091_v17 = vcombine.low %v1033_v11, %v1034_v12  ;;  %v15114_v18 = vsub.f32 %v15008_v51, %v929_v4  ;;  %v14285_v6 = vld [vmem:[%s14910_s18 + $0x20] ss:$12 sps:$4 sm:$0xff]   ;;  %v14289_v11 = vld [vmem:[%s14910_s18 + $0x38] ss:$12 sps:$4 sm:$0xff]   ;;  %v14290_v12 = vld [vmem:[%s14910_s18 + $0x48] ss:$12 sps:$4 sm:$0xff]  }
  0xd9   : > { %v1065_v19 = vrot.slane %v1057_v13, %v15025_v59  ;;  %v1072_v20 = vrot.slane %v1058_v14, %v15025_v59  ;;  %v15119_v45 = vsub.f32 %v15010_v52, %v936_v33  ;;  %v1029_v46 = vmul.f32 %v15104_v15, %v15104_v15  ;;  %v14276_v33 = vld [vmem:[%s14910_s18 + $0x4] ss:$12 sps:$4 sm:$0xff]  }
  0xda   : > { %v1092_v21 = vcombine.low %v1035_v42, %v1036_v44  ;;  %v1099_v26 = vrot.slane %v1091_v17, %v15025_v59  ;;  %v1030_v27 = vmul.f32 %v15107_v16, %v15107_v16  ;;  %v1031_v51 = vmul.f32 %v15114_v18, %v15114_v18  ;;  %1648 = vmatprep.subr.bf16.mxu0 %v14276_v33  ;;  %v14291_v13 = vld [vmem:[%s14910_s18 + $0x64] ss:$12 sps:$4 sm:$0xff]   ;;  %v14294_v42 = vld [vmem:[%s14910_s18 + $0x60] ss:$12 sps:$4 sm:$0xff]   ;;  %v14295_v44 = vld [vmem:[%s14910_s18 + $0x7c] ss:$12 sps:$4 sm:$0xff]  }
  0xdb   : > { %v1073_v28 = vcombine.low %v1065_v19, %v1072_v20  ;;  %v1032_v29 = vmul.f32 %v15119_v45, %v15119_v45  ;;  %v15131_v30 = vsub.f32 %v15012_v53, %v971_v34  ;;  %v15134_v52 = vsub.f32 %v15018_v56, %v978_v5  ;;  %v14278_v34 = vld [vmem:[%s14910_s18] ss:$12 sps:$4 sm:$0xff]   ;;  %v14279_v5 = vld [vmem:[%s14910_s18 + $0x1c] ss:$12 sps:$4 sm:$0xff]   ;;  %v14298_v20 = vld [vmem:[%s14910_s18 + $0x78] ss:$12 sps:$4 sm:$0xff]  }
  0xdc   : > { %v1106_v31 = vrot.slane %v1092_v21, %v15025_v59  ;;  %v1074_v38 = vcombine.low %v1029_v46, %v1030_v27  ;;  %v15138_v39 = vsub.f32 %v15020_v57, %v985_v36  ;;  %v15141_v43 = vsub.f32 %v15022_v58, %v992_v37  ;;  %1649 = vmatpush1.bf16.msra.mxu0 %v14278_v34  ;;  %v14281_v36 = vld [vmem:[%s14910_s18 + $0x8] ss:$12 sps:$4 sm:$0xff]   ;;  %v14282_v37 = vld [vmem:[%s14910_s18 + $0x18] ss:$12 sps:$4 sm:$0xff]   ;;  %v14293_v14 = vld [vmem:[%s14910_s18 + $0x50] ss:$12 sps:$4 sm:$0xff]  }
  0xdd   : > { %1129 = vadd.xlane.f32.xlu0 %v1073_v28  ;;  %v1075_v47 = vcombine.low %v1031_v51, %v1032_v29  ;;  %v1037_v48 = vmul.f32 %v15131_v30, %v15131_v30  ;;  %v1038_v53 = vmul.f32 %v15134_v52, %v15134_v52  ;;  %1650 = vmatprep.subr.bf16.mxu0 %v14279_v5  ;;  %v14297_v17 = vld [vmem:[%s14910_s18 + $0x68] ss:$12 sps:$4 sm:$0xff]   ;;  %v18295_v19 = vmov 0   ;;  %v14301_v21 = vld [vmem:[%s14910_s18 + $0x80] ss:$12 sps:$4 sm:$0xff]  }
  0xde   : > { %v1107_v56 = vcombine.low %v1099_v26, %v1106_v31  ;;  %v1082_v49 = vrot.slane %v1074_v38, %v15025_v59  ;;  %v1039_v57 = vmul.f32 %v15138_v39, %v15138_v39  ;;  %v1040_v58 = vmul.f32 %v15141_v43, %v15141_v43  ;;  %13175 = vmatprep.subr.bf16.mxu1 %v14281_v36  ;;  %v14299_v46 = vld [vmem:[%s14910_s18 + $0x94] ss:$12 sps:$4 sm:$0xff]   ;;  %v14302_v26 = vld [vmem:[%s14910_s18 + $0x90] ss:$12 sps:$4 sm:$0xff]   ;;  %v14303_v27 = vld [vmem:[%s14910_s18 + $0xac] ss:$12 sps:$4 sm:$0xff]  }
  0xdf   : > { %v1089_v50 = vrot.slane %v1075_v47, %v15025_v59  ;;  %v1108_v54 = vcombine.low %v1037_v48, %v1038_v53  ;;  %13176 = vmatpush3.bf16.msra.mxu1 %v14281_v36  ;;  %1680 = vmatprep.mubr.bf16.mxu0 %v18295_v19  ;;  %v14305_v51 = vld [vmem:[%s14910_s18 + $0x98] ss:$12 sps:$4 sm:$0xff]   ;;  %v14306_v28 = vld [vmem:[%s14910_s18 + $0xa8] ss:$12 sps:$4 sm:$0xff]   ;;  %v14307_v29 = vld [vmem:[%s14910_s18 + $0xb0] ss:$12 sps:$4 sm:$0xff]  }
  0xe0   : > { %v1109_v55 = vcombine.low %v1039_v57, %v1040_v58  ;;  %1651 = vmatpush1.bf16.msra.mxu0 %v14282_v37  ;;  %13177 = vmatprep.subr.bf16.mxu1 %v14285_v6  ;;  %v12589_v53 = vld [vmem:[%s18362_s23] ss:$0 sm:$0xff]  ;;  %s18363_s18 = sld [smem:[#allocation37_spill]] }
  0xe1   : > { %1133 = vadd.xlane.f32.xlu0 %v1107_v56  ;;  %v1090_v60 = vcombine.low %v1082_v49, %v1089_v50  ;;  %v1116_v3 = vrot.slane %v1108_v54, %v15025_v59  ;;  %1652 = vmatprep.subr.bf16.mxu0 %v14283_v41  ;;  %v1302_v50 = vcombine.high %v12589_v53, %v12589_v53 }
  0xe2   : > { %v1123_v32 = vrot.slane %v1109_v55, %v15025_v59 }
  0xe3   : > { %1131 = vadd.xlane.f32.xlu1 %v1090_v60  ;;  %13178 = vmatpush3.bf16.msra.mxu1 %v14285_v6 }
  0xe4   : > { %v1124_v4 = vcombine.low %v1116_v3, %v1123_v32  ;;  %1653 = vmatpush1.bf16.msra.mxu0 %v14286_v7  ;;  %13179 = vmatprep.subr.bf16.mxu1 %v14289_v11  ;;  %v15191_v3 = vrot.slane %v12589_v53, %v15025_v59 }
  0xe5   : > { %1654 = vmatprep.subr.bf16.mxu0 %v14287_v8 }
  0xe6   : > { %s18364_s27 = scalar_lea.vmem %s18363_s18, %s14889_s26  ;;  %v15201_v37 = vcombine.high %v15191_v3, %v15191_v3  ;;  %s18441_s26 = sld [smem:[#allocation4_spill]] }
  0xe7   : > { %1135 = vadd.xlane.f32.xlu1 %v1124_v4  ;;  %13180 = vmatpush3.bf16.msra.mxu1 %v14289_v11  ;;  %v12590_v54 = vld [vmem:[%s18364_s27] ss:$0 sm:$0xff]  ;;  %v15194_v4 = vrot.slane %v1302_v50, %v15025_v59 }
  0xe8   : > { %1655 = vmatpush1.bf16.msra.mxu0 %v14290_v12  ;;  %13181 = vmatprep.subr.bf16.mxu1 %v14293_v14  ;;  %v1344_v33 = vcombine.high %v12590_v54, %v12590_v54  ;;  %v15197_v5 = vrot.slane %v12590_v54, %v15025_v59 }
  0xe9   : > { %1656 = vmatprep.subr.bf16.mxu0 %v14291_v13  ;;  %v15205_v41 = vcombine.high %v15194_v4, %v15194_v4 }
  0xea   : > { %v15208_v6 = vrot.slane %v1344_v33, %v15025_v59 }
  0xeb   : > { %13182 = vmatpush3.bf16.msra.mxu1 %v14293_v14 }
  0xec   : > { %1657 = vmatpush1.bf16.msra.mxu0 %v14294_v42  ;;  %13183 = vmatprep.subr.bf16.mxu1 %v14297_v17  ;;  %p12835_p8 = scmp.ne.s32.totalorder %s18441_s26, 1 }
  0xed   : > { %1658 = vmatprep.subr.bf16.mxu0 %v14295_v44  ;;  %s18447_s23 = sld [smem:[#allocation41_spill]] (!%p12835_p8)  ;;  %s18448_s18 = sld [smem:[#allocation42_spill]] (!%p12835_p8) }
  0xef   : > { %13184 = vmatpush3.bf16.msra.mxu1 %v14297_v17 }
  0xf0   : > { %1659 = vmatpush1.bf16.msra.mxu0 %v14298_v20  ;;  %13185 = vmatprep.subr.bf16.mxu1 %v14301_v21  ;;  %v15220_v20 = vcombine.high %v15197_v5, %v15197_v5 }
  0xf1   : > { %1660 = vmatprep.subr.bf16.mxu0 %v14299_v46  ;;  %v15224_v46 = vcombine.high %v15208_v6, %v15208_v6 }
  0xf3   : > { %13186 = vmatpush3.bf16.msra.mxu1 %v14301_v21 }
  0xf4   : > { %1661 = vmatpush1.bf16.msra.mxu0 %v14302_v26  ;;  %13187 = vmatprep.subr.bf16.mxu1 %v14305_v51 }
  0xf5   : > { %1662 = vmatprep.subr.bf16.mxu0 %v14303_v27 }
  0xf7   : > { %13188 = vmatpush3.bf16.msra.mxu1 %v14305_v51 }
  0xf8   : > { %1663 = vmatpush1.bf16.msra.mxu0 %v14306_v28  ;;  %13189 = vmatprep.subr.bf16.mxu1 %v14307_v29 }
  0xfb   : > { %13190 = vmatpush3.bf16.msra.mxu1 %v14307_v29 }
 0x16a   : > { %v1130_v31 = vpop.xlane.xlu0 %1129 }
 0x16b   : > { %v1137_v38 = vmul.f32 0.0078125, %v1130_v31 }
 0x16d   : > { %v1141_v47 = vadd.f32 1e-05, %v1137_v38 }
 0x16e   : > { %v1134_v48 = vpop.xlane.xlu0 %1133 }
 0x16f   : > { %14396 = vrsqrt.f32 %v1141_v47  ;;  %v1139_v56 = vmul.f32 0.0078125, %v1134_v48 }
 0x170   : > { %v1132_v49 = vpop.xlane.xlu1 %1131 }
 0x171   : > { %v1138_v57 = vmul.f32 0.0078125, %v1132_v49  ;;  %v1143_v58 = vadd.f32 1e-05, %v1139_v56 }
 0x173   : > { %v1142_v55 = vadd.f32 1e-05, %v1138_v57  ;;  %14398 = vrsqrt.f32 %v1143_v58 }
 0x174   : > { %v1136_v60 = vpop.xlane.xlu1 %1135 }
 0x175   : > { %14400 = vrsqrt.f32 %v1142_v55  ;;  %v1140_v32 = vmul.f32 0.0078125, %v1136_v60 }
 0x177   : > { %v1144_v34 = vadd.f32 1e-05, %v1140_v32 }
 0x179   : > { %v14397_v36 = vpop.eup %14396  ;;  %14402 = vrsqrt.f32 %v1144_v34 }
 0x17a   : > { %v1159_v7 = vrot.slane %v14397_v36, %v15040_v22  ;;  %v1166_v8 = vrot.slane %v14397_v36, %v15043_v23  ;;  %v1173_v11 = vrot.slane %v14397_v36, %v15046_v24  ;;  %v1180_v12 = vrot.slane %v14397_v36, %v15049_v25 }
 0x17c   : > { %v1281_v13 = vmul.f32 %v1159_v7, %v15060_v61  ;;  %v1282_v14 = vmul.f32 %v1166_v8, %v15063_v62  ;;  %v1283_v42 = vmul.f32 %v1173_v11, %v15066_v63  ;;  %v1284_v44 = vmul.f32 %v1180_v12, %v15069_v0 }
 0x17d   : > { %v14399_v17 = vpop.eup %14398 }
 0x17e   : > { %v1323_v21 = vmul.f32 %v15191_v3, %v1281_v13  ;;  %v1324_v26 = vmul.f32 %v15201_v37, %v1282_v14  ;;  %v1325_v61 = vmul.f32 %v15194_v4, %v1283_v42  ;;  %v1326_v62 = vmul.f32 %v15205_v41, %v1284_v44 }
 0x17f   : > { %v14401_v63 = vpop.eup %14400  ;;  %v1215_v0 = vrot.slane %v14399_v17, %v15040_v22  ;;  %v1222_v27 = vrot.slane %v14399_v17, %v15043_v23  ;;  %v1229_v51 = vrot.slane %v14399_v17, %v15046_v24  ;;  %v1236_v28 = vrot.slane %v14399_v17, %v15049_v25 }
 0x180   : > { %v1187_v29 = vrot.slane %v14401_v63, %v15040_v22  ;;  %v1194_v31 = vrot.slane %v14401_v63, %v15043_v23  ;;  %v1201_v38 = vrot.slane %v14401_v63, %v15046_v24  ;;  %v1208_v47 = vrot.slane %v14401_v63, %v15049_v25 }
 0x181   : > { %v1365_v48 = vadd.f32 %v15197_v5, %v1323_v21  ;;  %v1366_v53 = vadd.f32 %v15220_v20, %v1324_v26  ;;  %v1367_v56 = vadd.f32 %v15208_v6, %v1325_v61  ;;  %v1368_v49 = vadd.f32 %v15224_v46, %v1326_v62 }
 0x182   : > { %v1285_v57 = vmul.f32 %v1187_v29, %v15104_v15  ;;  %v1286_v58 = vmul.f32 %v1194_v31, %v15107_v16  ;;  %v1287_v50 = vmul.f32 %v1201_v38, %v15114_v18  ;;  %v1288_v54 = vmul.f32 %v1208_v47, %v15119_v45 }
 0x183   : > { %v14403_v55 = vpop.eup %14402  ;;  %v1397_v60 = vcombine.low %v1365_v48, %v1366_v53  ;;  %v1398_v32 = vcombine.low %v1367_v56, %v1368_v49  ;;  %v1289_v33 = vmul.f32 %v1215_v0, %v15072_v1  ;;  %v1290_v34 = vmul.f32 %v1222_v27, %v15075_v2 }
 0x184   : > { %v1327_v36 = vmul.f32 %v15191_v3, %v1285_v57  ;;  %v1328_v7 = vmul.f32 %v15201_v37, %v1286_v58  ;;  %v1329_v8 = vmul.f32 %v15194_v4, %v1287_v50  ;;  %v1330_v15 = vmul.f32 %v15205_v41, %v1288_v54 }
 0x185   : > { %v1405_v16 = vrot.slane %v1397_v60, %v15025_v59  ;;  %v1412_v18 = vrot.slane %v1398_v32, %v15025_v59  ;;  %v1243_v45 = vrot.slane %v14403_v55, %v15040_v22  ;;  %v1250_v11 = vrot.slane %v14403_v55, %v15043_v23 }
 0x186   : > { %v1369_v1 = vadd.f32 %v15197_v5, %v1327_v36  ;;  %v1370_v2 = vadd.f32 %v15220_v20, %v1328_v7  ;;  %v1371_v12 = vadd.f32 %v15208_v6, %v1329_v8  ;;  %v1372_v13 = vadd.f32 %v15224_v46, %v1330_v15  ;;  %v1503_v36 = vld [vmem:[%s14920_s24] sm:$0x7]  ;;  %s14772_s24 = smov 96  }
 0x187   : > { %v1413_v14 = vcombine.low %v1405_v16, %v1412_v18  ;;  %v1257_v42 = vrot.slane %v14403_v55, %v15046_v24  ;;  %v1264_v44 = vrot.slane %v14403_v55, %v15049_v25  ;;  %v1291_v17 = vmul.f32 %v1229_v51, %v15094_v9 }
 0x188   : > { %v1414_v21 = vcombine.low %v1369_v1, %v1370_v2  ;;  %v1415_v26 = vcombine.low %v1371_v12, %v1372_v13  ;;  %v1292_v61 = vmul.f32 %v1236_v28, %v15097_v10  ;;  %v1293_v62 = vmul.f32 %v1243_v45, %v15131_v30 }
 0x189   : > { %v1294_v63 = vmul.f32 %v1250_v11, %v15134_v52  ;;  %v1295_v0 = vmul.f32 %v1257_v42, %v15138_v39  ;;  %v1296_v27 = vmul.f32 %v1264_v44, %v15141_v43  ;;  %v1331_v29 = vmul.f32 %v15191_v3, %v1289_v33 }
 0x18a   : > { %v1422_v31 = vrot.slane %v1414_v21, %v15025_v59  ;;  %v1429_v38 = vrot.slane %v1415_v26, %v15025_v59  ;;  %v1332_v9 = vmul.f32 %v15201_v37, %v1290_v34  ;;  %v1333_v51 = vmul.f32 %v15194_v4, %v1291_v17 }
 0x18b   : > { %v1334_v10 = vmul.f32 %v15205_v41, %v1292_v61  ;;  %v1335_v30 = vmul.f32 %v15191_v3, %v1293_v62  ;;  %v1336_v52 = vmul.f32 %v15201_v37, %v1294_v63  ;;  %v1337_v39 = vmul.f32 %v15194_v4, %v1295_v0 }
 0x18c   : > { %v1430_v28 = vcombine.low %v1422_v31, %v1429_v38  ;;  %v1338_v43 = vmul.f32 %v15205_v41, %v1296_v27  ;;  %v1373_v47 = vadd.f32 %v15197_v5, %v1331_v29  ;;  %v1374_v48 = vadd.f32 %v15220_v20, %v1332_v9 }
 0x18d   : > { %v1375_v53 = vadd.f32 %v15208_v6, %v1333_v51  ;;  %v1376_v56 = vadd.f32 %v15224_v46, %v1334_v10  ;;  %v1377_v49 = vadd.f32 %v15197_v5, %v1335_v30  ;;  %v1378_v57 = vadd.f32 %v15220_v20, %v1336_v52 }
 0x18e   : > { %v1469_v3 = vpack.c.bf16 %v1430_v28, %v1413_v14  ;;  %v1379_v37 = vadd.f32 %v15208_v6, %v1337_v39  ;;  %v1380_v4 = vadd.f32 %v15224_v46, %v1338_v43  ;;  %v1431_v58 = vcombine.low %v1373_v47, %v1374_v48 }
 0x18f   : > { %v1432_v50 = vcombine.low %v1375_v53, %v1376_v56  ;;  %v1448_v41 = vcombine.low %v1377_v49, %v1378_v57  ;;  %v18298_v33 = vmov 0.0   ;;  %v18294_v34 = vsub.s32 0, %v14988_v40 }
 0x190   : > { %1681 = vmatmul.mubr.bf16.vlgmr.msra.gmra.mrb[0].mxu0 %v1469_v3  ;;  %13191 = vmatprep.mubr.bf16.mxu1 %v1469_v3  ;;  %v1439_v54 = vrot.slane %v1431_v58, %v15025_v59  ;;  %v1449_v55 = vcombine.low %v1379_v37, %v1380_v4  ;;  %v18292_v7 = vsub.s32 1, %v14988_v40  ;;  %v18293_v2 = vsub.s32 2, %v14988_v40 }
 0x191   : > { %v1446_v60 = vrot.slane %v1432_v50, %v15025_v59  ;;  %v1456_v5 = vrot.slane %v1448_v41, %v15025_v59  ;;  %1690 = vmatprep.mubr.bf16.mxu0 %v18295_v19  ;;  %13195 = vmatprep.subr.bf16.mxu0 %v18298_v33  ;;  %v1508_v8 = vrot.slane %v1503_v36, %v18294_v34 }
 0x192   : > { %v1463_v20 = vrot.slane %v1449_v55, %v15025_v59  ;;  %13207 = vmatprep.subr.bf16.mxu1 %v18298_v33  ;;  %v1512_v15 = vrot.slane %v1503_v36, %v18292_v7  ;;  %v1516_v26 = vrot.slane %v1503_v36, %v18293_v2 }
 0x193   : > { %v1447_v6 = vcombine.low %v1439_v54, %v1446_v60 }
 0x194   : > { %v1464_v32 = vcombine.low %v1456_v5, %v1463_v20 }
 0x196   : > { %v1470_v46 = vpack.c.bf16 %v1464_v32, %v1447_v6 }
 0x198   : > { %13192 = vmatmul.mubr.bf16.vlgmr.msra.gmra.mrb[0].mxu1 %v1470_v46  ;;  %1691 = vmatmul.mubr.bf16.gmra.mrb[4].mxu0 %v1470_v46 }
 0x199   : > { %13197 = vmatprep.mubr.msk.bf16.mxu0 %vm14771_vm0, %v18298_v33  ;;  %13209 = vmatprep.mubr.msk.bf16.mxu1 %vm14771_vm0, %v18298_v33 }
 0x263   : > { %v1682_v16 = vpop.f32.mrb[0].mxu0 }
 0x264   : > { %v1683_v18 = vadd.f32 %v1682_v16, %v1508_v8  ;;  %v1684_v45 = vpop.f32.mrb[1].mxu0 }
 0x265   : > { %v1685_v11 = vadd.f32 %v1684_v45, %v1512_v15  ;;  %v1686_v1 = vpop.f32.mrb[2].mxu0 }
 0x266   : > { %v1687_v12 = vadd.f32 %v1686_v1, %v1508_v8  ;;  %v1688_v13 = vpop.f32.mrb[3].mxu0 }
 0x267   : > { %v1762_v14 = vcombine.low %v1683_v18, %v1685_v11  ;;  %v1763_v42 = vcombine.high %v1683_v18, %v1685_v11  ;;  %v1689_v44 = vadd.f32 %v1688_v13, %v1512_v15 }
 0x269   : > { %v1797_v17 = vcombine.low %v1687_v12, %v1689_v44  ;;  %v1798_v21 = vcombine.high %v1687_v12, %v1689_v44  ;;  %v1771_v10 = vrot.slane %v1762_v14, %v15025_v59  ;;  %v1778_v48 = vrot.slane %v1763_v42, %v15025_v59 }
 0x26b   : > { %v13193_v61 = vpop.f32.mrb[0].mxu1  ;;  %v1692_v62 = vpop.f32.mrb[4].mxu0  ;;  %v1806_v3 = vrot.slane %v1797_v17, %v15025_v59  ;;  %v1813_v54 = vrot.slane %v1798_v21, %v15025_v59 }
 0x26c   : > { %v1735_v63 = vpop.f32.mrb[1].mxu1  ;;  %v1693_v0 = vadd.f32 %v1692_v62, %v1508_v8  ;;  %v1694_v27 = vpop.f32.mrb[5].mxu0  ;;  %v1744_v29 = vadd.f32 %v13193_v61, %v1516_v26 }
 0x26d   : > { %v1736_v31 = vadd.f32 %v1735_v63, %v1516_v26  ;;  %v13194_v38 = vpop.f32.mrb[2].mxu1  ;;  %v1695_v9 = vadd.f32 %v1694_v27, %v1512_v15  ;;  %v1696_v51 = vpop.f32.mrb[6].mxu0 }
 0x26e   : > { %v1738_v30 = vpop.f32.mrb[3].mxu1  ;;  %v1698_v52 = vpop.f32.mrb[7].mxu0  ;;  %v1834_v53 = vcombine.high %v1744_v29, %v1744_v29  ;;  %v1747_v50 = vadd.f32 %v13194_v38, %v1516_v26  ;;  %v15329_v55 = vrot.slane %v1744_v29, %v15025_v59  ;;  %v1697_v46 = vadd.f32 %v1696_v51, %v1508_v8 }
 0x26f   : > { %v1764_v39 = vcombine.high %v1736_v31, %v1736_v31  ;;  %v15309_v28 = vrot.slane %v1736_v31, %v15025_v59  ;;  %v1739_v43 = vadd.f32 %v1738_v30, %v1516_v26  ;;  %v1832_v47 = vcombine.low %v1693_v0, %v1695_v9 }
 0x270   : > { %v1833_v5 = vcombine.high %v1693_v0, %v1695_v9  ;;  %v15335_v20 = vrot.slane %v1834_v53, %v15025_v59  ;;  %v1869_v11 = vcombine.high %v1747_v50, %v1747_v50  ;;  %v1699_v1 = vadd.f32 %v1698_v52, %v1512_v15 }
 0x271   : > { %v15313_v56 = vrot.slane %v1764_v39, %v15025_v59  ;;  %v1793_v49 = vcombine.low %v1771_v10, %v15309_v28  ;;  %v15317_v57 = vcombine.high %v1771_v10, %v15309_v28  ;;  %v1799_v37 = vcombine.high %v1739_v43, %v1739_v43 }
 0x272   : > { %v15325_v41 = vrot.slane %v1739_v43, %v15025_v59  ;;  %v1841_v18 = vrot.slane %v1832_v47, %v15025_v59  ;;  %v1848_v45 = vrot.slane %v1833_v5, %v15025_v59  ;;  %v1867_v17 = vcombine.low %v1697_v46, %v1699_v1 }
 0x273   : > { %v1795_v4 = vcombine.low %v1778_v48, %v15313_v56  ;;  %v15322_v58 = vcombine.high %v1778_v48, %v15313_v56  ;;  %v15332_v60 = vrot.slane %v1799_v37, %v15025_v59  ;;  %v1946_v12 = vrot.slane %v1793_v49, %v15025_v59 }
 0x274   : > { %v15338_v6 = vcombine.low %v1806_v3, %v15325_v41  ;;  %v15341_v32 = vcombine.high %v1806_v3, %v15325_v41  ;;  %v15354_v14 = vcombine.low %v1841_v18, %v15329_v55  ;;  %v15357_v8 = vcombine.high %v1841_v18, %v15329_v55 }
 0x275   : > { %v15344_v36 = vcombine.low %v1813_v54, %v15332_v60  ;;  %v15347_v16 = vcombine.high %v1813_v54, %v15332_v60  ;;  %v1962_v13 = vrot.slane %v1795_v4, %v15025_v59  ;;  %v15360_v42 = vcombine.low %v1848_v45, %v15335_v20 }
 0x276   : > { %v15363_v44 = vcombine.high %v1848_v45, %v15335_v20  ;;  %v1868_v21 = vcombine.high %v1697_v46, %v1699_v1  ;;  %v15365_v26 = vcombine.high %v1946_v12, %v1946_v12  ;;  %v15370_v61 = vrot.slane %v1747_v50, %v15025_v59 }
 0x277   : > { %v15367_v15 = vcombine.high %v1962_v13, %v1962_v13  ;;  %v15373_v62 = vrot.slane %v1869_v11, %v15025_v59  ;;  %v1954_v63 = vrot.slane %v15317_v57, %v15025_v59  ;;  %v1876_v0 = vrot.slane %v1867_v17, %v15025_v59 }
 0x278   : > { %v1883_v27 = vrot.slane %v1868_v21, %v15025_v59  ;;  %v2084_v29 = vpack.c.bf16 %v15365_v26, %v15365_v26  ;;  %v1978_v43 = vrot.slane %v15338_v6, %v15025_v59  ;;  %v1970_v53 = vrot.slane %v15322_v58, %v15025_v59 }
 0x279   : > { %v2086_v31 = vpack.c.bf16 %v15367_v15, %v15367_v15  ;;  %v15384_v38 = vcombine.low %v1876_v0, %v15370_v61  ;;  %v15387_v9 = vcombine.high %v1876_v0, %v15370_v61  ;;  %v1955_v39 = vcombine.high %v1954_v63, %v1954_v63 }
 0x27a   : > { %v15390_v51 = vcombine.low %v1883_v27, %v15373_v62  ;;  %v15393_v10 = vcombine.high %v1883_v27, %v15373_v62  ;;  %v2265_v30 = vsel %vm2260_vm1, %v2084_v29, 0  ;;  %v1979_v48 = vcombine.high %v1978_v43, %v1978_v43 }
 0x27b   : > { %v2357_v52 = vsel %vm2260_vm1, %v2086_v31, 0  ;;  %13196 = vmatpush3.bf16.xpose.msra.mxu0 %v2265_v30  ;;  %v2085_v47 = vpack.c.bf16 %v1955_v39, %v1955_v39  ;;  %v15403_v3 = vpack.c.bf16 %v1793_v49, %v1793_v49  ;;  %v12615_v37 = vcombine.low %v15309_v28, %v15309_v28 }
 0x27c   : > { %13208 = vmatpush3.bf16.xpose.msra.mxu1 %v2357_v52  ;;  %13201 = vmatprep.subr.bf16.mxu0 %v18298_v33  ;;  %v2010_v50 = vrot.slane %v15354_v14, %v15025_v59  ;;  %v1994_v54 = vrot.slane %v15344_v36, %v15025_v59  ;;  %v2018_v5 = vrot.slane %v15357_v8, %v15025_v59 }
 0x27d   : > { %13219 = vmatprep.subr.bf16.mxu1 %v18298_v33  ;;  %v2026_v46 = vrot.slane %v15360_v42, %v15025_v59  ;;  %v15415_v18 = vpack.c.bf16 %v1795_v4, %v1795_v4  ;;  %v2088_v45 = vpack.c.bf16 %v1979_v48, %v1979_v48  ;;  %v2034_v49 = vrot.slane %v15363_v44, %v15025_v59 }
 0x27e   : > { %v2311_v11 = vsel %vm2260_vm1, %v2085_v47, 0  ;;  %v1971_v1 = vcombine.high %v1970_v53, %v1970_v53  ;;  %v1986_v12 = vrot.slane %v15341_v32, %v15025_v59  ;;  %v2042_v13 = vrot.slane %v15384_v38, %v15025_v59 }
 0x27f   : > { %v2050_v4 = vrot.slane %v15387_v9, %v15025_v59  ;;  %v2449_v17 = vsel %vm2260_vm1, %v2088_v45, 0  ;;  %v1995_v21 = vcombine.high %v1994_v54, %v1994_v54  ;;  %v2058_v63 = vrot.slane %v15390_v51, %v15025_v59 }
 0x280   : > { %v2066_v0 = vrot.slane %v15393_v10, %v15025_v59  ;;  %v2002_v27 = vrot.slane %v15347_v16, %v15025_v59  ;;  %v12616_v29 = vcombine.high %v15309_v28, %v15309_v28  ;;  %v2011_v31 = vcombine.high %v2010_v50, %v2010_v50 }
 0x281   : > { %v15441_v30 = vcombine.high %v2018_v5, %v2018_v5  ;;  %v15446_v52 = vcombine.high %v2026_v46, %v2026_v46  ;;  %v15448_v43 = vcombine.high %v2034_v49, %v2034_v49  ;;  %v2087_v47 = vpack.c.bf16 %v1971_v1, %v1971_v1 }
 0x282   : > { %13198 = vmatmul.mubr.msk.bf16.vlgmr.msra.gmra.mrb[8].mxu0 %vm2260_vm1, %v15403_v3  ;;  %v1987_v53 = vcombine.high %v1986_v12, %v1986_v12  ;;  %v15451_v54 = vcombine.high %v2042_v13, %v2042_v13  ;;  %v15453_v45 = vcombine.high %v2050_v4, %v2050_v4  ;;  %v15457_v28 = vpack.c.bf16 %v15317_v57, %v15317_v57 }
 0x283   : > { %13202 = vmatpush3.bf16.xpose.msra.mxu0 %v2311_v11  ;;  %13210 = vmatmul.mubr.msk.bf16.vlgmr.msra.gmra.mrb[4].mxu1 %vm2260_vm1, %v15415_v18  ;;  %v2090_v50 = vpack.c.bf16 %v1995_v21, %v1995_v21  ;;  %v15459_v5 = vcombine.high %v2058_v63, %v2058_v63  ;;  %v15461_v11 = vcombine.high %v2066_v0, %v2066_v0 }
 0x284   : > { %13220 = vmatpush3.bf16.xpose.msra.mxu1 %v2449_v17  ;;  %13203 = vmatprep.mubr.msk.bf16.mxu0 %vm14771_vm0, %v18298_v33  ;;  %v15463_v46 = vcombine.high %v2002_v27, %v2002_v27  ;;  %v15466_v49 = vrot.slane %v12615_v37, %v15025_v59  ;;  %v15470_v12 = vpack.c.bf16 %v15338_v6, %v15338_v6  ;;  %v2403_v17 = vsel %vm2260_vm1, %v2087_v47, 0 }
 0x285   : > { %13213 = vmatprep.subr.bf16.mxu0 %v18298_v33  ;;  %13221 = vmatprep.mubr.msk.bf16.mxu1 %vm14771_vm0, %v18298_v33  ;;  %v15473_v13 = vrot.slane %v12616_v29, %v15025_v59  ;;  %v15476_v57 = vpack.i.bf16 %v1955_v39, %v15365_v26  ;;  %v15479_v4 = vpack.i.bf16 %v1971_v1, %v15367_v15  ;;  %v2541_v6 = vsel %vm2260_vm1, %v2090_v50, 0 }
 0x286   : > { %13231 = vmatprep.subr.bf16.mxu1 %v18298_v33  ;;  %v15484_v37 = vpack.i.bf16 %v1987_v53, %v1979_v48  ;;  %v15487_v63 = vpack.i.bf16 %v15441_v30, %v2011_v31  ;;  %v15494_v26 = vpack.i.bf16 %v15453_v45, %v15451_v54  ;;  %v15503_v39 = vpack.i.bf16 %v15463_v46, %v1995_v21 }
 0x287   : > { %v15498_v15 = vpack.i.bf16 %v15473_v13, %v15466_v49  ;;  %v15507_v48 = vpack.i.bf16 %v15448_v43, %v15446_v52  ;;  %v2089_v1 = vpack.c.bf16 %v1987_v53, %v1987_v53  ;;  %v15514_v0 = vpack.i.bf16 %v15461_v11, %v15459_v5 }
 0x288   : > { %v12619_v27 = vcombine.low %v15325_v41, %v15325_v41  ;;  %v12620_v21 = vcombine.high %v15325_v41, %v15325_v41  ;;  %v12617_v29 = vcombine.low %v15313_v56, %v15313_v56  ;;  %v12618_v47 = vcombine.high %v15313_v56, %v15313_v56 }
 0x289   : > { %v12623_v53 = vcombine.low %v15329_v55, %v15329_v55  ;;  %v12624_v50 = vcombine.high %v15329_v55, %v15329_v55  ;;  %v15533_v41 = vpack.c.bf16 %v15322_v58, %v15322_v58  ;;  %v12621_v7 = vcombine.low %v15332_v60, %v15332_v60 }
 0x28a   : > { %13204 = vmatmul.mubr.msk.bf16.vlgmr.msra.gmra.mrb[12].mxu0 %vm2260_vm1, %v15457_v28  ;;  %v12622_v56 = vcombine.high %v15332_v60, %v15332_v60  ;;  %v12628_v2 = vcombine.high %v15370_v61, %v15370_v61  ;;  %v2495_v34 = vsel %vm2260_vm1, %v2089_v1, 0  ;;  %v15544_v55 = vpack.c.bf16 %v15344_v36, %v15344_v36 }
 0x28b   : > { %13214 = vmatpush3.bf16.xpose.msra.mxu0 %v2403_v17  ;;  %13222 = vmatmul.mubr.msk.bf16.vlgmr.msra.gmra.mrb[8].mxu1 %vm2260_vm1, %v15470_v12  ;;  %v2092_v17 = vpack.c.bf16 %v2011_v31, %v2011_v31  ;;  %v2091_v31 = vpack.c.bf16 %v15463_v46, %v15463_v46  ;;  %v15551_v58 = vrot.slane %v12617_v29, %v15025_v59 }
 0x28c   : > { %13232 = vmatpush3.bf16.xpose.msra.mxu1 %v2541_v6  ;;  %13215 = vmatprep.mubr.msk.bf16.mxu0 %vm14771_vm0, %v18298_v33  ;;  %v12627_v6 = vcombine.low %v15370_v61, %v15370_v61  ;;  %v15554_v60 = vrot.slane %v12618_v47, %v15025_v59  ;;  %v15557_v61 = vrot.slane %v12619_v27, %v15025_v59 }
 0x28d   : > { %13225 = vmatprep.subr.bf16.mxu0 %v18298_v33  ;;  %13233 = vmatprep.mubr.msk.bf16.mxu1 %vm14771_vm0, %v18298_v33  ;;  %v15560_v1 = vrot.slane %v12620_v21, %v15025_v59  ;;  %v2633_v36 = vsel %vm2260_vm1, %v2092_v17, 0  ;;  %v15566_v46 = vrot.slane %v12623_v53, %v15025_v59  ;;  %v15569_v29 = vrot.slane %v12624_v50, %v15025_v59 }
 0x28e   : > { %13243 = vmatprep.subr.bf16.mxu1 %v18298_v33  ;;  %v12625_v47 = vcombine.low %v15335_v20, %v15335_v20  ;;  %v15579_v27 = vrot.slane %v12622_v56, %v15025_v59  ;;  %v12626_v21 = vcombine.high %v15335_v20, %v15335_v20  ;;  %v15590_v50 = vrot.slane %v12627_v6, %v15025_v59 }
 0x28f   : > { %v15599_v20 = vrot.slane %v12628_v2, %v15025_v59  ;;  %v12630_v56 = vcombine.high %v15373_v62, %v15373_v62  ;;  %v2094_v6 = vpack.c.bf16 %v15446_v52, %v15446_v52  ;;  %v15618_v2 = vpack.c.bf16 %v15354_v14, %v15354_v14 }
 0x290   : > { %v15587_v53 = vrot.slane %v12625_v47, %v15025_v59  ;;  %18365 = vst [vmem:[#allocation16_spill] sm:$0xff] %v15590_v50  ;;  %v15596_v17 = vrot.slane %v12626_v21, %v15025_v59  ;;  %v15614_v21 = vpack.i.bf16 %v15554_v60, %v15551_v58  ;;  %v15629_v52 = vpack.i.bf16 %v15569_v29, %v15566_v46 }
 0x291   : > { %18367 = vst [vmem:[#allocation18_spill] sm:$0xff] %v15599_v20  ;;  %v15625_v19 = vrot.slane %v12630_v56, %v15025_v59  ;;  %v15637_v35 = vpack.c.bf16 %v15347_v16, %v15347_v16  ;;  %v2093_v14 = vpack.c.bf16 %v15441_v30, %v15441_v30  ;;  %v2587_v56 = vsel %vm2260_vm1, %v2091_v31, 0 }
 0x292   : > { %13216 = vmatmul.mubr.msk.bf16.vlgmr.msra.gmra.mrb[16].mxu0 %vm2260_vm1, %v15533_v41  ;;  %18366 = vst [vmem:[#allocation17_spill] sm:$0xff] %v15596_v17  ;;  %18370 = vst [vmem:[#allocation21_spill] sm:$0xff] %v15614_v21  ;;  %v15656_v16 = vpack.i.bf16 %v15599_v20, %v15590_v50  ;;  %v2725_v30 = vsel %vm2260_vm1, %v2094_v6, 0 }
 0x293   : > { %13226 = vmatpush3.bf16.xpose.msra.mxu0 %v2495_v34  ;;  %13234 = vmatmul.mubr.msk.bf16.vlgmr.msra.gmra.mrb[12].mxu1 %vm2260_vm1, %v15544_v55  ;;  %v15576_v34 = vrot.slane %v12621_v7, %v15025_v59  ;;  %v12629_v7 = vcombine.low %v15373_v62, %v15373_v62  ;;  %v15622_v62 = vpack.c.bf16 %v15341_v32, %v15341_v32  ;;  %v2679_v25 = vsel %vm2260_vm1, %v2093_v14, 0 }
 0x294   : > { %13244 = vmatpush3.bf16.xpose.msra.mxu1 %v2633_v36  ;;  %13227 = vmatprep.mubr.msk.bf16.mxu0 %vm14771_vm0, %v18298_v33  ;;  %v15605_v36 = vpack.i.bf16 %v15560_v1, %v15557_v61  ;;  %18371 = vst [vmem:[#allocation22_spill] sm:$0xff] %v15625_v19  ;;  %18372 = vst [vmem:[#allocation23_spill] sm:$0xff] %v15629_v52  ;;  %v2095_v14 = vpack.c.bf16 %v15448_v43, %v15448_v43 }
 0x295   : > { %13237 = vmatprep.subr.bf16.mxu0 %v18298_v33  ;;  %13245 = vmatprep.mubr.msk.bf16.mxu1 %vm14771_vm0, %v18298_v33  ;;  %v15610_v47 = vrot.slane %v12629_v7, %v15025_v59  ;;  %v15633_v7 = vpack.c.bf16 %v15360_v42, %v15360_v42  ;;  %v15643_v32 = vpack.i.bf16 %v15579_v27, %v15576_v34 }
 0x296   : > { %13255 = vmatprep.subr.bf16.mxu1 %v18298_v33  ;;  %18368 = vst [vmem:[#allocation19_spill] sm:$0xff] %v15605_v36  ;;  %v2096_v42 = vpack.c.bf16 %v15451_v54, %v15451_v54  ;;  %v15652_v33 = vpack.i.bf16 %v15596_v17, %v15587_v53  ;;  %18375 = vst [vmem:[#allocation26_spill] sm:$0xff] %v15656_v16  ;;  %v18377_v54 = vmov 0.0  }
 0x297   : > { %18369 = vst [vmem:[#allocation20_spill] sm:$0xff] %v15610_v47  ;;  %18373 = vst [vmem:[#allocation24_spill] sm:$0xff] %v15643_v32  ;;  %v15663_v31 = vpack.i.bf16 %v15625_v19, %v15610_v47 }
 0x298   : > { %18374 = vst [vmem:[#allocation25_spill] sm:$0xff] %v15652_v33  ;;  %v2817_v6 = vsel %vm2260_vm1, %v2096_v42, 0  ;;  %v15693_v42 = vpack.c.bf16 %v15384_v38, %v15384_v38  ;;  %v2244_v38 = vpack.c.bf16 %v15466_v49, %v15466_v49 }
 0x299   : > { %18376 = vst [vmem:[#allocation27_spill] sm:$0xff] %v15663_v31 }
 0x29a   : > { %13228 = vmatmul.mubr.msk.bf16.vlgmr.msra.gmra.mrb[20].mxu0 %vm2260_vm1, %v15622_v62 }
 0x29b   : > { %13238 = vmatpush3.bf16.xpose.msra.mxu0 %v2587_v56  ;;  %13246 = vmatmul.mubr.msk.bf16.vlgmr.msra.gmra.mrb[16].mxu1 %vm2260_vm1, %v15618_v2  ;;  %v15689_v56 = vpack.c.bf16 %v15357_v8, %v15357_v8  ;;  %v2097_v8 = vpack.c.bf16 %v15453_v45, %v15453_v45  ;;  %v3228_v45 = vsel %vm3226_vm2, %v2244_v38, 0 }
 0x29c   : > { %13256 = vmatpush3.bf16.xpose.msra.mxu1 %v2725_v30  ;;  %13239 = vmatprep.mubr.msk.bf16.mxu0 %vm14771_vm0, %v18377_v54  ;;  %v2771_v30 = vsel %vm2260_vm1, %v2095_v14, 0 }
 0x29d   : > { %13249 = vmatprep.subr.bf16.mxu0 %v18377_v54  ;;  %13257 = vmatprep.mubr.msk.bf16.mxu1 %vm14771_vm0, %v18377_v54  ;;  %v2863_v14 = vsel %vm2260_vm1, %v2097_v8, 0 }
 0x29e   : > { %13267 = vmatprep.subr.bf16.mxu1 %v18377_v54 }
 0x2a2   : > { %13240 = vmatmul.mubr.msk.bf16.vlgmr.msra.gmra.mrb[24].mxu0 %vm2260_vm1, %v15637_v35 }
 0x2a3   : > { %13250 = vmatpush3.bf16.xpose.msra.mxu0 %v2679_v25  ;;  %13258 = vmatmul.mubr.msk.bf16.vlgmr.msra.gmra.mrb[20].mxu1 %vm2260_vm1, %v15633_v7  ;;  %v2098_v25 = vpack.c.bf16 %v15459_v5, %v15459_v5  ;;  %v15713_v5 = vpack.c.bf16 %v15363_v44, %v15363_v44  ;;  %v2099_v44 = vpack.c.bf16 %v15461_v11, %v15461_v11 }
 0x2a4   : > { %13268 = vmatpush3.bf16.xpose.msra.mxu1 %v2817_v6  ;;  %13251 = vmatprep.mubr.msk.bf16.mxu0 %vm14771_vm0, %v18377_v54  ;;  %v15717_v6 = vpack.c.bf16 %v15390_v51, %v15390_v51  ;;  %v15735_v51 = vpack.c.bf16 %v15387_v9, %v15387_v9  ;;  %v2245_v11 = vpack.c.bf16 %v15473_v13, %v15473_v13 }
 0x2a5   : > { %13261 = vmatprep.subr.bf16.mxu0 %v18377_v54  ;;  %13269 = vmatprep.mubr.msk.bf16.mxu1 %vm14771_vm0, %v18377_v54  ;;  %v2909_v43 = vsel %vm2260_vm1, %v2098_v25, 0  ;;  %v2955_v49 = vsel %vm2260_vm1, %v2099_v44, 0  ;;  %v15747_v25 = vpack.c.bf16 %v15393_v10, %v15393_v10 }
 0x2a6   : > { %13279 = vmatprep.subr.bf16.mxu1 %v18377_v54  ;;  %v3274_v9 = vsel %vm3226_vm2, %v2245_v11, 0 }
 0x2aa   : > { %13252 = vmatmul.mubr.msk.bf16.vlgmr.msra.gmra.mrb[28].mxu0 %vm2260_vm1, %v15689_v56 }
 0x2ab   : > { %13262 = vmatpush3.bf16.xpose.msra.mxu0 %v2771_v30  ;;  %13270 = vmatmul.mubr.msk.bf16.vlgmr.msra.gmra.mrb[24].mxu1 %vm2260_vm1, %v15693_v42  ;;  %v18378_v30 = vlaneseq }
 0x2ac   : > { %13280 = vmatpush3.bf16.xpose.msra.mxu1 %v2909_v43  ;;  %13263 = vmatprep.mubr.msk.bf16.mxu0 %vm14771_vm0, %v18377_v54 }
 0x2ad   : > { %13273 = vmatprep.subr.bf16.mxu0 %v18377_v54  ;;  %13281 = vmatprep.mubr.msk.bf16.mxu1 %vm14771_vm0, %v18377_v54  ;;  %v1921_v43 = vand.u32 127, %v18378_v30 }
 0x2ae   : > { %13291 = vmatprep.subr.bf16.mxu1 %v18377_v54 }
 0x2af   : > { %vm1922_vm3 = vcmp.gt.s32.totalorder %v1921_v43, %v14988_v40 }
 0x2b0   : > { %v15758_v8 = vsel %vm1922_vm3, -1e+30, %v18377_v54 }
 0x2b1   : > { %18379 = vst [vmem:[#allocation28_spill] sm:$0xff] %v15758_v8 }
 0x2b2   : > { %13264 = vmatmul.mubr.msk.bf16.vlgmr.msra.gmra.mrb[32].mxu0 %vm2260_vm1, %v15713_v5 }
 0x2b3   : > { %13274 = vmatpush3.bf16.xpose.msra.mxu0 %v2863_v14  ;;  %13282 = vmatmul.mubr.msk.bf16.vlgmr.msra.gmra.mrb[28].mxu1 %vm2260_vm1, %v15717_v6 }
 0x2b4   : > { %13292 = vmatpush3.bf16.msra.mxu1 %v3228_v45  ;;  %13275 = vmatprep.mubr.msk.bf16.mxu0 %vm14771_vm0, %v18377_v54 }
 0x2b5   : > { %13285 = vmatprep.subr.bf16.mxu0 %v18377_v54  ;;  %13293 = vmatprep.mubr.msk.bf16.mxu1 %vm14771_vm0, %v18377_v54 }
 0x2b6   : > { %13303 = vmatprep.subr.bf16.mxu1 %v18377_v54 }
 0x2ba   : > { %13276 = vmatmul.mubr.msk.bf16.vlgmr.msra.gmra.mrb[36].mxu0 %vm2260_vm1, %v15735_v51 }
 0x2bb   : > { %13286 = vmatpush3.bf16.xpose.msra.mxu0 %v2955_v49  ;;  %13287 = vmatprep.mubr.msk.bf16.mxu0 %vm14771_vm0, %v18377_v54 }
 0x2bc   : > { %13297 = vmatprep.subr.bf16.mxu0 %v18377_v54 }
 0x2c2   : > { %13288 = vmatmul.mubr.msk.bf16.vlgmr.msra.gmra.mrb[40].mxu0 %vm2260_vm1, %v15747_v25 }
 0x2c3   : > { %13298 = vmatpush3.bf16.msra.mxu0 %v3274_v9  ;;  %13299 = vmatprep.mubr.msk.bf16.mxu0 %vm14771_vm0, %v18377_v54 }
 0x2c4   : > { %13309 = vmatprep.subr.bf16.mxu0 %v18377_v54 }
 0x355   : > { %v2301_v13 = vpop.f32.mrb[8].mxu0 }
 0x356   : > { %v2997_v10 = vmul.f32 0.17677669, %v2301_v13  ;;  %v13199_v38 = vpop.f32.mrb[9].mxu0  ;;  %v2393_v14 = vpop.f32.mrb[4].mxu1 }
 0x357   : > { %v2304_v45 = vpop.f32.mrb[10].mxu0  ;;  %v2999_v44 = vmul.f32 0.17677669, %v2393_v14  ;;  %v13211_v49 = vpop.f32.mrb[5].mxu1 }
 0x358   : > { %v13200_v11 = vpop.f32.mrb[11].mxu0  ;;  %v2396_v9 = vpop.f32.mrb[6].mxu1  ;;  %v15761_v24 = vadd.f32 %v2997_v10, %v15758_v8 }
 0x359   : > { %v13212_v23 = vpop.f32.mrb[7].mxu1  ;;  %v15766_v43 = vadd.f32 %v2999_v44, %v15758_v8 }
 0x35a   : > { %v3030_v30 = vsel %vm3029_vm4, %v15761_v24, -inf }
 0x35b   : > { %3031 = vmax.xlane.f32.xlu0 %v3030_v30  ;;  %v3036_v14 = vsel %vm3029_vm4, %v15766_v43, -inf }
 0x35d   : > { %v2347_v13 = vpop.f32.mrb[12].mxu0 }
 0x35e   : > { %v2998_v38 = vmul.f32 0.17677669, %v2347_v13  ;;  %v13205_v40 = vpop.f32.mrb[13].mxu0  ;;  %v2485_v45 = vpop.f32.mrb[8].mxu1 }
 0x35f   : > { %v3001_v49 = vmul.f32 0.17677669, %v2485_v45  ;;  %3037 = vmax.xlane.f32.xlu0 %v3036_v14  ;;  %v2350_v11 = vpop.f32.mrb[14].mxu0  ;;  %v13223_v10 = vpop.f32.mrb[9].mxu1 }
 0x360   : > { %v13206_v9 = vpop.f32.mrb[15].mxu0  ;;  %v2488_v23 = vpop.f32.mrb[10].mxu1  ;;  %v15771_v22 = vadd.f32 %v2998_v38, %v15758_v8 }
 0x361   : > { %v13224_v59 = vpop.f32.mrb[11].mxu1  ;;  %v15774_v44 = vadd.f32 %v3001_v49, %v15758_v8 }
 0x362   : > { %v3033_v40 = vsel %vm3029_vm4, %v15771_v22, -inf }
 0x363   : > { %3034 = vmax.xlane.f32.xlu1 %v3033_v40  ;;  %v3042_v30 = vsel %vm3029_vm4, %v15774_v44, -inf }
 0x364   : > { %3043 = vmax.xlane.f32.xlu0 %v3042_v30 }
 0x365   : > { %v2439_v13 = vpop.f32.mrb[16].mxu0 }
 0x366   : > { %v3000_v45 = vmul.f32 0.17677669, %v2439_v13  ;;  %v13217_v14 = vpop.f32.mrb[17].mxu0  ;;  %v2577_v11 = vpop.f32.mrb[12].mxu1 }
 0x367   : > { %v2442_v10 = vpop.f32.mrb[18].mxu0  ;;  %v3003_v9 = vmul.f32 0.17677669, %v2577_v11  ;;  %v13235_v38 = vpop.f32.mrb[13].mxu1 }
 0x368   : > { %v13218_v23 = vpop.f32.mrb[19].mxu0  ;;  %v2580_v59 = vpop.f32.mrb[14].mxu1  ;;  %v15781_v49 = vadd.f32 %v3000_v45, %v15758_v8 }
 0x369   : > { %v13236_v31 = vpop.f32.mrb[15].mxu1  ;;  %v15784_v16 = vadd.f32 %v3003_v9, %v15758_v8 }
 0x36a   : > { %v3039_v40 = vsel %vm3029_vm4, %v15781_v49, -inf }
 0x36b   : > { %3040 = vmax.xlane.f32.xlu1 %v3039_v40  ;;  %v3048_v30 = vsel %vm3029_vm4, %v15784_v16, -inf }
 0x36c   : > { %3049 = vmax.xlane.f32.xlu0 %v3048_v30 }
 0x36d   : > { %v2531_v13 = vpop.f32.mrb[20].mxu0 }
 0x36e   : > { %v3002_v14 = vmul.f32 0.17677669, %v2531_v13  ;;  %v13229_v11 = vpop.f32.mrb[21].mxu0  ;;  %v2669_v10 = vpop.f32.mrb[16].mxu1 }
 0x36f   : > { %v2534_v38 = vpop.f32.mrb[22].mxu0  ;;  %v3005_v23 = vmul.f32 0.17677669, %v2669_v10  ;;  %v13247_v45 = vpop.f32.mrb[17].mxu1 }
 0x370   : > { %v13230_v59 = vpop.f32.mrb[23].mxu0  ;;  %v2672_v31 = vpop.f32.mrb[18].mxu1  ;;  %v15791_v9 = vadd.f32 %v3002_v14, %v15758_v8 }
 0x371   : > { %v13248_v33 = vpop.f32.mrb[19].mxu1  ;;  %v15794_v32 = vadd.f32 %v3005_v23, %v15758_v8 }
 0x372   : > { %v3045_v40 = vsel %vm3029_vm4, %v15791_v9, -inf }
 0x373   : > { %3046 = vmax.xlane.f32.xlu1 %v3045_v40  ;;  %v3054_v30 = vsel %vm3029_vm4, %v15794_v32, -inf }
 0x374   : > { %3055 = vmax.xlane.f32.xlu0 %v3054_v30 }
 0x375   : > { %v2623_v13 = vpop.f32.mrb[24].mxu0 }
 0x376   : > { %v3004_v11 = vmul.f32 0.17677669, %v2623_v13  ;;  %v13241_v10 = vpop.f32.mrb[25].mxu0  ;;  %v2761_v38 = vpop.f32.mrb[20].mxu1 }
 0x377   : > { %v2626_v45 = vpop.f32.mrb[26].mxu0  ;;  %v3007_v59 = vmul.f32 0.17677669, %v2761_v38  ;;  %v13259_v14 = vpop.f32.mrb[21].mxu1 }
 0x378   : > { %v13242_v31 = vpop.f32.mrb[27].mxu0  ;;  %v2764_v33 = vpop.f32.mrb[22].mxu1  ;;  %v15801_v23 = vadd.f32 %v3004_v11, %v15758_v8 }
 0x379   : > { %v13260_v52 = vpop.f32.mrb[23].mxu1  ;;  %v15804_v21 = vadd.f32 %v3007_v59, %v15758_v8 }
 0x37a   : > { %v3051_v40 = vsel %vm3029_vm4, %v15801_v23, -inf }
 0x37b   : > { %3052 = vmax.xlane.f32.xlu1 %v3051_v40  ;;  %v3060_v30 = vsel %vm3029_vm4, %v15804_v21, -inf }
 0x37c   : > { %3061 = vmax.xlane.f32.xlu0 %v3060_v30 }
 0x37d   : > { %v2715_v13 = vpop.f32.mrb[28].mxu0 }
 0x37e   : > { %v3006_v10 = vmul.f32 0.17677669, %v2715_v13  ;;  %v13253_v38 = vpop.f32.mrb[29].mxu0  ;;  %v2853_v45 = vpop.f32.mrb[24].mxu1 }
 0x37f   : > { %v2718_v14 = vpop.f32.mrb[30].mxu0  ;;  %v3009_v31 = vmul.f32 0.17677669, %v2853_v45  ;;  %v13271_v11 = vpop.f32.mrb[25].mxu1 }
 0x380   : > { %v13254_v33 = vpop.f32.mrb[31].mxu0  ;;  %v2856_v52 = vpop.f32.mrb[26].mxu1  ;;  %v15811_v59 = vadd.f32 %v3006_v10, %v15758_v8 }
 0x381   : > { %v13272_v36 = vpop.f32.mrb[27].mxu1  ;;  %v15814_v19 = vadd.f32 %v3009_v31, %v15758_v8 }
 0x382   : > { %v3057_v40 = vsel %vm3029_vm4, %v15811_v59, -inf }
 0x383   : > { %3058 = vmax.xlane.f32.xlu1 %v3057_v40  ;;  %v3066_v30 = vsel %vm3029_vm4, %v15814_v19, -inf }
 0x384   : > { %3067 = vmax.xlane.f32.xlu0 %v3066_v30 }
 0x385   : > { %v2807_v13 = vpop.f32.mrb[32].mxu0 }
 0x386   : > { %v3008_v38 = vmul.f32 0.17677669, %v2807_v13  ;;  %v13265_v45 = vpop.f32.mrb[33].mxu0  ;;  %v2945_v14 = vpop.f32.mrb[28].mxu1 }
 0x387   : > { %v2810_v11 = vpop.f32.mrb[34].mxu0  ;;  %v3011_v33 = vmul.f32 0.17677669, %v2945_v14  ;;  %v13283_v10 = vpop.f32.mrb[29].mxu1 }
 0x388   : > { %v13266_v52 = vpop.f32.mrb[35].mxu0  ;;  %v2948_v36 = vpop.f32.mrb[30].mxu1  ;;  %v15821_v31 = vadd.f32 %v3008_v38, %v15758_v8 }
 0x389   : > { %v13284_v47 = vpop.f32.mrb[31].mxu1  ;;  %v15824_v20 = vadd.f32 %v3011_v33, %v15758_v8 }
 0x38a   : > { %v3063_v40 = vsel %vm3029_vm4, %v15821_v31, -inf }
 0x38b   : > { %3064 = vmax.xlane.f32.xlu1 %v3063_v40  ;;  %v3072_v30 = vsel %vm3029_vm4, %v15824_v20, -inf }
 0x38c   : > { %3073 = vmax.xlane.f32.xlu0 %v3072_v30 }
 0x38d   : > { %v2899_v13 = vpop.f32.mrb[36].mxu0 }
 0x38e   : > { %v3010_v45 = vmul.f32 0.17677669, %v2899_v13  ;;  %v13277_v14 = vpop.f32.mrb[37].mxu0 }
 0x38f   : > { %v2902_v11 = vpop.f32.mrb[38].mxu0 }
 0x390   : > { %v13278_v10 = vpop.f32.mrb[39].mxu0  ;;  %v15831_v38 = vadd.f32 %v3010_v45, %v15758_v8 }
 0x392   : > { %v3069_v47 = vsel %vm3029_vm4, %v15831_v38, -inf }
 0x393   : > { %3070 = vmax.xlane.f32.xlu1 %v3069_v47 }
 0x395   : > { %v2991_v33 = vpop.f32.mrb[40].mxu0 }
 0x396   : > { %v3012_v52 = vmul.f32 0.17677669, %v2991_v33  ;;  %v13289_v36 = vpop.f32.mrb[41].mxu0 }
 0x397   : > { %v2994_v40 = vpop.f32.mrb[42].mxu0 }
 0x398   : > { %v13290_v50 = vpop.f32.mrb[43].mxu0  ;;  %v15836_v17 = vadd.f32 %v3012_v52, %v15758_v8 }
 0x39a   : > { %v3075_v30 = vsel %vm3029_vm4, %v15836_v17, -inf }
 0x39b   : > { %3076 = vmax.xlane.f32.xlu1 %v3075_v30 }
 0x3e8   : > { %v3032_v13 = vpop.xlane.xlu0 %3031 }
 0x3e9   : > { %v3078_v45 = vsub.f32 %v15761_v24, %v3032_v13 }
 0x3eb   : > { %v3094_v14 = vmul.f32 1.442695, %v3078_v45 }
 0x3ec   : > { %v3038_v11 = vpop.xlane.xlu0 %3037 }
 0x3ed   : > { %14404 = vpow2.f32 %v3094_v14  ;;  %v3080_v10 = vsub.f32 %v15766_v43, %v3038_v11 }
 0x3ef   : > { %v3098_v47 = vmul.f32 1.442695, %v3080_v10 }
 0x3f0   : > { %v3035_v33 = vpop.xlane.xlu1 %3034 }
 0x3f1   : > { %14406 = vpow2.f32 %v3098_v47  ;;  %v3079_v50 = vsub.f32 %v15771_v22, %v3035_v33  ;;  %v3044_v36 = vpop.xlane.xlu0 %3043 }
 0x3f2   : > { %v3082_v52 = vsub.f32 %v15774_v44, %v3044_v36 }
 0x3f3   : > { %v3096_v40 = vmul.f32 1.442695, %v3079_v50 }
 0x3f4   : > { %v3102_v8 = vmul.f32 1.442695, %v3082_v52 }
 0x3f5   : > { %14408 = vpow2.f32 %v3096_v40 }
 0x3f6   : > { %14410 = vpow2.f32 %v3102_v8 }
 0x3f7   : > { %v15844_v30 = vpop.eup %14404 }
 0x3f8   : > { %v3041_v24 = vpop.xlane.xlu1 %3040  ;;  %v3126_v13 = vsel %vm3029_vm4, %v15844_v30, 0.0 }
 0x3f9   : > { %v3081_v43 = vsub.f32 %v15781_v49, %v3041_v24  ;;  %3127 = vadd.xlane.f32.xlu0 %v3126_v13  ;;  %v3050_v45 = vpop.xlane.xlu0 %3049 }
 0x3fa   : > { %v3084_v14 = vsub.f32 %v15784_v16, %v3050_v45 }
 0x3fb   : > { %v15850_v22 = vpop.eup %14406  ;;  %v3100_v11 = vmul.f32 1.442695, %v3081_v43 }
 0x3fc   : > { %v3106_v44 = vmul.f32 1.442695, %v3084_v14  ;;  %v3132_v10 = vsel %vm3029_vm4, %v15850_v22, 0.0 }
 0x3fd   : > { %14412 = vpow2.f32 %v3100_v11  ;;  %3133 = vadd.xlane.f32.xlu0 %v3132_v10 }
 0x3fe   : > { %14414 = vpow2.f32 %v3106_v44 }
 0x3ff   : > { %v15854_v8 = vpop.eup %14408 }
 0x400   : > { %v15856_v47 = vpop.eup %14410  ;;  %v3047_v33 = vpop.xlane.xlu1 %3046  ;;  %v3129_v49 = vsel %vm3029_vm4, %v15854_v8, 0.0 }
 0x401   : > { %v3083_v16 = vsub.f32 %v15791_v9, %v3047_v33  ;;  %3130 = vadd.xlane.f32.xlu1 %v3129_v49  ;;  %v3056_v50 = vpop.xlane.xlu0 %3055  ;;  %v3138_v36 = vsel %vm3029_vm4, %v15856_v47, 0.0 }
 0x402   : > { %v3086_v52 = vsub.f32 %v15794_v32, %v3056_v50  ;;  %3139 = vadd.xlane.f32.xlu0 %v3138_v36 }
 0x403   : > { %v3104_v40 = vmul.f32 1.442695, %v3083_v16 }
 0x404   : > { %v3110_v24 = vmul.f32 1.442695, %v3086_v52 }
 0x405   : > { %14416 = vpow2.f32 %v3104_v40 }
 0x406   : > { %14418 = vpow2.f32 %v3110_v24 }
 0x407   : > { %v15864_v13 = vpop.eup %14412 }
 0x408   : > { %v15866_v43 = vpop.eup %14414  ;;  %v3053_v45 = vpop.xlane.xlu1 %3052  ;;  %v3135_v9 = vsel %vm3029_vm4, %v15864_v13, 0.0 }
 0x409   : > { %v3085_v14 = vsub.f32 %v15801_v23, %v3053_v45  ;;  %3136 = vadd.xlane.f32.xlu1 %v3135_v9  ;;  %v3062_v11 = vpop.xlane.xlu0 %3061  ;;  %v3144_v32 = vsel %vm3029_vm4, %v15866_v43, 0.0 }
 0x40a   : > { %v3088_v44 = vsub.f32 %v15804_v21, %v3062_v11  ;;  %3145 = vadd.xlane.f32.xlu0 %v3144_v32 }
 0x40b   : > { %v3108_v10 = vmul.f32 1.442695, %v3085_v14 }
 0x40c   : > { %v3114_v33 = vmul.f32 1.442695, %v3088_v44 }
 0x40d   : > { %14420 = vpow2.f32 %v3108_v10 }
 0x40e   : > { %14422 = vpow2.f32 %v3114_v33 }
 0x40f   : > { %v15874_v49 = vpop.eup %14416 }
 0x410   : > { %v15876_v16 = vpop.eup %14418  ;;  %v3059_v50 = vpop.xlane.xlu1 %3058  ;;  %v3141_v23 = vsel %vm3029_vm4, %v15874_v49, 0.0 }
 0x411   : > { %v3087_v36 = vsub.f32 %v15811_v59, %v3059_v50  ;;  %3142 = vadd.xlane.f32.xlu1 %v3141_v23  ;;  %v3068_v52 = vpop.xlane.xlu0 %3067  ;;  %v3150_v21 = vsel %vm3029_vm4, %v15876_v16, 0.0 }
 0x412   : > { %v3090_v40 = vsub.f32 %v15814_v19, %v3068_v52  ;;  %3151 = vadd.xlane.f32.xlu0 %v3150_v21 }
 0x413   : > { %v3112_v24 = vmul.f32 1.442695, %v3087_v36 }
 0x414   : > { %v3118_v45 = vmul.f32 1.442695, %v3090_v40 }
 0x415   : > { %14424 = vpow2.f32 %v3112_v24 }
 0x416   : > { %14426 = vpow2.f32 %v3118_v45 }
 0x417   : > { %v15884_v9 = vpop.eup %14420 }
 0x418   : > { %v15886_v14 = vpop.eup %14422  ;;  %v3065_v11 = vpop.xlane.xlu1 %3064  ;;  %v3147_v59 = vsel %vm3029_vm4, %v15884_v9, 0.0 }
 0x419   : > { %v3089_v32 = vsub.f32 %v15821_v31, %v3065_v11  ;;  %3148 = vadd.xlane.f32.xlu1 %v3147_v59  ;;  %v3074_v44 = vpop.xlane.xlu0 %3073  ;;  %v3156_v19 = vsel %vm3029_vm4, %v15886_v14, 0.0 }
 0x41a   : > { %v3092_v10 = vsub.f32 %v15824_v20, %v3074_v44  ;;  %3157 = vadd.xlane.f32.xlu0 %v3156_v19 }
 0x41b   : > { %v3116_v33 = vmul.f32 1.442695, %v3089_v32 }
 0x41c   : > { %v3122_v50 = vmul.f32 1.442695, %v3092_v10 }
 0x41d   : > { %14428 = vpow2.f32 %v3116_v33 }
 0x41e   : > { %14430 = vpow2.f32 %v3122_v50 }
 0x41f   : > { %v15894_v23 = vpop.eup %14424 }
 0x420   : > { %v15896_v36 = vpop.eup %14426  ;;  %v3071_v52 = vpop.xlane.xlu1 %3070  ;;  %v3153_v31 = vsel %vm3029_vm4, %v15894_v23, 0.0 }
 0x421   : > { %v3091_v21 = vsub.f32 %v15831_v38, %v3071_v52  ;;  %3154 = vadd.xlane.f32.xlu1 %v3153_v31  ;;  %v3162_v40 = vsel %vm3029_vm4, %v15896_v36, 0.0 }
 0x422   : > { %3163 = vadd.xlane.f32.xlu0 %v3162_v40 }
 0x423   : > { %v3120_v20 = vmul.f32 1.442695, %v3091_v21 }
 0x425   : > { %14432 = vpow2.f32 %v3120_v20 }
 0x427   : > { %v15903_v24 = vpop.eup %14428 }
 0x428   : > { %v15905_v45 = vpop.eup %14430  ;;  %v3159_v11 = vsel %vm3029_vm4, %v15903_v24, 0.0  ;;  %v3077_v44 = vpop.xlane.xlu1 %3076 }
 0x429   : > { %3160 = vadd.xlane.f32.xlu1 %v3159_v11  ;;  %v3168_v59 = vsel %vm3029_vm4, %v15905_v45, 0.0  ;;  %v3093_v19 = vsub.f32 %v15836_v17, %v3077_v44  ;;  %v2246_v11 = vpack.c.bf16 %v15551_v58, %v15551_v58 }
 0x42a   : > { %3169 = vadd.xlane.f32.xlu0 %v3168_v59 }
 0x42b   : > { %v3124_v10 = vmul.f32 1.442695, %v3093_v19  ;;  %v3320_v19 = vsel %vm3226_vm2, %v2246_v11, 0 }
 0x42d   : > { %14434 = vpow2.f32 %v3124_v10 }
 0x42f   : > { %v15911_v38 = vpop.eup %14432 }
 0x430   : > { %v3165_v32 = vsel %vm3029_vm4, %v15911_v38, 0.0 }
 0x431   : > { %3166 = vadd.xlane.f32.xlu1 %v3165_v32 }
 0x437   : > { %v15936_v33 = vpop.eup %14434 }
 0x438   : > { %v3171_v17 = vsel %vm3029_vm4, %v15936_v33, 0.0 }
 0x440   : > { %14037 = vrot.lane.b32.xlu0 %v15476_v57, %s14772_s24 }
 0x442   : > { %14042 = vrot.lane.b32.xlu1 %v15479_v4, %s14772_s24 }
 0x444   : > { %14047 = vrot.lane.b32.xlu0 %v15484_v37, %s14772_s24 }
 0x448   : > { %4253 = vrot.lane.b32.xlu0 %v15533_v41, %s14772_s24 }
 0x44c   : > { %4302 = vrot.lane.b32.xlu0 %v15470_v12, %s14772_s24 }
 0x450   : > { %14057 = vrot.lane.b32.xlu0 %v15487_v63, %s14772_s24 }
 0x454   : > { %4449 = vrot.lane.b32.xlu0 %v15637_v35, %s14772_s24 }
 0x458   : > { %4498 = vrot.lane.b32.xlu0 %v15618_v2, %s14772_s24 }
 0x45c   : > { %14067 = vrot.lane.b32.xlu0 %v15494_v26, %s14772_s24 }
 0x460   : > { %4645 = vrot.lane.b32.xlu0 %v15713_v5, %s14772_s24 }
 0x464   : > { %4694 = vrot.lane.b32.xlu0 %v15693_v42, %s14772_s24 }
 0x466   : > { %3172 = vadd.xlane.f32.xlu1 %v3171_v17 }
 0x468   : > { %4792 = vrot.lane.b32.xlu0 %v15717_v6, %s14772_s24 }
 0x46c   : > { %14077 = vrot.lane.b32.xlu0 %v15498_v15, %s14772_s24 }
 0x477   : > { %4106 = vrot.lane.b32.xlu1 %v15403_v3, %s14772_s24 }
 0x47b   : > { %4155 = vrot.lane.b32.xlu1 %v15457_v28, %s14772_s24 }
 0x47f   : > { %4204 = vrot.lane.b32.xlu1 %v15415_v18, %s14772_s24 }
 0x483   : > { %14052 = vrot.lane.b32.xlu1 %v15503_v39, %s14772_s24 }
 0x486   : > { %v3128_v50 = vpop.xlane.xlu0 %3127 }
 0x487   : > { %14436 = vrcp.f32 %v3128_v50  ;;  %4351 = vrot.lane.b32.xlu1 %v15622_v62, %s14772_s24  ;;  %v2247_v50 = vpack.c.bf16 %v15554_v60, %v15554_v60 }
 0x48a   : > { %v3134_v52 = vpop.xlane.xlu0 %3133 }
 0x48b   : > { %14438 = vrcp.f32 %v3134_v52  ;;  %4400 = vrot.lane.b32.xlu1 %v15544_v55, %s14772_s24  ;;  %v2248_v52 = vpack.c.bf16 %v15557_v61, %v15557_v61 }
 0x48e   : > { %v3131_v31 = vpop.xlane.xlu1 %3130 }
 0x48f   : > { %14440 = vrcp.f32 %v3131_v31  ;;  %14062 = vrot.lane.b32.xlu1 %v15507_v48, %s14772_s24  ;;  %v3140_v21 = vpop.xlane.xlu0 %3139 }
 0x490   : > { %14442 = vrcp.f32 %v3140_v21 }
 0x491   : > { %v14437_v40 = vpop.eup %14436 }
 0x492   : > { %v3190_v20 = vmul.f32 %v14437_v40, %v15844_v30 }
 0x493   : > { %4547 = vrot.lane.b32.xlu1 %v15689_v56, %s14772_s24 }
 0x494   : > { %v3206_v59 = vpack.c.bf16 %v3190_v20, %v3190_v20 }
 0x495   : > { %v14439_v32 = vpop.eup %14438 }
 0x496   : > { %v3137_v44 = vpop.xlane.xlu1 %3136  ;;  %13294 = vmatmul.mubr.msk.bf16.vlgmr.msra.gmra.mrb[32].mxu1 %vm3222_vm5, %v3206_v59  ;;  %v3192_v58 = vmul.f32 %v14439_v32, %v15850_v22  ;;  %v3366_v22 = vsel %vm3226_vm2, %v2247_v50, 0  ;;  %v2249_v32 = vpack.c.bf16 %v15560_v1, %v15560_v1 }
 0x497   : > { %14444 = vrcp.f32 %v3137_v44  ;;  %13304 = vmatpush3.bf16.msra.mxu1 %v3320_v19  ;;  %4596 = vrot.lane.b32.xlu1 %v15633_v7, %s14772_s24  ;;  %v3146_v30 = vpop.xlane.xlu0 %3145  ;;  %v2250_v44 = vpack.c.bf16 %v15576_v34, %v15576_v34 }
 0x498   : > { %13305 = vmatprep.mubr.msk.bf16.mxu1 %vm14771_vm0, %v18377_v54  ;;  %13315 = vmatprep.subr.bf16.mxu1 %v18377_v54  ;;  %14446 = vrcp.f32 %v3146_v30  ;;  %v3208_v21 = vpack.c.bf16 %v3192_v58, %v3192_v58  ;;  %v3458_v58 = vsel %vm3226_vm2, %v2249_v32, 0 }
 0x499   : > { %v14441_v10 = vpop.eup %14440 }
 0x49a   : > { %v3191_v17 = vmul.f32 %v14441_v10, %v15854_v8  ;;  %v14443_v40 = vpop.eup %14442  ;;  %v3412_v8 = vsel %vm3226_vm2, %v2248_v52, 0  ;;  %v2251_v52 = vpack.c.bf16 %v15579_v27, %v15579_v27 }
 0x49b   : > { %14072 = vrot.lane.b32.xlu1 %v15514_v0, %s14772_s24  ;;  %v3194_v61 = vmul.f32 %v14443_v40, %v15856_v47 }
 0x49c   : > { %v3207_v31 = vpack.c.bf16 %v3191_v17, %v3191_v17 }
 0x49d   : > { %v3210_v19 = vpack.c.bf16 %v3194_v61, %v3194_v61  ;;  %v2253_v61 = vpack.c.bf16 %v15569_v29, %v15569_v29 }
 0x49e   : > { %13300 = vmatmul.mubr.msk.bf16.vlgmr.msra.gmra.mrb[44].mxu0 %vm3222_vm5, %v3207_v31  ;;  %v3143_v20 = vpop.xlane.xlu1 %3142  ;;  %13306 = vmatmul.mubr.msk.bf16.vlgmr.msra.gmra.mrb[36].mxu1 %vm3222_vm5, %v3208_v21  ;;  %v2252_v31 = vpack.c.bf16 %v15566_v46, %v15566_v46 }
 0x49f   : > { %13310 = vmatpush3.bf16.msra.mxu0 %v3366_v22  ;;  %14448 = vrcp.f32 %v3143_v20  ;;  %13316 = vmatpush3.bf16.msra.mxu1 %v3412_v8  ;;  %v3152_v60 = vpop.xlane.xlu0 %3151 }
 0x4a0   : > { %4743 = vrot.lane.b32.xlu1 %v15735_v51, %s14772_s24  ;;  %13311 = vmatprep.mubr.msk.bf16.mxu0 %vm14771_vm0, %v18377_v54  ;;  %14450 = vrcp.f32 %v3152_v60  ;;  %v3596_v8 = vsel %vm3226_vm2, %v2252_v31, 0 }
 0x4a1   : > { %v14445_v11 = vpop.eup %14444  ;;  %13317 = vmatprep.mubr.msk.bf16.mxu1 %vm14771_vm0, %v18377_v54  ;;  %13321 = vmatprep.subr.bf16.mxu0 %v18377_v54 }
 0x4a2   : > { %13327 = vmatprep.subr.bf16.mxu1 %v18377_v54  ;;  %v3193_v59 = vmul.f32 %v14445_v11, %v15864_v13  ;;  %v14447_v30 = vpop.eup %14446  ;;  %v3504_v13 = vsel %vm3226_vm2, %v2250_v44, 0  ;;  %v2254_v11 = vpack.c.bf16 %v15587_v53, %v15587_v53 }
 0x4a3   : > { %v3196_v34 = vmul.f32 %v14447_v30, %v15866_v43  ;;  %v3550_v43 = vsel %vm3226_vm2, %v2251_v52, 0 }
 0x4a4   : > { %4841 = vrot.lane.b32.xlu1 %v15747_v25, %s14772_s24  ;;  %v3209_v47 = vpack.c.bf16 %v3193_v59, %v3193_v59 }
 0x4a5   : > { %v3212_v40 = vpack.c.bf16 %v3196_v34, %v3196_v34 }
 0x4a6   : > { %13312 = vmatmul.mubr.msk.bf16.vlgmr.msra.gmra.mrb[48].mxu0 %vm3222_vm5, %v3209_v47  ;;  %v3149_v10 = vpop.xlane.xlu1 %3148  ;;  %13318 = vmatmul.mubr.msk.bf16.vlgmr.msra.gmra.mrb[40].mxu1 %vm3222_vm5, %v3210_v19  ;;  %v3688_v19 = vsel %vm3226_vm2, %v2254_v11, 0 }
 0x4a7   : > { %13322 = vmatpush3.bf16.msra.mxu0 %v3458_v58  ;;  %14452 = vrcp.f32 %v3149_v10  ;;  %13328 = vmatpush3.bf16.msra.mxu1 %v3504_v13  ;;  %v3158_v1 = vpop.xlane.xlu0 %3157  ;;  %v18380_v58 = vld [vmem:[#allocation17_spill] sm:$0xff]  ;;  %v18381_v13 = vld [vmem:[#allocation16_spill] sm:$0xff] }
 0x4a8   : > { %13323 = vmatprep.mubr.msk.bf16.mxu0 %vm14771_vm0, %v18377_v54  ;;  %13329 = vmatprep.mubr.msk.bf16.mxu1 %vm14771_vm0, %v18377_v54  ;;  %14454 = vrcp.f32 %v3158_v1  ;;  %v2255_v10 = vpack.c.bf16 %v18380_v58, %v18380_v58  ;;  %v2256_v1 = vpack.c.bf16 %v18381_v13, %v18381_v13 }
 0x4a9   : > { %v14449_v17 = vpop.eup %14448  ;;  %13333 = vmatprep.subr.bf16.mxu0 %v18377_v54  ;;  %13339 = vmatprep.subr.bf16.mxu1 %v18377_v54 }
 0x4aa   : > { %v3195_v50 = vmul.f32 %v14449_v17, %v15874_v49  ;;  %v14451_v22 = vpop.eup %14450  ;;  %v3780_v31 = vsel %vm3226_vm2, %v2256_v1, 0 }
 0x4ab   : > { %v3198_v46 = vmul.f32 %v14451_v22, %v15876_v16  ;;  %v3642_v16 = vsel %vm3226_vm2, %v2253_v61, 0  ;;  %v18382_v22 = vld [vmem:[#allocation18_spill] sm:$0xff] }
 0x4ac   : > { %v3211_v21 = vpack.c.bf16 %v3195_v50, %v3195_v50 }
 0x4ad   : > { %v3214_v32 = vpack.c.bf16 %v3198_v46, %v3198_v46 }
 0x4ae   : > { %13324 = vmatmul.mubr.msk.bf16.vlgmr.msra.gmra.mrb[52].mxu0 %vm3222_vm5, %v3211_v21  ;;  %v3155_v20 = vpop.xlane.xlu1 %3154  ;;  %13330 = vmatmul.mubr.msk.bf16.vlgmr.msra.gmra.mrb[44].mxu1 %vm3222_vm5, %v3212_v40 }
 0x4af   : > { %13334 = vmatpush3.bf16.msra.mxu0 %v3550_v43  ;;  %14456 = vrcp.f32 %v3155_v20  ;;  %13340 = vmatpush3.bf16.msra.mxu1 %v3596_v8  ;;  %v3164_v27 = vpop.xlane.xlu0 %3163  ;;  %v2257_v43 = vpack.c.bf16 %v18382_v22, %v18382_v22  ;;  %v18383_v20 = vld [vmem:[#allocation20_spill] sm:$0xff] }
 0x4b0   : > { %13335 = vmatprep.mubr.msk.bf16.mxu0 %vm14771_vm0, %v18377_v54  ;;  %13341 = vmatprep.mubr.msk.bf16.mxu1 %vm14771_vm0, %v18377_v54  ;;  %14458 = vrcp.f32 %v3164_v27  ;;  %v2258_v8 = vpack.c.bf16 %v18383_v20, %v18383_v20 }
 0x4b1   : > { %v14453_v49 = vpop.eup %14452  ;;  %13345 = vmatprep.subr.bf16.mxu0 %v18377_v54  ;;  %13351 = vmatprep.subr.bf16.mxu1 %v18377_v54 }
 0x4b2   : > { %v3197_v60 = vmul.f32 %v14453_v49, %v15884_v9  ;;  %v14455_v44 = vpop.eup %14454  ;;  %v3872_v61 = vsel %vm3226_vm2, %v2258_v8, 0 }
 0x4b3   : > { %v3200_v53 = vmul.f32 %v14455_v44, %v15886_v14  ;;  %v3734_v14 = vsel %vm3226_vm2, %v2255_v10, 0  ;;  %v18384_v44 = vld [vmem:[#allocation22_spill] sm:$0xff] }
 0x4b4   : > { %v3213_v59 = vpack.c.bf16 %v3197_v60, %v3197_v60 }
 0x4b5   : > { %v3216_v17 = vpack.c.bf16 %v3200_v53, %v3200_v53 }
 0x4b6   : > { %13336 = vmatmul.mubr.msk.bf16.vlgmr.msra.gmra.mrb[56].mxu0 %vm3222_vm5, %v3213_v59  ;;  %v3161_v47 = vpop.xlane.xlu1 %3160  ;;  %13342 = vmatmul.mubr.msk.bf16.vlgmr.msra.gmra.mrb[48].mxu1 %vm3222_vm5, %v3214_v32 }
 0x4b7   : > { %13346 = vmatpush3.bf16.msra.mxu0 %v3642_v16  ;;  %14460 = vrcp.f32 %v3161_v47  ;;  %13352 = vmatpush3.bf16.msra.mxu1 %v3688_v19  ;;  %v3170_v29 = vpop.xlane.xlu0 %3169  ;;  %v2259_v16 = vpack.c.bf16 %v18384_v44, %v18384_v44 }
 0x4b8   : > { %13347 = vmatprep.mubr.msk.bf16.mxu0 %vm14771_vm0, %v18377_v54  ;;  %13353 = vmatprep.mubr.msk.bf16.mxu1 %vm14771_vm0, %v18377_v54  ;;  %14462 = vrcp.f32 %v3170_v29 }
 0x4b9   : > { %v14457_v9 = vpop.eup %14456  ;;  %13357 = vmatprep.subr.bf16.mxu0 %v18377_v54  ;;  %13363 = vmatprep.subr.bf16.mxu1 %v18377_v54  ;;  %v3918_v53 = vsel %vm3226_vm2, %v2259_v16, 0 }
 0x4ba   : > { %v3199_v30 = vmul.f32 %v14457_v9, %v15894_v23  ;;  %v14459_v50 = vpop.eup %14458 }
 0x4bb   : > { %v3202_v23 = vmul.f32 %v14459_v50, %v15896_v36  ;;  %v14038_v27 = vpop.permute.xlu0 %14037  ;;  %v3826_v36 = vsel %vm3226_vm2, %v2257_v43, 0 }
 0x4bc   : > { %v3215_v34 = vpack.c.bf16 %v3199_v30, %v3199_v30  ;;  %v14039_v11 = vunpack.i.l.bf16 %v14038_v27 }
 0x4bd   : > { %v3218_v49 = vpack.c.bf16 %v3202_v23, %v3202_v23 }
 0x4be   : > { %13348 = vmatmul.mubr.msk.bf16.vlgmr.msra.gmra.mrb[60].mxu0 %vm3222_vm5, %v3215_v34  ;;  %v3167_v52 = vpop.xlane.xlu1 %3166  ;;  %13354 = vmatmul.mubr.msk.bf16.vlgmr.msra.gmra.mrb[52].mxu1 %vm3222_vm5, %v3216_v17  ;;  %v4025_v47 = vpack.c.bf16 %v14039_v11, %v14039_v11 }
 0x4bf   : > { %13358 = vmatpush3.bf16.msra.mxu0 %v3734_v14  ;;  %14464 = vrcp.f32 %v3167_v52  ;;  %13364 = vmatpush3.bf16.msra.mxu1 %v3780_v31  ;;  %v14040_v14 = vunpack.i.h.bf16 %v14038_v27 }
 0x4c0   : > { %13359 = vmatprep.mubr.msk.bf16.mxu0 %vm14771_vm0, %v18377_v54  ;;  %13365 = vmatprep.mubr.msk.bf16.mxu1 %vm14771_vm0, %v18377_v54 }
 0x4c1   : > { %v14461_v21 = vpop.eup %14460  ;;  %13369 = vmatprep.subr.bf16.mxu0 %v18377_v54  ;;  %13375 = vmatprep.subr.bf16.mxu1 %v18377_v54 }
 0x4c2   : > { %v3201_v40 = vmul.f32 %v14461_v21, %v15903_v24  ;;  %v14463_v60 = vpop.eup %14462  ;;  %v14043_v9 = vpop.permute.xlu1 %14042 }
 0x4c3   : > { %v3204_v24 = vmul.f32 %v14463_v60, %v15905_v45  ;;  %v4112_v45 = vsel %vm2260_vm1, %v4025_v47, 0  ;;  %v14044_v58 = vunpack.i.l.bf16 %v14043_v9  ;;  %v14045_v27 = vunpack.i.h.bf16 %v14043_v9 }
 0x4c4   : > { %v3217_v46 = vpack.c.bf16 %v3201_v40, %v3201_v40  ;;  %v4026_v40 = vpack.c.bf16 %v14040_v14, %v14040_v14 }
 0x4c5   : > { %v3220_v29 = vpack.c.bf16 %v3204_v24, %v3204_v24  ;;  %v4027_v13 = vpack.c.bf16 %v14044_v58, %v14044_v58 }
 0x4c6   : > { %13360 = vmatmul.mubr.msk.bf16.vlgmr.msra.gmra.mrb[64].mxu0 %vm3222_vm5, %v3217_v46  ;;  %13366 = vmatmul.mubr.msk.bf16.vlgmr.msra.gmra.mrb[56].mxu1 %vm3222_vm5, %v3218_v49  ;;  %v4161_v60 = vsel %vm2260_vm1, %v4026_v40, 0 }
 0x4c7   : > { %13370 = vmatpush3.bf16.msra.mxu0 %v3826_v36  ;;  %13376 = vmatpush3.bf16.msra.mxu1 %v3872_v61  ;;  %v4210_v50 = vsel %vm2260_vm1, %v4027_v13, 0  ;;  %v4028_v61 = vpack.c.bf16 %v14045_v27, %v14045_v27 }
 0x4c8   : > { %13371 = vmatprep.mubr.msk.bf16.mxu0 %vm14771_vm0, %v18377_v54  ;;  %13377 = vmatprep.mubr.msk.bf16.mxu1 %vm14771_vm0, %v18377_v54 }
 0x4c9   : > { %v14465_v59 = vpop.eup %14464  ;;  %13381 = vmatprep.subr.bf16.mxu0 %v18377_v54  ;;  %13387 = vmatprep.subr.bf16.mxu1 %v18377_v54  ;;  %v4259_v47 = vsel %vm2260_vm1, %v4028_v61, 0 }
 0x4ca   : > { %v3203_v32 = vmul.f32 %v14465_v59, %v15911_v38  ;;  %v14048_v38 = vpop.permute.xlu0 %14047 }
 0x4cb   : > { %v14049_v17 = vunpack.i.l.bf16 %v14048_v38  ;;  %v14050_v44 = vunpack.i.h.bf16 %v14048_v38 }
 0x4cc   : > { %v3219_v19 = vpack.c.bf16 %v3203_v32, %v3203_v32 }
 0x4cd   : > { %v4029_v23 = vpack.c.bf16 %v14049_v17, %v14049_v17 }
 0x4ce   : > { %13372 = vmatmul.mubr.msk.bf16.vlgmr.msra.gmra.mrb[68].mxu0 %vm3222_vm5, %v3219_v19  ;;  %13378 = vmatmul.mubr.msk.bf16.vlgmr.msra.gmra.mrb[60].mxu1 %vm3222_vm5, %v3220_v29  ;;  %v16088_v30 = vpop.permute.xlu0 %4253 }
 0x4cf   : > { %13382 = vmatpush3.bf16.msra.mxu0 %v3918_v53  ;;  %13389 = vmatprep.mubr.msk.bf16.mxu1 %vm14771_vm0, %v18377_v54  ;;  %v4308_v20 = vsel %vm2260_vm1, %v4029_v23, 0  ;;  %v4030_v53 = vpack.c.bf16 %v14050_v44, %v14050_v44 }
 0x4d0   : > { %13388 = vmatpush3.bf16.xpose.msra.mxu1 %v4112_v45  ;;  %13383 = vmatprep.mubr.msk.bf16.mxu0 %vm14771_vm0, %v18377_v54 }
 0x4d1   : > { %13399 = vmatprep.subr.bf16.mxu1 %v18377_v54  ;;  %13393 = vmatprep.subr.bf16.mxu0 %v18377_v54 }
 0x4d2   : > { %v4303_v1 = vpop.permute.xlu0 %4302 }
 0x4d6   : > { %v16095_v52 = vpop.permute.xlu0 %14057 }
 0x4d7   : > { %v14059_v59 = vunpack.i.l.bf16 %v16095_v52 }
 0x4d9   : > { %v4033_v19 = vpack.c.bf16 %v14059_v59, %v14059_v59 }
 0x4da   : > { %v16100_v8 = vpop.permute.xlu0 %4449 }
 0x4db   : > { %v4504_v38 = vsel %vm2260_vm1, %v4033_v19, 0 }
 0x4de   : > { %v4499_v11 = vpop.permute.xlu0 %4498 }
 0x4e2   : > { %v16120_v29 = vpop.permute.xlu0 %14067 }
 0x4e3   : > { %v14069_v14 = vunpack.i.l.bf16 %v16120_v29 }
 0x4e5   : > { %v4037_v40 = vpack.c.bf16 %v14069_v14, %v14069_v14 }
 0x4e6   : > { %v16128_v58 = vpop.permute.xlu0 %4645 }
 0x4e7   : > { %v4700_v27 = vsel %vm2260_vm1, %v4037_v40, 0 }
 0x4ea   : > { %v4695_v23 = vpop.permute.xlu0 %4694 }
 0x4f3   : > { %v3173_v10 = vpop.xlane.xlu1 %3172 }
 0x4f4   : > { %14466 = vrcp.f32 %v3173_v10 }
 0x4f7   : > { %v4107_v34 = vpop.permute.xlu1 %4106 }
 0x4f8   : > { %13390 = vmatmul.mubr.msk.bf16.vlgmr.msra.gmra.mrb[64].mxu1 %vm2260_vm1, %v4107_v34 }
 0x4f9   : > { %13400 = vmatpush3.bf16.xpose.msra.mxu1 %v4210_v50  ;;  %13401 = vmatprep.mubr.msk.bf16.mxu1 %vm14771_vm0, %v18377_v54 }
 0x4fa   : > { %13411 = vmatprep.subr.bf16.mxu1 %v18377_v54 }
 0x4fb   : > { %v4156_v31 = vpop.permute.xlu1 %4155 }
 0x4fe   : > { %v14467_v21 = vpop.eup %14466 }
 0x4ff   : > { %v4205_v22 = vpop.permute.xlu1 %4204  ;;  %v3205_v43 = vmul.f32 %v14467_v21, %v15936_v33 }
 0x500   : > { %13402 = vmatmul.mubr.msk.bf16.vlgmr.msra.gmra.mrb[68].mxu1 %vm2260_vm1, %v4205_v22 }
 0x501   : > { %13412 = vmatpush3.bf16.xpose.msra.mxu1 %v4308_v20  ;;  %v3221_v46 = vpack.c.bf16 %v3205_v43, %v3205_v43  ;;  %13413 = vmatprep.mubr.msk.bf16.mxu1 %vm14771_vm0, %v18377_v54  ;;  %v4793_v20 = vpop.permute.xlu0 %4792 }
 0x502   : > { %13423 = vmatprep.subr.bf16.mxu1 %v18377_v54 }
 0x503   : > { %13384 = vmatmul.mubr.msk.bf16.vlgmr.msra.gmra.mrb[72].mxu0 %vm3222_vm5, %v3221_v46  ;;  %v14053_v49 = vpop.permute.xlu1 %14052 }
 0x504   : > { %v14054_v33 = vunpack.i.l.bf16 %v14053_v49  ;;  %13394 = vmatpush3.bf16.xpose.msra.mxu0 %v4161_v60  ;;  %13395 = vmatprep.mubr.msk.bf16.mxu0 %vm14771_vm0, %v18377_v54  ;;  %v14055_v10 = vunpack.i.h.bf16 %v14053_v49 }
 0x505   : > { %13405 = vmatprep.subr.bf16.mxu0 %v18377_v54 }
 0x506   : > { %v4031_v36 = vpack.c.bf16 %v14054_v33, %v14054_v33  ;;  %v4032_v17 = vpack.c.bf16 %v14055_v10, %v14055_v10  ;;  %v14078_v33 = vpop.permute.xlu0 %14077 }
 0x507   : > { %v4352_v24 = vpop.permute.xlu1 %4351  ;;  %v14079_v61 = vunpack.i.l.bf16 %v14078_v33 }
 0x508   : > { %13414 = vmatmul.mubr.msk.bf16.vlgmr.msra.gmra.mrb[72].mxu1 %vm2260_vm1, %v4303_v1  ;;  %v4406_v32 = vsel %vm2260_vm1, %v4031_v36, 0  ;;  %v4357_v1 = vsel %vm2260_vm1, %v4030_v53, 0  ;;  %v4455_v21 = vsel %vm2260_vm1, %v4032_v17, 0  ;;  %v14080_v53 = vunpack.i.h.bf16 %v14078_v33 }
 0x509   : > { %13424 = vmatpush3.bf16.xpose.msra.mxu1 %v4406_v32  ;;  %13425 = vmatprep.mubr.msk.bf16.mxu1 %vm14771_vm0, %v18377_v54  ;;  %v4089_v59 = vpack.c.bf16 %v14079_v61, %v14079_v61 }
 0x50a   : > { %13435 = vmatprep.subr.bf16.mxu1 %v18377_v54 }
 0x50b   : > { %v4401_v16 = vpop.permute.xlu1 %4400  ;;  %13396 = vmatmul.mubr.msk.bf16.vlgmr.msra.gmra.mrb[76].mxu0 %vm2260_vm1, %v4156_v31  ;;  %v5117_v44 = vsel %vm3226_vm2, %v4089_v59, 0 }
 0x50c   : > { %13406 = vmatpush3.bf16.xpose.msra.mxu0 %v4259_v47  ;;  %13407 = vmatprep.mubr.msk.bf16.mxu0 %vm14771_vm0, %v18377_v54 }
 0x50d   : > { %13417 = vmatprep.subr.bf16.mxu0 %v18377_v54 }
 0x50f   : > { %v14063_v45 = vpop.permute.xlu1 %14062 }
 0x510   : > { %v14064_v9 = vunpack.i.l.bf16 %v14063_v45  ;;  %13426 = vmatmul.mubr.msk.bf16.vlgmr.msra.gmra.mrb[76].mxu1 %vm2260_vm1, %v4401_v16 }
 0x511   : > { %13436 = vmatpush3.bf16.xpose.msra.mxu1 %v4504_v38  ;;  %13437 = vmatprep.mubr.msk.bf16.mxu1 %vm14771_vm0, %v18377_v54 }
 0x512   : > { %13447 = vmatprep.subr.bf16.mxu1 %v18377_v54  ;;  %v4035_v34 = vpack.c.bf16 %v14064_v9, %v14064_v9  ;;  %v4090_v9 = vpack.c.bf16 %v14080_v53, %v14080_v53 }
 0x513   : > { %v4548_v13 = vpop.permute.xlu1 %4547  ;;  %13408 = vmatmul.mubr.msk.bf16.vlgmr.msra.gmra.mrb[80].mxu0 %vm2260_vm1, %v16088_v30  ;;  %v14060_v30 = vunpack.i.h.bf16 %v16095_v52  ;;  %v14065_v52 = vunpack.i.h.bf16 %v14063_v45 }
 0x514   : > { %13418 = vmatpush3.bf16.xpose.msra.mxu0 %v4357_v1  ;;  %13419 = vmatprep.mubr.msk.bf16.mxu0 %vm14771_vm0, %v18377_v54  ;;  %v4602_v31 = vsel %vm2260_vm1, %v4035_v34, 0 }
 0x515   : > { %13429 = vmatprep.subr.bf16.mxu0 %v18377_v54  ;;  %v4034_v43 = vpack.c.bf16 %v14060_v30, %v14060_v30  ;;  %v4036_v36 = vpack.c.bf16 %v14065_v52, %v14065_v52 }
 0x517   : > { %v4597_v50 = vpop.permute.xlu1 %4596  ;;  %v4553_v49 = vsel %vm2260_vm1, %v4034_v43, 0 }
 0x518   : > { %13438 = vmatmul.mubr.msk.bf16.vlgmr.msra.gmra.mrb[80].mxu1 %vm2260_vm1, %v4499_v11 }
 0x519   : > { %13448 = vmatpush3.bf16.xpose.msra.mxu1 %v4602_v31  ;;  %13449 = vmatprep.mubr.msk.bf16.mxu1 %vm14771_vm0, %v18377_v54 }
 0x51a   : > { %13459 = vmatprep.subr.bf16.mxu1 %v18377_v54 }
 0x51b   : > { %13420 = vmatmul.mubr.msk.bf16.vlgmr.msra.gmra.mrb[84].mxu0 %vm2260_vm1, %v4352_v24  ;;  %v14073_v22 = vpop.permute.xlu1 %14072  ;;  %v4651_v24 = vsel %vm2260_vm1, %v4036_v36, 0 }
 0x51c   : > { %13430 = vmatpush3.bf16.xpose.msra.mxu0 %v4455_v21  ;;  %13431 = vmatprep.mubr.msk.bf16.mxu0 %vm14771_vm0, %v18377_v54  ;;  %v14074_v46 = vunpack.i.l.bf16 %v14073_v22  ;;  %v14075_v16 = vunpack.i.h.bf16 %v14073_v22 }
 0x51d   : > { %13441 = vmatprep.subr.bf16.mxu0 %v18377_v54 }
 0x51e   : > { %v4039_v60 = vpack.c.bf16 %v14074_v46, %v14074_v46  ;;  %v4040_v19 = vpack.c.bf16 %v14075_v16, %v14075_v16 }
 0x520   : > { %13450 = vmatmul.mubr.msk.bf16.vlgmr.msra.gmra.mrb[84].mxu1 %vm2260_vm1, %v4597_v50  ;;  %v4798_v11 = vsel %vm2260_vm1, %v4039_v60, 0  ;;  %v4847_v45 = vsel %vm2260_vm1, %v4040_v19, 0 }
 0x521   : > { %13460 = vmatpush3.bf16.xpose.msra.mxu1 %v4700_v27  ;;  %13461 = vmatprep.mubr.msk.bf16.mxu1 %vm14771_vm0, %v18377_v54 }
 0x522   : > { %13471 = vmatprep.subr.bf16.mxu1 %v18377_v54 }
 0x523   : > { %13432 = vmatmul.mubr.msk.bf16.vlgmr.msra.gmra.mrb[88].mxu0 %vm2260_vm1, %v16100_v8  ;;  %v14070_v8 = vunpack.i.h.bf16 %v16120_v29  ;;  %v4744_v29 = vpop.permute.xlu1 %4743 }
 0x524   : > { %13442 = vmatpush3.bf16.xpose.msra.mxu0 %v4553_v49  ;;  %13443 = vmatprep.mubr.msk.bf16.mxu0 %vm14771_vm0, %v18377_v54 }
 0x525   : > { %13453 = vmatprep.subr.bf16.mxu0 %v18377_v54  ;;  %v4038_v32 = vpack.c.bf16 %v14070_v8, %v14070_v8 }
 0x527   : > { %v4749_v47 = vsel %vm2260_vm1, %v4038_v32, 0  ;;  %v4842_v38 = vpop.permute.xlu1 %4841 }
 0x528   : > { %13462 = vmatmul.mubr.msk.bf16.vlgmr.msra.gmra.mrb[88].mxu1 %vm2260_vm1, %v4695_v23 }
 0x529   : > { %13472 = vmatpush3.bf16.xpose.msra.mxu1 %v4798_v11  ;;  %13473 = vmatprep.mubr.msk.bf16.mxu1 %vm14771_vm0, %v18377_v54 }
 0x52a   : > { %13483 = vmatprep.subr.bf16.mxu1 %v18377_v54 }
 0x52b   : > { %13444 = vmatmul.mubr.msk.bf16.vlgmr.msra.gmra.mrb[92].mxu0 %vm2260_vm1, %v4548_v13 }
 0x52c   : > { %13454 = vmatpush3.bf16.xpose.msra.mxu0 %v4651_v24  ;;  %13455 = vmatprep.mubr.msk.bf16.mxu0 %vm14771_vm0, %v18377_v54 }
 0x52d   : > { %13465 = vmatprep.subr.bf16.mxu0 %v18377_v54 }
 0x530   : > { %13474 = vmatmul.mubr.msk.bf16.vlgmr.msra.gmra.mrb[92].mxu1 %vm2260_vm1, %v4793_v20 }
 0x531   : > { %13484 = vmatpush3.bf16.msra.mxu1 %v5117_v44  ;;  %13485 = vmatprep.mubr.msk.bf16.mxu1 %vm14771_vm0, %v18377_v54 }
 0x532   : > { %13495 = vmatprep.subr.bf16.mxu1 %v18377_v54 }
 0x533   : > { %13456 = vmatmul.mubr.msk.bf16.vlgmr.msra.gmra.mrb[96].mxu0 %vm2260_vm1, %v16128_v58  ;;  %v5163_v58 = vsel %vm3226_vm2, %v4090_v9, 0 }
 0x534   : > { %13466 = vmatpush3.bf16.xpose.msra.mxu0 %v4749_v47  ;;  %13467 = vmatprep.mubr.msk.bf16.mxu0 %vm14771_vm0, %v18377_v54 }
 0x535   : > { %13477 = vmatprep.subr.bf16.mxu0 %v18377_v54 }
 0x53b   : > { %13468 = vmatmul.mubr.msk.bf16.vlgmr.msra.gmra.mrb[100].mxu0 %vm2260_vm1, %v4744_v29 }
 0x53c   : > { %13478 = vmatpush3.bf16.xpose.msra.mxu0 %v4847_v45  ;;  %13479 = vmatprep.mubr.msk.bf16.mxu0 %vm14771_vm0, %v18377_v54 }
 0x53d   : > { %13489 = vmatprep.subr.bf16.mxu0 %v18377_v54 }
 0x543   : > { %13480 = vmatmul.mubr.msk.bf16.vlgmr.msra.gmra.mrb[104].mxu0 %vm2260_vm1, %v4842_v38 }
 0x544   : > { %13490 = vmatpush3.bf16.msra.mxu0 %v5163_v58  ;;  %13491 = vmatprep.mubr.msk.bf16.mxu0 %vm14771_vm0, %v18377_v54 }
 0x545   : > { %13501 = vmatprep.subr.bf16.mxu0 %v18377_v54 }
 0x569   : > { %v3264_v10 = vpop.f32.mrb[32].mxu1 }
 0x56a   : > { %3961 = vst.msk [vmem:[#allocation3] sm:$0x3] %vm3960_vm6, %v3264_v10  ;;  %v13295_v13 = vpop.f32.mrb[33].mxu1 }
 0x56b   : > { %v3267_v1 = vpop.f32.mrb[34].mxu1 }
 0x56c   : > { %v13296_v34 = vpop.f32.mrb[35].mxu1 }
 0x571   : > { %v3310_v17 = vpop.f32.mrb[44].mxu0  ;;  %v3356_v50 = vpop.f32.mrb[36].mxu1 }
 0x572   : > { %3962 = vst.msk [vmem:[#allocation3 + $0x2] sm:$0x3] %vm3960_vm6, %v3310_v17  ;;  %3963 = vst.msk [vmem:[#allocation3 + $0x4] sm:$0x3] %vm3960_vm6, %v3356_v50  ;;  %v13301_v14 = vpop.f32.mrb[45].mxu0  ;;  %v13307_v31 = vpop.f32.mrb[37].mxu1 }
 0x573   : > { %v3313_v23 = vpop.f32.mrb[46].mxu0  ;;  %v3359_v30 = vpop.f32.mrb[38].mxu1 }
 0x574   : > { %v13302_v21 = vpop.f32.mrb[47].mxu0  ;;  %v13308_v40 = vpop.f32.mrb[39].mxu1 }
 0x579   : > { %v3402_v22 = vpop.f32.mrb[48].mxu0  ;;  %v3448_v43 = vpop.f32.mrb[40].mxu1 }
 0x57a   : > { %3964 = vst.msk [vmem:[#allocation3 + $0x6] sm:$0x3] %vm3960_vm6, %v3402_v22  ;;  %3965 = vst.msk [vmem:[#allocation3 + $0x8] sm:$0x3] %vm3960_vm6, %v3448_v43  ;;  %v13313_v20 = vpop.f32.mrb[49].mxu0  ;;  %v13319_v46 = vpop.f32.mrb[41].mxu1 }
 0x57b   : > { %v3405_v27 = vpop.f32.mrb[50].mxu0  ;;  %v3451_v52 = vpop.f32.mrb[42].mxu1 }
 0x57c   : > { %v13314_v49 = vpop.f32.mrb[51].mxu0  ;;  %v13320_v60 = vpop.f32.mrb[43].mxu1 }
 0x581   : > { %v3494_v33 = vpop.f32.mrb[52].mxu0  ;;  %v3540_v36 = vpop.f32.mrb[44].mxu1 }
 0x582   : > { %3966 = vst.msk [vmem:[#allocation3 + $0xa] sm:$0x3] %vm3960_vm6, %v3494_v33  ;;  %3967 = vst.msk [vmem:[#allocation3 + $0xc] sm:$0x3] %vm3960_vm6, %v3540_v36  ;;  %v13325_v61 = vpop.f32.mrb[53].mxu0  ;;  %v13331_v11 = vpop.f32.mrb[45].mxu1 }
 0x583   : > { %v3497_v8 = vpop.f32.mrb[54].mxu0  ;;  %v3543_v24 = vpop.f32.mrb[46].mxu1 }
 0x584   : > { %v13326_v59 = vpop.f32.mrb[55].mxu0  ;;  %v13332_v32 = vpop.f32.mrb[47].mxu1 }
 0x585   : > { %v18385_v32 = vld [vmem:[#allocation28_spill] sm:$0xff] }
 0x589   : > { %v3586_v44 = vpop.f32.mrb[56].mxu0  ;;  %v3632_v16 = vpop.f32.mrb[48].mxu1 }
 0x58a   : > { %3968 = vst.msk [vmem:[#allocation3 + $0xe] sm:$0x3] %vm3960_vm6, %v3586_v44  ;;  %3969 = vst.msk [vmem:[#allocation3 + $0x10] sm:$0x3] %vm3960_vm6, %v3632_v16  ;;  %v13337_v47 = vpop.f32.mrb[57].mxu0  ;;  %v13343_v19 = vpop.f32.mrb[49].mxu1 }
 0x58b   : > { %v3589_v29 = vpop.f32.mrb[58].mxu0  ;;  %v3635_v53 = vpop.f32.mrb[50].mxu1 }
 0x58c   : > { %v13338_v45 = vpop.f32.mrb[59].mxu0  ;;  %v13344_v9 = vpop.f32.mrb[51].mxu1 }
 0x591   : > { %v3678_v38 = vpop.f32.mrb[60].mxu0  ;;  %v3724_v58 = vpop.f32.mrb[52].mxu1 }
 0x592   : > { %3970 = vst.msk [vmem:[#allocation3 + $0x12] sm:$0x3] %vm3960_vm6, %v3678_v38  ;;  %3971 = vst.msk [vmem:[#allocation3 + $0x14] sm:$0x3] %vm3960_vm6, %v3724_v58  ;;  %v13349_v10 = vpop.f32.mrb[61].mxu0  ;;  %v13355_v13 = vpop.f32.mrb[53].mxu1 }
 0x593   : > { %v3681_v1 = vpop.f32.mrb[62].mxu0  ;;  %v3727_v34 = vpop.f32.mrb[54].mxu1 }
 0x594   : > { %v13350_v17 = vpop.f32.mrb[63].mxu0  ;;  %v13356_v50 = vpop.f32.mrb[55].mxu1 }
 0x599   : > { %v3770_v14 = vpop.f32.mrb[64].mxu0  ;;  %v3816_v31 = vpop.f32.mrb[56].mxu1 }
 0x59a   : > { %3972 = vst.msk [vmem:[#allocation3 + $0x16] sm:$0x3] %vm3960_vm6, %v3770_v14  ;;  %3973 = vst.msk [vmem:[#allocation3 + $0x18] sm:$0x3] %vm3960_vm6, %v3816_v31  ;;  %v13361_v23 = vpop.f32.mrb[65].mxu0  ;;  %v13367_v30 = vpop.f32.mrb[57].mxu1 }
 0x59b   : > { %v3773_v21 = vpop.f32.mrb[66].mxu0  ;;  %v3819_v40 = vpop.f32.mrb[58].mxu1 }
 0x59c   : > { %v13362_v22 = vpop.f32.mrb[67].mxu0  ;;  %v13368_v43 = vpop.f32.mrb[59].mxu1 }
 0x5a1   : > { %v3862_v20 = vpop.f32.mrb[68].mxu0  ;;  %v3908_v46 = vpop.f32.mrb[60].mxu1 }
 0x5a2   : > { %3974 = vst.msk [vmem:[#allocation3 + $0x1a] sm:$0x3] %vm3960_vm6, %v3862_v20  ;;  %3975 = vst.msk [vmem:[#allocation3 + $0x1c] sm:$0x3] %vm3960_vm6, %v3908_v46  ;;  %v13373_v27 = vpop.f32.mrb[69].mxu0  ;;  %v13379_v52 = vpop.f32.mrb[61].mxu1 }
 0x5a3   : > { %v3865_v49 = vpop.f32.mrb[70].mxu0  ;;  %v3911_v60 = vpop.f32.mrb[62].mxu1  ;;  %v18386_v52 = vld [vmem:[#allocation19_spill] sm:$0xff] }
 0x5a4   : > { %v13374_v33 = vpop.f32.mrb[71].mxu0  ;;  %v13380_v36 = vpop.f32.mrb[63].mxu1 }
 0x5cb   : > { %v4148_v61 = vpop.f32.mrb[64].mxu1 }
 0x5cc   : > { %v4889_v11 = vmul.f32 0.17677669, %v4148_v61  ;;  %v13391_v8 = vpop.f32.mrb[65].mxu1 }
 0x5cd   : > { %v4151_v24 = vpop.f32.mrb[66].mxu1 }
 0x5ce   : > { %v13392_v59 = vpop.f32.mrb[67].mxu1  ;;  %v16207_v44 = vadd.f32 %v4889_v11, %v18385_v32 }
 0x5d0   : > { %v4921_v16 = vsel %vm3029_vm4, %v16207_v44, -inf }
 0x5d1   : > { %4922 = vmax.xlane.f32.xlu0 %v4921_v16 }
 0x5d3   : > { %v4246_v47 = vpop.f32.mrb[68].mxu1 }
 0x5d4   : > { %v13403_v19 = vpop.f32.mrb[69].mxu1 }
 0x5d5   : > { %v4249_v29 = vpop.f32.mrb[70].mxu1 }
 0x5d6   : > { %v3954_v53 = vpop.f32.mrb[72].mxu0  ;;  %v13404_v45 = vpop.f32.mrb[71].mxu1 }
 0x5d7   : > { %3976 = vst.msk [vmem:[#allocation3 + $0x1e] sm:$0x3] %vm3960_vm6, %v3954_v53  ;;  %v13385_v9 = vpop.f32.mrb[73].mxu0  ;;  %v18387_v53 = vld [vmem:[#allocation21_spill] sm:$0xff] }
 0x5d8   : > { %v3957_v38 = vpop.f32.mrb[74].mxu0 }
 0x5d9   : > { %v13386_v58 = vpop.f32.mrb[75].mxu0 }
 0x5db   : > { %v4344_v10 = vpop.f32.mrb[72].mxu1 }
 0x5dc   : > { %v13415_v13 = vpop.f32.mrb[73].mxu1 }
 0x5dd   : > { %v4347_v1 = vpop.f32.mrb[74].mxu1 }
 0x5de   : > { %v4197_v34 = vpop.f32.mrb[76].mxu0  ;;  %v13416_v17 = vpop.f32.mrb[75].mxu1 }
 0x5df   : > { %v4890_v50 = vmul.f32 0.17677669, %v4197_v34  ;;  %v13397_v14 = vpop.f32.mrb[77].mxu0 }
 0x5e0   : > { %v4200_v31 = vpop.f32.mrb[78].mxu0 }
 0x5e1   : > { %v13398_v23 = vpop.f32.mrb[79].mxu0  ;;  %v16213_v30 = vadd.f32 %v4890_v50, %v18385_v32  ;;  %v4891_v50 = vmul.f32 0.17677669, %v4246_v47 }
 0x5e3   : > { %v4442_v21 = vpop.f32.mrb[76].mxu1  ;;  %v4924_v40 = vsel %vm3029_vm4, %v16213_v30, -inf }
 0x5e4   : > { %4925 = vmax.xlane.f32.xlu1 %v4924_v40  ;;  %v13427_v22 = vpop.f32.mrb[77].mxu1 }
 0x5e5   : > { %v4445_v43 = vpop.f32.mrb[78].mxu1 }
 0x5e6   : > { %v4295_v20 = vpop.f32.mrb[80].mxu0  ;;  %v13428_v46 = vpop.f32.mrb[79].mxu1 }
 0x5e7   : > { %v13409_v27 = vpop.f32.mrb[81].mxu0  ;;  %14087 = vrot.lane.b32.xlu0 %v18386_v52, %s14772_s24  ;;  %v4892_v43 = vmul.f32 0.17677669, %v4295_v20  ;;  %v4895_v20 = vmul.f32 0.17677669, %v4442_v21 }
 0x5e8   : > { %v4298_v49 = vpop.f32.mrb[82].mxu0  ;;  %v16222_v27 = vadd.f32 %v4891_v50, %v18385_v32 }
 0x5e9   : > { %v13410_v60 = vpop.f32.mrb[83].mxu0 }
 0x5eb   : > { %v4540_v33 = vpop.f32.mrb[80].mxu1 }
 0x5ec   : > { %v13439_v36 = vpop.f32.mrb[81].mxu1 }
 0x5ed   : > { %v4543_v61 = vpop.f32.mrb[82].mxu1  ;;  %v4893_v36 = vmul.f32 0.17677669, %v4344_v10  ;;  %v4897_v10 = vmul.f32 0.17677669, %v4540_v33 }
 0x5ee   : > { %v4393_v11 = vpop.f32.mrb[84].mxu0  ;;  %v13440_v8 = vpop.f32.mrb[83].mxu1 }
 0x5ef   : > { %v13421_v24 = vpop.f32.mrb[85].mxu0  ;;  %v4927_v8 = vsel %vm3029_vm4, %v16222_v27, -inf }
 0x5f0   : > { %v4396_v59 = vpop.f32.mrb[86].mxu0  ;;  %v16227_v24 = vadd.f32 %v4892_v43, %v18385_v32  ;;  %v16242_v43 = vadd.f32 %v4897_v10, %v18385_v32 }
 0x5f1   : > { %v13422_v16 = vpop.f32.mrb[87].mxu0 }
 0x5f3   : > { %v4638_v19 = vpop.f32.mrb[84].mxu1 }
 0x5f4   : > { %v13451_v29 = vpop.f32.mrb[85].mxu1 }
 0x5f5   : > { %14082 = vrot.lane.b32.xlu1 %v18387_v53, %s14772_s24  ;;  %v4641_v45 = vpop.f32.mrb[86].mxu1 }
 0x5f6   : > { %v4491_v9 = vpop.f32.mrb[88].mxu0  ;;  %v13452_v38 = vpop.f32.mrb[87].mxu1 }
 0x5f7   : > { %v13433_v58 = vpop.f32.mrb[89].mxu0  ;;  %v4930_v38 = vsel %vm3029_vm4, %v16227_v24, -inf  ;;  %v4896_v33 = vmul.f32 0.17677669, %v4491_v9 }
 0x5f8   : > { %v4494_v13 = vpop.f32.mrb[90].mxu0  ;;  %v16232_v58 = vadd.f32 %v4893_v36, %v18385_v32  ;;  %v4945_v36 = vsel %vm3029_vm4, %v16242_v43, -inf }
 0x5f9   : > { %v13434_v1 = vpop.f32.mrb[91].mxu0  ;;  %v16255_v9 = vadd.f32 %v4896_v33, %v18385_v32 }
 0x5fa   : > { %v4933_v13 = vsel %vm3029_vm4, %v16232_v58, -inf  ;;  %v16237_v1 = vadd.f32 %v4895_v20, %v18385_v32 }
 0x5fb   : > { %v4736_v34 = vpop.f32.mrb[88].mxu1 }
 0x5fc   : > { %v13463_v17 = vpop.f32.mrb[89].mxu1 }
 0x5fd   : > { %v4739_v14 = vpop.f32.mrb[90].mxu1 }
 0x5fe   : > { %v4589_v31 = vpop.f32.mrb[92].mxu0  ;;  %v13464_v23 = vpop.f32.mrb[91].mxu1  ;;  %v4894_v14 = vmul.f32 0.17677669, %v4393_v11 }
 0x5ff   : > { %v13445_v40 = vpop.f32.mrb[93].mxu0  ;;  %v4899_v23 = vmul.f32 0.17677669, %v4638_v19 }
 0x600   : > { %v4592_v22 = vpop.f32.mrb[94].mxu0 }
 0x601   : > { %v13446_v46 = vpop.f32.mrb[95].mxu0  ;;  %v4939_v22 = vsel %vm3029_vm4, %v16237_v1, -inf  ;;  %v16250_v11 = vadd.f32 %v4899_v23, %v18385_v32 }
 0x602   : > { %v16245_v46 = vadd.f32 %v4894_v14, %v18385_v32 }
 0x603   : > { %v4834_v49 = vpop.f32.mrb[92].mxu1  ;;  %v4951_v20 = vsel %vm3029_vm4, %v16250_v11, -inf }
 0x604   : > { %v13475_v60 = vpop.f32.mrb[93].mxu1 }
 0x605   : > { %v4837_v61 = vpop.f32.mrb[94].mxu1  ;;  %v4901_v60 = vmul.f32 0.17677669, %v4736_v34 }
 0x606   : > { %v4687_v47 = vpop.f32.mrb[96].mxu0  ;;  %4928 = vmax.xlane.f32.xlu0 %v4927_v8  ;;  %v13476_v59 = vpop.f32.mrb[95].mxu1  ;;  %v4898_v8 = vmul.f32 0.17677669, %v4589_v31  ;;  %v4942_v31 = vsel %vm3029_vm4, %v16255_v9, -inf }
 0x607   : > { %v13457_v16 = vpop.f32.mrb[97].mxu0 }
 0x608   : > { %v4690_v29 = vpop.f32.mrb[98].mxu0  ;;  %v4936_v16 = vsel %vm3029_vm4, %v16245_v46, -inf  ;;  %v16265_v10 = vadd.f32 %v4898_v8, %v18385_v32 }
 0x609   : > { %v13458_v45 = vpop.f32.mrb[99].mxu0  ;;  %v4903_v29 = vmul.f32 0.17677669, %v4834_v49 }
 0x60a   : > { %4931 = vmax.xlane.f32.xlu0 %v4930_v38  ;;  %v16260_v45 = vadd.f32 %v4901_v60, %v18385_v32  ;;  %v4900_v38 = vmul.f32 0.17677669, %v4687_v47  ;;  %v4948_v14 = vsel %vm3029_vm4, %v16265_v10, -inf }
 0x60c   : > { %v4957_v49 = vsel %vm3029_vm4, %v16260_v45, -inf  ;;  %v16275_v47 = vadd.f32 %v4900_v38, %v18385_v32 }
 0x60e   : > { %v4785_v17 = vpop.f32.mrb[100].mxu0  ;;  %4934 = vmax.xlane.f32.xlu0 %v4933_v13  ;;  %v16270_v13 = vadd.f32 %v4903_v29, %v18385_v32 }
 0x60f   : > { %v13469_v50 = vpop.f32.mrb[101].mxu0 }
 0x610   : > { %v4788_v21 = vpop.f32.mrb[102].mxu0  ;;  %v4902_v50 = vmul.f32 0.17677669, %v4785_v17 }
 0x611   : > { %v13470_v40 = vpop.f32.mrb[103].mxu0  ;;  %v4963_v21 = vsel %vm3029_vm4, %v16270_v13, -inf }
 0x612   : > { %4940 = vmax.xlane.f32.xlu0 %v4939_v22  ;;  %v4954_v40 = vsel %vm3029_vm4, %v16275_v47, -inf  ;;  %v16282_v22 = vadd.f32 %v4902_v50, %v18385_v32 }
 0x614   : > { %v4960_v17 = vsel %vm3029_vm4, %v16282_v22, -inf }
 0x616   : > { %v4883_v19 = vpop.f32.mrb[104].mxu0  ;;  %4946 = vmax.xlane.f32.xlu0 %v4945_v36  ;;  %v18388_v36 = vld [vmem:[#allocation23_spill] sm:$0xff] }
 0x617   : > { %v13481_v61 = vpop.f32.mrb[105].mxu0  ;;  %v4904_v23 = vmul.f32 0.17677669, %v4883_v19  ;;  %v18389_v19 = vld [vmem:[#allocation24_spill] sm:$0xff] }
 0x618   : > { %v4886_v59 = vpop.f32.mrb[106].mxu0 }
 0x619   : > { %4937 = vmax.xlane.f32.xlu1 %v4936_v16  ;;  %v13482_v34 = vpop.f32.mrb[107].mxu0  ;;  %v16287_v33 = vadd.f32 %v4904_v23, %v18385_v32 }
 0x61a   : > { %4952 = vmax.xlane.f32.xlu0 %v4951_v20 }
 0x61b   : > { %v4966_v60 = vsel %vm3029_vm4, %v16287_v33, -inf }
 0x61d   : > { %4943 = vmax.xlane.f32.xlu1 %v4942_v31 }
 0x61e   : > { %4958 = vmax.xlane.f32.xlu0 %v4957_v49 }
 0x621   : > { %4949 = vmax.xlane.f32.xlu1 %v4948_v14 }
 0x622   : > { %4964 = vmax.xlane.f32.xlu0 %v4963_v21 }
 0x625   : > { %4955 = vmax.xlane.f32.xlu1 %v4954_v40 }
 0x629   : > { %4961 = vmax.xlane.f32.xlu1 %v4960_v17 }
 0x62d   : > { %4967 = vmax.xlane.f32.xlu1 %v4966_v60 }
 0x638   : > { %14097 = vrot.lane.b32.xlu0 %v18388_v36, %s14772_s24 }
 0x63e   : > { %14092 = vrot.lane.b32.xlu1 %v18389_v19, %s14772_s24 }
 0x65e   : > { %v4923_v61 = vpop.xlane.xlu0 %4922 }
 0x65f   : > { %v4969_v8 = vsub.f32 %v16207_v44, %v4923_v61 }
 0x661   : > { %v4985_v59 = vmul.f32 1.442695, %v4969_v8 }
 0x662   : > { %v16305_v44 = vpop.permute.xlu0 %14087 }
 0x663   : > { %14468 = vpow2.f32 %v4985_v59 }
 0x66d   : > { %v16296_v16 = vpop.eup %14468 }
 0x66e   : > { %v5017_v29 = vsel %vm3029_vm4, %v16296_v16, 0.0 }
 0x66f   : > { %5018 = vadd.xlane.f32.xlu0 %v5017_v29 }
 0x671   : > { %v4926_v34 = vpop.xlane.xlu1 %4925 }
 0x672   : > { %v4970_v20 = vsub.f32 %v16213_v30, %v4926_v34 }
 0x674   : > { %v4987_v38 = vmul.f32 1.442695, %v4970_v20 }
 0x675   : > { %v16312_v29 = vpop.permute.xlu1 %14082 }
 0x676   : > { %14470 = vpow2.f32 %v4987_v38 }
 0x680   : > { %v16301_v31 = vpop.eup %14470 }
 0x681   : > { %v5020_v49 = vsel %vm3029_vm4, %v16301_v31, 0.0 }
 0x682   : > { %5021 = vadd.xlane.f32.xlu1 %v5020_v49 }
 0x693   : > { %v4929_v50 = vpop.xlane.xlu0 %4928 }
 0x694   : > { %v4971_v14 = vsub.f32 %v16222_v27, %v4929_v50 }
 0x696   : > { %v4989_v21 = vmul.f32 1.442695, %v4971_v14 }
 0x697   : > { %v4932_v23 = vpop.xlane.xlu0 %4931 }
 0x698   : > { %14472 = vpow2.f32 %v4989_v21  ;;  %v4972_v40 = vsub.f32 %v16227_v24, %v4932_v23 }
 0x69a   : > { %v4991_v17 = vmul.f32 1.442695, %v4972_v40 }
 0x69b   : > { %v4935_v30 = vpop.xlane.xlu0 %4934 }
 0x69c   : > { %14474 = vpow2.f32 %v4991_v17  ;;  %v4973_v60 = vsub.f32 %v16232_v58, %v4935_v30 }
 0x69e   : > { %v4993_v61 = vmul.f32 1.442695, %v4973_v60 }
 0x69f   : > { %v4941_v8 = vpop.xlane.xlu0 %4940 }
 0x6a0   : > { %14476 = vpow2.f32 %v4993_v61  ;;  %v4975_v24 = vsub.f32 %v16237_v1, %v4941_v8 }
 0x6a2   : > { %v16310_v59 = vpop.eup %14472  ;;  %v4997_v21 = vmul.f32 1.442695, %v4975_v24 }
 0x6a3   : > { %v4947_v34 = vpop.xlane.xlu0 %4946  ;;  %v5023_v27 = vsel %vm3029_vm4, %v16310_v59, 0.0 }
 0x6a4   : > { %v4977_v20 = vsub.f32 %v16242_v43, %v4947_v34  ;;  %5024 = vadd.xlane.f32.xlu0 %v5023_v27 }
 0x6a6   : > { %v16318_v38 = vpop.eup %14474  ;;  %v5001_v49 = vmul.f32 1.442695, %v4977_v20  ;;  %v4938_v58 = vpop.xlane.xlu1 %4937 }
 0x6a7   : > { %v4974_v50 = vsub.f32 %v16245_v46, %v4938_v58  ;;  %v5026_v14 = vsel %vm3029_vm4, %v16318_v38, 0.0  ;;  %v4953_v46 = vpop.xlane.xlu0 %4952 }
 0x6a8   : > { %14478 = vpow2.f32 %v5001_v49  ;;  %5027 = vadd.xlane.f32.xlu1 %v5026_v14  ;;  %v4979_v8 = vsub.f32 %v16250_v11, %v4953_v46 }
 0x6a9   : > { %v4995_v23 = vmul.f32 1.442695, %v4974_v50 }
 0x6aa   : > { %v16323_v40 = vpop.eup %14476  ;;  %v4944_v17 = vpop.xlane.xlu1 %4943  ;;  %v5005_v58 = vmul.f32 1.442695, %v4979_v8 }
 0x6ab   : > { %14480 = vpow2.f32 %v4995_v23  ;;  %v4976_v43 = vsub.f32 %v16255_v9, %v4944_v17  ;;  %v5029_v1 = vsel %vm3029_vm4, %v16323_v40, 0.0  ;;  %v4959_v24 = vpop.xlane.xlu0 %4958 }
 0x6ac   : > { %5030 = vadd.xlane.f32.xlu0 %v5029_v1  ;;  %14482 = vpow2.f32 %v4997_v21 }
 0x6ad   : > { %v4999_v30 = vmul.f32 1.442695, %v4976_v43 }
 0x6ae   : > { %v4950_v60 = vpop.xlane.xlu1 %4949 }
 0x6af   : > { %v4978_v61 = vsub.f32 %v16265_v10, %v4950_v60  ;;  %14484 = vpow2.f32 %v4999_v30  ;;  %v4965_v17 = vpop.xlane.xlu0 %4964 }
 0x6b1   : > { %v5003_v34 = vmul.f32 1.442695, %v4978_v61 }
 0x6b2   : > { %v16330_v27 = vpop.eup %14478  ;;  %v4956_v20 = vpop.xlane.xlu1 %4955 }
 0x6b3   : > { %v5041_v9 = vsel %vm3029_vm4, %v16330_v27, 0.0  ;;  %14486 = vpow2.f32 %v5003_v34  ;;  %v4980_v50 = vsub.f32 %v16275_v47, %v4956_v20  ;;  %v4983_v47 = vsub.f32 %v16270_v13, %v4965_v17 }
 0x6b4   : > { %5042 = vadd.xlane.f32.xlu0 %v5041_v9  ;;  %14488 = vpow2.f32 %v5005_v58 }
 0x6b5   : > { %v16334_v49 = vpop.eup %14480  ;;  %v5007_v21 = vmul.f32 1.442695, %v4980_v50  ;;  %v5013_v8 = vmul.f32 1.442695, %v4983_v47  ;;  %v18390_v50 = vld [vmem:[#allocation25_spill] sm:$0xff] }
 0x6b6   : > { %v4962_v14 = vpop.xlane.xlu1 %4961  ;;  %v5032_v11 = vsel %vm3029_vm4, %v16334_v49, 0.0  ;;  %v16339_v10 = vpop.eup %14482 }
 0x6b7   : > { %5033 = vadd.xlane.f32.xlu1 %v5032_v11  ;;  %v4982_v23 = vsub.f32 %v16282_v22, %v4962_v14  ;;  %v5035_v43 = vsel %vm3029_vm4, %v16339_v10, 0.0  ;;  %14490 = vpow2.f32 %v5007_v21 }
 0x6b9   : > { %v16344_v1 = vpop.eup %14484  ;;  %v5011_v30 = vmul.f32 1.442695, %v4982_v23 }
 0x6ba   : > { %v4968_v46 = vpop.xlane.xlu1 %4967  ;;  %v5038_v60 = vsel %vm3029_vm4, %v16344_v1, 0.0 }
 0x6bb   : > { %5036 = vadd.xlane.f32.xlu1 %v5035_v43  ;;  %14492 = vpow2.f32 %v5011_v30  ;;  %v4984_v22 = vsub.f32 %v16287_v33, %v4968_v46  ;;  %v4981_v43 = vsub.f32 %v16260_v45, %v4959_v24  ;;  %v16389_v45 = vpop.permute.xlu0 %14097 }
 0x6bc   : > { %14494 = vpow2.f32 %v5013_v8 }
 0x6bd   : > { %v16349_v61 = vpop.eup %14486  ;;  %v5015_v13 = vmul.f32 1.442695, %v4984_v22  ;;  %v5009_v30 = vmul.f32 1.442695, %v4981_v43  ;;  %v18392_v22 = vld [vmem:[#allocation27_spill] sm:$0xff] }
 0x6be   : > { %v5044_v34 = vsel %vm3029_vm4, %v16349_v61, 0.0  ;;  %v16354_v20 = vpop.eup %14488 }
 0x6bf   : > { %5039 = vadd.xlane.f32.xlu1 %v5038_v60  ;;  %v5047_v9 = vsel %vm3029_vm4, %v16354_v20, 0.0  ;;  %14496 = vpow2.f32 %v5015_v13  ;;  %v18391_v60 = vld [vmem:[#allocation26_spill] sm:$0xff] }
 0x6c0   : > { %14498 = vpow2.f32 %v5009_v30 }
 0x6c1   : > { %v16358_v58 = vpop.eup %14490 }
 0x6c2   : > { %v5050_v33 = vsel %vm3029_vm4, %v16358_v58, 0.0 }
 0x6c3   : > { %5045 = vadd.xlane.f32.xlu1 %v5044_v34  ;;  %v14084_v34 = vunpack.i.l.bf16 %v16312_v29 }
 0x6c5   : > { %v16364_v14 = vpop.eup %14492 }
 0x6c6   : > { %v5056_v11 = vsel %vm3029_vm4, %v16364_v14, 0.0  ;;  %v16368_v21 = vpop.eup %14494 }
 0x6c7   : > { %5048 = vadd.xlane.f32.xlu1 %v5047_v9  ;;  %v5059_v23 = vsel %vm3029_vm4, %v16368_v21, 0.0  ;;  %v4091_v9 = vpack.c.bf16 %v14084_v34, %v14084_v34 }
 0x6c9   : > { %v16372_v17 = vpop.eup %14496  ;;  %v5209_v43 = vsel %vm3226_vm2, %v4091_v9, 0  ;;  %v14089_v9 = vunpack.i.l.bf16 %v16305_v44 }
 0x6ca   : > { %14102 = vrot.lane.b32.xlu0 %v18390_v50, %s14772_s24  ;;  %v5062_v47 = vsel %vm3029_vm4, %v16372_v17, 0.0  ;;  %v16377_v46 = vpop.eup %14498 }
 0x6cb   : > { %5051 = vadd.xlane.f32.xlu1 %v5050_v33  ;;  %v5053_v8 = vsel %vm3029_vm4, %v16377_v46, 0.0 }
 0x6cf   : > { %5057 = vadd.xlane.f32.xlu1 %v5056_v11 }
 0x6d3   : > { %5060 = vadd.xlane.f32.xlu1 %v5059_v23  ;;  %v16409_v23 = vpop.permute.xlu1 %14092 }
 0x6d7   : > { %5063 = vadd.xlane.f32.xlu1 %v5062_v47  ;;  %v14085_v47 = vunpack.i.h.bf16 %v16312_v29 }
 0x6e8   : > { %14107 = vrot.lane.b32.xlu1 %v18391_v60, %s14772_s24 }
 0x6e9   : > { %5054 = vadd.xlane.f32.xlu0 %v5053_v8  ;;  %v4092_v8 = vpack.c.bf16 %v14085_v47, %v14085_v47 }
 0x6ec   : > { %6106 = vrot.lane.b32.xlu1 %v15457_v28, %s14773_s22 }
 0x6f0   : > { %6154 = vrot.lane.b32.xlu1 %v15415_v18, %s14773_s22 }
 0x6f4   : > { %14132 = vrot.lane.b32.xlu1 %v15503_v39, %s14773_s22 }
 0x6f8   : > { %6298 = vrot.lane.b32.xlu1 %v15622_v62, %s14773_s22 }
 0x6fc   : > { %6346 = vrot.lane.b32.xlu1 %v15544_v55, %s14773_s22  ;;  %v5019_v24 = vpop.xlane.xlu0 %5018 }
 0x6fd   : > { %14500 = vrcp.f32 %v5019_v24 }
 0x6ff   : > { %14112 = vrot.lane.b32.xlu0 %v18392_v22, %s14772_s24 }
 0x700   : > { %14142 = vrot.lane.b32.xlu1 %v15507_v48, %s14773_s22 }
 0x703   : > { %14117 = vrot.lane.b32.xlu0 %v15476_v57, %s14773_s22 }
 0x704   : > { %6490 = vrot.lane.b32.xlu1 %v15689_v56, %s14773_s22 }
 0x707   : > { %v14501_v13 = vpop.eup %14500  ;;  %14122 = vrot.lane.b32.xlu0 %v15479_v4, %s14773_s22 }
 0x708   : > { %6538 = vrot.lane.b32.xlu1 %v15633_v7, %s14773_s22  ;;  %v5081_v33 = vmul.f32 %v14501_v13, %v16296_v16  ;;  %v5255_v13 = vsel %vm3226_vm2, %v4092_v8, 0 }
 0x70a   : > { %v5097_v11 = vpack.c.bf16 %v5081_v33, %v5081_v33 }
 0x70b   : > { %6058 = vrot.lane.b32.xlu0 %v15403_v3, %s14773_s22 }
 0x70c   : > { %14152 = vrot.lane.b32.xlu1 %v15514_v0, %s14773_s22  ;;  %13486 = vmatmul.mubr.msk.bf16.vlgmr.msra.gmra.mrb[96].mxu1 %vm3222_vm5, %v5097_v11 }
 0x70d   : > { %13496 = vmatpush3.bf16.msra.mxu1 %v5209_v43  ;;  %13497 = vmatprep.mubr.msk.bf16.mxu1 %vm14771_vm0, %v18377_v54  ;;  %v14090_v43 = vunpack.i.h.bf16 %v16305_v44 }
 0x70e   : > { %13507 = vmatprep.subr.bf16.mxu1 %v18377_v54 }
 0x70f   : > { %v5022_v16 = vpop.xlane.xlu1 %5021  ;;  %14127 = vrot.lane.b32.xlu0 %v15484_v37, %s14773_s22 }
 0x710   : > { %14502 = vrcp.f32 %v5022_v16  ;;  %6682 = vrot.lane.b32.xlu1 %v15735_v51, %s14773_s22  ;;  %v4093_v16 = vpack.c.bf16 %v14089_v9, %v14089_v9 }
 0x713   : > { %6202 = vrot.lane.b32.xlu0 %v15533_v41, %s14773_s22 }
 0x714   : > { %6778 = vrot.lane.b32.xlu1 %v15747_v25, %s14773_s22 }
 0x717   : > { %6250 = vrot.lane.b32.xlu0 %v15470_v12, %s14773_s22 }
 0x71a   : > { %v14503_v30 = vpop.eup %14502 }
 0x71b   : > { %14137 = vrot.lane.b32.xlu0 %v15487_v63, %s14773_s22  ;;  %v5082_v24 = vmul.f32 %v14503_v30, %v16301_v31 }
 0x71d   : > { %v5098_v34 = vpack.c.bf16 %v5082_v24, %v5082_v24  ;;  %v4094_v24 = vpack.c.bf16 %v14090_v43, %v14090_v43 }
 0x71f   : > { %13492 = vmatmul.mubr.msk.bf16.vlgmr.msra.gmra.mrb[108].mxu0 %vm3222_vm5, %v5098_v34  ;;  %6394 = vrot.lane.b32.xlu0 %v15637_v35, %s14773_s22  ;;  %v14094_v34 = vunpack.i.l.bf16 %v16409_v23 }
 0x720   : > { %13502 = vmatpush3.bf16.msra.mxu0 %v5255_v13  ;;  %13503 = vmatprep.mubr.msk.bf16.mxu0 %vm14771_vm0, %v18377_v54  ;;  %v5301_v13 = vsel %vm3226_vm2, %v4093_v16, 0 }
 0x721   : > { %13513 = vmatprep.subr.bf16.mxu0 %v18377_v54  ;;  %v4095_v9 = vpack.c.bf16 %v14094_v34, %v14094_v34 }
 0x723   : > { %6442 = vrot.lane.b32.xlu0 %v15618_v2, %s14773_s22 }
 0x727   : > { %14147 = vrot.lane.b32.xlu0 %v15494_v26, %s14773_s22 }
 0x72b   : > { %6586 = vrot.lane.b32.xlu0 %v15713_v5, %s14773_s22 }
 0x72f   : > { %6634 = vrot.lane.b32.xlu0 %v15693_v42, %s14773_s22 }
 0x731   : > { %v5025_v31 = vpop.xlane.xlu0 %5024 }
 0x732   : > { %14504 = vrcp.f32 %v5025_v31 }
 0x733   : > { %6730 = vrot.lane.b32.xlu0 %v15717_v6, %s14773_s22 }
 0x735   : > { %v5028_v29 = vpop.xlane.xlu1 %5027 }
 0x736   : > { %14506 = vrcp.f32 %v5028_v29 }
 0x737   : > { %14157 = vrot.lane.b32.xlu0 %v15498_v15, %s14773_s22 }
 0x739   : > { %v5031_v33 = vpop.xlane.xlu0 %5030 }
 0x73a   : > { %14508 = vrcp.f32 %v5031_v33  ;;  %v5347_v33 = vsel %vm3226_vm2, %v4094_v24, 0  ;;  %v14099_v24 = vunpack.i.l.bf16 %v16389_v45 }
 0x73c   : > { %v14505_v11 = vpop.eup %14504 }
 0x73d   : > { %v5083_v47 = vmul.f32 %v14505_v11, %v16310_v59 }
 0x73f   : > { %v5099_v30 = vpack.c.bf16 %v5083_v47, %v5083_v47  ;;  %v5393_v47 = vsel %vm3226_vm2, %v4095_v9, 0  ;;  %v4097_v9 = vpack.c.bf16 %v14099_v24, %v14099_v24 }
 0x740   : > { %v14507_v8 = vpop.eup %14506 }
 0x741   : > { %13498 = vmatmul.mubr.msk.bf16.vlgmr.msra.gmra.mrb[100].mxu1 %vm3222_vm5, %v5099_v30  ;;  %v5084_v31 = vmul.f32 %v14507_v8, %v16318_v38  ;;  %v5043_v16 = vpop.xlane.xlu0 %5042 }
 0x742   : > { %13508 = vmatpush3.bf16.msra.mxu1 %v5301_v13  ;;  %13509 = vmatprep.mubr.msk.bf16.mxu1 %vm14771_vm0, %v18377_v54 }
 0x743   : > { %v5100_v29 = vpack.c.bf16 %v5084_v31, %v5084_v31  ;;  %13519 = vmatprep.subr.bf16.mxu1 %v18377_v54 }
 0x744   : > { %v14509_v44 = vpop.eup %14508  ;;  %v5034_v59 = vpop.xlane.xlu1 %5033 }
 0x745   : > { %14510 = vrcp.f32 %v5034_v59  ;;  %13504 = vmatmul.mubr.msk.bf16.vlgmr.msra.gmra.mrb[112].mxu0 %vm3222_vm5, %v5100_v29  ;;  %v5085_v11 = vmul.f32 %v14509_v44, %v16323_v40  ;;  %v14095_v40 = vunpack.i.h.bf16 %v16409_v23  ;;  %v14100_v59 = vunpack.i.h.bf16 %v16389_v45 }
 0x746   : > { %13514 = vmatpush3.bf16.msra.mxu0 %v5347_v33  ;;  %13515 = vmatprep.mubr.msk.bf16.mxu0 %vm14771_vm0, %v18377_v54 }
 0x747   : > { %v5101_v38 = vpack.c.bf16 %v5085_v11, %v5085_v11  ;;  %13525 = vmatprep.subr.bf16.mxu0 %v18377_v54  ;;  %v4096_v34 = vpack.c.bf16 %v14095_v40, %v14095_v40  ;;  %v4098_v45 = vpack.c.bf16 %v14100_v59, %v14100_v59 }
 0x748   : > { %v5037_v43 = vpop.xlane.xlu1 %5036 }
 0x749   : > { %14512 = vrcp.f32 %v5037_v43  ;;  %13510 = vmatmul.mubr.msk.bf16.vlgmr.msra.gmra.mrb[104].mxu1 %vm3222_vm5, %v5101_v38  ;;  %v5439_v23 = vsel %vm3226_vm2, %v4096_v34, 0  ;;  %v14103_v38 = vpop.permute.xlu0 %14102 }
 0x74a   : > { %13520 = vmatpush3.bf16.msra.mxu1 %v5393_v47  ;;  %13521 = vmatprep.mubr.msk.bf16.mxu1 %vm14771_vm0, %v18377_v54  ;;  %14514 = vrcp.f32 %v5043_v16  ;;  %v14104_v47 = vunpack.i.l.bf16 %v14103_v38 }
 0x74b   : > { %13531 = vmatprep.subr.bf16.mxu1 %v18377_v54 }
 0x74c   : > { %v5040_v30 = vpop.xlane.xlu1 %5039 }
 0x74d   : > { %14516 = vrcp.f32 %v5040_v30  ;;  %v5485_v30 = vsel %vm3226_vm2, %v4097_v9, 0 }
 0x74f   : > { %v14511_v8 = vpop.eup %14510 }
 0x750   : > { %v5046_v13 = vpop.xlane.xlu1 %5045  ;;  %v5086_v31 = vmul.f32 %v14511_v8, %v16334_v49 }
 0x751   : > { %14518 = vrcp.f32 %v5046_v13  ;;  %v14105_v13 = vunpack.i.h.bf16 %v14103_v38 }
 0x752   : > { %v5102_v29 = vpack.c.bf16 %v5086_v31, %v5086_v31  ;;  %v4099_v31 = vpack.c.bf16 %v14104_v47, %v14104_v47 }
 0x753   : > { %v14513_v44 = vpop.eup %14512 }
 0x754   : > { %13516 = vmatmul.mubr.msk.bf16.vlgmr.msra.gmra.mrb[116].mxu0 %vm3222_vm5, %v5102_v29  ;;  %v5049_v33 = vpop.xlane.xlu1 %5048  ;;  %v5087_v11 = vmul.f32 %v14513_v44, %v16339_v10  ;;  %v14515_v49 = vpop.eup %14514  ;;  %v5531_v44 = vsel %vm3226_vm2, %v4098_v45, 0 }
 0x755   : > { %13526 = vmatpush3.bf16.msra.mxu0 %v5439_v23  ;;  %14520 = vrcp.f32 %v5049_v33  ;;  %13527 = vmatprep.mubr.msk.bf16.mxu0 %vm14771_vm0, %v18377_v54  ;;  %v5089_v24 = vmul.f32 %v14515_v49, %v16330_v27  ;;  %v4100_v23 = vpack.c.bf16 %v14105_v13, %v14105_v13  ;;  %v5577_v33 = vsel %vm3226_vm2, %v4099_v31, 0 }
 0x756   : > { %v5103_v43 = vpack.c.bf16 %v5087_v11, %v5087_v11  ;;  %13537 = vmatprep.subr.bf16.mxu0 %v18377_v54 }
 0x757   : > { %v14517_v16 = vpop.eup %14516 }
 0x758   : > { %v5052_v40 = vpop.xlane.xlu1 %5051  ;;  %13522 = vmatmul.mubr.msk.bf16.vlgmr.msra.gmra.mrb[108].mxu1 %vm3222_vm5, %v5103_v43  ;;  %v5088_v10 = vmul.f32 %v14517_v16, %v16344_v1  ;;  %v5105_v1 = vpack.c.bf16 %v5089_v24, %v5089_v24 }
 0x759   : > { %14522 = vrcp.f32 %v5052_v40  ;;  %13532 = vmatpush3.bf16.msra.mxu1 %v5485_v30  ;;  %13533 = vmatprep.mubr.msk.bf16.mxu1 %vm14771_vm0, %v18377_v54 }
 0x75a   : > { %v5104_v8 = vpack.c.bf16 %v5088_v10, %v5088_v10  ;;  %13543 = vmatprep.subr.bf16.mxu1 %v18377_v54 }
 0x75b   : > { %v14519_v34 = vpop.eup %14518 }
 0x75c   : > { %13528 = vmatmul.mubr.msk.bf16.vlgmr.msra.gmra.mrb[120].mxu0 %vm3222_vm5, %v5104_v8  ;;  %v5058_v29 = vpop.xlane.xlu1 %5057  ;;  %v5090_v59 = vmul.f32 %v14519_v34, %v16349_v61  ;;  %v5623_v61 = vsel %vm3226_vm2, %v4100_v23, 0 }
 0x75d   : > { %13538 = vmatpush3.bf16.msra.mxu0 %v5531_v44  ;;  %13539 = vmatprep.mubr.msk.bf16.mxu0 %vm14771_vm0, %v18377_v54  ;;  %14524 = vrcp.f32 %v5058_v29 }
 0x75e   : > { %13549 = vmatprep.subr.bf16.mxu0 %v18377_v54  ;;  %v5106_v11 = vpack.c.bf16 %v5090_v59, %v5090_v59 }
 0x75f   : > { %v14521_v9 = vpop.eup %14520 }
 0x760   : > { %v5061_v27 = vpop.xlane.xlu1 %5060  ;;  %13534 = vmatmul.mubr.msk.bf16.vlgmr.msra.gmra.mrb[112].mxu1 %vm3222_vm5, %v5105_v1  ;;  %v5091_v38 = vmul.f32 %v14521_v9, %v16354_v20 }
 0x761   : > { %13544 = vmatpush3.bf16.msra.mxu1 %v5577_v33  ;;  %13545 = vmatprep.mubr.msk.bf16.mxu1 %vm14771_vm0, %v18377_v54 }
 0x762   : > { %13555 = vmatprep.subr.bf16.mxu1 %v18377_v54  ;;  %v5107_v16 = vpack.c.bf16 %v5091_v38, %v5091_v38 }
 0x763   : > { %v14523_v49 = vpop.eup %14522 }
 0x764   : > { %v5064_v43 = vpop.xlane.xlu1 %5063  ;;  %13540 = vmatmul.mubr.msk.bf16.vlgmr.msra.gmra.mrb[124].mxu0 %vm3222_vm5, %v5106_v11  ;;  %v5092_v45 = vmul.f32 %v14523_v49, %v16358_v58 }
 0x765   : > { %13550 = vmatpush3.bf16.msra.mxu0 %v5623_v61  ;;  %13551 = vmatprep.mubr.msk.bf16.mxu0 %vm14771_vm0, %v18377_v54  ;;  %14526 = vrcp.f32 %v5064_v43 }
 0x766   : > { %13561 = vmatprep.subr.bf16.mxu0 %v18377_v54  ;;  %v5108_v30 = vpack.c.bf16 %v5092_v45, %v5092_v45 }
 0x767   : > { %v14525_v10 = vpop.eup %14524 }
 0x768   : > { %v14108_v47 = vpop.permute.xlu1 %14107  ;;  %13546 = vmatmul.mubr.msk.bf16.vlgmr.msra.gmra.mrb[116].mxu1 %vm3222_vm5, %v5107_v16  ;;  %v5094_v13 = vmul.f32 %v14525_v10, %v16364_v14 }
 0x769   : > { %v14110_v20 = vunpack.i.h.bf16 %v14108_v47  ;;  %v14109_v40 = vunpack.i.l.bf16 %v14108_v47  ;;  %13557 = vmatprep.mubr.msk.bf16.mxu1 %vm14771_vm0, %v18377_v54 }
 0x76a   : > { %v5110_v31 = vpack.c.bf16 %v5094_v13, %v5094_v13 }
 0x76b   : > { %v4102_v8 = vpack.c.bf16 %v14110_v20, %v14110_v20  ;;  %v4101_v24 = vpack.c.bf16 %v14109_v40, %v14109_v40 }
 0x76c   : > { %13552 = vmatmul.mubr.msk.bf16.vlgmr.msra.gmra.mrb[128].mxu0 %vm3222_vm5, %v5108_v30  ;;  %v6107_v20 = vpop.permute.xlu1 %6106 }
 0x76d   : > { %v5669_v34 = vsel %vm3226_vm2, %v4101_v24, 0  ;;  %v5715_v58 = vsel %vm3226_vm2, %v4102_v8, 0  ;;  %13563 = vmatprep.mubr.msk.bf16.mxu0 %vm14771_vm0, %v18377_v54 }
 0x76e   : > { %13556 = vmatpush3.bf16.msra.mxu1 %v5669_v34  ;;  %13562 = vmatpush3.bf16.msra.mxu0 %v5715_v58 }
 0x76f   : > { %13573 = vmatprep.subr.bf16.mxu0 %v18377_v54  ;;  %13567 = vmatprep.subr.bf16.mxu1 %v18377_v54  ;;  %v14527_v44 = vpop.eup %14526 }
 0x770   : > { %v5096_v14 = vmul.f32 %v14527_v44, %v16372_v17  ;;  %v6155_v58 = vpop.permute.xlu1 %6154 }
 0x772   : > { %v5112_v43 = vpack.c.bf16 %v5096_v14, %v5096_v14 }
 0x774   : > { %13564 = vmatmul.mubr.msk.bf16.vlgmr.msra.gmra.mrb[132].mxu0 %vm3222_vm5, %v5110_v31  ;;  %v14133_v14 = vpop.permute.xlu1 %14132 }
 0x775   : > { %13575 = vmatprep.mubr.msk.bf16.mxu0 %vm14771_vm0, %v18377_v54 }
 0x776   : > { %v5055_v29 = vpop.xlane.xlu0 %5054 }
 0x777   : > { %14528 = vrcp.f32 %v5055_v29 }
 0x778   : > { %14530 = vrcp.f32 %v5061_v27 }
 0x77a   : > { %v14113_v1 = vpop.permute.xlu0 %14112 }
 0x77b   : > { %v14115_v59 = vunpack.i.h.bf16 %v14113_v1  ;;  %v14114_v23 = vunpack.i.l.bf16 %v14113_v1 }
 0x77d   : > { %v4104_v9 = vpack.c.bf16 %v14115_v59, %v14115_v59  ;;  %v4103_v61 = vpack.c.bf16 %v14114_v23, %v14114_v23 }
 0x77e   : > { %v14118_v33 = vpop.permute.xlu0 %14117 }
 0x77f   : > { %v5807_v11 = vsel %vm3226_vm2, %v4104_v9, 0  ;;  %v14120_v38 = vunpack.i.h.bf16 %v14118_v33  ;;  %v5761_v30 = vsel %vm3226_vm2, %v4103_v61, 0  ;;  %v14119_v10 = vunpack.i.l.bf16 %v14118_v33 }
 0x780   : > { %13574 = vmatpush3.bf16.msra.mxu0 %v5807_v11 }
 0x781   : > { %v14529_v49 = vpop.eup %14528  ;;  %13585 = vmatprep.subr.bf16.mxu0 %v18377_v54  ;;  %v5979_v27 = vpack.c.bf16 %v14120_v38, %v14120_v38  ;;  %v5978_v13 = vpack.c.bf16 %v14119_v10, %v14119_v10 }
 0x782   : > { %v14123_v16 = vpop.permute.xlu0 %14122  ;;  %v5093_v45 = vmul.f32 %v14529_v49, %v16377_v46  ;;  %v14531_v17 = vpop.eup %14530 }
 0x783   : > { %13576 = vmatmul.mubr.msk.bf16.vlgmr.msra.gmra.mrb[136].mxu0 %vm3222_vm5, %v5112_v43  ;;  %v14125_v46 = vunpack.i.h.bf16 %v14123_v16  ;;  %v6112_v8 = vsel %vm2260_vm1, %v5979_v27, 0  ;;  %v5095_v24 = vmul.f32 %v14531_v17, %v16368_v21  ;;  %v14124_v1 = vunpack.i.l.bf16 %v14123_v16  ;;  %v6299_v49 = vpop.permute.xlu1 %6298 }
 0x784   : > { %v5109_v47 = vpack.c.bf16 %v5093_v45, %v5093_v45  ;;  %13587 = vmatprep.mubr.msk.bf16.mxu0 %vm14771_vm0, %v18377_v54  ;;  %v6064_v59 = vsel %vm2260_vm1, %v5978_v13, 0  ;;  %v14135_v16 = vunpack.i.h.bf16 %v14133_v14 }
 0x785   : > { %v5981_v31 = vpack.c.bf16 %v14125_v46, %v14125_v46  ;;  %v5111_v29 = vpack.c.bf16 %v5095_v24, %v5095_v24  ;;  %v5980_v33 = vpack.c.bf16 %v14124_v1, %v14124_v1 }
 0x786   : > { %v6059_v40 = vpop.permute.xlu0 %6058  ;;  %13558 = vmatmul.mubr.msk.bf16.vlgmr.msra.gmra.mrb[120].mxu1 %vm3222_vm5, %v5109_v47  ;;  %v5985_v17 = vpack.c.bf16 %v14135_v16, %v14135_v16 }
 0x787   : > { %13568 = vmatpush3.bf16.msra.mxu1 %v5761_v30  ;;  %13569 = vmatprep.mubr.msk.bf16.mxu1 %vm14771_vm0, %v18377_v54  ;;  %v6208_v9 = vsel %vm2260_vm1, %v5981_v31, 0  ;;  %v6160_v61 = vsel %vm2260_vm1, %v5980_v33, 0 }
 0x788   : > { %13579 = vmatprep.subr.bf16.mxu1 %v18377_v54 }
 0x789   : > { %13586 = vmatpush3.bf16.xpose.msra.mxu0 %v6112_v8  ;;  %v6400_v8 = vsel %vm2260_vm1, %v5985_v17, 0 }
 0x78a   : > { %v14128_v34 = vpop.permute.xlu0 %14127  ;;  %13597 = vmatprep.subr.bf16.mxu0 %v18377_v54 }
 0x78b   : > { %v14130_v21 = vunpack.i.h.bf16 %v14128_v34  ;;  %v14129_v43 = vunpack.i.l.bf16 %v14128_v34 }
 0x78d   : > { %v5983_v11 = vpack.c.bf16 %v14130_v21, %v14130_v21  ;;  %v5982_v47 = vpack.c.bf16 %v14129_v43, %v14129_v43 }
 0x78e   : > { %v6203_v44 = vpop.permute.xlu0 %6202  ;;  %13570 = vmatmul.mubr.msk.bf16.vlgmr.msra.gmra.mrb[124].mxu1 %vm3222_vm5, %v5111_v29 }
 0x78f   : > { %13581 = vmatprep.mubr.msk.bf16.mxu1 %vm14771_vm0, %v18377_v54  ;;  %v6304_v45 = vsel %vm2260_vm1, %v5983_v11, 0  ;;  %v6256_v10 = vsel %vm2260_vm1, %v5982_v47, 0 }
 0x790   : > { %13580 = vmatpush3.bf16.xpose.msra.mxu1 %v6064_v59  ;;  %13588 = vmatmul.mubr.msk.bf16.vlgmr.msra.gmra.mrb[140].mxu0 %vm2260_vm1, %v6107_v20  ;;  %v6347_v20 = vpop.permute.xlu1 %6346 }
 0x791   : > { %13598 = vmatpush3.bf16.xpose.msra.mxu0 %v6208_v9  ;;  %13591 = vmatprep.subr.bf16.mxu1 %v18377_v54 }
 0x792   : > { %v6251_v23 = vpop.permute.xlu0 %6250  ;;  %13599 = vmatprep.mubr.msk.bf16.mxu0 %vm14771_vm0, %v18377_v54  ;;  %13609 = vmatprep.subr.bf16.mxu0 %v18377_v54 }
 0x794   : > { %v14143_v34 = vpop.permute.xlu1 %14142 }
 0x796   : > { %v14138_v38 = vpop.permute.xlu0 %14137 }
 0x797   : > { %13582 = vmatmul.mubr.msk.bf16.vlgmr.msra.gmra.mrb[128].mxu1 %vm2260_vm1, %v6059_v40  ;;  %v14134_v40 = vunpack.i.l.bf16 %v14133_v14  ;;  %v14140_v46 = vunpack.i.h.bf16 %v14138_v38  ;;  %v14139_v31 = vunpack.i.l.bf16 %v14138_v38 }
 0x798   : > { %13592 = vmatpush3.bf16.xpose.msra.mxu1 %v6160_v61  ;;  %13600 = vmatmul.mubr.msk.bf16.vlgmr.msra.gmra.mrb[144].mxu0 %vm2260_vm1, %v6203_v44  ;;  %v14145_v44 = vunpack.i.h.bf16 %v14143_v34  ;;  %v6491_v59 = vpop.permute.xlu1 %6490 }
 0x799   : > { %13610 = vmatpush3.bf16.xpose.msra.mxu0 %v6304_v45  ;;  %13593 = vmatprep.mubr.msk.bf16.mxu1 %vm14771_vm0, %v18377_v54  ;;  %v5984_v24 = vpack.c.bf16 %v14134_v40, %v14134_v40  ;;  %v5986_v21 = vpack.c.bf16 %v14139_v31, %v14139_v31 }
 0x79a   : > { %v6395_v27 = vpop.permute.xlu0 %6394  ;;  %13603 = vmatprep.subr.bf16.mxu1 %v18377_v54  ;;  %13611 = vmatprep.mubr.msk.bf16.mxu0 %vm14771_vm0, %v18377_v54  ;;  %v5989_v14 = vpack.c.bf16 %v14145_v44, %v14145_v44 }
 0x79b   : > { %13621 = vmatprep.subr.bf16.mxu0 %v18377_v54  ;;  %v6352_v29 = vsel %vm2260_vm1, %v5984_v24, 0  ;;  %v6448_v11 = vsel %vm2260_vm1, %v5986_v21, 0 }
 0x79c   : > { %v6539_v33 = vpop.permute.xlu1 %6538 }
 0x79e   : > { %v6443_v30 = vpop.permute.xlu0 %6442 }
 0x79f   : > { %13594 = vmatmul.mubr.msk.bf16.vlgmr.msra.gmra.mrb[132].mxu1 %vm2260_vm1, %v6155_v58  ;;  %v5987_v58 = vpack.c.bf16 %v14140_v46, %v14140_v46 }
 0x7a0   : > { %13604 = vmatpush3.bf16.xpose.msra.mxu1 %v6256_v10  ;;  %13612 = vmatmul.mubr.msk.bf16.vlgmr.msra.gmra.mrb[148].mxu0 %vm2260_vm1, %v6299_v49  ;;  %v6592_v49 = vsel %vm2260_vm1, %v5989_v14, 0  ;;  %v14153_v45 = vpop.permute.xlu1 %14152 }
 0x7a1   : > { %13622 = vmatpush3.bf16.xpose.msra.mxu0 %v6400_v8  ;;  %13605 = vmatprep.mubr.msk.bf16.mxu1 %vm14771_vm0, %v18377_v54  ;;  %v6496_v1 = vsel %vm2260_vm1, %v5987_v58, 0  ;;  %v14154_v8 = vunpack.i.l.bf16 %v14153_v45 }
 0x7a2   : > { %13615 = vmatprep.subr.bf16.mxu1 %v18377_v54  ;;  %13623 = vmatprep.mubr.msk.bf16.mxu0 %vm14771_vm0, %v18377_v54  ;;  %v14148_v13 = vpop.permute.xlu0 %14147 }
 0x7a3   : > { %13633 = vmatprep.subr.bf16.mxu0 %v18377_v54  ;;  %v14150_v38 = vunpack.i.h.bf16 %v14148_v13  ;;  %v5992_v31 = vpack.c.bf16 %v14154_v8, %v14154_v8 }
 0x7a4   : > { %v6683_v24 = vpop.permute.xlu1 %6682 }
 0x7a5   : > { %v5991_v16 = vpack.c.bf16 %v14150_v38, %v14150_v38 }
 0x7a6   : > { %v6587_v9 = vpop.permute.xlu0 %6586 }
 0x7a7   : > { %13606 = vmatmul.mubr.msk.bf16.vlgmr.msra.gmra.mrb[136].mxu1 %vm2260_vm1, %v6251_v23  ;;  %v14144_v23 = vunpack.i.l.bf16 %v14143_v34  ;;  %v6688_v40 = vsel %vm2260_vm1, %v5991_v16, 0 }
 0x7a8   : > { %13616 = vmatpush3.bf16.xpose.msra.mxu1 %v6352_v29  ;;  %13624 = vmatmul.mubr.msk.bf16.vlgmr.msra.gmra.mrb[152].mxu0 %vm2260_vm1, %v6395_v27  ;;  %v14149_v27 = vunpack.i.l.bf16 %v14148_v13  ;;  %v6779_v44 = vpop.permute.xlu1 %6778 }
 0x7a9   : > { %13634 = vmatpush3.bf16.xpose.msra.mxu0 %v6496_v1  ;;  %13617 = vmatprep.mubr.msk.bf16.mxu1 %vm14771_vm0, %v18377_v54  ;;  %v5988_v61 = vpack.c.bf16 %v14144_v23, %v14144_v23 }
 0x7aa   : > { %13627 = vmatprep.subr.bf16.mxu1 %v18377_v54  ;;  %13635 = vmatprep.mubr.msk.bf16.mxu0 %vm14771_vm0, %v18377_v54  ;;  %v6635_v43 = vpop.permute.xlu0 %6634  ;;  %v5990_v10 = vpack.c.bf16 %v14149_v27, %v14149_v27 }
 0x7ab   : > { %13645 = vmatprep.subr.bf16.mxu0 %v18377_v54  ;;  %v6544_v17 = vsel %vm2260_vm1, %v5988_v61, 0 }
 0x7ac   : > { %v6640_v34 = vsel %vm2260_vm1, %v5990_v10, 0 }
 0x7ae   : > { %v6731_v47 = vpop.permute.xlu0 %6730 }
 0x7af   : > { %13618 = vmatmul.mubr.msk.bf16.vlgmr.msra.gmra.mrb[140].mxu1 %vm2260_vm1, %v6347_v20  ;;  %v14155_v20 = vunpack.i.h.bf16 %v14153_v45 }
 0x7b0   : > { %13628 = vmatpush3.bf16.xpose.msra.mxu1 %v6448_v11  ;;  %13636 = vmatmul.mubr.msk.bf16.vlgmr.msra.gmra.mrb[156].mxu0 %vm2260_vm1, %v6491_v59  ;;  %v6736_v59 = vsel %vm2260_vm1, %v5992_v31, 0 }
 0x7b1   : > { %13646 = vmatpush3.bf16.xpose.msra.mxu0 %v6592_v49  ;;  %13629 = vmatprep.mubr.msk.bf16.mxu1 %vm14771_vm0, %v18377_v54 }
 0x7b2   : > { %13639 = vmatprep.subr.bf16.mxu1 %v18377_v54  ;;  %13647 = vmatprep.mubr.msk.bf16.mxu0 %vm14771_vm0, %v18377_v54  ;;  %v14158_v46 = vpop.permute.xlu0 %14157 }
 0x7b3   : > { %13657 = vmatprep.subr.bf16.mxu0 %v18377_v54  ;;  %v14160_v58 = vunpack.i.h.bf16 %v14158_v46  ;;  %v14159_v1 = vunpack.i.l.bf16 %v14158_v46 }
 0x7b5   : > { %v6043_v29 = vpack.c.bf16 %v14160_v58, %v14160_v58 }
 0x7b7   : > { %13630 = vmatmul.mubr.msk.bf16.vlgmr.msra.gmra.mrb[144].mxu1 %vm2260_vm1, %v6443_v30  ;;  %v5993_v30 = vpack.c.bf16 %v14155_v20, %v14155_v20  ;;  %v7100_v21 = vsel %vm3226_vm2, %v6043_v29, 0 }
 0x7b8   : > { %13640 = vmatpush3.bf16.xpose.msra.mxu1 %v6544_v17  ;;  %13648 = vmatmul.mubr.msk.bf16.vlgmr.msra.gmra.mrb[160].mxu0 %vm2260_vm1, %v6587_v9  ;;  %v6042_v9 = vpack.c.bf16 %v14159_v1, %v14159_v1 }
 0x7b9   : > { %13658 = vmatpush3.bf16.xpose.msra.mxu0 %v6688_v40  ;;  %13641 = vmatprep.mubr.msk.bf16.mxu1 %vm14771_vm0, %v18377_v54  ;;  %v6784_v13 = vsel %vm2260_vm1, %v5993_v30, 0 }
 0x7ba   : > { %13651 = vmatprep.subr.bf16.mxu1 %v18377_v54  ;;  %13659 = vmatprep.mubr.msk.bf16.mxu0 %vm14771_vm0, %v18377_v54  ;;  %v7054_v14 = vsel %vm3226_vm2, %v6042_v9, 0 }
 0x7bb   : > { %13669 = vmatprep.subr.bf16.mxu0 %v18377_v54 }
 0x7bf   : > { %13642 = vmatmul.mubr.msk.bf16.vlgmr.msra.gmra.mrb[148].mxu1 %vm2260_vm1, %v6539_v33 }
 0x7c0   : > { %13652 = vmatpush3.bf16.xpose.msra.mxu1 %v6640_v34  ;;  %13660 = vmatmul.mubr.msk.bf16.vlgmr.msra.gmra.mrb[164].mxu0 %vm2260_vm1, %v6683_v24 }
 0x7c1   : > { %13670 = vmatpush3.bf16.xpose.msra.mxu0 %v6784_v13  ;;  %13653 = vmatprep.mubr.msk.bf16.mxu1 %vm14771_vm0, %v18377_v54 }
 0x7c2   : > { %13663 = vmatprep.subr.bf16.mxu1 %v18377_v54  ;;  %13671 = vmatprep.mubr.msk.bf16.mxu0 %vm14771_vm0, %v18377_v54 }
 0x7c3   : > { %13681 = vmatprep.subr.bf16.mxu0 %v18377_v54 }
 0x7c7   : > { %13654 = vmatmul.mubr.msk.bf16.vlgmr.msra.gmra.mrb[152].mxu1 %vm2260_vm1, %v6635_v43 }
 0x7c8   : > { %13664 = vmatpush3.bf16.xpose.msra.mxu1 %v6736_v59  ;;  %13672 = vmatmul.mubr.msk.bf16.vlgmr.msra.gmra.mrb[168].mxu0 %vm2260_vm1, %v6779_v44 }
 0x7c9   : > { %13682 = vmatpush3.bf16.msra.mxu0 %v7100_v21  ;;  %13665 = vmatprep.mubr.msk.bf16.mxu1 %vm14771_vm0, %v18377_v54 }
 0x7ca   : > { %13675 = vmatprep.subr.bf16.mxu1 %v18377_v54  ;;  %13683 = vmatprep.mubr.msk.bf16.mxu0 %vm14771_vm0, %v18377_v54 }
 0x7cb   : > { %13693 = vmatprep.subr.bf16.mxu0 %v18377_v54 }
 0x7cf   : > { %13666 = vmatmul.mubr.msk.bf16.vlgmr.msra.gmra.mrb[156].mxu1 %vm2260_vm1, %v6731_v47 }
 0x7d0   : > { %13676 = vmatpush3.bf16.msra.mxu1 %v7054_v14  ;;  %13677 = vmatprep.mubr.msk.bf16.mxu1 %vm14771_vm0, %v18377_v54 }
 0x7d1   : > { %13687 = vmatprep.subr.bf16.mxu1 %v18377_v54 }
 0x7df   : > { %v16623_v23 = vpop.f32.mrb[96].mxu1 }
 0x7e0   : > { %18393 = vst [vmem:[#allocation17_spill] sm:$0xff] %v16623_v23  ;;  %v13487_v33 = vpop.f32.mrb[97].mxu1 }
 0x7e1   : > { %v5156_v11 = vpop.f32.mrb[98].mxu1 }
 0x7e2   : > { %v13488_v38 = vpop.f32.mrb[99].mxu1 }
 0x7f2   : > { %v16625_v49 = vpop.f32.mrb[108].mxu0 }
 0x7f3   : > { %18394 = vst [vmem:[#allocation16_spill] sm:$0xff] %v16625_v49  ;;  %v13493_v43 = vpop.f32.mrb[109].mxu0 }
 0x7f4   : > { %v5202_v61 = vpop.f32.mrb[110].mxu0 }
 0x7f5   : > { %v13494_v16 = vpop.f32.mrb[111].mxu0 }
 0x814   : > { %v16627_v45 = vpop.f32.mrb[100].mxu1 }
 0x815   : > { %18395 = vst [vmem:[#allocation18_spill] sm:$0xff] %v16627_v45  ;;  %v13499_v27 = vpop.f32.mrb[101].mxu1 }
 0x816   : > { %v5248_v47 = vpop.f32.mrb[102].mxu1 }
 0x817   : > { %v13500_v17 = vpop.f32.mrb[103].mxu1 }
 0x818   : > { %v16629_v20 = vpop.f32.mrb[112].mxu0 }
 0x819   : > { %18396 = vst [vmem:[#allocation20_spill] sm:$0xff] %v16629_v20  ;;  %v13505_v40 = vpop.f32.mrb[113].mxu0 }
 0x81a   : > { %v5294_v10 = vpop.f32.mrb[114].mxu0 }
 0x81b   : > { %v13506_v30 = vpop.f32.mrb[115].mxu0 }
 0x81c   : > { %v16631_v46 = vpop.f32.mrb[104].mxu1 }
 0x81d   : > { %18397 = vst [vmem:[#allocation22_spill] sm:$0xff] %v16631_v46  ;;  %v13511_v8 = vpop.f32.mrb[105].mxu1 }
 0x81e   : > { %v5340_v24 = vpop.f32.mrb[106].mxu1 }
 0x81f   : > { %v13512_v34 = vpop.f32.mrb[107].mxu1 }
 0x827   : > { %v16633_v58 = vpop.f32.mrb[116].mxu0 }
 0x828   : > { %18398 = vst [vmem:[#allocation28_spill] sm:$0xff] %v16633_v58  ;;  %v13517_v13 = vpop.f32.mrb[117].mxu0 }
 0x829   : > { %v5386_v31 = vpop.f32.mrb[118].mxu0 }
 0x82a   : > { %v13518_v29 = vpop.f32.mrb[119].mxu0 }
 0x82b   : > { %v16635_v44 = vpop.f32.mrb[108].mxu1 }
 0x82c   : > { %18399 = vst [vmem:[#allocation21_spill] sm:$0xff] %v16635_v44  ;;  %v13523_v1 = vpop.f32.mrb[109].mxu1 }
 0x82d   : > { %v5432_v59 = vpop.f32.mrb[110].mxu1 }
 0x82e   : > { %v13524_v21 = vpop.f32.mrb[111].mxu1 }
 0x82f   : > { %v16637_v9 = vpop.f32.mrb[120].mxu0 }
 0x830   : > { %18400 = vst [vmem:[#allocation25_spill] sm:$0xff] %v16637_v9  ;;  %v13529_v14 = vpop.f32.mrb[121].mxu0 }
 0x831   : > { %v5478_v33 = vpop.f32.mrb[122].mxu0 }
 0x832   : > { %v13530_v11 = vpop.f32.mrb[123].mxu0 }
 0x833   : > { %v16639_v38 = vpop.f32.mrb[112].mxu1 }
 0x834   : > { %18401 = vst [vmem:[#allocation26_spill] sm:$0xff] %v16639_v38  ;;  %v13535_v43 = vpop.f32.mrb[113].mxu1 }
 0x835   : > { %v5524_v61 = vpop.f32.mrb[114].mxu1 }
 0x836   : > { %v13536_v16 = vpop.f32.mrb[115].mxu1 }
 0x837   : > { %v16641_v27 = vpop.f32.mrb[124].mxu0 }
 0x838   : > { %18402 = vst [vmem:[#allocation27_spill] sm:$0xff] %v16641_v27  ;;  %v13541_v47 = vpop.f32.mrb[125].mxu0 }
 0x839   : > { %v5570_v17 = vpop.f32.mrb[126].mxu0 }
 0x83a   : > { %v13542_v40 = vpop.f32.mrb[127].mxu0 }
 0x83b   : > { %v16643_v10 = vpop.f32.mrb[116].mxu1 }
 0x83c   : > { %18403 = vst [vmem:[#allocation29_spill] sm:$0xff] %v16643_v10  ;;  %v13547_v30 = vpop.f32.mrb[117].mxu1 }
 0x83d   : > { %v5616_v8 = vpop.f32.mrb[118].mxu1 }
 0x83e   : > { %v13548_v24 = vpop.f32.mrb[119].mxu1 }
 0x83f   : > { %v16645_v34 = vpop.f32.mrb[128].mxu0 }
 0x840   : > { %18404 = vst [vmem:[#allocation30_spill] sm:$0xff] %v16645_v34  ;;  %v13553_v13 = vpop.f32.mrb[129].mxu0 }
 0x841   : > { %v5662_v31 = vpop.f32.mrb[130].mxu0 }
 0x842   : > { %v13554_v29 = vpop.f32.mrb[131].mxu0 }
 0x847   : > { %v16647_v1 = vpop.f32.mrb[132].mxu0 }
 0x848   : > { %18405 = vst [vmem:[#allocation31_spill] sm:$0xff] %v16647_v1  ;;  %v13565_v59 = vpop.f32.mrb[133].mxu0 }
 0x849   : > { %v5754_v21 = vpop.f32.mrb[134].mxu0 }
 0x84a   : > { %v13566_v14 = vpop.f32.mrb[135].mxu0 }
 0x856   : > { %v16649_v33 = vpop.f32.mrb[136].mxu0 }
 0x857   : > { %18406 = vst [vmem:[#allocation32_spill] sm:$0xff] %v16649_v33  ;;  %v13577_v11 = vpop.f32.mrb[137].mxu0 }
 0x858   : > { %v5846_v43 = vpop.f32.mrb[138].mxu0 }
 0x859   : > { %v16651_v61 = vpop.f32.mrb[120].mxu1  ;;  %v13578_v16 = vpop.f32.mrb[139].mxu0 }
 0x85a   : > { %18407 = vst [vmem:[#allocation33_spill] sm:$0xff] %v16651_v61  ;;  %v13559_v47 = vpop.f32.mrb[121].mxu1 }
 0x85b   : > { %v5708_v17 = vpop.f32.mrb[122].mxu1 }
 0x85c   : > { %v13560_v40 = vpop.f32.mrb[123].mxu1 }
 0x861   : > { %v16653_v30 = vpop.f32.mrb[124].mxu1 }
 0x862   : > { %18408 = vst [vmem:[#allocation34_spill] sm:$0xff] %v16653_v30  ;;  %v13571_v8 = vpop.f32.mrb[125].mxu1 }
 0x863   : > { %v5800_v24 = vpop.f32.mrb[126].mxu1  ;;  %v6148_v13 = vpop.f32.mrb[140].mxu0 }
 0x864   : > { %v6827_v31 = vmul.f32 0.17677669, %v6148_v13  ;;  %v13572_v29 = vpop.f32.mrb[127].mxu1  ;;  %v13589_v59 = vpop.f32.mrb[141].mxu0 }
 0x865   : > { %v6151_v21 = vpop.f32.mrb[142].mxu0 }
 0x866   : > { %v16656_v14 = vadd.f32 %v6827_v31, %v18385_v32  ;;  %v13590_v11 = vpop.f32.mrb[143].mxu0 }
 0x868   : > { %v6861_v43 = vsel %vm3029_vm4, %v16656_v14, -inf }
 0x869   : > { %6862 = vmax.xlane.f32.xlu1 %v6861_v43 }
 0x86a   : > { %v6100_v16 = vpop.f32.mrb[128].mxu1 }
 0x86b   : > { %v6826_v47 = vmul.f32 0.17677669, %v6100_v16  ;;  %v13583_v17 = vpop.f32.mrb[129].mxu1  ;;  %v16660_v40 = vpop.f32.mrb[144].mxu0 }
 0x86c   : > { %v6103_v8 = vpop.f32.mrb[130].mxu1  ;;  %v13601_v24 = vpop.f32.mrb[145].mxu0 }
 0x86d   : > { %v16663_v13 = vadd.f32 %v6826_v47, %v18385_v32  ;;  %v13584_v29 = vpop.f32.mrb[131].mxu1  ;;  %v6247_v59 = vpop.f32.mrb[146].mxu0 }
 0x86e   : > { %v13602_v21 = vpop.f32.mrb[147].mxu0 }
 0x86f   : > { %v6858_v31 = vsel %vm3029_vm4, %v16663_v13, -inf }
 0x870   : > { %6859 = vmax.xlane.f32.xlu0 %v6858_v31 }
 0x872   : > { %v6196_v11 = vpop.f32.mrb[132].mxu1 }
 0x873   : > { %v13595_v30 = vpop.f32.mrb[133].mxu1  ;;  %v6340_v43 = vpop.f32.mrb[148].mxu0 }
 0x874   : > { %v6199_v61 = vpop.f32.mrb[134].mxu1  ;;  %v13613_v16 = vpop.f32.mrb[149].mxu0 }
 0x875   : > { %v13596_v17 = vpop.f32.mrb[135].mxu1  ;;  %v6343_v10 = vpop.f32.mrb[150].mxu0 }
 0x876   : > { %v13614_v38 = vpop.f32.mrb[151].mxu0 }
 0x87a   : > { %v6292_v8 = vpop.f32.mrb[136].mxu1  ;;  %14162 = vrot.lane.b32.xlu1 %v18387_v53, %s14773_s22 }
 0x87b   : > { %v13607_v47 = vpop.f32.mrb[137].mxu1  ;;  %v6436_v24 = vpop.f32.mrb[152].mxu0 }
 0x87c   : > { %v6295_v29 = vpop.f32.mrb[138].mxu1  ;;  %v13625_v59 = vpop.f32.mrb[153].mxu0 }
 0x87d   : > { %v13608_v21 = vpop.f32.mrb[139].mxu1  ;;  %v6439_v44 = vpop.f32.mrb[154].mxu0 }
 0x87e   : > { %v13626_v46 = vpop.f32.mrb[155].mxu0 }
 0x882   : > { %v6388_v31 = vpop.f32.mrb[140].mxu1 }
 0x883   : > { %v13619_v45 = vpop.f32.mrb[141].mxu1  ;;  %v6532_v30 = vpop.f32.mrb[156].mxu0 }
 0x884   : > { %v6391_v49 = vpop.f32.mrb[142].mxu1  ;;  %v13637_v61 = vpop.f32.mrb[157].mxu0 }
 0x885   : > { %v13620_v16 = vpop.f32.mrb[143].mxu1  ;;  %v6535_v17 = vpop.f32.mrb[158].mxu0  ;;  %v6831_v61 = vmul.f32 0.17677669, %v6340_v43 }
 0x886   : > { %14167 = vrot.lane.b32.xlu0 %v18386_v52, %s14773_s22  ;;  %v13638_v38 = vpop.f32.mrb[159].mxu0 }
 0x887   : > { %v16672_v9 = vadd.f32 %v6831_v61, %v18385_v32  ;;  %v6833_v38 = vmul.f32 0.17677669, %v6436_v24  ;;  %v6829_v61 = vmul.f32 0.17677669, %v16660_v40 }
 0x889   : > { %v6873_v43 = vsel %vm3029_vm4, %v16672_v9, -inf }
 0x88a   : > { %v6484_v10 = vpop.f32.mrb[144].mxu1 }
 0x88b   : > { %v13631_v23 = vpop.f32.mrb[145].mxu1  ;;  %v6628_v47 = vpop.f32.mrb[160].mxu0 }
 0x88c   : > { %v6487_v33 = vpop.f32.mrb[146].mxu1  ;;  %v13649_v29 = vpop.f32.mrb[161].mxu0 }
 0x88d   : > { %v13632_v59 = vpop.f32.mrb[147].mxu1  ;;  %v6631_v21 = vpop.f32.mrb[162].mxu0  ;;  %v6828_v29 = vmul.f32 0.17677669, %v6196_v11  ;;  %v6837_v11 = vmul.f32 0.17677669, %v6628_v47 }
 0x88e   : > { %v13650_v44 = vpop.f32.mrb[163].mxu0 }
 0x88f   : > { %v16675_v44 = vadd.f32 %v6833_v38, %v18385_v32  ;;  %v16681_v24 = vadd.f32 %v6828_v29, %v18385_v32  ;;  %v16689_v38 = vadd.f32 %v6829_v61, %v18385_v32  ;;  %v16694_v29 = vadd.f32 %v6837_v11, %v18385_v32 }
 0x891   : > { %v6864_v40 = vsel %vm3029_vm4, %v16681_v24, -inf }
 0x892   : > { %v6580_v46 = vpop.f32.mrb[148].mxu1 }
 0x893   : > { %v13643_v1 = vpop.f32.mrb[149].mxu1  ;;  %v6724_v45 = vpop.f32.mrb[164].mxu0 }
 0x894   : > { %v6583_v34 = vpop.f32.mrb[150].mxu1  ;;  %v13661_v49 = vpop.f32.mrb[165].mxu0  ;;  %v6835_v1 = vmul.f32 0.17677669, %v6532_v30 }
 0x895   : > { %v13644_v16 = vpop.f32.mrb[151].mxu1  ;;  %v6727_v17 = vpop.f32.mrb[166].mxu0 }
 0x896   : > { %v13662_v27 = vpop.f32.mrb[167].mxu0  ;;  %v6879_v16 = vsel %vm3029_vm4, %v16675_v44, -inf }
 0x89a   : > { %v6676_v23 = vpop.f32.mrb[152].mxu1 }
 0x89b   : > { %v13655_v58 = vpop.f32.mrb[153].mxu1  ;;  %v6820_v33 = vpop.f32.mrb[168].mxu0 }
 0x89c   : > { %v6679_v59 = vpop.f32.mrb[154].mxu1  ;;  %v13673_v21 = vpop.f32.mrb[169].mxu0  ;;  %v16684_v58 = vadd.f32 %v6835_v1, %v18385_v32  ;;  %v6839_v1 = vmul.f32 0.17677669, %v6724_v45  ;;  %v6841_v61 = vmul.f32 0.17677669, %v6820_v33 }
 0x89d   : > { %v13656_v34 = vpop.f32.mrb[155].mxu1  ;;  %v6823_v49 = vpop.f32.mrb[170].mxu0  ;;  %v6830_v59 = vmul.f32 0.17677669, %v6292_v8  ;;  %v6867_v8 = vsel %vm3029_vm4, %v16689_v38, -inf  ;;  %v6891_v45 = vsel %vm3029_vm4, %v16694_v29, -inf }
 0x89e   : > { %6874 = vmax.xlane.f32.xlu1 %v6873_v43  ;;  %v13674_v27 = vpop.f32.mrb[171].mxu0  ;;  %v6885_v34 = vsel %vm3029_vm4, %v16684_v58, -inf  ;;  %v6832_v43 = vmul.f32 0.17677669, %v6388_v31  ;;  %v16714_v31 = vadd.f32 %v6841_v61, %v18385_v32 }
 0x89f   : > { %v16699_v49 = vadd.f32 %v6830_v59, %v18385_v32  ;;  %v16704_v27 = vadd.f32 %v6839_v1, %v18385_v32 }
 0x8a0   : > { %v16709_v11 = vadd.f32 %v6832_v43, %v18385_v32 }
 0x8a1   : > { %v6897_v59 = vsel %vm3029_vm4, %v16704_v27, -inf }
 0x8a2   : > { %v6772_v30 = vpop.f32.mrb[156].mxu1  ;;  %6880 = vmax.xlane.f32.xlu1 %v6879_v16  ;;  %v6834_v16 = vmul.f32 0.17677669, %v6484_v10  ;;  %v6903_v10 = vsel %vm3029_vm4, %v16714_v31, -inf }
 0x8a3   : > { %v13667_v17 = vpop.f32.mrb[157].mxu1 }
 0x8a4   : > { %v6775_v21 = vpop.f32.mrb[158].mxu1  ;;  %v6870_v17 = vsel %vm3029_vm4, %v16699_v49, -inf  ;;  %v16719_v33 = vadd.f32 %v6834_v16, %v18385_v32 }
 0x8a5   : > { %6865 = vmax.xlane.f32.xlu0 %v6864_v40  ;;  %v13668_v47 = vpop.f32.mrb[159].mxu1  ;;  %v6836_v21 = vmul.f32 0.17677669, %v6580_v46  ;;  %v6876_v40 = vsel %vm3029_vm4, %v16709_v11, -inf  ;;  %v6840_v46 = vmul.f32 0.17677669, %v6772_v30 }
 0x8a6   : > { %6886 = vmax.xlane.f32.xlu1 %v6885_v34  ;;  %v6838_v47 = vmul.f32 0.17677669, %v6676_v23  ;;  %v6882_v34 = vsel %vm3029_vm4, %v16719_v33, -inf }
 0x8a7   : > { %v16726_v1 = vadd.f32 %v6836_v21, %v18385_v32  ;;  %v16736_v61 = vadd.f32 %v6840_v46, %v18385_v32 }
 0x8a8   : > { %v16731_v43 = vadd.f32 %v6838_v47, %v18385_v32 }
 0x8a9   : > { %6868 = vmax.xlane.f32.xlu0 %v6867_v8  ;;  %v6888_v8 = vsel %vm3029_vm4, %v16726_v1, -inf  ;;  %v6900_v23 = vsel %vm3029_vm4, %v16736_v61, -inf }
 0x8aa   : > { %6892 = vmax.xlane.f32.xlu1 %v6891_v45  ;;  %v6894_v45 = vsel %vm3029_vm4, %v16731_v43, -inf }
 0x8ad   : > { %6871 = vmax.xlane.f32.xlu0 %v6870_v17 }
 0x8ae   : > { %6898 = vmax.xlane.f32.xlu1 %v6897_v59 }
 0x8b1   : > { %6877 = vmax.xlane.f32.xlu0 %v6876_v40 }
 0x8b2   : > { %6904 = vmax.xlane.f32.xlu1 %v6903_v10 }
 0x8b5   : > { %6883 = vmax.xlane.f32.xlu0 %v6882_v34 }
 0x8b9   : > { %6889 = vmax.xlane.f32.xlu0 %v6888_v8 }
 0x8bd   : > { %6895 = vmax.xlane.f32.xlu0 %v6894_v45 }
 0x8c1   : > { %6901 = vmax.xlane.f32.xlu0 %v6900_v23 }
 0x8c3   : > { %14172 = vrot.lane.b32.xlu1 %v18389_v19, %s14773_s22 }
 0x8d7   : > { %14177 = vrot.lane.b32.xlu0 %v18388_v36, %s14773_s22 }
 0x8f6   : > { %v6863_v30 = vpop.xlane.xlu1 %6862 }
 0x8f7   : > { %v6907_v16 = vsub.f32 %v16656_v14, %v6863_v30 }
 0x8f9   : > { %v6924_v17 = vmul.f32 1.442695, %v6907_v16 }
 0x8fa   : > { %v16756_v14 = vpop.permute.xlu1 %14162 }
 0x8fb   : > { %14532 = vpow2.f32 %v6924_v17 }
 0x8fd   : > { %v6860_v59 = vpop.xlane.xlu0 %6859 }
 0x8fe   : > { %v6906_v21 = vsub.f32 %v16663_v13, %v6860_v59 }
 0x900   : > { %v6922_v40 = vmul.f32 1.442695, %v6906_v21 }
 0x901   : > { %v16758_v8 = vpop.permute.xlu0 %14167 }
 0x902   : > { %14534 = vpow2.f32 %v6922_v40 }
 0x905   : > { %v16748_v10 = vpop.eup %14532 }
 0x906   : > { %v6957_v47 = vsel %vm3029_vm4, %v16748_v10, 0.0 }
 0x907   : > { %6958 = vadd.xlane.f32.xlu1 %v6957_v47 }
 0x90c   : > { %v16752_v34 = vpop.eup %14534 }
 0x90d   : > { %v6954_v46 = vsel %vm3029_vm4, %v16752_v34, 0.0 }
 0x90e   : > { %6955 = vadd.xlane.f32.xlu0 %v6954_v46 }
 0x92b   : > { %v6875_v45 = vpop.xlane.xlu1 %6874 }
 0x92c   : > { %v6911_v30 = vsub.f32 %v16672_v9, %v6875_v45 }
 0x92e   : > { %v6932_v40 = vmul.f32 1.442695, %v6911_v30 }
 0x92f   : > { %v6881_v21 = vpop.xlane.xlu1 %6880 }
 0x930   : > { %v6913_v36 = vsub.f32 %v16675_v44, %v6881_v21 }
 0x932   : > { %v6866_v13 = vpop.xlane.xlu0 %6865 }
 0x933   : > { %v6908_v23 = vsub.f32 %v16681_v24, %v6866_v13  ;;  %v6887_v52 = vpop.xlane.xlu1 %6886  ;;  %v6936_v13 = vmul.f32 1.442695, %v6913_v36 }
 0x935   : > { %v6926_v16 = vmul.f32 1.442695, %v6908_v23 }
 0x936   : > { %v6869_v17 = vpop.xlane.xlu0 %6868 }
 0x937   : > { %14536 = vpow2.f32 %v6926_v16  ;;  %v6909_v59 = vsub.f32 %v16689_v38, %v6869_v17  ;;  %v6915_v38 = vsub.f32 %v16684_v58, %v6887_v52  ;;  %v6893_v44 = vpop.xlane.xlu1 %6892 }
 0x939   : > { %v6928_v47 = vmul.f32 1.442695, %v6909_v59 }
 0x93a   : > { %v6872_v20 = vpop.xlane.xlu0 %6871 }
 0x93b   : > { %14538 = vpow2.f32 %v6928_v47  ;;  %v6910_v46 = vsub.f32 %v16699_v49, %v6872_v20 }
 0x93c   : > { %14540 = vpow2.f32 %v6932_v40  ;;  %v6899_v40 = vpop.xlane.xlu1 %6898 }
 0x93d   : > { %v6930_v19 = vmul.f32 1.442695, %v6910_v46 }
 0x93e   : > { %v6878_v24 = vpop.xlane.xlu0 %6877 }
 0x93f   : > { %14542 = vpow2.f32 %v6930_v19  ;;  %v6912_v9 = vsub.f32 %v16709_v11, %v6878_v24  ;;  %v6940_v19 = vmul.f32 1.442695, %v6915_v38 }
 0x941   : > { %v16766_v45 = vpop.eup %14536  ;;  %v6934_v23 = vmul.f32 1.442695, %v6912_v9 }
 0x942   : > { %v6884_v30 = vpop.xlane.xlu0 %6883  ;;  %v6960_v16 = vsel %vm3029_vm4, %v16766_v45, 0.0 }
 0x943   : > { %14544 = vpow2.f32 %v6934_v23  ;;  %v6914_v20 = vsub.f32 %v16719_v33, %v6884_v30  ;;  %6961 = vadd.xlane.f32.xlu0 %v6960_v16  ;;  %v6917_v33 = vsub.f32 %v16694_v29, %v6893_v44  ;;  %v6905_v44 = vpop.xlane.xlu1 %6904 }
 0x944   : > { %14546 = vpow2.f32 %v6936_v13  ;;  %v6919_v13 = vsub.f32 %v16704_v27, %v6899_v40 }
 0x945   : > { %v16772_v49 = vpop.eup %14538  ;;  %v6938_v11 = vmul.f32 1.442695, %v6914_v20 }
 0x946   : > { %v6890_v17 = vpop.xlane.xlu0 %6889  ;;  %v6963_v36 = vsel %vm3029_vm4, %v16772_v49, 0.0  ;;  %v16776_v52 = vpop.eup %14540  ;;  %v6948_v16 = vmul.f32 1.442695, %v6919_v13 }
 0x947   : > { %14548 = vpow2.f32 %v6938_v11  ;;  %v6916_v58 = vsub.f32 %v16726_v1, %v6890_v17  ;;  %6964 = vadd.xlane.f32.xlu1 %v6963_v36  ;;  %v6969_v46 = vsel %vm3029_vm4, %v16776_v52, 0.0  ;;  %v6944_v1 = vmul.f32 1.442695, %v6917_v33 }
 0x948   : > { %14550 = vpow2.f32 %v6940_v19  ;;  %v6921_v17 = vsub.f32 %v16714_v31, %v6905_v44 }
 0x949   : > { %v16779_v59 = vpop.eup %14542  ;;  %v6942_v21 = vmul.f32 1.442695, %v6916_v58 }
 0x94a   : > { %v6896_v47 = vpop.xlane.xlu0 %6895  ;;  %v6966_v24 = vsel %vm3029_vm4, %v16779_v59, 0.0 }
 0x94b   : > { %6970 = vadd.xlane.f32.xlu1 %v6969_v46  ;;  %6967 = vadd.xlane.f32.xlu0 %v6966_v24  ;;  %14552 = vpow2.f32 %v6942_v21 }
 0x94c   : > { %14554 = vpow2.f32 %v6944_v1 }
 0x94d   : > { %v16786_v9 = vpop.eup %14544  ;;  %14556 = vpow2.f32 %v6948_v16  ;;  %v6918_v16 = vsub.f32 %v16731_v43, %v6896_v47  ;;  %v16842_v43 = vpop.permute.xlu1 %14172 }
 0x94e   : > { %v6902_v38 = vpop.xlane.xlu0 %6901  ;;  %v6972_v29 = vsel %vm3029_vm4, %v16786_v9, 0.0  ;;  %v16791_v23 = vpop.eup %14546 }
 0x94f   : > { %6973 = vadd.xlane.f32.xlu1 %v6972_v29  ;;  %v6920_v20 = vsub.f32 %v16736_v61, %v6902_v38  ;;  %v6975_v19 = vsel %vm3029_vm4, %v16791_v23, 0.0  ;;  %v6952_v61 = vmul.f32 1.442695, %v6921_v17 }
 0x951   : > { %v16793_v30 = vpop.eup %14548  ;;  %v6950_v36 = vmul.f32 1.442695, %v6920_v20  ;;  %v6946_v20 = vmul.f32 1.442695, %v6918_v16 }
 0x952   : > { %v6978_v27 = vsel %vm3029_vm4, %v16793_v30, 0.0  ;;  %v16800_v11 = vpop.eup %14550 }
 0x953   : > { %6976 = vadd.xlane.f32.xlu1 %v6975_v19  ;;  %6979 = vadd.xlane.f32.xlu0 %v6978_v27  ;;  %v6981_v58 = vsel %vm3029_vm4, %v16800_v11, 0.0  ;;  %14558 = vpow2.f32 %v6950_v36  ;;  %v14164_v27 = vunpack.i.l.bf16 %v16756_v14  ;;  %v14174_v36 = vunpack.i.l.bf16 %v16842_v43 }
 0x954   : > { %14560 = vpow2.f32 %v6952_v61 }
 0x955   : > { %v16805_v33 = vpop.eup %14552  ;;  %14562 = vpow2.f32 %v6946_v20 }
 0x956   : > { %v6984_v21 = vsel %vm3029_vm4, %v16805_v33, 0.0  ;;  %v16809_v40 = vpop.eup %14554 }
 0x957   : > { %6982 = vadd.xlane.f32.xlu1 %v6981_v58  ;;  %v6987_v46 = vsel %vm3029_vm4, %v16809_v40, 0.0  ;;  %v16813_v31 = vpop.eup %14556 }
 0x958   : > { %v6993_v24 = vsel %vm3029_vm4, %v16813_v31, 0.0 }
 0x95b   : > { %6985 = vadd.xlane.f32.xlu1 %v6984_v21  ;;  %v14175_v21 = vunpack.i.h.bf16 %v16842_v43 }
 0x95d   : > { %v16817_v1 = vpop.eup %14558 }
 0x95e   : > { %v6996_v13 = vsel %vm3029_vm4, %v16817_v1, 0.0  ;;  %v16821_v38 = vpop.eup %14560 }
 0x95f   : > { %6988 = vadd.xlane.f32.xlu1 %v6987_v46  ;;  %v6999_v29 = vsel %vm3029_vm4, %v16821_v38, 0.0  ;;  %v16832_v44 = vpop.eup %14562 }
 0x960   : > { %v6990_v19 = vsel %vm3029_vm4, %v16832_v44, 0.0 }
 0x963   : > { %6994 = vadd.xlane.f32.xlu1 %v6993_v24  ;;  %v6048_v24 = vpack.c.bf16 %v14174_v36, %v14174_v36 }
 0x967   : > { %6997 = vadd.xlane.f32.xlu1 %v6996_v13 }
 0x969   : > { %14182 = vrot.lane.b32.xlu0 %v18390_v50, %s14773_s22 }
 0x96b   : > { %7000 = vadd.xlane.f32.xlu1 %v6999_v29 }
 0x97c   : > { %14187 = vrot.lane.b32.xlu1 %v18391_v60, %s14773_s22 }
 0x980   : > { %8043 = vrot.lane.b32.xlu1 %v15457_v28, %s14774_s20 }
 0x984   : > { %8091 = vrot.lane.b32.xlu1 %v15415_v18, %s14774_s20  ;;  %v16848_v18 = vpop.permute.xlu0 %14177 }
 0x988   : > { %6991 = vadd.xlane.f32.xlu0 %v6990_v19  ;;  %14212 = vrot.lane.b32.xlu1 %v15503_v39, %s14774_s20  ;;  %v14165_v39 = vunpack.i.h.bf16 %v16756_v14  ;;  %v6049_v19 = vpack.c.bf16 %v14175_v21, %v14175_v21 }
 0x98c   : > { %8235 = vrot.lane.b32.xlu1 %v15622_v62, %s14774_s20  ;;  %v6045_v62 = vpack.c.bf16 %v14165_v39, %v14165_v39 }
 0x990   : > { %8283 = vrot.lane.b32.xlu1 %v15544_v55, %s14774_s20 }
 0x994   : > { %14222 = vrot.lane.b32.xlu1 %v15507_v48, %s14774_s20  ;;  %v6959_v28 = vpop.xlane.xlu1 %6958 }
 0x995   : > { %14564 = vrcp.f32 %v6959_v28  ;;  %v14179_v28 = vunpack.i.l.bf16 %v16848_v18 }
 0x998   : > { %8427 = vrot.lane.b32.xlu1 %v15689_v56, %s14774_s20 }
 0x99b   : > { %v6956_v47 = vpop.xlane.xlu0 %6955 }
 0x99c   : > { %14566 = vrcp.f32 %v6956_v47  ;;  %8475 = vrot.lane.b32.xlu1 %v15633_v7, %s14774_s20  ;;  %v7192_v7 = vsel %vm3226_vm2, %v6045_v62, 0  ;;  %v7330_v47 = vsel %vm3226_vm2, %v6048_v24, 0  ;;  %v7376_v62 = vsel %vm3226_vm2, %v6049_v19, 0 }
 0x99e   : > { %14192 = vrot.lane.b32.xlu0 %v18392_v22, %s14773_s22 }
 0x99f   : > { %v14565_v55 = vpop.eup %14564 }
 0x9a0   : > { %14232 = vrot.lane.b32.xlu1 %v15514_v0, %s14774_s20  ;;  %v7019_v48 = vmul.f32 %v14565_v55, %v16748_v10  ;;  %v14180_v55 = vunpack.i.h.bf16 %v16848_v18 }
 0x9a2   : > { %14197 = vrot.lane.b32.xlu0 %v15476_v57, %s14774_s20  ;;  %v7035_v56 = vpack.c.bf16 %v7019_v48, %v7019_v48  ;;  %v6044_v57 = vpack.c.bf16 %v14164_v27, %v14164_v27 }
 0x9a4   : > { %8619 = vrot.lane.b32.xlu1 %v15735_v51, %s14774_s20  ;;  %13684 = vmatmul.mubr.msk.bf16.vlgmr.msra.gmra.mrb[172].mxu0 %vm3222_vm5, %v7035_v56  ;;  %v7146_v14 = vsel %vm3226_vm2, %v6044_v57, 0  ;;  %v6050_v56 = vpack.c.bf16 %v14179_v28, %v14179_v28  ;;  %v6051_v57 = vpack.c.bf16 %v14180_v55, %v14180_v55 }
 0x9a5   : > { %13694 = vmatpush3.bf16.msra.mxu0 %v7192_v7  ;;  %13695 = vmatprep.mubr.msk.bf16.mxu0 %vm14771_vm0, %v18377_v54 }
 0x9a6   : > { %v14567_v0 = vpop.eup %14566  ;;  %14202 = vrot.lane.b32.xlu0 %v15479_v4, %s14774_s20  ;;  %13705 = vmatprep.subr.bf16.mxu0 %v18377_v54 }
 0x9a7   : > { %v7018_v10 = vmul.f32 %v14567_v0, %v16752_v34 }
 0x9a8   : > { %8715 = vrot.lane.b32.xlu1 %v15747_v25, %s14774_s20 }
 0x9a9   : > { %v7034_v51 = vpack.c.bf16 %v7018_v10, %v7018_v10 }
 0x9aa   : > { %7995 = vrot.lane.b32.xlu0 %v15403_v3, %s14774_s20 }
 0x9ab   : > { %13678 = vmatmul.mubr.msk.bf16.vlgmr.msra.gmra.mrb[160].mxu1 %vm3222_vm5, %v7034_v51  ;;  %v7422_v51 = vsel %vm3226_vm2, %v6050_v56, 0 }
 0x9ac   : > { %13688 = vmatpush3.bf16.msra.mxu1 %v7146_v14  ;;  %13689 = vmatprep.mubr.msk.bf16.mxu1 %vm14771_vm0, %v18377_v54 }
 0x9ad   : > { %13699 = vmatprep.subr.bf16.mxu1 %v18377_v54 }
 0x9ae   : > { %14207 = vrot.lane.b32.xlu0 %v15484_v37, %s14774_s20 }
 0x9b2   : > { %8139 = vrot.lane.b32.xlu0 %v15533_v41, %s14774_s20 }
 0x9b6   : > { %8187 = vrot.lane.b32.xlu0 %v15470_v12, %s14774_s20 }
 0x9ba   : > { %14217 = vrot.lane.b32.xlu0 %v15487_v63, %s14774_s20 }
 0x9be   : > { %8331 = vrot.lane.b32.xlu0 %v15637_v35, %s14774_s20  ;;  %v14169_v35 = vunpack.i.l.bf16 %v16758_v8 }
 0x9c0   : > { %v6046_v41 = vpack.c.bf16 %v14169_v35, %v14169_v35 }
 0x9c2   : > { %8379 = vrot.lane.b32.xlu0 %v15618_v2, %s14774_s20 }
 0x9c6   : > { %14227 = vrot.lane.b32.xlu0 %v15494_v26, %s14774_s20  ;;  %v14170_v26 = vunpack.i.h.bf16 %v16758_v8 }
 0x9c8   : > { %v6047_v25 = vpack.c.bf16 %v14170_v26, %v14170_v26 }
 0x9ca   : > { %8523 = vrot.lane.b32.xlu0 %v15713_v5, %s14774_s20  ;;  %v7284_v46 = vsel %vm3226_vm2, %v6047_v25, 0 }
 0x9ce   : > { %8571 = vrot.lane.b32.xlu0 %v15693_v42, %s14774_s20 }
 0x9d0   : > { %v6962_v3 = vpop.xlane.xlu0 %6961 }
 0x9d1   : > { %14568 = vrcp.f32 %v6962_v3 }
 0x9d2   : > { %8667 = vrot.lane.b32.xlu0 %v15717_v6, %s14774_s20 }
 0x9d4   : > { %v6965_v12 = vpop.xlane.xlu1 %6964 }
 0x9d5   : > { %14570 = vrcp.f32 %v6965_v12 }
 0x9d6   : > { %14237 = vrot.lane.b32.xlu0 %v15498_v15, %s14774_s20  ;;  %v7238_v15 = vsel %vm3226_vm2, %v6046_v41, 0 }
 0x9d8   : > { %v6971_v4 = vpop.xlane.xlu1 %6970  ;;  %v6968_v37 = vpop.xlane.xlu0 %6967 }
 0x9d9   : > { %14572 = vrcp.f32 %v6971_v4  ;;  %v7468_v4 = vsel %vm3226_vm2, %v6051_v57, 0 }
 0x9da   : > { %14574 = vrcp.f32 %v6968_v37 }
 0x9db   : > { %v14569_v63 = vpop.eup %14568 }
 0x9dc   : > { %v6974_v2 = vpop.xlane.xlu1 %6973  ;;  %v7020_v42 = vmul.f32 %v14569_v63, %v16766_v45 }
 0x9dd   : > { %14576 = vrcp.f32 %v6974_v2 }
 0x9de   : > { %v7036_v5 = vpack.c.bf16 %v7020_v42, %v7020_v42 }
 0x9df   : > { %v14571_v6 = vpop.eup %14570 }
 0x9e0   : > { %v6977_v34 = vpop.xlane.xlu1 %6976  ;;  %13690 = vmatmul.mubr.msk.bf16.vlgmr.msra.gmra.mrb[164].mxu1 %vm3222_vm5, %v7036_v5  ;;  %v7021_v17 = vmul.f32 %v14571_v6, %v16772_v49  ;;  %v6980_v58 = vpop.xlane.xlu0 %6979 }
 0x9e1   : > { %14578 = vrcp.f32 %v6977_v34  ;;  %13700 = vmatpush3.bf16.msra.mxu1 %v7238_v15  ;;  %13701 = vmatprep.mubr.msk.bf16.mxu1 %vm14771_vm0, %v18377_v54 }
 0x9e2   : > { %v7037_v8 = vpack.c.bf16 %v7021_v17, %v7021_v17  ;;  %13711 = vmatprep.subr.bf16.mxu1 %v18377_v54  ;;  %14580 = vrcp.f32 %v6980_v58 }
 0x9e3   : > { %v14573_v45 = vpop.eup %14572 }
 0x9e4   : > { %v14575_v61 = vpop.eup %14574  ;;  %13696 = vmatmul.mubr.msk.bf16.vlgmr.msra.gmra.mrb[176].mxu0 %vm3222_vm5, %v7037_v8  ;;  %v6983_v49 = vpop.xlane.xlu1 %6982  ;;  %v7023_v29 = vmul.f32 %v14573_v45, %v16776_v52 }
 0x9e5   : > { %13706 = vmatpush3.bf16.msra.mxu0 %v7284_v46  ;;  %v7022_v13 = vmul.f32 %v14575_v61, %v16779_v59  ;;  %13707 = vmatprep.mubr.msk.bf16.mxu0 %vm14771_vm0, %v18377_v54  ;;  %14582 = vrcp.f32 %v6983_v49  ;;  %v14183_v27 = vpop.permute.xlu0 %14182 }
 0x9e6   : > { %13717 = vmatprep.subr.bf16.mxu0 %v18377_v54  ;;  %v7039_v59 = vpack.c.bf16 %v7023_v29, %v7023_v29  ;;  %v14184_v10 = vunpack.i.l.bf16 %v14183_v27  ;;  %v14185_v12 = vunpack.i.h.bf16 %v14183_v27 }
 0x9e7   : > { %v7038_v16 = vpack.c.bf16 %v7022_v13, %v7022_v13  ;;  %v14577_v20 = vpop.eup %14576 }
 0x9e8   : > { %v6986_v43 = vpop.xlane.xlu1 %6985  ;;  %v7024_v52 = vmul.f32 %v14577_v20, %v16786_v9  ;;  %v6052_v37 = vpack.c.bf16 %v14184_v10, %v14184_v10  ;;  %v6053_v2 = vpack.c.bf16 %v14185_v12, %v14185_v12 }
 0x9e9   : > { %13702 = vmatmul.mubr.msk.bf16.vlgmr.msra.gmra.mrb[168].mxu1 %vm3222_vm5, %v7038_v16  ;;  %14584 = vrcp.f32 %v6986_v43 }
 0x9ea   : > { %13712 = vmatpush3.bf16.msra.mxu1 %v7330_v47  ;;  %13713 = vmatprep.mubr.msk.bf16.mxu1 %vm14771_vm0, %v18377_v54  ;;  %v7040_v0 = vpack.c.bf16 %v7024_v52, %v7024_v52  ;;  %v7560_v34 = vsel %vm3226_vm2, %v6053_v2, 0 }
 0x9eb   : > { %v14579_v39 = vpop.eup %14578  ;;  %13723 = vmatprep.subr.bf16.mxu1 %v18377_v54 }
 0x9ec   : > { %13708 = vmatmul.mubr.msk.bf16.vlgmr.msra.gmra.mrb[180].mxu0 %vm3222_vm5, %v7039_v59  ;;  %v6989_v48 = vpop.xlane.xlu1 %6988  ;;  %v7025_v7 = vmul.f32 %v14579_v39, %v16791_v23  ;;  %v14581_v9 = vpop.eup %14580 }
 0x9ed   : > { %13718 = vmatpush3.bf16.msra.mxu0 %v7376_v62  ;;  %13719 = vmatprep.mubr.msk.bf16.mxu0 %vm14771_vm0, %v18377_v54  ;;  %14586 = vrcp.f32 %v6989_v48  ;;  %v7026_v23 = vmul.f32 %v14581_v9, %v16793_v30  ;;  %v7514_v30 = vsel %vm3226_vm2, %v6052_v37, 0 }
 0x9ee   : > { %13729 = vmatprep.subr.bf16.mxu0 %v18377_v54  ;;  %v7041_v14 = vpack.c.bf16 %v7025_v7, %v7025_v7 }
 0x9ef   : > { %v14583_v3 = vpop.eup %14582  ;;  %v7042_v26 = vpack.c.bf16 %v7026_v23, %v7026_v23 }
 0x9f0   : > { %v6995_v18 = vpop.xlane.xlu1 %6994  ;;  %v7027_v63 = vmul.f32 %v14583_v3, %v16800_v11 }
 0x9f1   : > { %13714 = vmatmul.mubr.msk.bf16.vlgmr.msra.gmra.mrb[172].mxu1 %vm3222_vm5, %v7040_v0  ;;  %14588 = vrcp.f32 %v6995_v18 }
 0x9f2   : > { %13724 = vmatpush3.bf16.msra.mxu1 %v7422_v51  ;;  %13725 = vmatprep.mubr.msk.bf16.mxu1 %vm14771_vm0, %v18377_v54  ;;  %v7043_v5 = vpack.c.bf16 %v7027_v63, %v7027_v63 }
 0x9f3   : > { %13735 = vmatprep.subr.bf16.mxu1 %v18377_v54  ;;  %v14585_v41 = vpop.eup %14584 }
 0x9f4   : > { %13720 = vmatmul.mubr.msk.bf16.vlgmr.msra.gmra.mrb[184].mxu0 %vm3222_vm5, %v7041_v14  ;;  %v6998_v35 = vpop.xlane.xlu1 %6997  ;;  %v7028_v25 = vmul.f32 %v14585_v41, %v16805_v33 }
 0x9f5   : > { %13730 = vmatpush3.bf16.msra.mxu0 %v7468_v4  ;;  %13731 = vmatprep.mubr.msk.bf16.mxu0 %vm14771_vm0, %v18377_v54 }
 0x9f6   : > { %13741 = vmatprep.subr.bf16.mxu0 %v18377_v54  ;;  %v7044_v45 = vpack.c.bf16 %v7028_v25, %v7028_v25 }
 0x9f7   : > { %v14587_v6 = vpop.eup %14586 }
 0x9f8   : > { %v7001_v42 = vpop.xlane.xlu1 %7000  ;;  %v7029_v36 = vmul.f32 %v14587_v6, %v16809_v40 }
 0x9f9   : > { %13726 = vmatmul.mubr.msk.bf16.vlgmr.msra.gmra.mrb[176].mxu1 %vm3222_vm5, %v7042_v26  ;;  %14590 = vrcp.f32 %v7001_v42 }
 0x9fa   : > { %13736 = vmatpush3.bf16.msra.mxu1 %v7514_v30  ;;  %13737 = vmatprep.mubr.msk.bf16.mxu1 %vm14771_vm0, %v18377_v54  ;;  %v7045_v61 = vpack.c.bf16 %v7029_v36, %v7029_v36 }
 0x9fb   : > { %13747 = vmatprep.subr.bf16.mxu1 %v18377_v54  ;;  %v14589_v21 = vpop.eup %14588 }
 0x9fc   : > { %v14188_v11 = vpop.permute.xlu1 %14187  ;;  %13732 = vmatmul.mubr.msk.bf16.vlgmr.msra.gmra.mrb[188].mxu0 %vm3222_vm5, %v7043_v5  ;;  %v7031_v40 = vmul.f32 %v14589_v21, %v16813_v31 }
 0x9fd   : > { %v14190_v15 = vunpack.i.h.bf16 %v14188_v11  ;;  %v14189_v17 = vunpack.i.l.bf16 %v14188_v11  ;;  %13742 = vmatpush3.bf16.msra.mxu0 %v7560_v34  ;;  %13743 = vmatprep.mubr.msk.bf16.mxu0 %vm14771_vm0, %v18377_v54 }
 0x9fe   : > { %13753 = vmatprep.subr.bf16.mxu0 %v18377_v54  ;;  %v7047_v49 = vpack.c.bf16 %v7031_v40, %v7031_v40 }
 0x9ff   : > { %v6054_v8 = vpack.c.bf16 %v14189_v17, %v14189_v17  ;;  %v6055_v33 = vpack.c.bf16 %v14190_v15, %v14190_v15 }
 0xa00   : > { %v8044_v27 = vpop.permute.xlu1 %8043 }
 0xa01   : > { %13738 = vmatmul.mubr.msk.bf16.vlgmr.msra.gmra.mrb[180].mxu1 %vm3222_vm5, %v7044_v45  ;;  %v7606_v58 = vsel %vm3226_vm2, %v6054_v8, 0  ;;  %v7652_v46 = vsel %vm3226_vm2, %v6055_v33, 0 }
 0xa02   : > { %13748 = vmatpush3.bf16.msra.mxu1 %v7606_v58  ;;  %13749 = vmatprep.mubr.msk.bf16.mxu1 %vm14771_vm0, %v18377_v54 }
 0xa03   : > { %13759 = vmatprep.subr.bf16.mxu1 %v18377_v54  ;;  %v14591_v13 = vpop.eup %14590 }
 0xa04   : > { %13744 = vmatmul.mubr.msk.bf16.vlgmr.msra.gmra.mrb[192].mxu0 %vm3222_vm5, %v7045_v61  ;;  %v7033_v19 = vmul.f32 %v14591_v13, %v16821_v38  ;;  %v8092_v51 = vpop.permute.xlu1 %8091 }
 0xa05   : > { %13754 = vmatpush3.bf16.msra.mxu0 %v7652_v46  ;;  %13755 = vmatprep.mubr.msk.bf16.mxu0 %vm14771_vm0, %v18377_v54 }
 0xa06   : > { %13765 = vmatprep.subr.bf16.mxu0 %v18377_v54  ;;  %v7049_v39 = vpack.c.bf16 %v7033_v19, %v7033_v19 }
 0xa08   : > { %v14213_v63 = vpop.permute.xlu1 %14212 }
 0xa09   : > { %v14215_v25 = vunpack.i.h.bf16 %v14213_v63  ;;  %v14214_v8 = vunpack.i.l.bf16 %v14213_v63 }
 0xa0b   : > { %v7922_v17 = vpack.c.bf16 %v14215_v25, %v14215_v25  ;;  %v7921_v21 = vpack.c.bf16 %v14214_v8, %v14214_v8 }
 0xa0c   : > { %13756 = vmatmul.mubr.msk.bf16.vlgmr.msra.gmra.mrb[196].mxu0 %vm3222_vm5, %v7047_v49  ;;  %v8236_v30 = vpop.permute.xlu1 %8235 }
 0xa0d   : > { %13767 = vmatprep.mubr.msk.bf16.mxu0 %vm14771_vm0, %v18377_v54  ;;  %v8337_v61 = vsel %vm2260_vm1, %v7922_v17, 0  ;;  %v8289_v13 = vsel %vm2260_vm1, %v7921_v21, 0 }
 0xa10   : > { %v8284_v36 = vpop.permute.xlu1 %8283 }
 0xa14   : > { %v14223_v46 = vpop.permute.xlu1 %14222 }
 0xa15   : > { %v6992_v24 = vpop.xlane.xlu0 %6991 }
 0xa16   : > { %14592 = vrcp.f32 %v6992_v24 }
 0xa17   : > { %14594 = vrcp.f32 %v6998_v35 }
 0xa19   : > { %v14193_v29 = vpop.permute.xlu0 %14192 }
 0xa1a   : > { %v14195_v16 = vunpack.i.h.bf16 %v14193_v29  ;;  %v14194_v43 = vunpack.i.l.bf16 %v14193_v29  ;;  %v14225_v29 = vunpack.i.h.bf16 %v14223_v46 }
 0xa1c   : > { %v6057_v20 = vpack.c.bf16 %v14195_v16, %v14195_v16  ;;  %v6056_v52 = vpack.c.bf16 %v14194_v43, %v14194_v43 }
 0xa1d   : > { %v14198_v31 = vpop.permute.xlu0 %14197 }
 0xa1e   : > { %v7744_v28 = vsel %vm3226_vm2, %v6057_v20, 0  ;;  %v14200_v47 = vunpack.i.h.bf16 %v14198_v31  ;;  %v7698_v0 = vsel %vm3226_vm2, %v6056_v52, 0  ;;  %v14199_v9 = vunpack.i.l.bf16 %v14198_v31  ;;  %v8428_v20 = vpop.permute.xlu1 %8427 }
 0xa1f   : > { %13766 = vmatpush3.bf16.msra.mxu0 %v7744_v28  ;;  %v7926_v31 = vpack.c.bf16 %v14225_v29, %v14225_v29  ;;  %v14224_v28 = vunpack.i.l.bf16 %v14223_v46 }
 0xa20   : > { %v14593_v59 = vpop.eup %14592  ;;  %13777 = vmatprep.subr.bf16.mxu0 %v18377_v54  ;;  %v7916_v48 = vpack.c.bf16 %v14200_v47, %v14200_v47  ;;  %v7915_v14 = vpack.c.bf16 %v14199_v9, %v14199_v9 }
 0xa21   : > { %v14203_v55 = vpop.permute.xlu0 %14202  ;;  %v7030_v62 = vmul.f32 %v14593_v59, %v16832_v44  ;;  %v14595_v38 = vpop.eup %14594  ;;  %v8529_v52 = vsel %vm2260_vm1, %v7926_v31, 0 }
 0xa22   : > { %13768 = vmatmul.mubr.msk.bf16.vlgmr.msra.gmra.mrb[200].mxu0 %vm3222_vm5, %v7049_v39  ;;  %v14205_v44 = vunpack.i.h.bf16 %v14203_v55  ;;  %v8049_v57 = vsel %vm2260_vm1, %v7916_v48, 0  ;;  %v7032_v18 = vmul.f32 %v14595_v38, %v16817_v1  ;;  %v14204_v35 = vunpack.i.l.bf16 %v14203_v55  ;;  %v8476_v47 = vpop.permute.xlu1 %8475 }
 0xa23   : > { %v7046_v56 = vpack.c.bf16 %v7030_v62, %v7030_v62  ;;  %13779 = vmatprep.mubr.msk.bf16.mxu0 %vm14771_vm0, %v18377_v54  ;;  %v8001_v4 = vsel %vm2260_vm1, %v7915_v14, 0  ;;  %v7925_v62 = vpack.c.bf16 %v14224_v28, %v14224_v28 }
 0xa24   : > { %v7918_v3 = vpack.c.bf16 %v14205_v44, %v14205_v44  ;;  %v7048_v23 = vpack.c.bf16 %v7032_v18, %v7032_v18  ;;  %v7917_v41 = vpack.c.bf16 %v14204_v35, %v14204_v35 }
 0xa25   : > { %v7996_v7 = vpop.permute.xlu0 %7995  ;;  %13750 = vmatmul.mubr.msk.bf16.vlgmr.msra.gmra.mrb[184].mxu1 %vm3222_vm5, %v7046_v56 }
 0xa26   : > { %13760 = vmatpush3.bf16.msra.mxu1 %v7698_v0  ;;  %13761 = vmatprep.mubr.msk.bf16.mxu1 %vm14771_vm0, %v18377_v54  ;;  %v8145_v37 = vsel %vm2260_vm1, %v7918_v3, 0  ;;  %v8097_v6 = vsel %vm2260_vm1, %v7917_v41, 0  ;;  %v14233_v56 = vpop.permute.xlu1 %14232 }
 0xa27   : > { %13771 = vmatprep.subr.bf16.mxu1 %v18377_v54  ;;  %v14235_v0 = vunpack.i.h.bf16 %v14233_v56 }
 0xa28   : > { %13778 = vmatpush3.bf16.xpose.msra.mxu0 %v8049_v57 }
 0xa29   : > { %v14208_v10 = vpop.permute.xlu0 %14207  ;;  %13789 = vmatprep.subr.bf16.mxu0 %v18377_v54  ;;  %v7930_v57 = vpack.c.bf16 %v14235_v0, %v14235_v0 }
 0xa2a   : > { %v14210_v1 = vunpack.i.h.bf16 %v14208_v10  ;;  %v14209_v5 = vunpack.i.l.bf16 %v14208_v10  ;;  %v14234_v10 = vunpack.i.l.bf16 %v14233_v56 }
 0xa2c   : > { %v7920_v2 = vpack.c.bf16 %v14210_v1, %v14210_v1  ;;  %v7919_v15 = vpack.c.bf16 %v14209_v5, %v14209_v5 }
 0xa2d   : > { %v8140_v12 = vpop.permute.xlu0 %8139  ;;  %13762 = vmatmul.mubr.msk.bf16.vlgmr.msra.gmra.mrb[188].mxu1 %vm3222_vm5, %v7048_v23  ;;  %v8721_v23 = vsel %vm2260_vm1, %v7930_v57, 0 }
 0xa2e   : > { %13773 = vmatprep.mubr.msk.bf16.mxu1 %vm14771_vm0, %v18377_v54  ;;  %v8241_v11 = vsel %vm2260_vm1, %v7920_v2, 0  ;;  %v8193_v33 = vsel %vm2260_vm1, %v7919_v15, 0 }
 0xa2f   : > { %13772 = vmatpush3.bf16.xpose.msra.mxu1 %v8001_v4  ;;  %13780 = vmatmul.mubr.msk.bf16.vlgmr.msra.gmra.mrb[204].mxu0 %vm2260_vm1, %v8044_v27 }
 0xa30   : > { %13790 = vmatpush3.bf16.xpose.msra.mxu0 %v8145_v37  ;;  %13783 = vmatprep.subr.bf16.mxu1 %v18377_v54 }
 0xa31   : > { %v8188_v26 = vpop.permute.xlu0 %8187  ;;  %13791 = vmatprep.mubr.msk.bf16.mxu0 %vm14771_vm0, %v18377_v54  ;;  %13801 = vmatprep.subr.bf16.mxu0 %v18377_v54 }
 0xa35   : > { %v14218_v42 = vpop.permute.xlu0 %14217 }
 0xa36   : > { %13774 = vmatmul.mubr.msk.bf16.vlgmr.msra.gmra.mrb[192].mxu1 %vm2260_vm1, %v7996_v7  ;;  %v14220_v58 = vunpack.i.h.bf16 %v14218_v42  ;;  %v14219_v24 = vunpack.i.l.bf16 %v14218_v42  ;;  %v8481_v7 = vsel %vm2260_vm1, %v7925_v62, 0 }
 0xa37   : > { %13784 = vmatpush3.bf16.xpose.msra.mxu1 %v8097_v6  ;;  %13792 = vmatmul.mubr.msk.bf16.vlgmr.msra.gmra.mrb[208].mxu0 %vm2260_vm1, %v8140_v12  ;;  %v7929_v12 = vpack.c.bf16 %v14234_v10, %v14234_v10 }
 0xa38   : > { %13802 = vmatpush3.bf16.xpose.msra.mxu0 %v8241_v11  ;;  %13785 = vmatprep.mubr.msk.bf16.mxu1 %vm14771_vm0, %v18377_v54  ;;  %v7924_v40 = vpack.c.bf16 %v14220_v58, %v14220_v58  ;;  %v7923_v19 = vpack.c.bf16 %v14219_v24, %v14219_v24 }
 0xa39   : > { %v8332_v34 = vpop.permute.xlu0 %8331  ;;  %13795 = vmatprep.subr.bf16.mxu1 %v18377_v54  ;;  %13803 = vmatprep.mubr.msk.bf16.mxu0 %vm14771_vm0, %v18377_v54  ;;  %v8673_v37 = vsel %vm2260_vm1, %v7929_v12, 0 }
 0xa3a   : > { %13813 = vmatprep.subr.bf16.mxu0 %v18377_v54  ;;  %v8433_v16 = vsel %vm2260_vm1, %v7924_v40, 0  ;;  %v8385_v59 = vsel %vm2260_vm1, %v7923_v19, 0 }
 0xa3d   : > { %v8380_v45 = vpop.permute.xlu0 %8379 }
 0xa3e   : > { %13786 = vmatmul.mubr.msk.bf16.vlgmr.msra.gmra.mrb[196].mxu1 %vm2260_vm1, %v8092_v51  ;;  %v8620_v51 = vpop.permute.xlu1 %8619 }
 0xa3f   : > { %13796 = vmatpush3.bf16.xpose.msra.mxu1 %v8193_v33  ;;  %13804 = vmatmul.mubr.msk.bf16.vlgmr.msra.gmra.mrb[212].mxu0 %vm2260_vm1, %v8236_v30 }
 0xa40   : > { %13814 = vmatpush3.bf16.xpose.msra.mxu0 %v8337_v61  ;;  %13797 = vmatprep.mubr.msk.bf16.mxu1 %vm14771_vm0, %v18377_v54 }
 0xa41   : > { %13807 = vmatprep.subr.bf16.mxu1 %v18377_v54  ;;  %13815 = vmatprep.mubr.msk.bf16.mxu0 %vm14771_vm0, %v18377_v54  ;;  %v14228_v49 = vpop.permute.xlu0 %14227 }
 0xa42   : > { %13825 = vmatprep.subr.bf16.mxu0 %v18377_v54  ;;  %v14230_v39 = vunpack.i.h.bf16 %v14228_v49  ;;  %v14229_v38 = vunpack.i.l.bf16 %v14228_v49  ;;  %v8716_v4 = vpop.permute.xlu1 %8715 }
 0xa44   : > { %v7928_v48 = vpack.c.bf16 %v14230_v39, %v14230_v39  ;;  %v7927_v44 = vpack.c.bf16 %v14229_v38, %v14229_v38 }
 0xa45   : > { %v8524_v43 = vpop.permute.xlu0 %8523 }
 0xa46   : > { %13798 = vmatmul.mubr.msk.bf16.vlgmr.msra.gmra.mrb[200].mxu1 %vm2260_vm1, %v8188_v26  ;;  %v8625_v9 = vsel %vm2260_vm1, %v7928_v48, 0  ;;  %v8577_v14 = vsel %vm2260_vm1, %v7927_v44, 0 }
 0xa47   : > { %13808 = vmatpush3.bf16.xpose.msra.mxu1 %v8289_v13  ;;  %13816 = vmatmul.mubr.msk.bf16.vlgmr.msra.gmra.mrb[216].mxu0 %vm2260_vm1, %v8332_v34 }
 0xa48   : > { %13826 = vmatpush3.bf16.xpose.msra.mxu0 %v8433_v16  ;;  %13809 = vmatprep.mubr.msk.bf16.mxu1 %vm14771_vm0, %v18377_v54 }
 0xa49   : > { %13819 = vmatprep.subr.bf16.mxu1 %v18377_v54  ;;  %13827 = vmatprep.mubr.msk.bf16.mxu0 %vm14771_vm0, %v18377_v54  ;;  %v8572_v55 = vpop.permute.xlu0 %8571 }
 0xa4a   : > { %13837 = vmatprep.subr.bf16.mxu0 %v18377_v54 }
 0xa4d   : > { %v8668_v27 = vpop.permute.xlu0 %8667 }
 0xa4e   : > { %13810 = vmatmul.mubr.msk.bf16.vlgmr.msra.gmra.mrb[204].mxu1 %vm2260_vm1, %v8284_v36 }
 0xa4f   : > { %13820 = vmatpush3.bf16.xpose.msra.mxu1 %v8385_v59  ;;  %13828 = vmatmul.mubr.msk.bf16.vlgmr.msra.gmra.mrb[220].mxu0 %vm2260_vm1, %v8428_v20 }
 0xa50   : > { %13838 = vmatpush3.bf16.xpose.msra.mxu0 %v8529_v52  ;;  %13821 = vmatprep.mubr.msk.bf16.mxu1 %vm14771_vm0, %v18377_v54 }
 0xa51   : > { %13831 = vmatprep.subr.bf16.mxu1 %v18377_v54  ;;  %13839 = vmatprep.mubr.msk.bf16.mxu0 %vm14771_vm0, %v18377_v54  ;;  %v14238_v18 = vpop.permute.xlu0 %14237 }
 0xa52   : > { %13849 = vmatprep.subr.bf16.mxu0 %v18377_v54  ;;  %v14240_v3 = vunpack.i.h.bf16 %v14238_v18  ;;  %v14239_v1 = vunpack.i.l.bf16 %v14238_v18 }
 0xa54   : > { %v7980_v35 = vpack.c.bf16 %v14240_v3, %v14240_v3  ;;  %v7979_v26 = vpack.c.bf16 %v14239_v1, %v14239_v1 }
 0xa56   : > { %13822 = vmatmul.mubr.msk.bf16.vlgmr.msra.gmra.mrb[208].mxu1 %vm2260_vm1, %v8380_v45  ;;  %v9037_v63 = vsel %vm3226_vm2, %v7980_v35, 0  ;;  %v8991_v41 = vsel %vm3226_vm2, %v7979_v26, 0 }
 0xa57   : > { %13832 = vmatpush3.bf16.xpose.msra.mxu1 %v8481_v7  ;;  %13840 = vmatmul.mubr.msk.bf16.vlgmr.msra.gmra.mrb[224].mxu0 %vm2260_vm1, %v8524_v43 }
 0xa58   : > { %13850 = vmatpush3.bf16.xpose.msra.mxu0 %v8625_v9  ;;  %13833 = vmatprep.mubr.msk.bf16.mxu1 %vm14771_vm0, %v18377_v54 }
 0xa59   : > { %13843 = vmatprep.subr.bf16.mxu1 %v18377_v54  ;;  %13851 = vmatprep.mubr.msk.bf16.mxu0 %vm14771_vm0, %v18377_v54 }
 0xa5a   : > { %13861 = vmatprep.subr.bf16.mxu0 %v18377_v54 }
 0xa5e   : > { %13834 = vmatmul.mubr.msk.bf16.vlgmr.msra.gmra.mrb[212].mxu1 %vm2260_vm1, %v8476_v47 }
 0xa5f   : > { %13844 = vmatpush3.bf16.xpose.msra.mxu1 %v8577_v14  ;;  %13852 = vmatmul.mubr.msk.bf16.vlgmr.msra.gmra.mrb[228].mxu0 %vm2260_vm1, %v8620_v51 }
 0xa60   : > { %13862 = vmatpush3.bf16.xpose.msra.mxu0 %v8721_v23  ;;  %13845 = vmatprep.mubr.msk.bf16.mxu1 %vm14771_vm0, %v18377_v54 }
 0xa61   : > { %13855 = vmatprep.subr.bf16.mxu1 %v18377_v54  ;;  %13863 = vmatprep.mubr.msk.bf16.mxu0 %vm14771_vm0, %v18377_v54 }
 0xa62   : > { %13873 = vmatprep.subr.bf16.mxu0 %v18377_v54 }
 0xa66   : > { %13846 = vmatmul.mubr.msk.bf16.vlgmr.msra.gmra.mrb[216].mxu1 %vm2260_vm1, %v8572_v55 }
 0xa67   : > { %13856 = vmatpush3.bf16.xpose.msra.mxu1 %v8673_v37  ;;  %13864 = vmatmul.mubr.msk.bf16.vlgmr.msra.gmra.mrb[232].mxu0 %vm2260_vm1, %v8716_v4 }
 0xa68   : > { %13874 = vmatpush3.bf16.msra.mxu0 %v9037_v63  ;;  %13857 = vmatprep.mubr.msk.bf16.mxu1 %vm14771_vm0, %v18377_v54 }
 0xa69   : > { %13867 = vmatprep.subr.bf16.mxu1 %v18377_v54  ;;  %13875 = vmatprep.mubr.msk.bf16.mxu0 %vm14771_vm0, %v18377_v54 }
 0xa6a   : > { %13885 = vmatprep.subr.bf16.mxu0 %v18377_v54 }
 0xa6e   : > { %13858 = vmatmul.mubr.msk.bf16.vlgmr.msra.gmra.mrb[220].mxu1 %vm2260_vm1, %v8668_v27 }
 0xa6f   : > { %13868 = vmatpush3.bf16.msra.mxu1 %v8991_v41  ;;  %13869 = vmatprep.mubr.msk.bf16.mxu1 %vm14771_vm0, %v18377_v54 }
 0xa70   : > { %13879 = vmatprep.subr.bf16.mxu1 %v18377_v54 }
 0xa77   : > { %v17074_v2 = vpop.f32.mrb[172].mxu0 }
 0xa78   : > { %v13685_v42 = vpop.f32.mrb[173].mxu0 }
 0xa79   : > { %v7139_v30 = vpop.f32.mrb[174].mxu0 }
 0xa7a   : > { %v13686_v5 = vpop.f32.mrb[175].mxu0 }
 0xa7e   : > { %v17076_v6 = vpop.f32.mrb[160].mxu1 }
 0xa7f   : > { %v13679_v25 = vpop.f32.mrb[161].mxu1 }
 0xa80   : > { %v7093_v11 = vpop.f32.mrb[162].mxu1 }
 0xa81   : > { %v13680_v34 = vpop.f32.mrb[163].mxu1 }
 0xab3   : > { %v17078_v15 = vpop.f32.mrb[164].mxu1 }
 0xab4   : > { %v13691_v17 = vpop.f32.mrb[165].mxu1 }
 0xab5   : > { %v7185_v36 = vpop.f32.mrb[166].mxu1 }
 0xab6   : > { %v13692_v8 = vpop.f32.mrb[167].mxu1 }
 0xab7   : > { %v17080_v45 = vpop.f32.mrb[176].mxu0 }
 0xab8   : > { %v13697_v33 = vpop.f32.mrb[177].mxu0 }
 0xab9   : > { %v7231_v58 = vpop.f32.mrb[178].mxu0 }
 0xaba   : > { %v13698_v61 = vpop.f32.mrb[179].mxu0 }
 0xabc   : > { %v17082_v21 = vpop.f32.mrb[168].mxu1 }
 0xabd   : > { %v13703_v46 = vpop.f32.mrb[169].mxu1 }
 0xabe   : > { %v7277_v40 = vpop.f32.mrb[170].mxu1 }
 0xabf   : > { %v13704_v49 = vpop.f32.mrb[171].mxu1  ;;  %v17084_v24 = vpop.f32.mrb[180].mxu0 }
 0xac0   : > { %v13709_v13 = vpop.f32.mrb[181].mxu0 }
 0xac1   : > { %v7323_v29 = vpop.f32.mrb[182].mxu0 }
 0xac2   : > { %v13710_v16 = vpop.f32.mrb[183].mxu0 }
 0xac4   : > { %v17086_v20 = vpop.f32.mrb[172].mxu1 }
 0xac5   : > { %v13715_v19 = vpop.f32.mrb[173].mxu1 }
 0xac6   : > { %v7369_v43 = vpop.f32.mrb[174].mxu1 }
 0xac7   : > { %v13716_v31 = vpop.f32.mrb[175].mxu1  ;;  %v17088_v28 = vpop.f32.mrb[184].mxu0 }
 0xac8   : > { %v13721_v47 = vpop.f32.mrb[185].mxu0 }
 0xac9   : > { %v7415_v59 = vpop.f32.mrb[186].mxu0 }
 0xaca   : > { %v13722_v39 = vpop.f32.mrb[187].mxu0 }
 0xacc   : > { %v17090_v52 = vpop.f32.mrb[176].mxu1 }
 0xacd   : > { %v13727_v55 = vpop.f32.mrb[177].mxu1 }
 0xace   : > { %v7461_v62 = vpop.f32.mrb[178].mxu1 }
 0xacf   : > { %v13728_v48 = vpop.f32.mrb[179].mxu1  ;;  %v17092_v56 = vpop.f32.mrb[188].mxu0 }
 0xad0   : > { %v13733_v38 = vpop.f32.mrb[189].mxu0 }
 0xad1   : > { %v7507_v27 = vpop.f32.mrb[190].mxu0 }
 0xad2   : > { %v13734_v7 = vpop.f32.mrb[191].mxu0 }
 0xad4   : > { %v17094_v0 = vpop.f32.mrb[180].mxu1 }
 0xad5   : > { %v13739_v9 = vpop.f32.mrb[181].mxu1 }
 0xad6   : > { %v7553_v44 = vpop.f32.mrb[182].mxu1 }
 0xad7   : > { %v13740_v57 = vpop.f32.mrb[183].mxu1  ;;  %v17096_v18 = vpop.f32.mrb[192].mxu0 }
 0xad8   : > { %v13745_v10 = vpop.f32.mrb[193].mxu0 }
 0xad9   : > { %v7599_v51 = vpop.f32.mrb[194].mxu0 }
 0xada   : > { %v13746_v14 = vpop.f32.mrb[195].mxu0 }
 0xadf   : > { %v17098_v3 = vpop.f32.mrb[196].mxu0 }
 0xae0   : > { %v13757_v23 = vpop.f32.mrb[197].mxu0 }
 0xae1   : > { %v7691_v12 = vpop.f32.mrb[198].mxu0 }
 0xae2   : > { %v13758_v35 = vpop.f32.mrb[199].mxu0 }
 0xaf5   : > { %v17100_v4 = vpop.f32.mrb[200].mxu0 }
 0xaf6   : > { %v13769_v1 = vpop.f32.mrb[201].mxu0 }
 0xaf7   : > { %v7783_v37 = vpop.f32.mrb[202].mxu0 }
 0xaf8   : > { %v17102_v63 = vpop.f32.mrb[184].mxu1  ;;  %v13770_v26 = vpop.f32.mrb[203].mxu0 }
 0xaf9   : > { %v13751_v41 = vpop.f32.mrb[185].mxu1 }
 0xafa   : > { %v7645_v42 = vpop.f32.mrb[186].mxu1 }
 0xafb   : > { %v13752_v30 = vpop.f32.mrb[187].mxu1 }
 0xb00   : > { %v17104_v5 = vpop.f32.mrb[188].mxu1 }
 0xb01   : > { %v13763_v25 = vpop.f32.mrb[189].mxu1 }
 0xb02   : > { %v7737_v11 = vpop.f32.mrb[190].mxu1  ;;  %v8085_v34 = vpop.f32.mrb[204].mxu0 }
 0xb03   : > { %v8764_v17 = vmul.f32 0.17677669, %v8085_v34  ;;  %v13764_v36 = vpop.f32.mrb[191].mxu1  ;;  %v13781_v8 = vpop.f32.mrb[205].mxu0  ;;  %v18409_v34 = vld [vmem:[#allocation19_spill] sm:$0xff] }
 0xb04   : > { %v8088_v33 = vpop.f32.mrb[206].mxu0 }
 0xb05   : > { %v17107_v58 = vadd.f32 %v8764_v17, %v18385_v32  ;;  %v13782_v61 = vpop.f32.mrb[207].mxu0 }
 0xb07   : > { %v8798_v46 = vsel %vm3029_vm4, %v17107_v58, -inf }
 0xb08   : > { %8799 = vmax.xlane.f32.xlu1 %v8798_v46 }
 0xb09   : > { %v8037_v40 = vpop.f32.mrb[192].mxu1 }
 0xb0a   : > { %v8763_v49 = vmul.f32 0.17677669, %v8037_v40  ;;  %v13775_v13 = vpop.f32.mrb[193].mxu1  ;;  %v17111_v29 = vpop.f32.mrb[208].mxu0 }
 0xb0b   : > { %v8040_v16 = vpop.f32.mrb[194].mxu1  ;;  %v13793_v19 = vpop.f32.mrb[209].mxu0 }
 0xb0c   : > { %v17114_v43 = vadd.f32 %v8763_v49, %v18385_v32  ;;  %v13776_v31 = vpop.f32.mrb[195].mxu1  ;;  %v8184_v47 = vpop.f32.mrb[210].mxu0 }
 0xb0d   : > { %v13794_v59 = vpop.f32.mrb[211].mxu0 }
 0xb0e   : > { %v8795_v39 = vsel %vm3029_vm4, %v17114_v43, -inf }
 0xb0f   : > { %8796 = vmax.xlane.f32.xlu0 %v8795_v39 }
 0xb11   : > { %v8133_v55 = vpop.f32.mrb[196].mxu1 }
 0xb12   : > { %v13787_v62 = vpop.f32.mrb[197].mxu1  ;;  %v8277_v48 = vpop.f32.mrb[212].mxu0 }
 0xb13   : > { %v8136_v38 = vpop.f32.mrb[198].mxu1  ;;  %v13805_v27 = vpop.f32.mrb[213].mxu0  ;;  %v8768_v59 = vmul.f32 0.17677669, %v8277_v48 }
 0xb14   : > { %v13788_v7 = vpop.f32.mrb[199].mxu1  ;;  %v8280_v9 = vpop.f32.mrb[214].mxu0 }
 0xb15   : > { %v13806_v44 = vpop.f32.mrb[215].mxu0  ;;  %v17123_v27 = vadd.f32 %v8768_v59, %v18385_v32 }
 0xb17   : > { %v8810_v48 = vsel %vm3029_vm4, %v17123_v27, -inf }
 0xb19   : > { %v8229_v57 = vpop.f32.mrb[200].mxu1  ;;  %14242 = vrot.lane.b32.xlu1 %v18387_v53, %s14774_s20 }
 0xb1a   : > { %v13799_v10 = vpop.f32.mrb[201].mxu1  ;;  %v8373_v51 = vpop.f32.mrb[216].mxu0 }
 0xb1b   : > { %v8232_v14 = vpop.f32.mrb[202].mxu1  ;;  %v13817_v23 = vpop.f32.mrb[217].mxu0  ;;  %v8770_v7 = vmul.f32 0.17677669, %v8373_v51 }
 0xb1c   : > { %v13800_v12 = vpop.f32.mrb[203].mxu1  ;;  %v8376_v35 = vpop.f32.mrb[218].mxu0  ;;  %v8765_v14 = vmul.f32 0.17677669, %v8133_v55 }
 0xb1d   : > { %v13818_v1 = vpop.f32.mrb[219].mxu0  ;;  %v17126_v35 = vadd.f32 %v8770_v7, %v18385_v32 }
 0xb1e   : > { %v17132_v51 = vadd.f32 %v8765_v14, %v18385_v32 }
 0xb21   : > { %v8325_v37 = vpop.f32.mrb[204].mxu1 }
 0xb22   : > { %v13811_v26 = vpop.f32.mrb[205].mxu1  ;;  %v8469_v41 = vpop.f32.mrb[220].mxu0 }
 0xb23   : > { %v8328_v42 = vpop.f32.mrb[206].mxu1  ;;  %v13829_v30 = vpop.f32.mrb[221].mxu0  ;;  %v8772_v1 = vmul.f32 0.17677669, %v8469_v41 }
 0xb24   : > { %v13812_v25 = vpop.f32.mrb[207].mxu1  ;;  %v8472_v11 = vpop.f32.mrb[222].mxu0 }
 0xb25   : > { %14247 = vrot.lane.b32.xlu0 %v18409_v34, %s14774_s20  ;;  %v13830_v17 = vpop.f32.mrb[223].mxu0  ;;  %v8766_v25 = vmul.f32 0.17677669, %v17111_v29  ;;  %v17135_v55 = vadd.f32 %v8772_v1, %v18385_v32  ;;  %v8816_v34 = vsel %vm3029_vm4, %v17126_v35, -inf  ;;  %v8801_v29 = vsel %vm3029_vm4, %v17132_v51, -inf }
 0xb29   : > { %v8421_v36 = vpop.f32.mrb[208].mxu1 }
 0xb2a   : > { %v13823_v53 = vpop.f32.mrb[209].mxu1  ;;  %v8565_v8 = vpop.f32.mrb[224].mxu0 }
 0xb2b   : > { %v8424_v33 = vpop.f32.mrb[210].mxu1  ;;  %v13841_v61 = vpop.f32.mrb[225].mxu0  ;;  %v8774_v11 = vmul.f32 0.17677669, %v8565_v8  ;;  %v17140_v53 = vadd.f32 %v8766_v25, %v18385_v32  ;;  %v18410_v25 = vld [vmem:[#allocation24_spill] sm:$0xff] }
 0xb2c   : > { %v13824_v46 = vpop.f32.mrb[211].mxu1  ;;  %v8568_v40 = vpop.f32.mrb[226].mxu0  ;;  %v8767_v33 = vmul.f32 0.17677669, %v8229_v57 }
 0xb2d   : > { %v13842_v49 = vpop.f32.mrb[227].mxu0  ;;  %v17145_v46 = vadd.f32 %v8774_v11, %v18385_v32  ;;  %v8804_v57 = vsel %vm3029_vm4, %v17140_v53, -inf  ;;  %v18411_v11 = vld [vmem:[#allocation23_spill] sm:$0xff] }
 0xb2e   : > { %v8822_v49 = vsel %vm3029_vm4, %v17135_v55, -inf }
 0xb31   : > { %v8517_v13 = vpop.f32.mrb[212].mxu1 }
 0xb32   : > { %v13835_v16 = vpop.f32.mrb[213].mxu1  ;;  %v8661_v19 = vpop.f32.mrb[228].mxu0 }
 0xb33   : > { %v8520_v31 = vpop.f32.mrb[214].mxu1  ;;  %v13853_v47 = vpop.f32.mrb[229].mxu0  ;;  %v8776_v40 = vmul.f32 0.17677669, %v8661_v19  ;;  %v17150_v16 = vadd.f32 %v8767_v33, %v18385_v32  ;;  %v8828_v19 = vsel %vm3029_vm4, %v17145_v46, -inf }
 0xb34   : > { %v13836_v39 = vpop.f32.mrb[215].mxu1  ;;  %v8664_v62 = vpop.f32.mrb[230].mxu0  ;;  %v8769_v31 = vmul.f32 0.17677669, %v8325_v37 }
 0xb35   : > { %v13854_v38 = vpop.f32.mrb[231].mxu0  ;;  %v17155_v47 = vadd.f32 %v8776_v40, %v18385_v32  ;;  %v8771_v62 = vmul.f32 0.17677669, %v8421_v36 }
 0xb36   : > { %v17160_v39 = vadd.f32 %v8769_v31, %v18385_v32  ;;  %v8807_v38 = vsel %vm3029_vm4, %v17150_v16, -inf }
 0xb37   : > { %v8834_v7 = vsel %vm3029_vm4, %v17155_v47, -inf }
 0xb38   : > { %v8813_v14 = vsel %vm3029_vm4, %v17160_v39, -inf }
 0xb39   : > { %v8613_v9 = vpop.f32.mrb[216].mxu1 }
 0xb3a   : > { %v13847_v44 = vpop.f32.mrb[217].mxu1  ;;  %v8757_v10 = vpop.f32.mrb[232].mxu0 }
 0xb3b   : > { %v8616_v23 = vpop.f32.mrb[218].mxu1  ;;  %v13865_v12 = vpop.f32.mrb[233].mxu0  ;;  %v8778_v59 = vmul.f32 0.17677669, %v8757_v10  ;;  %v17170_v44 = vadd.f32 %v8771_v62, %v18385_v32  ;;  %v8773_v10 = vmul.f32 0.17677669, %v8517_v13 }
 0xb3c   : > { %v13848_v26 = vpop.f32.mrb[219].mxu1  ;;  %v8760_v42 = vpop.f32.mrb[234].mxu0  ;;  %v8775_v12 = vmul.f32 0.17677669, %v8613_v9 }
 0xb3d   : > { %8811 = vmax.xlane.f32.xlu1 %v8810_v48  ;;  %v13866_v30 = vpop.f32.mrb[235].mxu0  ;;  %v17165_v37 = vadd.f32 %v8778_v59, %v18385_v32  ;;  %v17177_v23 = vadd.f32 %v8773_v10, %v18385_v32  ;;  %v8819_v1 = vsel %vm3029_vm4, %v17170_v44, -inf }
 0xb3e   : > { %v17182_v26 = vadd.f32 %v8775_v12, %v18385_v32 }
 0xb3f   : > { %v8840_v36 = vsel %vm3029_vm4, %v17165_v37, -inf  ;;  %v8825_v42 = vsel %vm3029_vm4, %v17177_v23, -inf }
 0xb40   : > { %v8831_v30 = vsel %vm3029_vm4, %v17182_v26, -inf }
 0xb41   : > { %v8709_v41 = vpop.f32.mrb[220].mxu1  ;;  %8817 = vmax.xlane.f32.xlu1 %v8816_v34 }
 0xb42   : > { %v13859_v17 = vpop.f32.mrb[221].mxu1  ;;  %v8777_v13 = vmul.f32 0.17677669, %v8709_v41 }
 0xb43   : > { %v8712_v61 = vpop.f32.mrb[222].mxu1 }
 0xb44   : > { %8802 = vmax.xlane.f32.xlu0 %v8801_v29  ;;  %v13860_v8 = vpop.f32.mrb[223].mxu1  ;;  %v17187_v48 = vadd.f32 %v8777_v13, %v18385_v32 }
 0xb45   : > { %8823 = vmax.xlane.f32.xlu1 %v8822_v49 }
 0xb46   : > { %v8837_v9 = vsel %vm3029_vm4, %v17187_v48, -inf }
 0xb48   : > { %8805 = vmax.xlane.f32.xlu0 %v8804_v57 }
 0xb49   : > { %8829 = vmax.xlane.f32.xlu1 %v8828_v19 }
 0xb4c   : > { %8808 = vmax.xlane.f32.xlu0 %v8807_v38 }
 0xb4d   : > { %8835 = vmax.xlane.f32.xlu1 %v8834_v7 }
 0xb50   : > { %8814 = vmax.xlane.f32.xlu0 %v8813_v14 }
 0xb51   : > { %8841 = vmax.xlane.f32.xlu1 %v8840_v36 }
 0xb54   : > { %8820 = vmax.xlane.f32.xlu0 %v8819_v1 }
 0xb58   : > { %8826 = vmax.xlane.f32.xlu0 %v8825_v42 }
 0xb5c   : > { %8832 = vmax.xlane.f32.xlu0 %v8831_v30 }
 0xb60   : > { %8838 = vmax.xlane.f32.xlu0 %v8837_v9 }
 0xb62   : > { %14252 = vrot.lane.b32.xlu1 %v18410_v25, %s14774_s20 }
 0xb76   : > { %14257 = vrot.lane.b32.xlu0 %v18411_v11, %s14774_s20 }
 0xb95   : > { %v8800_v34 = vpop.xlane.xlu1 %8799 }
 0xb96   : > { %v8844_v41 = vsub.f32 %v17107_v58, %v8800_v34 }
 0xb98   : > { %v8861_v17 = vmul.f32 1.442695, %v8844_v41 }
 0xb99   : > { %v17207_v58 = vpop.permute.xlu1 %14242 }
 0xb9a   : > { %14596 = vpow2.f32 %v8861_v17 }
 0xb9c   : > { %v8797_v32 = vpop.xlane.xlu0 %8796 }
 0xb9d   : > { %v8843_v33 = vsub.f32 %v17114_v43, %v8797_v32 }
 0xb9f   : > { %v8859_v61 = vmul.f32 1.442695, %v8843_v33 }
 0xba0   : > { %v17209_v31 = vpop.permute.xlu0 %14247 }
 0xba1   : > { %14598 = vpow2.f32 %v8859_v61 }
 0xba4   : > { %v17199_v29 = vpop.eup %14596 }
 0xba5   : > { %v8894_v40 = vsel %vm3029_vm4, %v17199_v29, 0.0 }
 0xba6   : > { %8895 = vadd.xlane.f32.xlu1 %v8894_v40 }
 0xbab   : > { %v17203_v8 = vpop.eup %14598 }
 0xbac   : > { %v8891_v49 = vsel %vm3029_vm4, %v17203_v8, 0.0 }
 0xbad   : > { %8892 = vadd.xlane.f32.xlu0 %v8891_v49 }
 0xbca   : > { %v8812_v57 = vpop.xlane.xlu1 %8811 }
 0xbcb   : > { %v8848_v19 = vsub.f32 %v17123_v27, %v8812_v57 }
 0xbcd   : > { %v8869_v14 = vmul.f32 1.442695, %v8848_v19 }
 0xbce   : > { %v8818_v10 = vpop.xlane.xlu1 %8817 }
 0xbcf   : > { %v8850_v13 = vsub.f32 %v17126_v35, %v8818_v10 }
 0xbd1   : > { %v8803_v43 = vpop.xlane.xlu0 %8802  ;;  %v8873_v25 = vmul.f32 1.442695, %v8850_v13 }
 0xbd2   : > { %v8845_v59 = vsub.f32 %v17132_v51, %v8803_v43  ;;  %v8824_v30 = vpop.xlane.xlu1 %8823 }
 0xbd4   : > { %v8863_v62 = vmul.f32 1.442695, %v8845_v59 }
 0xbd5   : > { %v8806_v38 = vpop.xlane.xlu0 %8805 }
 0xbd6   : > { %14600 = vpow2.f32 %v8863_v62  ;;  %v8846_v7 = vsub.f32 %v17140_v53, %v8806_v38  ;;  %v8852_v53 = vsub.f32 %v17135_v55, %v8824_v30  ;;  %v8830_v35 = vpop.xlane.xlu1 %8829 }
 0xbd8   : > { %v8865_v36 = vmul.f32 1.442695, %v8846_v7  ;;  %v8877_v32 = vmul.f32 1.442695, %v8852_v53 }
 0xbd9   : > { %v8809_v12 = vpop.xlane.xlu0 %8808 }
 0xbda   : > { %14602 = vpow2.f32 %v8865_v36  ;;  %v8847_v1 = vsub.f32 %v17150_v16, %v8809_v12  ;;  %v8836_v43 = vpop.xlane.xlu1 %8835 }
 0xbdb   : > { %14604 = vpow2.f32 %v8869_v14  ;;  %v8856_v7 = vsub.f32 %v17155_v47, %v8836_v43  ;;  %v18413_v43 = vld [vmem:[#allocation28_spill] sm:$0xff] }
 0xbdc   : > { %v8867_v42 = vmul.f32 1.442695, %v8847_v1 }
 0xbdd   : > { %v8815_v51 = vpop.xlane.xlu0 %8814  ;;  %v8885_v12 = vmul.f32 1.442695, %v8856_v7 }
 0xbde   : > { %14606 = vpow2.f32 %v8867_v42  ;;  %v8849_v27 = vsub.f32 %v17160_v39, %v8815_v51  ;;  %v8842_v13 = vpop.xlane.xlu1 %8841 }
 0xbdf   : > { %v8858_v51 = vsub.f32 %v17165_v37, %v8842_v13 }
 0xbe0   : > { %v17217_v9 = vpop.eup %14600  ;;  %v8871_v11 = vmul.f32 1.442695, %v8849_v27 }
 0xbe1   : > { %v8821_v34 = vpop.xlane.xlu0 %8820  ;;  %v8897_v41 = vsel %vm3029_vm4, %v17217_v9, 0.0 }
 0xbe2   : > { %14608 = vpow2.f32 %v8871_v11  ;;  %v8851_v16 = vsub.f32 %v17170_v44, %v8821_v34  ;;  %8898 = vadd.xlane.f32.xlu0 %v8897_v41  ;;  %v8854_v44 = vsub.f32 %v17145_v46, %v8830_v35 }
 0xbe3   : > { %14610 = vpow2.f32 %v8873_v25 }
 0xbe4   : > { %v17223_v17 = vpop.eup %14602  ;;  %v8875_v39 = vmul.f32 1.442695, %v8851_v16 }
 0xbe5   : > { %v8827_v33 = vpop.xlane.xlu0 %8826  ;;  %v8900_v61 = vsel %vm3029_vm4, %v17223_v17, 0.0  ;;  %v17227_v55 = vpop.eup %14604 }
 0xbe6   : > { %14612 = vpow2.f32 %v8875_v39  ;;  %v8853_v40 = vsub.f32 %v17177_v23, %v8827_v33  ;;  %8901 = vadd.xlane.f32.xlu1 %v8900_v61  ;;  %v8906_v19 = vsel %vm3029_vm4, %v17227_v55, 0.0  ;;  %v8881_v23 = vmul.f32 1.442695, %v8854_v44  ;;  %v18412_v44 = vld [vmem:[#allocation20_spill] sm:$0xff] }
 0xbe7   : > { %14614 = vpow2.f32 %v8877_v32 }
 0xbe8   : > { %v17230_v49 = vpop.eup %14606  ;;  %v8879_v57 = vmul.f32 1.442695, %v8853_v40 }
 0xbe9   : > { %v8833_v59 = vpop.xlane.xlu0 %8832  ;;  %v8903_v62 = vsel %vm3029_vm4, %v17230_v49, 0.0 }
 0xbea   : > { %8907 = vadd.xlane.f32.xlu1 %v8906_v19  ;;  %8904 = vadd.xlane.f32.xlu0 %v8903_v62  ;;  %14616 = vpow2.f32 %v8879_v57  ;;  %v8855_v61 = vsub.f32 %v17182_v26, %v8833_v59  ;;  %v18414_v19 = vld [vmem:[#allocation25_spill] sm:$0xff]  ;;  %v18415_v26 = vld [vmem:[#allocation27_spill] sm:$0xff]  ;;  %v17293_v59 = vpop.permute.xlu1 %14252 }
 0xbeb   : > { %14618 = vpow2.f32 %v8881_v23  ;;  %v18417_v62 = vld [vmem:[#allocation31_spill] sm:$0xff] }
 0xbec   : > { %v17237_v38 = vpop.eup %14608  ;;  %14620 = vpow2.f32 %v8885_v12  ;;  %v8883_v40 = vmul.f32 1.442695, %v8855_v61  ;;  %v14245_v12 = vunpack.i.h.bf16 %v17207_v58 }
 0xbed   : > { %v8839_v10 = vpop.xlane.xlu0 %8838  ;;  %v8909_v46 = vsel %vm3029_vm4, %v17237_v38, 0.0  ;;  %v17242_v14 = vpop.eup %14610 }
 0xbee   : > { %8910 = vadd.xlane.f32.xlu1 %v8909_v46  ;;  %v8857_v1 = vsub.f32 %v17187_v48, %v8839_v10  ;;  %v8912_v42 = vsel %vm3029_vm4, %v17242_v14, 0.0  ;;  %v8889_v48 = vmul.f32 1.442695, %v8858_v51  ;;  %v18418_v10 = vld [vmem:[#allocation32_spill] sm:$0xff]  ;;  %v7982_v13 = vpack.c.bf16 %v14245_v12, %v14245_v12 }
 0xbf0   : > { %v17244_v36 = vpop.eup %14612  ;;  %v8887_v27 = vmul.f32 1.442695, %v8857_v1 }
 0xbf1   : > { %v8915_v47 = vsel %vm3029_vm4, %v17244_v36, 0.0  ;;  %v17251_v30 = vpop.eup %14614  ;;  %v17299_v7 = vpop.permute.xlu0 %14257 }
 0xbf2   : > { %8913 = vadd.xlane.f32.xlu1 %v8912_v42  ;;  %8916 = vadd.xlane.f32.xlu0 %v8915_v47  ;;  %v8918_v25 = vsel %vm3029_vm4, %v17251_v30, 0.0  ;;  %14622 = vpow2.f32 %v8887_v27  ;;  %v18419_v47 = vld [vmem:[#allocation17_spill] sm:$0xff]  ;;  %v14244_v27 = vunpack.i.l.bf16 %v17207_v58 }
 0xbf3   : > { %14624 = vpow2.f32 %v8889_v48 }
 0xbf4   : > { %v17256_v53 = vpop.eup %14616  ;;  %14626 = vpow2.f32 %v8883_v40 }
 0xbf5   : > { %v8921_v11 = vsel %vm3029_vm4, %v17256_v53, 0.0  ;;  %v17260_v34 = vpop.eup %14618 }
 0xbf6   : > { %8919 = vadd.xlane.f32.xlu1 %v8918_v25  ;;  %v8924_v41 = vsel %vm3029_vm4, %v17260_v34, 0.0  ;;  %v17264_v37 = vpop.eup %14620  ;;  %v18421_v25 = vld [vmem:[#allocation18_spill] sm:$0xff] }
 0xbf7   : > { %v8930_v16 = vsel %vm3029_vm4, %v17264_v37, 0.0 }
 0xbfa   : > { %8922 = vadd.xlane.f32.xlu1 %v8921_v11  ;;  %v18424_v11 = vld [vmem:[#allocation26_spill] sm:$0xff] }
 0xbfc   : > { %v17268_v35 = vpop.eup %14622 }
 0xbfd   : > { %v8933_v32 = vsel %vm3029_vm4, %v17268_v35, 0.0  ;;  %v17272_v39 = vpop.eup %14624 }
 0xbfe   : > { %8925 = vadd.xlane.f32.xlu1 %v8924_v41  ;;  %v8936_v33 = vsel %vm3029_vm4, %v17272_v39, 0.0  ;;  %v17283_v57 = vpop.eup %14626  ;;  %v18426_v41 = vld [vmem:[#allocation33_spill] sm:$0xff] }
 0xc02   : > { %8931 = vadd.xlane.f32.xlu1 %v8930_v16  ;;  %v14249_v16 = vunpack.i.l.bf16 %v17209_v31 }
 0xc06   : > { %8934 = vadd.xlane.f32.xlu1 %v8933_v32 }
 0xc08   : > { %14262 = vrot.lane.b32.xlu0 %v18390_v50, %s14774_s20  ;;  %v8927_v50 = vsel %vm3029_vm4, %v17283_v57, 0.0 }
 0xc0a   : > { %8937 = vadd.xlane.f32.xlu1 %v8936_v33  ;;  %v7983_v33 = vpack.c.bf16 %v14249_v16, %v14249_v16 }
 0xc1b   : > { %14267 = vrot.lane.b32.xlu1 %v18391_v60, %s14774_s20  ;;  %v18416_v60 = vld [vmem:[#allocation30_spill] sm:$0xff] }
 0xc1f   : > { %5871 = vrot.lane.b32.xlu1 %v18412_v44, %s14774_s20 }
 0xc23   : > { %5875 = vrot.lane.b32.xlu1 %v18413_v43, %s14774_s20 }
 0xc27   : > { %8928 = vadd.xlane.f32.xlu0 %v8927_v50  ;;  %5879 = vrot.lane.b32.xlu1 %v18414_v19, %s14774_s20 }
 0xc2b   : > { %5883 = vrot.lane.b32.xlu1 %v18415_v26, %s14774_s20  ;;  %v14255_v26 = vunpack.i.h.bf16 %v17293_v59 }
 0xc2f   : > { %5887 = vrot.lane.b32.xlu1 %v18416_v60, %s14774_s20 }
 0xc33   : > { %5891 = vrot.lane.b32.xlu1 %v18417_v62, %s14774_s20  ;;  %v8896_v23 = vpop.xlane.xlu1 %8895 }
 0xc34   : > { %14628 = vrcp.f32 %v8896_v23 }
 0xc37   : > { %5895 = vrot.lane.b32.xlu1 %v18418_v10, %s14774_s20 }
 0xc3a   : > { %v8893_v46 = vpop.xlane.xlu0 %8892 }
 0xc3b   : > { %14630 = vrcp.f32 %v8893_v46  ;;  %7804 = vrot.lane.b32.xlu1 %v17074_v2, %s14773_s22 }
 0xc3d   : > { %14272 = vrot.lane.b32.xlu0 %v18392_v22, %s14774_s20  ;;  %v9129_v22 = vsel %vm3226_vm2, %v7982_v13, 0  ;;  %v14259_v13 = vunpack.i.l.bf16 %v17299_v7 }
 0xc3e   : > { %v14629_v1 = vpop.eup %14628 }
 0xc3f   : > { %v8956_v42 = vmul.f32 %v14629_v1, %v17199_v29  ;;  %7808 = vrot.lane.b32.xlu1 %v17080_v45, %s14773_s22  ;;  %v18420_v45 = vld [vmem:[#allocation16_spill] sm:$0xff]  ;;  %v7981_v29 = vpack.c.bf16 %v14244_v27, %v14244_v27 }
 0xc41   : > { %5865 = vrot.lane.b32.xlu0 %v18419_v47, %s14774_s20  ;;  %v8972_v51 = vpack.c.bf16 %v8956_v42, %v8956_v42  ;;  %v9083_v48 = vsel %vm3226_vm2, %v7981_v29, 0 }
 0xc43   : > { %7812 = vrot.lane.b32.xlu1 %v17084_v24, %s14773_s22  ;;  %13876 = vmatmul.mubr.msk.bf16.vlgmr.msra.gmra.mrb[236].mxu0 %vm3222_vm5, %v8972_v51  ;;  %v14260_v51 = vunpack.i.h.bf16 %v17299_v7 }
 0xc44   : > { %13886 = vmatpush3.bf16.msra.mxu0 %v9129_v22  ;;  %13887 = vmatprep.mubr.msk.bf16.mxu0 %vm14771_vm0, %v18377_v54 }
 0xc45   : > { %v14631_v2 = vpop.eup %14630  ;;  %5867 = vrot.lane.b32.xlu0 %v18420_v45, %s14774_s20  ;;  %13897 = vmatprep.subr.bf16.mxu0 %v18377_v54 }
 0xc46   : > { %v8955_v58 = vmul.f32 %v14631_v2, %v17203_v8  ;;  %v18422_v8 = vld [vmem:[#allocation22_spill] sm:$0xff]  ;;  %v7987_v2 = vpack.c.bf16 %v14259_v13, %v14259_v13 }
 0xc47   : > { %7816 = vrot.lane.b32.xlu1 %v17088_v28, %s14773_s22  ;;  %v18423_v28 = vld [vmem:[#allocation21_spill] sm:$0xff] }
 0xc48   : > { %v8971_v24 = vpack.c.bf16 %v8955_v58, %v8955_v58 }
 0xc49   : > { %5869 = vrot.lane.b32.xlu0 %v18421_v25, %s14774_s20 }
 0xc4a   : > { %13870 = vmatmul.mubr.msk.bf16.vlgmr.msra.gmra.mrb[224].mxu1 %vm3222_vm5, %v8971_v24  ;;  %v7988_v24 = vpack.c.bf16 %v14260_v51, %v14260_v51 }
 0xc4b   : > { %13880 = vmatpush3.bf16.msra.mxu1 %v9083_v48  ;;  %7820 = vrot.lane.b32.xlu1 %v17092_v56, %s14773_s22  ;;  %v18425_v56 = vld [vmem:[#allocation29_spill] sm:$0xff]  ;;  %v9359_v48 = vsel %vm3226_vm2, %v7987_v2, 0 }
 0xc4c   : > { %13881 = vmatprep.mubr.msk.bf16.mxu1 %vm14771_vm0, %v18377_v54  ;;  %13891 = vmatprep.subr.bf16.mxu1 %v18377_v54 }
 0xc4d   : > { %5873 = vrot.lane.b32.xlu0 %v18422_v8, %s14774_s20 }
 0xc4f   : > { %7824 = vrot.lane.b32.xlu1 %v17096_v18, %s14773_s22  ;;  %v18427_v18 = vld [vmem:[#allocation34_spill] sm:$0xff] }
 0xc51   : > { %5877 = vrot.lane.b32.xlu0 %v18423_v28, %s14774_s20 }
 0xc53   : > { %7828 = vrot.lane.b32.xlu1 %v17098_v3, %s14773_s22 }
 0xc55   : > { %5881 = vrot.lane.b32.xlu0 %v18424_v11, %s14774_s20 }
 0xc57   : > { %7832 = vrot.lane.b32.xlu1 %v17100_v4, %s14773_s22 }
 0xc59   : > { %5885 = vrot.lane.b32.xlu0 %v18425_v56, %s14774_s20 }
 0xc5d   : > { %5889 = vrot.lane.b32.xlu0 %v18426_v41, %s14774_s20  ;;  %v9405_v41 = vsel %vm3226_vm2, %v7988_v24, 0 }
 0xc61   : > { %5893 = vrot.lane.b32.xlu0 %v18427_v18, %s14774_s20 }
 0xc65   : > { %7802 = vrot.lane.b32.xlu0 %v17076_v6, %s14773_s22 }
 0xc69   : > { %7806 = vrot.lane.b32.xlu0 %v17078_v15, %s14773_s22 }
 0xc6d   : > { %7810 = vrot.lane.b32.xlu0 %v17082_v21, %s14773_s22  ;;  %v14250_v21 = vunpack.i.h.bf16 %v17209_v31  ;;  %v14254_v31 = vunpack.i.l.bf16 %v17293_v59  ;;  %v7986_v59 = vpack.c.bf16 %v14255_v26, %v14255_v26 }
 0xc6f   : > { %v8899_v3 = vpop.xlane.xlu0 %8898  ;;  %v7984_v44 = vpack.c.bf16 %v14250_v21, %v14250_v21  ;;  %v7985_v23 = vpack.c.bf16 %v14254_v31, %v14254_v31  ;;  %v9313_v27 = vsel %vm3226_vm2, %v7986_v59, 0 }
 0xc70   : > { %14632 = vrcp.f32 %v8899_v3 }
 0xc71   : > { %7814 = vrot.lane.b32.xlu0 %v17086_v20, %s14773_s22  ;;  %v9221_v60 = vsel %vm3226_vm2, %v7984_v44, 0 }
 0xc73   : > { %v8902_v4 = vpop.xlane.xlu1 %8901 }
 0xc74   : > { %14634 = vrcp.f32 %v8902_v4 }
 0xc75   : > { %7818 = vrot.lane.b32.xlu0 %v17090_v52, %s14773_s22 }
 0xc77   : > { %v8908_v32 = vpop.xlane.xlu1 %8907  ;;  %v8905_v6 = vpop.xlane.xlu0 %8904 }
 0xc78   : > { %14636 = vrcp.f32 %v8908_v32 }
 0xc79   : > { %14638 = vrcp.f32 %v8905_v6  ;;  %7822 = vrot.lane.b32.xlu0 %v17094_v0, %s14773_s22  ;;  %v9175_v0 = vsel %vm3226_vm2, %v7983_v33, 0 }
 0xc7a   : > { %v14633_v15 = vpop.eup %14632 }
 0xc7b   : > { %v8957_v20 = vmul.f32 %v14633_v15, %v17217_v9  ;;  %v8911_v61 = vpop.xlane.xlu1 %8910 }
 0xc7c   : > { %14640 = vrcp.f32 %v8911_v61 }
 0xc7d   : > { %7826 = vrot.lane.b32.xlu0 %v17102_v63, %s14773_s22  ;;  %v8973_v52 = vpack.c.bf16 %v8957_v20, %v8957_v20 }
 0xc7e   : > { %v14635_v40 = vpop.eup %14634 }
 0xc7f   : > { %v8958_v43 = vmul.f32 %v14635_v40, %v17223_v17  ;;  %v8914_v50 = vpop.xlane.xlu1 %8913  ;;  %13882 = vmatmul.mubr.msk.bf16.vlgmr.msra.gmra.mrb[228].mxu1 %vm3222_vm5, %v8973_v52  ;;  %v8917_v17 = vpop.xlane.xlu0 %8916 }
 0xc80   : > { %14642 = vrcp.f32 %v8914_v50  ;;  %13892 = vmatpush3.bf16.msra.mxu1 %v9175_v0  ;;  %13893 = vmatprep.mubr.msk.bf16.mxu1 %vm14771_vm0, %v18377_v54 }
 0xc81   : > { %7830 = vrot.lane.b32.xlu0 %v17104_v5, %s14773_s22  ;;  %v8974_v63 = vpack.c.bf16 %v8958_v43, %v8958_v43  ;;  %13903 = vmatprep.subr.bf16.mxu1 %v18377_v54  ;;  %14644 = vrcp.f32 %v8917_v17 }
 0xc82   : > { %v14637_v9 = vpop.eup %14636 }
 0xc83   : > { %v14639_v19 = vpop.eup %14638  ;;  %13888 = vmatmul.mubr.msk.bf16.vlgmr.msra.gmra.mrb[240].mxu0 %vm3222_vm5, %v8974_v63  ;;  %v8920_v62 = vpop.xlane.xlu1 %8919  ;;  %v8960_v5 = vmul.f32 %v14637_v9, %v17227_v55 }
 0xc84   : > { %v8959_v10 = vmul.f32 %v14639_v19, %v17230_v49  ;;  %13898 = vmatpush3.bf16.msra.mxu0 %v9221_v60  ;;  %13899 = vmatprep.mubr.msk.bf16.mxu0 %vm14771_vm0, %v18377_v54  ;;  %14646 = vrcp.f32 %v8920_v62  ;;  %v9267_v49 = vsel %vm3226_vm2, %v7985_v23, 0  ;;  %v14263_v29 = vpop.permute.xlu0 %14262 }
 0xc85   : > { %13909 = vmatprep.subr.bf16.mxu0 %v18377_v54  ;;  %v8976_v42 = vpack.c.bf16 %v8960_v5, %v8960_v5  ;;  %v14264_v25 = vunpack.i.l.bf16 %v14263_v29  ;;  %v14265_v11 = vunpack.i.h.bf16 %v14263_v29  ;;  %v18428_v29 = vmov 0  }
 0xc86   : > { %v8975_v46 = vpack.c.bf16 %v8959_v10, %v8959_v10  ;;  %v14641_v12 = vpop.eup %14640 }
 0xc87   : > { %v8923_v1 = vpop.xlane.xlu1 %8922  ;;  %v8961_v47 = vmul.f32 %v14641_v12, %v17237_v38  ;;  %v7989_v18 = vpack.c.bf16 %v14264_v25, %v14264_v25  ;;  %v7990_v16 = vpack.c.bf16 %v14265_v11, %v14265_v11 }
 0xc88   : > { %13894 = vmatmul.mubr.msk.bf16.vlgmr.msra.gmra.mrb[232].mxu1 %vm3222_vm5, %v8975_v46  ;;  %14648 = vrcp.f32 %v8923_v1 }
 0xc89   : > { %13904 = vmatpush3.bf16.msra.mxu1 %v9267_v49  ;;  %13905 = vmatprep.mubr.msk.bf16.mxu1 %vm14771_vm0, %v18377_v54  ;;  %v8977_v38 = vpack.c.bf16 %v8961_v47, %v8961_v47  ;;  %v9451_v6 = vsel %vm3226_vm2, %v7989_v18, 0  ;;  %v9497_v20 = vsel %vm3226_vm2, %v7990_v16, 0 }
 0xc8a   : > { %v14643_v55 = vpop.eup %14642  ;;  %13915 = vmatprep.subr.bf16.mxu1 %v18377_v54 }
 0xc8b   : > { %13900 = vmatmul.mubr.msk.bf16.vlgmr.msra.gmra.mrb[244].mxu0 %vm3222_vm5, %v8976_v42  ;;  %v8926_v22 = vpop.xlane.xlu1 %8925  ;;  %v8962_v45 = vmul.f32 %v14643_v55, %v17242_v14  ;;  %v14645_v58 = vpop.eup %14644 }
 0xc8c   : > { %13910 = vmatpush3.bf16.msra.mxu0 %v9313_v27  ;;  %13911 = vmatprep.mubr.msk.bf16.mxu0 %vm14771_vm0, %v18377_v54  ;;  %14650 = vrcp.f32 %v8926_v22  ;;  %v8963_v28 = vmul.f32 %v14645_v58, %v17244_v36 }
 0xc8d   : > { %13921 = vmatprep.subr.bf16.mxu0 %v18377_v54  ;;  %v8978_v8 = vpack.c.bf16 %v8962_v45, %v8962_v45 }
 0xc8e   : > { %v14647_v14 = vpop.eup %14646  ;;  %v8979_v4 = vpack.c.bf16 %v8963_v28, %v8963_v28 }
 0xc8f   : > { %v8932_v7 = vpop.xlane.xlu1 %8931  ;;  %v8964_v3 = vmul.f32 %v14647_v14, %v17251_v30 }
 0xc90   : > { %13906 = vmatmul.mubr.msk.bf16.vlgmr.msra.gmra.mrb[236].mxu1 %vm3222_vm5, %v8977_v38  ;;  %14652 = vrcp.f32 %v8932_v7 }
 0xc91   : > { %13916 = vmatpush3.bf16.msra.mxu1 %v9359_v48  ;;  %13917 = vmatprep.mubr.msk.bf16.mxu1 %vm14771_vm0, %v18377_v54  ;;  %v8980_v15 = vpack.c.bf16 %v8964_v3, %v8964_v3 }
 0xc92   : > { %13927 = vmatprep.subr.bf16.mxu1 %v18377_v54  ;;  %v14649_v36 = vpop.eup %14648 }
 0xc93   : > { %13912 = vmatmul.mubr.msk.bf16.vlgmr.msra.gmra.mrb[248].mxu0 %vm3222_vm5, %v8978_v8  ;;  %v17408_v56 = vpop.xlane.xlu1 %8934  ;;  %v8965_v33 = vmul.f32 %v14649_v36, %v17256_v53 }
 0xc94   : > { %13922 = vmatpush3.bf16.msra.mxu0 %v9405_v41  ;;  %13923 = vmatprep.mubr.msk.bf16.mxu0 %vm14771_vm0, %v18377_v54 }
 0xc95   : > { %13933 = vmatprep.subr.bf16.mxu0 %v18377_v54  ;;  %v8981_v53 = vpack.c.bf16 %v8965_v33, %v8965_v33 }
 0xc96   : > { %v14651_v21 = vpop.eup %14650 }
 0xc97   : > { %v8938_v32 = vpop.xlane.xlu1 %8937  ;;  %v8966_v40 = vmul.f32 %v14651_v21, %v17260_v34 }
 0xc98   : > { %13918 = vmatmul.mubr.msk.bf16.vlgmr.msra.gmra.mrb[240].mxu1 %vm3222_vm5, %v8979_v4  ;;  %14654 = vrcp.f32 %v8938_v32 }
 0xc99   : > { %13928 = vmatpush3.bf16.msra.mxu1 %v9451_v6  ;;  %13929 = vmatprep.mubr.msk.bf16.mxu1 %vm14771_vm0, %v18377_v54  ;;  %v8982_v31 = vpack.c.bf16 %v8966_v40, %v8966_v40 }
 0xc9a   : > { %13939 = vmatprep.subr.bf16.mxu1 %v18377_v54  ;;  %v14653_v63 = vpop.eup %14652 }
 0xc9b   : > { %v14268_v30 = vpop.permute.xlu1 %14267  ;;  %13924 = vmatmul.mubr.msk.bf16.vlgmr.msra.gmra.mrb[252].mxu0 %vm3222_vm5, %v8980_v15  ;;  %v8968_v17 = vmul.f32 %v14653_v63, %v17264_v37 }
 0xc9c   : > { %v14270_v61 = vunpack.i.h.bf16 %v14268_v30  ;;  %v14269_v52 = vunpack.i.l.bf16 %v14268_v30  ;;  %13934 = vmatpush3.bf16.msra.mxu0 %v9497_v20  ;;  %13935 = vmatprep.mubr.msk.bf16.mxu0 %vm14771_vm0, %v18377_v54 }
 0xc9d   : > { %13945 = vmatprep.subr.bf16.mxu0 %v18377_v54  ;;  %v8984_v26 = vpack.c.bf16 %v8968_v17, %v8968_v17 }
 0xc9e   : > { %v7991_v44 = vpack.c.bf16 %v14269_v52, %v14269_v52  ;;  %v7992_v43 = vpack.c.bf16 %v14270_v61, %v14270_v61 }
 0xc9f   : > { %v5872_v50 = vpop.permute.xlu1 %5871 }
 0xca0   : > { %5917 = vst.msk [vmem:[#allocation3 + $0x6] sm:$0x3] %vm5913_vm7, %v5872_v50  ;;  %13930 = vmatmul.mubr.msk.bf16.vlgmr.msra.gmra.mrb[244].mxu1 %vm3222_vm5, %v8981_v53  ;;  %v9543_v0 = vsel %vm3226_vm2, %v7991_v44, 0  ;;  %v9589_v9 = vsel %vm3226_vm2, %v7992_v43, 0 }
 0xca1   : > { %13940 = vmatpush3.bf16.msra.mxu1 %v9543_v0  ;;  %13941 = vmatprep.mubr.msk.bf16.mxu1 %vm14771_vm0, %v18377_v54 }
 0xca2   : > { %13951 = vmatprep.subr.bf16.mxu1 %v18377_v54  ;;  %v14655_v5 = vpop.eup %14654 }
 0xca3   : > { %v5876_v34 = vpop.permute.xlu1 %5875  ;;  %13936 = vmatmul.mubr.msk.bf16.vlgmr.msra.gmra.mrb[0].mxu0 %vm3222_vm5, %v8982_v31  ;;  %v8970_v59 = vmul.f32 %v14655_v5, %v17272_v39 }
 0xca4   : > { %5919 = vst.msk [vmem:[#allocation3 + $0xa] sm:$0x3] %vm5913_vm7, %v5876_v34  ;;  %13946 = vmatpush3.bf16.msra.mxu0 %v9589_v9  ;;  %13947 = vmatprep.mubr.msk.bf16.mxu0 %vm14771_vm0, %v18377_v54 }
 0xca5   : > { %13957 = vmatprep.subr.bf16.mxu0 %v18377_v54  ;;  %v8986_v51 = vpack.c.bf16 %v8970_v59, %v8970_v59 }
 0xca7   : > { %v5880_v19 = vpop.permute.xlu1 %5879 }
 0xca8   : > { %5921 = vst.msk [vmem:[#allocation3 + $0xe] sm:$0x3] %vm5913_vm7, %v5880_v19 }
 0xcab   : > { %v5884_v60 = vpop.permute.xlu1 %5883  ;;  %13948 = vmatmul.mubr.msk.bf16.vlgmr.msra.gmra.mrb[4].mxu0 %vm3222_vm5, %v8984_v26 }
 0xcac   : > { %5923 = vst.msk [vmem:[#allocation3 + $0x12] sm:$0x3] %vm5913_vm7, %v5884_v60  ;;  %13959 = vmatprep.mubr.msk.bf16.mxu0 %vm14771_vm0, %v18377_v54 }
 0xcaf   : > { %v5888_v62 = vpop.permute.xlu1 %5887 }
 0xcb0   : > { %5925 = vst.msk [vmem:[#allocation3 + $0x16] sm:$0x3] %vm5913_vm7, %v5888_v62 }
 0xcb3   : > { %v5892_v23 = vpop.permute.xlu1 %5891 }
 0xcb4   : > { %5927 = vst.msk [vmem:[#allocation3 + $0x1a] sm:$0x3] %vm5913_vm7, %v5892_v23  ;;  %v8929_v37 = vpop.xlane.xlu0 %8928 }
 0xcb5   : > { %14656 = vrcp.f32 %v8929_v37 }
 0xcb6   : > { %14658 = vrcp.f32 %v17408_v56 }
 0xcb7   : > { %v5896_v10 = vpop.permute.xlu1 %5895 }
 0xcb8   : > { %5929 = vst.msk [vmem:[#allocation3 + $0x1e] sm:$0x3] %vm5913_vm7, %v5896_v10  ;;  %v14273_v46 = vpop.permute.xlu0 %14272 }
 0xcb9   : > { %v14275_v12 = vunpack.i.h.bf16 %v14273_v46  ;;  %v14274_v49 = vunpack.i.l.bf16 %v14273_v46 }
 0xcbb   : > { %v7994_v1 = vpack.c.bf16 %v14275_v12, %v14275_v12  ;;  %v7805_v13 = vpop.permute.xlu1 %7804  ;;  %v7993_v2 = vpack.c.bf16 %v14274_v49, %v14274_v49 }
 0xcbc   : > { %v5866_v42 = vpop.permute.xlu0 %5865 }
 0xcbd   : > { %5914 = vst.msk [vmem:[#allocation3] sm:$0x3] %vm5913_vm7, %v5866_v42  ;;  %v9681_v55 = vsel %vm3226_vm2, %v7994_v1, 0 }
 0xcbe   : > { %13958 = vmatpush3.bf16.msra.mxu0 %v9681_v55 }
 0xcbf   : > { %v14657_v47 = vpop.eup %14656  ;;  %v7809_v27 = vpop.permute.xlu1 %7808 }
 0xcc0   : > { %v8967_v22 = vmul.f32 %v14657_v47, %v17283_v57  ;;  %7854 = vst.msk [vmem:[#allocation3 + $0x6] sm:$0x3] %vm7850_vm8, %v7809_v27  ;;  %v5868_v45 = vpop.permute.xlu0 %5867  ;;  %v14659_v38 = vpop.eup %14658  ;;  %v9635_v57 = vsel %vm3226_vm2, %v7993_v2, 0 }
 0xcc1   : > { %5915 = vst.msk [vmem:[#allocation3 + $0x2] sm:$0x3] %vm5913_vm7, %v5868_v45  ;;  %13960 = vmatmul.mubr.msk.bf16.vlgmr.msra.gmra.mrb[8].mxu0 %vm3222_vm5, %v8986_v51  ;;  %v8969_v7 = vmul.f32 %v14659_v38, %v17268_v35 }
 0xcc2   : > { %7852 = vst.msk [vmem:[#allocation3 + $0x2] sm:$0x3] %vm7850_vm8, %v7805_v13  ;;  %v8983_v39 = vpack.c.bf16 %v8967_v22, %v8967_v22  ;;  %11112 = vmatprep.mubr.bf16.mxu0 %v18428_v29 }
 0xcc3   : > { %v7813_v58 = vpop.permute.xlu1 %7812  ;;  %v8985_v8 = vpack.c.bf16 %v8969_v7, %v8969_v7 }
 0xcc4   : > { %7856 = vst.msk [vmem:[#allocation3 + $0xa] sm:$0x3] %vm7850_vm8, %v7813_v58  ;;  %v5870_v24 = vpop.permute.xlu0 %5869  ;;  %13942 = vmatmul.mubr.msk.bf16.vlgmr.msra.gmra.mrb[248].mxu1 %vm3222_vm5, %v8983_v39 }
 0xcc5   : > { %5916 = vst.msk [vmem:[#allocation3 + $0x4] sm:$0x3] %vm5913_vm7, %v5870_v24  ;;  %13952 = vmatpush3.bf16.msra.mxu1 %v9635_v57  ;;  %13953 = vmatprep.mubr.msk.bf16.mxu1 %vm14771_vm0, %v18377_v54 }
 0xcc7   : > { %v7817_v25 = vpop.permute.xlu1 %7816 }
 0xcc8   : > { %7858 = vst.msk [vmem:[#allocation3 + $0xe] sm:$0x3] %vm7850_vm8, %v7817_v25  ;;  %v5874_v48 = vpop.permute.xlu0 %5873 }
 0xcc9   : > { %5918 = vst.msk [vmem:[#allocation3 + $0x8] sm:$0x3] %vm5913_vm7, %v5874_v48 }
 0xccb   : > { %v7821_v14 = vpop.permute.xlu1 %7820 }
 0xccc   : > { %7860 = vst.msk [vmem:[#allocation3 + $0x12] sm:$0x3] %vm7850_vm8, %v7821_v14  ;;  %v5878_v28 = vpop.permute.xlu0 %5877  ;;  %13954 = vmatmul.mubr.msk.bf16.vlgmr.msra.gmra.mrb[252].mxu1 %vm3222_vm5, %v8985_v8 }
 0xccd   : > { %5920 = vst.msk [vmem:[#allocation3 + $0xc] sm:$0x3] %vm5913_vm7, %v5878_v28 }
 0xccf   : > { %v7825_v11 = vpop.permute.xlu1 %7824 }
 0xcd0   : > { %7862 = vst.msk [vmem:[#allocation3 + $0x16] sm:$0x3] %vm7850_vm8, %v7825_v11  ;;  %v5882_v54 = vpop.permute.xlu0 %5881  ;;  %v14308_v11 = vld [vmem:[%s14915_s29] sm:$0xff]  }
 0xcd1   : > { %5922 = vst.msk [vmem:[#allocation3 + $0x10] sm:$0x3] %vm5913_vm7, %v5882_v54  ;;  %13963 = vmatprep.subr.bf16.mxu1 %v14308_v11 }
 0xcd2   : > { %13964 = vmatpush3.bf16.msra.mxu1 %v14308_v11 }
 0xcd3   : > { %v7829_v35 = vpop.permute.xlu1 %7828 }
 0xcd4   : > { %7864 = vst.msk [vmem:[#allocation3 + $0x1a] sm:$0x3] %vm7850_vm8, %v7829_v35  ;;  %v5886_v56 = vpop.permute.xlu0 %5885 }
 0xcd5   : > { %5924 = vst.msk [vmem:[#allocation3 + $0x14] sm:$0x3] %vm5913_vm7, %v5886_v56 }
 0xcd7   : > { %v7833_v41 = vpop.permute.xlu1 %7832 }
 0xcd8   : > { %7866 = vst.msk [vmem:[#allocation3 + $0x1e] sm:$0x3] %vm7850_vm8, %v7833_v41  ;;  %v5890_v18 = vpop.permute.xlu0 %5889 }
 0xcd9   : > { %5926 = vst.msk [vmem:[#allocation3 + $0x18] sm:$0x3] %vm5913_vm7, %v5890_v18 }
 0xcdc   : > { %v5894_v3 = vpop.permute.xlu0 %5893 }
 0xcdd   : > { %5928 = vst.msk [vmem:[#allocation3 + $0x1c] sm:$0x3] %vm5913_vm7, %v5894_v3  ;;  %v14309_v3 = vld [vmem:[%s14915_s29 + $0x8] sm:$0xff]  }
 0xcde   : > { %13965 = vmatprep.subr.bf16.mxu1 %v14309_v3 }
 0xcdf   : > { %13966 = vmatpush3.bf16.msra.mxu1 %v14309_v3 }
 0xce0   : > { %v7803_v4 = vpop.permute.xlu0 %7802 }
 0xce1   : > { %7851 = vst.msk [vmem:[#allocation3] sm:$0x3] %vm7850_vm8, %v7803_v4 }
 0xce4   : > { %v7807_v36 = vpop.permute.xlu0 %7806 }
 0xce5   : > { %7853 = vst.msk [vmem:[#allocation3 + $0x4] sm:$0x3] %vm7850_vm8, %v7807_v36  ;;  %v14310_v36 = vld [vmem:[%s14915_s29 + $0x10] sm:$0xff]  }
 0xce6   : > { %13967 = vmatprep.subr.bf16.mxu1 %v14310_v36 }
 0xce7   : > { %13968 = vmatpush3.bf16.msra.mxu1 %v14310_v36 }
 0xce8   : > { %v7811_v16 = vpop.permute.xlu0 %7810 }
 0xce9   : > { %7855 = vst.msk [vmem:[#allocation3 + $0x8] sm:$0x3] %vm7850_vm8, %v7811_v16  ;;  %v14311_v16 = vld [vmem:[%s14915_s29 + $0x18] sm:$0xff]  }
 0xcea   : > { %13969 = vmatprep.subr.bf16.mxu1 %v14311_v16 }
 0xceb   : > { %13970 = vmatpush3.bf16.msra.mxu1 %v14311_v16 }
 0xcec   : > { %v7815_v32 = vpop.permute.xlu0 %7814 }
 0xced   : > { %7857 = vst.msk [vmem:[#allocation3 + $0xc] sm:$0x3] %vm7850_vm8, %v7815_v32 }
 0xcf0   : > { %v7819_v6 = vpop.permute.xlu0 %7818 }
 0xcf1   : > { %7859 = vst.msk [vmem:[#allocation3 + $0x10] sm:$0x3] %vm7850_vm8, %v7819_v6 }
 0xcf4   : > { %v7823_v15 = vpop.permute.xlu0 %7822 }
 0xcf5   : > { %7861 = vst.msk [vmem:[#allocation3 + $0x14] sm:$0x3] %vm7850_vm8, %v7823_v15 }
 0xcf8   : > { %v7827_v21 = vpop.permute.xlu0 %7826 }
 0xcf9   : > { %7863 = vst.msk [vmem:[#allocation3 + $0x18] sm:$0x3] %vm7850_vm8, %v7827_v21 }
 0xcfc   : > { %v7831_v33 = vpop.permute.xlu0 %7830 }
 0xcfd   : > { %7865 = vst.msk [vmem:[#allocation3 + $0x1c] sm:$0x3] %vm7850_vm8, %v7831_v33 }
 0xd16   : > { %v9073_v30 = vpop.f32.mrb[236].mxu0 }
 0xd17   : > { %v13877_v20 = vpop.f32.mrb[237].mxu0  ;;  %9741 = vrot.lane.b32.xlu1 %v9073_v30, %s14772_s24 }
 0xd18   : > { %v9076_v61 = vpop.f32.mrb[238].mxu0 }
 0xd19   : > { %v13878_v52 = vpop.f32.mrb[239].mxu0 }
 0xd1a   : > { %v14312_v52 = vld [vmem:[%s14915_s29 + $0x20] sm:$0xff]  }
 0xd1b   : > { %13971 = vmatprep.subr.bf16.mxu1 %v14312_v52 }
 0xd1c   : > { %13972 = vmatpush3.bf16.msra.mxu1 %v14312_v52 }
 0xd1d   : > { %v9027_v40 = vpop.f32.mrb[224].mxu1 }
 0xd1e   : > { %9739 = vrot.lane.b32.xlu0 %v9027_v40, %s14772_s24  ;;  %v13871_v44 = vpop.f32.mrb[225].mxu1  ;;  %v14313_v40 = vld [vmem:[%s14915_s29 + $0x28] sm:$0xff]  }
 0xd1f   : > { %v9030_v53 = vpop.f32.mrb[226].mxu1  ;;  %13973 = vmatprep.subr.bf16.mxu1 %v14313_v40 }
 0xd20   : > { %v13872_v43 = vpop.f32.mrb[227].mxu1  ;;  %v14314_v53 = vld [vmem:[%s14915_s29 + $0x30] sm:$0xff]   ;;  %13974 = vmatpush3.bf16.msra.mxu1 %v14313_v40 }
 0xd21   : > { %13975 = vmatprep.subr.bf16.mxu1 %v14314_v53 }
 0xd24   : > { %13976 = vmatpush3.bf16.msra.mxu1 %v14314_v53 }
 0xd52   : > { %v9119_v50 = vpop.f32.mrb[228].mxu1 }
 0xd53   : > { %9743 = vrot.lane.b32.xlu0 %v9119_v50, %s14772_s24  ;;  %v13883_v0 = vpop.f32.mrb[229].mxu1 }
 0xd54   : > { %v9122_v31 = vpop.f32.mrb[230].mxu1 }
 0xd55   : > { %v13884_v63 = vpop.f32.mrb[231].mxu1  ;;  %v14315_v31 = vld [vmem:[%s14915_s29 + $0x38] sm:$0xff]  }
 0xd56   : > { %v9165_v34 = vpop.f32.mrb[240].mxu0  ;;  %13977 = vmatprep.subr.bf16.mxu1 %v14315_v31 }
 0xd57   : > { %v13889_v9 = vpop.f32.mrb[241].mxu0  ;;  %9745 = vrot.lane.b32.xlu1 %v9165_v34, %s14772_s24  ;;  %13978 = vmatpush3.bf16.msra.mxu1 %v14315_v31 }
 0xd58   : > { %v9168_v17 = vpop.f32.mrb[242].mxu0 }
 0xd59   : > { %v13890_v19 = vpop.f32.mrb[243].mxu0 }
 0xd5b   : > { %v9211_v26 = vpop.f32.mrb[232].mxu1 }
 0xd5c   : > { %9747 = vrot.lane.b32.xlu0 %v9211_v26, %s14772_s24  ;;  %v13895_v60 = vpop.f32.mrb[233].mxu1 }
 0xd5d   : > { %v9214_v62 = vpop.f32.mrb[234].mxu1 }
 0xd5e   : > { %v13896_v23 = vpop.f32.mrb[235].mxu1  ;;  %v9257_v37 = vpop.f32.mrb[244].mxu0 }
 0xd5f   : > { %v13901_v10 = vpop.f32.mrb[245].mxu0  ;;  %9749 = vrot.lane.b32.xlu1 %v9257_v37, %s14772_s24 }
 0xd60   : > { %v9260_v5 = vpop.f32.mrb[246].mxu0 }
 0xd61   : > { %v13902_v46 = vpop.f32.mrb[247].mxu0 }
 0xd63   : > { %v9303_v12 = vpop.f32.mrb[236].mxu1 }
 0xd64   : > { %9751 = vrot.lane.b32.xlu0 %v9303_v12, %s14772_s24  ;;  %v13907_v59 = vpop.f32.mrb[237].mxu1 }
 0xd65   : > { %v9306_v1 = vpop.f32.mrb[238].mxu1 }
 0xd66   : > { %v13908_v13 = vpop.f32.mrb[239].mxu1  ;;  %v9349_v49 = vpop.f32.mrb[248].mxu0 }
 0xd67   : > { %v13913_v42 = vpop.f32.mrb[249].mxu0  ;;  %9753 = vrot.lane.b32.xlu1 %v9349_v49, %s14772_s24 }
 0xd68   : > { %v9352_v55 = vpop.f32.mrb[250].mxu0 }
 0xd69   : > { %v13914_v47 = vpop.f32.mrb[251].mxu0  ;;  %v18429_v55 = vld [vmem:[#allocation11_spill] sm:$0xff] }
 0xd6b   : > { %v9395_v51 = vpop.f32.mrb[240].mxu1 }
 0xd6c   : > { %9755 = vrot.lane.b32.xlu0 %v9395_v51, %s14772_s24  ;;  %v13919_v27 = vpop.f32.mrb[241].mxu1 }
 0xd6d   : > { %v9398_v22 = vpop.f32.mrb[242].mxu1 }
 0xd6e   : > { %v13920_v2 = vpop.f32.mrb[243].mxu1  ;;  %v9441_v45 = vpop.f32.mrb[252].mxu0 }
 0xd6f   : > { %9757 = vrot.lane.b32.xlu1 %v9441_v45, %s14772_s24  ;;  %v13925_v39 = vpop.f32.mrb[253].mxu0 }
 0xd70   : > { %v9444_v38 = vpop.f32.mrb[254].mxu0 }
 0xd71   : > { %v13926_v58 = vpop.f32.mrb[255].mxu0 }
 0xd73   : > { %v9487_v24 = vpop.f32.mrb[244].mxu1 }
 0xd74   : > { %9759 = vrot.lane.b32.xlu0 %v9487_v24, %s14772_s24  ;;  %v13931_v57 = vpop.f32.mrb[245].mxu1 }
 0xd75   : > { %v9490_v7 = vpop.f32.mrb[246].mxu1 }
 0xd76   : > { %v13932_v25 = vpop.f32.mrb[247].mxu1  ;;  %v9533_v48 = vpop.f32.mrb[0].mxu0 }
 0xd77   : > { %9761 = vrot.lane.b32.xlu1 %v9533_v48, %s14772_s24  ;;  %v13937_v8 = vpop.f32.mrb[1].mxu0 }
 0xd78   : > { %v9536_v14 = vpop.f32.mrb[2].mxu0 }
 0xd79   : > { %v13938_v28 = vpop.f32.mrb[3].mxu0 }
 0xd7e   : > { %v9625_v54 = vpop.f32.mrb[4].mxu0 }
 0xd7f   : > { %9765 = vrot.lane.b32.xlu1 %v9625_v54, %s14772_s24  ;;  %v13949_v35 = vpop.f32.mrb[5].mxu0 }
 0xd80   : > { %v9628_v56 = vpop.f32.mrb[6].mxu0 }
 0xd81   : > { %v13950_v41 = vpop.f32.mrb[7].mxu0 }
 0xd89   : > { %v9742_v18 = vpop.permute.xlu1 %9741 }
 0xd8a   : > { %9789 = vst.msk [vmem:[#allocation3 + $0x2] sm:$0x3] %vm9787_vm9, %v9742_v18 }
 0xd90   : > { %v9740_v4 = vpop.permute.xlu0 %9739 }
 0xd91   : > { %9788 = vst.msk [vmem:[#allocation3] sm:$0x3] %vm9787_vm9, %v9740_v4  ;;  %v9805_v46 = vld [vmem:[#allocation3 + $0x2] sm:$0x3] }
 0xd94   : > { %v9717_v32 = vpop.f32.mrb[8].mxu0 }
 0xd95   : > { %9769 = vrot.lane.b32.xlu1 %v9717_v32, %s14772_s24  ;;  %v13961_v6 = vpop.f32.mrb[9].mxu0 }
 0xd96   : > { %v9720_v15 = vpop.f32.mrb[10].mxu0 }
 0xd97   : > { %v9579_v21 = vpop.f32.mrb[248].mxu1  ;;  %v13962_v33 = vpop.f32.mrb[11].mxu0 }
 0xd98   : > { %9763 = vrot.lane.b32.xlu0 %v9579_v21, %s14772_s24  ;;  %v13943_v30 = vpop.f32.mrb[249].mxu1  ;;  %v9804_v62 = vld [vmem:[#allocation3] sm:$0x3] }
 0xd99   : > { %v9582_v20 = vpop.f32.mrb[250].mxu1  ;;  %v9836_v59 = vcombine.low %v9804_v62, %v9805_v46  ;;  %v14701_v46 = vld [vmem:[#allocation2 + $0x12] sm:$0x3] }
 0xd9a   : > { %v13944_v61 = vpop.f32.mrb[251].mxu1  ;;  %v12767_v20 = vld [vmem:[%s18430_s19] ss:$0 sm:$0xff] }
 0xd9b   : > { %v9844_v27 = vrot.slane %v9836_v59, %v18429_v55  ;;  %v10133_v61 = vcombine.high %v12767_v20, %v12767_v20  ;;  %v17540_v52 = vrot.slane %v12767_v20, %v18429_v55  ;;  %v14702_v59 = vld [vmem:[#allocation2] sm:$0x3]  ;;  %v14712_v20 = vld [vmem:[#allocation2 + $0x18] sm:$0x3] }
 0xd9f   : > { %v9671_v44 = vpop.f32.mrb[252].mxu1 }
 0xda0   : > { %9767 = vrot.lane.b32.xlu0 %v9671_v44, %s14772_s24  ;;  %v13955_v43 = vpop.f32.mrb[253].mxu1 }
 0xda1   : > { %v9674_v50 = vpop.f32.mrb[254].mxu1 }
 0xda2   : > { %v13956_v0 = vpop.f32.mrb[255].mxu1  ;;  %v17544_v50 = vrot.slane %v10133_v61, %v18429_v55 }
 0xdc5   : > { %v9744_v63 = vpop.permute.xlu0 %9743 }
 0xdc6   : > { %9790 = vst.msk [vmem:[#allocation3 + $0x4] sm:$0x3] %vm9787_vm9, %v9744_v63 }
 0xdc9   : > { %v9746_v34 = vpop.permute.xlu1 %9745 }
 0xdca   : > { %9791 = vst.msk [vmem:[#allocation3 + $0x6] sm:$0x3] %vm9787_vm9, %v9746_v34 }
 0xdcd   : > { %v9806_v23 = vld [vmem:[#allocation3 + $0x4] sm:$0x3] }
 0xdce   : > { %v9748_v9 = vpop.permute.xlu0 %9747 }
 0xdcf   : > { %9792 = vst.msk [vmem:[#allocation3 + $0x8] sm:$0x3] %vm9787_vm9, %v9748_v9 }
 0xdd1   : > { %v9750_v17 = vpop.permute.xlu1 %9749  ;;  %v9807_v60 = vld [vmem:[#allocation3 + $0x6] sm:$0x3] }
 0xdd2   : > { %9793 = vst.msk [vmem:[#allocation3 + $0xa] sm:$0x3] %vm9787_vm9, %v9750_v17  ;;  %v9837_v5 = vcombine.low %v9806_v23, %v9807_v60  ;;  %v17550_v17 = vcombine.high %v17540_v52, %v17540_v52  ;;  %v14700_v60 = vld [vmem:[#allocation2 + $0x10] sm:$0x3] }
 0xdd4   : > { %v9851_v47 = vrot.slane %v9837_v5, %v18429_v55 }
 0xdd6   : > { %v9752_v19 = vpop.permute.xlu0 %9751  ;;  %v9808_v12 = vld [vmem:[#allocation3 + $0x8] sm:$0x3]  ;;  %v9852_v39 = vcombine.low %v9844_v27, %v9851_v47 }
 0xdd7   : > { %9794 = vst.msk [vmem:[#allocation3 + $0xc] sm:$0x3] %vm9787_vm9, %v9752_v19 }
 0xdd9   : > { %v9754_v26 = vpop.permute.xlu1 %9753  ;;  %v9809_v37 = vld [vmem:[#allocation3 + $0xa] sm:$0x3] }
 0xdda   : > { %9795 = vst.msk [vmem:[#allocation3 + $0xe] sm:$0x3] %vm9787_vm9, %v9754_v26  ;;  %v9853_v1 = vcombine.low %v9808_v12, %v9809_v37 }
 0xddc   : > { %v9861_v22 = vrot.slane %v9853_v1, %v18429_v55 }
 0xdde   : > { %v9756_v10 = vpop.permute.xlu0 %9755  ;;  %v9810_v49 = vld [vmem:[#allocation3 + $0xc] sm:$0x3] }
 0xddf   : > { %9796 = vst.msk [vmem:[#allocation3 + $0x10] sm:$0x3] %vm9787_vm9, %v9756_v10 }
 0xde1   : > { %v9758_v13 = vpop.permute.xlu1 %9757  ;;  %v9811_v42 = vld [vmem:[#allocation3 + $0xe] sm:$0x3] }
 0xde2   : > { %9797 = vst.msk [vmem:[#allocation3 + $0x12] sm:$0x3] %vm9787_vm9, %v9758_v13  ;;  %v9854_v51 = vcombine.low %v9810_v49, %v9811_v42  ;;  %v10149_v13 = vcombine.high %v17544_v50, %v17544_v50  ;;  %v14703_v42 = vld [vmem:[#allocation2 + $0x2] sm:$0x3] }
 0xde4   : > { %v9868_v2 = vrot.slane %v9854_v51, %v18429_v55  ;;  %v14704_v51 = vld [vmem:[#allocation2 + $0x14] sm:$0x3] }
 0xde6   : > { %v9760_v45 = vpop.permute.xlu0 %9759  ;;  %v9869_v38 = vcombine.low %v9861_v22, %v9868_v2  ;;  %v9812_v35 = vld [vmem:[#allocation3 + $0x10] sm:$0x3]  ;;  %v14705_v22 = vld [vmem:[#allocation2 + $0x16] sm:$0x3] }
 0xde7   : > { %9798 = vst.msk [vmem:[#allocation3 + $0x14] sm:$0x3] %vm9787_vm9, %v9760_v45  ;;  %v14706_v45 = vld [vmem:[#allocation2 + $0x4] sm:$0x3] }
 0xde8   : > { %v9908_v58 = vpack.c.bf16 %v9869_v38, %v9852_v39 }
 0xde9   : > { %v9762_v24 = vpop.permute.xlu1 %9761  ;;  %v9813_v14 = vld [vmem:[#allocation3 + $0x12] sm:$0x3] }
 0xdea   : > { %9799 = vst.msk [vmem:[#allocation3 + $0x16] sm:$0x3] %vm9787_vm9, %v9762_v24  ;;  %13979 = vmatprep.mubr.bf16.mxu1 %v9908_v58  ;;  %v9870_v41 = vcombine.low %v9812_v35, %v9813_v14  ;;  %v14707_v24 = vld [vmem:[#allocation2 + $0x6] sm:$0x3]  ;;  %v14709_v35 = vld [vmem:[#allocation2 + $0x1a] sm:$0x3] }
 0xdec   : > { %v9878_v32 = vrot.slane %v9870_v41, %v18429_v55 }
 0xdee   : > { %v9814_v28 = vld [vmem:[#allocation3 + $0x14] sm:$0x3] }
 0xdf1   : > { %v9766_v57 = vpop.permute.xlu1 %9765  ;;  %v9815_v8 = vld [vmem:[#allocation3 + $0x16] sm:$0x3] }
 0xdf2   : > { %9801 = vst.msk [vmem:[#allocation3 + $0x1a] sm:$0x3] %vm9787_vm9, %v9766_v57  ;;  %v9871_v54 = vcombine.low %v9814_v28, %v9815_v8  ;;  %v14708_v28 = vld [vmem:[#allocation2 + $0x1c] sm:$0x3] }
 0xdf4   : > { %v9885_v16 = vrot.slane %v9871_v54, %v18429_v55 }
 0xdf6   : > { %v9886_v21 = vcombine.low %v9878_v32, %v9885_v16 }
 0xdf9   : > { %v9817_v56 = vld [vmem:[#allocation3 + $0x1a] sm:$0x3] }
 0xe07   : > { %v9770_v7 = vpop.permute.xlu1 %9769 }
 0xe08   : > { %9803 = vst.msk [vmem:[#allocation3 + $0x1e] sm:$0x3] %vm9787_vm9, %v9770_v7 }
 0xe0a   : > { %v9764_v25 = vpop.permute.xlu0 %9763 }
 0xe0b   : > { %9800 = vst.msk [vmem:[#allocation3 + $0x18] sm:$0x3] %vm9787_vm9, %v9764_v25 }
 0xe0f   : > { %v9819_v3 = vld [vmem:[#allocation3 + $0x1e] sm:$0x3] }
 0xe12   : > { %v9768_v48 = vpop.permute.xlu0 %9767  ;;  %v9816_v11 = vld [vmem:[#allocation3 + $0x18] sm:$0x3] }
 0xe13   : > { %9802 = vst.msk [vmem:[#allocation3 + $0x1c] sm:$0x3] %vm9787_vm9, %v9768_v48  ;;  %v9887_v18 = vcombine.low %v9816_v11, %v9817_v56 }
 0xe15   : > { %v9895_v6 = vrot.slane %v9887_v18, %v18429_v55 }
 0xe1a   : > { %v9818_v4 = vld [vmem:[#allocation3 + $0x1c] sm:$0x3] }
 0xe1b   : > { %v9888_v36 = vcombine.low %v9818_v4, %v9819_v3 }
 0xe1d   : > { %v9902_v15 = vrot.slane %v9888_v36, %v18429_v55  ;;  %v14710_v36 = vld [vmem:[#allocation2 + $0x1e] sm:$0x3] }
 0xe1f   : > { %v9903_v33 = vcombine.low %v9895_v6, %v9902_v15 }
 0xe21   : > { %v9909_v30 = vpack.c.bf16 %v9903_v33, %v9886_v21  ;;  %v14711_v33 = vld [vmem:[#allocation2 + $0x8] sm:$0x3] }
 0xe23   : > { %13980 = vmatmul.mubr.bf16.vlgmr.msra.gmra.mrb[0].mxu1 %v9909_v30 }
 0xe24   : > { %11165 = vmatprep.mubr.bf16.mxu1 %v18428_v29 }
 0xef6   : > { %v13981_v40 = vpop.f32.mrb[0].mxu1 }
 0xef7   : > { %v10061_v44 = vcombine.high %v13981_v40, %v13981_v40  ;;  %v10068_v53 = vrot.slane %v13981_v40, %v18429_v55  ;;  %v10008_v43 = vpop.f32.mrb[1].mxu1 }
 0xef8   : > { %v10027_v0 = vcombine.high %v10008_v43, %v10008_v43  ;;  %v10034_v31 = vrot.slane %v10008_v43, %v18429_v55  ;;  %v13982_v63 = vpop.f32.mrb[2].mxu1 }
 0xef9   : > { %v10075_v34 = vrot.slane %v10061_v44, %v18429_v55  ;;  %v10076_v9 = vcombine.high %v10068_v53, %v10068_v53  ;;  %v10078_v19 = vcombine.high %v13982_v63, %v13982_v63  ;;  %v10011_v26 = vpop.f32.mrb[3].mxu1  ;;  %v10119_v62 = vadd.f32 %v14700_v60, %v10068_v53 }
 0xefa   : > { %v10041_v23 = vrot.slane %v10027_v0, %v18429_v55  ;;  %v10042_v37 = vcombine.high %v10034_v31, %v10034_v31  ;;  %v10085_v10 = vrot.slane %v13982_v63, %v18429_v55  ;;  %v10111_v1 = vadd.f32 %v14702_v59, %v10034_v31  ;;  %v14713_v31 = vld [vmem:[#allocation2 + $0xa] sm:$0x3] }
 0xefb   : > { %v10077_v5 = vcombine.high %v10075_v34, %v10075_v34  ;;  %v10120_v12 = vadd.f32 %v14701_v46, %v10076_v9  ;;  %v10121_v27 = vadd.f32 %v14704_v51, %v10075_v34  ;;  %v10092_v38 = vrot.slane %v10078_v19, %v18429_v55  ;;  %v14714_v34 = vld [vmem:[#allocation2 + $0xc] sm:$0x3] }
 0xefc   : > { %v10043_v49 = vcombine.high %v10041_v23, %v10041_v23  ;;  %v10112_v47 = vadd.f32 %v14703_v42, %v10042_v37  ;;  %v10113_v39 = vadd.f32 %v14706_v45, %v10041_v23  ;;  %v17558_v58 = vadd.f32 %v17540_v52, %v10119_v62  ;;  %v14715_v23 = vld [vmem:[#allocation2 + $0xe] sm:$0x3] }
 0xefd   : > { %v10122_v2 = vadd.f32 %v14705_v22, %v10077_v5  ;;  %v10093_v25 = vcombine.high %v10085_v10, %v10085_v10  ;;  %v17564_v48 = vadd.f32 %v17550_v17, %v10120_v12  ;;  %v17567_v8 = vadd.f32 %v17540_v52, %v10111_v1 }
 0xefe   : > { %v10114_v57 = vadd.f32 %v14707_v24, %v10043_v49  ;;  %v17561_v7 = vadd.f32 %v17550_v17, %v10112_v47  ;;  %v10094_v14 = vcombine.high %v10092_v38, %v10092_v38  ;;  %v10125_v11 = vadd.f32 %v14708_v28, %v10092_v38 }
 0xeff   : > { %v10124_v56 = vadd.f32 %v14709_v35, %v10093_v25  ;;  %v10044_v41 = vcombine.high %v10011_v26, %v10011_v26  ;;  %v10051_v18 = vrot.slane %v10011_v26, %v18429_v55  ;;  %v17572_v3 = vadd.f32 %v10149_v13, %v10122_v2 }
 0xf00   : > { %v17569_v54 = vadd.f32 %v10149_v13, %v10114_v57  ;;  %v17575_v4 = vadd.f32 %v17544_v50, %v10113_v39  ;;  %v10126_v16 = vadd.f32 %v14710_v36, %v10094_v14  ;;  %v10188_v32 = vcombine.low %v17567_v8, %v17561_v7  ;;  %v18431_v57 = vld [vmem:[#allocation12_spill] sm:$0xff]  ;;  %v18432_v14 = vld [vmem:[#allocation13_spill] sm:$0xff] }
 0xf01   : > { %v17580_v6 = vadd.f32 %v17544_v50, %v10121_v27  ;;  %v10058_v15 = vrot.slane %v10044_v41, %v18429_v55  ;;  %v10059_v21 = vcombine.high %v10051_v18, %v10051_v18  ;;  %v10115_v30 = vadd.f32 %v14711_v33, %v10051_v18 }
 0xf02   : > { %v10123_v61 = vadd.f32 %v14712_v20, %v10085_v10  ;;  %v17584_v40 = vadd.f32 %v17544_v50, %v10125_v11  ;;  %v17586_v44 = vadd.f32 %v10149_v13, %v10126_v16  ;;  %v10189_v53 = vcombine.low %v17575_v4, %v17569_v54  ;;  %v18433_v11 = vld [vmem:[#allocation14_spill] sm:$0xff] }
 0xf03   : > { %v17591_v43 = vadd.f32 %v17550_v17, %v10124_v56  ;;  %v10060_v0 = vcombine.high %v10058_v15, %v10058_v15  ;;  %v10116_v63 = vadd.f32 %v14713_v31, %v10059_v21  ;;  %v10117_v9 = vadd.f32 %v14714_v34, %v10058_v15  ;;  %v18434_v56 = vld [vmem:[#allocation15_spill] sm:$0xff] }
 0xf04   : > { %v10196_v19 = vrot.slane %v10188_v32, %v18429_v55  ;;  %v10203_v26 = vrot.slane %v10189_v53, %v18429_v55  ;;  %v10222_v60 = vcombine.low %v17558_v58, %v17564_v48  ;;  %v10223_v62 = vcombine.low %v17580_v6, %v17572_v3 }
 0xf05   : > { %v10118_v37 = vadd.f32 %v14715_v23, %v10060_v0  ;;  %v17600_v10 = vadd.f32 %v17540_v52, %v10115_v30  ;;  %v17603_v5 = vadd.f32 %v17550_v17, %v10116_v63  ;;  %v17606_v46 = vadd.f32 %v17540_v52, %v10123_v61 }
 0xf06   : > { %v10204_v12 = vcombine.low %v10196_v19, %v10203_v26  ;;  %v10237_v59 = vrot.slane %v10223_v62, %v18429_v55  ;;  %v10240_v1 = vcombine.low %v17584_v40, %v17586_v44  ;;  %v17612_v49 = vadd.f32 %v17544_v50, %v10117_v9 }
 0xf07   : > { %v17614_v42 = vadd.f32 %v10149_v13, %v10118_v37  ;;  %v10205_v47 = vcombine.low %v17600_v10, %v17603_v5  ;;  %v10230_v17 = vrot.slane %v10222_v60, %v18429_v55  ;;  %v10239_v52 = vcombine.low %v17606_v46, %v17591_v43 }
 0xf08   : > { %10260 = vadd.xlane.f32.xlu0 %v10204_v12  ;;  %v10254_v22 = vrot.slane %v10240_v1, %v18429_v55 }
 0xf09   : > { %v10206_v51 = vcombine.low %v17612_v49, %v17614_v42  ;;  %v10238_v27 = vcombine.low %v10230_v17, %v10237_v59  ;;  %v10213_v50 = vrot.slane %v10205_v47, %v18429_v55  ;;  %v10247_v2 = vrot.slane %v10239_v52, %v18429_v55 }
 0xf0b   : > { %v10220_v13 = vrot.slane %v10206_v51, %v18429_v55  ;;  %v10255_v39 = vcombine.low %v10247_v2, %v10254_v22 }
 0xf0c   : > { %10264 = vadd.xlane.f32.xlu0 %v10238_v27 }
 0xf0d   : > { %v10221_v45 = vcombine.low %v10213_v50, %v10220_v13 }
 0xf0f   : > { %10262 = vadd.xlane.f32.xlu1 %v10221_v45 }
 0xf10   : > { %10266 = vadd.xlane.f32.xlu0 %v10255_v39 }
 0xf95   : > { %v10261_v38 = vpop.xlane.xlu0 %10260 }
 0xf96   : > { %v10268_v24 = vmul.f32 0.0078125, %v10261_v38 }
 0xf98   : > { %v10282_v25 = vrot.slane %v10268_v24, %v18431_v57  ;;  %v10289_v28 = vrot.slane %v10268_v24, %v18432_v14  ;;  %v10296_v35 = vrot.slane %v10268_v24, %v18433_v11  ;;  %v10303_v41 = vrot.slane %v10268_v24, %v18434_v56 }
 0xf99   : > { %v10265_v18 = vpop.xlane.xlu0 %10264 }
 0xf9a   : > { %v17632_v36 = vsub.f32 %v17567_v8, %v10282_v25  ;;  %v17635_v16 = vsub.f32 %v17561_v7, %v10289_v28  ;;  %v17638_v32 = vsub.f32 %v17575_v4, %v10296_v35  ;;  %v17641_v15 = vsub.f32 %v17569_v54, %v10303_v41 }
 0xf9b   : > { %v10270_v21 = vmul.f32 0.0078125, %v10265_v18 }
 0xf9c   : > { %v10263_v33 = vpop.xlane.xlu1 %10262  ;;  %v10420_v30 = vmul.f32 %v17632_v36, %v17632_v36  ;;  %v10421_v20 = vmul.f32 %v17635_v16, %v17635_v16  ;;  %v10422_v61 = vmul.f32 %v17638_v32, %v17638_v32  ;;  %v10423_v53 = vmul.f32 %v17641_v15, %v17641_v15 }
 0xf9d   : > { %v10269_v0 = vmul.f32 0.0078125, %v10263_v33  ;;  %v10338_v31 = vrot.slane %v10270_v21, %v18431_v57  ;;  %v10345_v63 = vrot.slane %v10270_v21, %v18432_v14  ;;  %v10352_v34 = vrot.slane %v10270_v21, %v18433_v11  ;;  %v10267_v9 = vpop.xlane.xlu0 %10266 }
 0xf9e   : > { %v10359_v19 = vrot.slane %v10270_v21, %v18434_v56  ;;  %v10271_v26 = vmul.f32 0.0078125, %v10267_v9  ;;  %v10452_v60 = vcombine.low %v10420_v30, %v10421_v20  ;;  %v10453_v62 = vcombine.low %v10422_v61, %v10423_v53 }
 0xf9f   : > { %v10310_v23 = vrot.slane %v10269_v0, %v18431_v57  ;;  %v10317_v37 = vrot.slane %v10269_v0, %v18432_v14  ;;  %v10324_v12 = vrot.slane %v10269_v0, %v18433_v11  ;;  %v10331_v59 = vrot.slane %v10269_v0, %v18434_v56 }
 0xfa0   : > { %v17660_v1 = vsub.f32 %v17558_v58, %v10338_v31  ;;  %v17663_v47 = vsub.f32 %v17564_v48, %v10345_v63  ;;  %v17666_v17 = vsub.f32 %v17580_v6, %v10352_v34  ;;  %v17669_v52 = vsub.f32 %v17572_v3, %v10359_v19 }
 0xfa1   : > { %v17672_v51 = vsub.f32 %v17600_v10, %v10310_v23  ;;  %v17675_v27 = vsub.f32 %v17603_v5, %v10317_v37  ;;  %v17678_v22 = vsub.f32 %v17612_v49, %v10324_v12  ;;  %v17681_v50 = vsub.f32 %v17614_v42, %v10331_v59 }
 0xfa2   : > { %v10366_v13 = vrot.slane %v10271_v26, %v18431_v57  ;;  %v10373_v2 = vrot.slane %v10271_v26, %v18432_v14  ;;  %v10380_v45 = vrot.slane %v10271_v26, %v18433_v11  ;;  %v10387_v39 = vrot.slane %v10271_v26, %v18434_v56 }
 0xfa3   : > { %v10460_v38 = vrot.slane %v10452_v60, %v18429_v55  ;;  %v10467_v24 = vrot.slane %v10453_v62, %v18429_v55  ;;  %v10424_v25 = vmul.f32 %v17672_v51, %v17672_v51  ;;  %v10425_v28 = vmul.f32 %v17675_v27, %v17675_v27 }
 0xfa4   : > { %v17694_v35 = vsub.f32 %v17606_v46, %v10366_v13  ;;  %v17697_v41 = vsub.f32 %v17591_v43, %v10373_v2  ;;  %v17700_v18 = vsub.f32 %v17584_v40, %v10380_v45  ;;  %v17703_v21 = vsub.f32 %v17586_v44, %v10387_v39 }
 0xfa5   : > { %v10468_v33 = vcombine.low %v10460_v38, %v10467_v24  ;;  %v10426_v30 = vmul.f32 %v17678_v22, %v17678_v22  ;;  %v10427_v20 = vmul.f32 %v17681_v50, %v17681_v50  ;;  %v10469_v61 = vcombine.low %v10424_v25, %v10425_v28 }
 0xfa6   : > { %v10428_v53 = vmul.f32 %v17660_v1, %v17660_v1  ;;  %v10429_v0 = vmul.f32 %v17663_v47, %v17663_v47  ;;  %v10430_v31 = vmul.f32 %v17666_v17, %v17666_v17  ;;  %v10431_v63 = vmul.f32 %v17669_v52, %v17669_v52 }
 0xfa7   : > { %10524 = vadd.xlane.f32.xlu0 %v10468_v33  ;;  %v10470_v34 = vcombine.low %v10426_v30, %v10427_v20  ;;  %v10477_v9 = vrot.slane %v10469_v61, %v18429_v55  ;;  %v10432_v19 = vmul.f32 %v17694_v35, %v17694_v35  ;;  %v10433_v26 = vmul.f32 %v17697_v41, %v17697_v41  ;;  %v14316_v33 = vld [vmem:[%s14939_s30] ss:$16 sps:$4 sm:$0xff]   ;;  %v14318_v30 = vld [vmem:[%s14939_s30 + $0x4] ss:$16 sps:$4 sm:$0xff]   ;;  %v14319_v20 = vld [vmem:[%s14939_s30 + $0x8] ss:$16 sps:$4 sm:$0xff]  }
 0xfa8   : > { %v10486_v60 = vcombine.low %v10428_v53, %v10429_v0  ;;  %v10487_v62 = vcombine.low %v10430_v31, %v10431_v63  ;;  %v10434_v23 = vmul.f32 %v17700_v18, %v17700_v18  ;;  %v10435_v37 = vmul.f32 %v17703_v21, %v17703_v21  ;;  %v14321_v61 = vld [vmem:[%s14939_s30 + $0xc] ss:$16 sps:$4 sm:$0xff]   ;;  %11080 = vmatprep.subr.bf16.mxu0 %v14318_v30  ;;  %v14322_v53 = vld [vmem:[%s14939_s30 + $0x20] ss:$16 sps:$4 sm:$0xff]   ;;  %v14324_v0 = vld [vmem:[%s14939_s30 + $0x24] ss:$16 sps:$4 sm:$0xff]  }
 0xfa9   : > { %v10484_v12 = vrot.slane %v10470_v34, %v18429_v55  ;;  %v10503_v59 = vcombine.low %v10432_v19, %v10433_v26  ;;  %11133 = vmatprep.subr.bf16.mxu1 %v14321_v61  ;;  %11081 = vmatpush1.bf16.msra.mxu0 %v14316_v33  ;;  %v14325_v31 = vld [vmem:[%s14939_s30 + $0x28] ss:$16 sps:$4 sm:$0xff]   ;;  %v14327_v63 = vld [vmem:[%s14939_s30 + $0x2c] ss:$16 sps:$4 sm:$0xff]   ;;  %v14328_v34 = vld [vmem:[%s14939_s30 + $0x40] ss:$16 sps:$4 sm:$0xff]  }
 0xfaa   : > { %v10494_v13 = vrot.slane %v10486_v60, %v18429_v55  ;;  %v10501_v2 = vrot.slane %v10487_v62, %v18429_v55  ;;  %v10504_v45 = vcombine.low %v10434_v23, %v10435_v37  ;;  %11134 = vmatpush1.bf16.msra.mxu1 %v14319_v20  ;;  %11082 = vmatprep.subr.bf16.mxu0 %v14324_v0  ;;  %v14331_v19 = vld [vmem:[%s14939_s30 + $0x48] ss:$16 sps:$4 sm:$0xff]   ;;  %v14333_v26 = vld [vmem:[%s14939_s30 + $0x4c] ss:$16 sps:$4 sm:$0xff]   ;;  %v14336_v60 = vld [vmem:[%s14939_s30 + $0x64] ss:$16 sps:$4 sm:$0xff]  }
 0xfab   : > { %v10485_v39 = vcombine.low %v10477_v9, %v10484_v12  ;;  %v10511_v38 = vrot.slane %v10503_v59, %v18429_v55  ;;  %11135 = vmatprep.subr.bf16.mxu1 %v14327_v63  ;;  %v14330_v9 = vld [vmem:[%s14939_s30 + $0x44] ss:$16 sps:$4 sm:$0xff]   ;;  %v14339_v62 = vld [vmem:[%s14939_s30 + $0x6c] ss:$16 sps:$4 sm:$0xff]   ;;  %v14334_v23 = vld [vmem:[%s14939_s30 + $0x60] ss:$16 sps:$4 sm:$0xff]  }
 0xfac   : > { %v10502_v24 = vcombine.low %v10494_v13, %v10501_v2  ;;  %v10518_v25 = vrot.slane %v10504_v45, %v18429_v55  ;;  %v14337_v37 = vld [vmem:[%s14939_s30 + $0x68] ss:$16 sps:$4 sm:$0xff]   ;;  %v14342_v12 = vld [vmem:[%s14939_s30 + $0x84] ss:$16 sps:$4 sm:$0xff]   ;;  %v14345_v59 = vld [vmem:[%s14939_s30 + $0x8c] ss:$16 sps:$4 sm:$0xff]  }
 0xfad   : > { %10526 = vadd.xlane.f32.xlu1 %v10485_v39  ;;  %11083 = vmatpush1.bf16.msra.mxu0 %v14322_v53  ;;  %v14340_v13 = vld [vmem:[%s14939_s30 + $0x80] ss:$16 sps:$4 sm:$0xff]   ;;  %v14343_v2 = vld [vmem:[%s14939_s30 + $0x88] ss:$16 sps:$4 sm:$0xff]   ;;  %v14348_v45 = vld [vmem:[%s14939_s30 + $0xa4] ss:$16 sps:$4 sm:$0xff]  }
 0xfae   : > { %10528 = vadd.xlane.f32.xlu0 %v10502_v24  ;;  %v10519_v28 = vcombine.low %v10511_v38, %v10518_v25  ;;  %11136 = vmatpush1.bf16.msra.mxu1 %v14325_v31  ;;  %v14351_v39 = vld [vmem:[%s14939_s30 + $0xac] ss:$16 sps:$4 sm:$0xff]   ;;  %v14346_v38 = vld [vmem:[%s14939_s30 + $0xa0] ss:$16 sps:$4 sm:$0xff]   ;;  %v14349_v24 = vld [vmem:[%s14939_s30 + $0xa8] ss:$16 sps:$4 sm:$0xff]  }
 0xfaf   : > { %11084 = vmatprep.subr.bf16.mxu0 %v14330_v9  ;;  %11137 = vmatprep.subr.bf16.mxu1 %v14333_v26  ;;  %v14354_v25 = vld [vmem:[%s14939_s30 + $0xc4] ss:$16 sps:$4 sm:$0xff]   ;;  %v14352_v33 = vld [vmem:[%s14939_s30 + $0xc0] ss:$16 sps:$4 sm:$0xff]   ;;  %v14355_v30 = vld [vmem:[%s14939_s30 + $0xc8] ss:$16 sps:$4 sm:$0xff]  }
 0xfb0   : > { %v14360_v20 = vld [vmem:[%s14939_s30 + $0xe4] ss:$16 sps:$4 sm:$0xff]   ;;  %v14363_v61 = vld [vmem:[%s14939_s30 + $0xec] ss:$16 sps:$4 sm:$0xff]   ;;  %v14358_v53 = vld [vmem:[%s14939_s30 + $0xe0] ss:$16 sps:$4 sm:$0xff]  }
 0xfb1   : > { %10530 = vadd.xlane.f32.xlu1 %v10519_v28  ;;  %11085 = vmatpush1.bf16.msra.mxu0 %v14328_v34  ;;  %v14357_v28 = vld [vmem:[%s14939_s30 + $0xcc] ss:$16 sps:$4 sm:$0xff]   ;;  %v14361_v0 = vld [vmem:[%s14939_s30 + $0xe8] ss:$16 sps:$4 sm:$0xff]   ;;  %v14364_v31 = vld [vmem:[%s14949_s1 + $0x40] sm:$0xff]  }
 0xfb2   : > { %11138 = vmatpush1.bf16.msra.mxu1 %v14331_v19  ;;  %11086 = vmatprep.subr.bf16.mxu0 %v14336_v60  ;;  %v14365_v63 = vld [vmem:[%s14949_s1 + $0xc0] sm:$0xff]  }
 0xfb3   : > { %11139 = vmatprep.subr.bf16.mxu1 %v14339_v62  ;;  %v12768_v26 = vld [vmem:[%s18435_s28] ss:$0 sm:$0xff] }
 0xfb5   : > { %11087 = vmatpush1.bf16.msra.mxu0 %v14334_v23 }
 0xfb6   : > { %11140 = vmatpush1.bf16.msra.mxu1 %v14337_v37  ;;  %11088 = vmatprep.subr.bf16.mxu0 %v14342_v12  ;;  %v10697_v37 = vcombine.high %v12768_v26, %v12768_v26 }
 0xfb7   : > { %11141 = vmatprep.subr.bf16.mxu1 %v14345_v59  ;;  %v12769_v59 = vld [vmem:[%s18436_s3] ss:$0 sm:$0xff] }
 0xfb9   : > { %11089 = vmatpush1.bf16.msra.mxu0 %v14340_v13 }
 0xfba   : > { %11142 = vmatpush1.bf16.msra.mxu1 %v14343_v2  ;;  %11090 = vmatprep.subr.bf16.mxu0 %v14348_v45 }
 0xfbb   : > { %11143 = vmatprep.subr.bf16.mxu1 %v14351_v39  ;;  %v17776_v39 = vrot.slane %v12768_v26, %v18429_v55 }
 0xfbd   : > { %11091 = vmatpush1.bf16.msra.mxu0 %v14346_v38 }
 0xfbe   : > { %11144 = vmatpush1.bf16.msra.mxu1 %v14349_v24  ;;  %11092 = vmatprep.subr.bf16.mxu0 %v14354_v25  ;;  %v17779_v24 = vrot.slane %v10697_v37, %v18429_v55  ;;  %v10739_v25 = vcombine.high %v12769_v59, %v12769_v59 }
 0xfbf   : > { %11145 = vmatprep.subr.bf16.mxu1 %v14357_v28 }
 0xfc1   : > { %11093 = vmatpush1.bf16.msra.mxu0 %v14352_v33  ;;  %v17783_v33 = vcombine.high %v17776_v39, %v17776_v39 }
 0xfc2   : > { %11146 = vmatpush1.bf16.msra.mxu1 %v14355_v30  ;;  %11094 = vmatprep.subr.bf16.mxu0 %v14360_v20  ;;  %v17787_v20 = vcombine.high %v17779_v24, %v17779_v24 }
 0xfc3   : > { %11147 = vmatprep.subr.bf16.mxu1 %v14363_v61  ;;  %v17790_v61 = vrot.slane %v12769_v59, %v18429_v55 }
 0xfc5   : > { %11095 = vmatpush1.bf16.msra.mxu0 %v14358_v53  ;;  %v17793_v53 = vrot.slane %v10739_v25, %v18429_v55 }
 0xfc6   : > { %11148 = vmatpush1.bf16.msra.mxu1 %v14361_v0  ;;  %13119 = vmatprep.subr.bf16.mxu0 %v14364_v31 }
 0xfc7   : > { %13147 = vmatprep.subr.bf16.mxu1 %v14365_v63 }
0x1034   : > { %v10525_v34 = vpop.xlane.xlu0 %10524 }
0x1035   : > { %v10532_v9 = vmul.f32 0.0078125, %v10525_v34 }
0x1037   : > { %v10536_v19 = vadd.f32 1e-05, %v10532_v9 }
0x1039   : > { %14660 = vrsqrt.f32 %v10536_v19 }
0x103a   : > { %v10527_v60 = vpop.xlane.xlu1 %10526 }
0x103b   : > { %v10533_v62 = vmul.f32 0.0078125, %v10527_v60  ;;  %v10529_v23 = vpop.xlane.xlu0 %10528 }
0x103c   : > { %v10534_v12 = vmul.f32 0.0078125, %v10529_v23  ;;  %v17809_v23 = vcombine.high %v17793_v53, %v17793_v53 }
0x103d   : > { %v10537_v13 = vadd.f32 1e-05, %v10533_v62  ;;  %v17805_v62 = vcombine.high %v17790_v61, %v17790_v61 }
0x103e   : > { %v10538_v2 = vadd.f32 1e-05, %v10534_v12  ;;  %v10531_v45 = vpop.xlane.xlu1 %10530 }
0x103f   : > { %14662 = vrsqrt.f32 %v10537_v13  ;;  %v10535_v38 = vmul.f32 0.0078125, %v10531_v45 }
0x1040   : > { %14664 = vrsqrt.f32 %v10538_v2 }
0x1041   : > { %v10539_v28 = vadd.f32 1e-05, %v10535_v38 }
0x1043   : > { %v14661_v30 = vpop.eup %14660  ;;  %14666 = vrsqrt.f32 %v10539_v28 }
0x1044   : > { %v10554_v0 = vrot.slane %v14661_v30, %v18431_v57  ;;  %v10561_v31 = vrot.slane %v14661_v30, %v18432_v14  ;;  %v10568_v63 = vrot.slane %v14661_v30, %v18433_v11  ;;  %v10575_v34 = vrot.slane %v14661_v30, %v18434_v56 }
0x1046   : > { %v10676_v9 = vmul.f32 %v10554_v0, %v17632_v36  ;;  %v10677_v19 = vmul.f32 %v10561_v31, %v17635_v16  ;;  %v10678_v26 = vmul.f32 %v10568_v63, %v17638_v32  ;;  %v10679_v60 = vmul.f32 %v10575_v34, %v17641_v15 }
0x1048   : > { %v10718_v37 = vmul.f32 %v17776_v39, %v10676_v9  ;;  %v10719_v12 = vmul.f32 %v17783_v33, %v10677_v19  ;;  %v10720_v36 = vmul.f32 %v17779_v24, %v10678_v26  ;;  %v10721_v16 = vmul.f32 %v17787_v20, %v10679_v60 }
0x1049   : > { %v14663_v59 = vpop.eup %14662 }
0x104a   : > { %v14665_v32 = vpop.eup %14664  ;;  %v10582_v15 = vrot.slane %v14663_v59, %v18431_v57  ;;  %v10589_v13 = vrot.slane %v14663_v59, %v18432_v14  ;;  %v10596_v2 = vrot.slane %v14663_v59, %v18433_v11  ;;  %v10603_v45 = vrot.slane %v14663_v59, %v18434_v56 }
0x104b   : > { %v10760_v38 = vadd.f32 %v17790_v61, %v10718_v37  ;;  %v10761_v25 = vadd.f32 %v17805_v62, %v10719_v12  ;;  %v10762_v28 = vadd.f32 %v17793_v53, %v10720_v36  ;;  %v10763_v30 = vadd.f32 %v17809_v23, %v10721_v16 }
0x104c   : > { %v10680_v0 = vmul.f32 %v10582_v15, %v17672_v51  ;;  %v10681_v31 = vmul.f32 %v10589_v13, %v17675_v27  ;;  %v10682_v63 = vmul.f32 %v10596_v2, %v17678_v22  ;;  %v10683_v34 = vmul.f32 %v10603_v45, %v17681_v50 }
0x104d   : > { %v14667_v9 = vpop.eup %14666  ;;  %v10792_v19 = vcombine.low %v10760_v38, %v10761_v25  ;;  %v10793_v26 = vcombine.low %v10762_v28, %v10763_v30  ;;  %v10610_v60 = vrot.slane %v14665_v32, %v18431_v57  ;;  %v10617_v37 = vrot.slane %v14665_v32, %v18432_v14 }
0x104e   : > { %v10722_v12 = vmul.f32 %v17776_v39, %v10680_v0  ;;  %v10723_v36 = vmul.f32 %v17783_v33, %v10681_v31  ;;  %v10724_v16 = vmul.f32 %v17779_v24, %v10682_v63  ;;  %v10725_v51 = vmul.f32 %v17787_v20, %v10683_v34 }
0x104f   : > { %v10800_v27 = vrot.slane %v10792_v19, %v18429_v55  ;;  %v10807_v22 = vrot.slane %v10793_v26, %v18429_v55  ;;  %v10624_v50 = vrot.slane %v14665_v32, %v18433_v11  ;;  %v10631_v59 = vrot.slane %v14665_v32, %v18434_v56 }
0x1050   : > { %v10764_v15 = vadd.f32 %v17790_v61, %v10722_v12  ;;  %v10765_v13 = vadd.f32 %v17805_v62, %v10723_v36  ;;  %v10766_v2 = vadd.f32 %v17793_v53, %v10724_v16  ;;  %v10767_v45 = vadd.f32 %v17809_v23, %v10725_v51 }
0x1051   : > { %v10808_v38 = vcombine.low %v10800_v27, %v10807_v22  ;;  %v10638_v25 = vrot.slane %v14667_v9, %v18431_v57  ;;  %v10645_v28 = vrot.slane %v14667_v9, %v18432_v14  ;;  %v10652_v30 = vrot.slane %v14667_v9, %v18433_v11 }
0x1052   : > { %v10809_v0 = vcombine.low %v10764_v15, %v10765_v13  ;;  %v10810_v31 = vcombine.low %v10766_v2, %v10767_v45  ;;  %v10659_v63 = vrot.slane %v14667_v9, %v18434_v56  ;;  %v10684_v32 = vmul.f32 %v10610_v60, %v17660_v1  ;;  %v14368_v15 = vld [vmem:[%s14949_s1 + $0x48] sm:$0xff]  }
0x1053   : > { %v10685_v34 = vmul.f32 %v10617_v37, %v17663_v47  ;;  %v10686_v19 = vmul.f32 %v10624_v50, %v17666_v17  ;;  %v10687_v26 = vmul.f32 %v10631_v59, %v17669_v52  ;;  %v10688_v12 = vmul.f32 %v10638_v25, %v17694_v35  ;;  %v14367_v50 = vld [vmem:[%s14949_s1 + $0x80] sm:$0xff]   ;;  %v14369_v13 = vld [vmem:[%s14949_s1 + $0xc8] sm:$0xff]  }
0x1054   : > { %v10817_v57 = vrot.slane %v10809_v0, %v18429_v55  ;;  %v10824_v14 = vrot.slane %v10810_v31, %v18429_v55  ;;  %v10689_v11 = vmul.f32 %v10645_v28, %v17697_v41  ;;  %v10690_v36 = vmul.f32 %v10652_v30, %v17700_v18  ;;  %v14372_v31 = vld [vmem:[%s14949_s1 + $0x50] sm:$0xff]  }
0x1055   : > { %v10691_v56 = vmul.f32 %v10659_v63, %v17703_v21  ;;  %v10726_v1 = vmul.f32 %v17776_v39, %v10684_v32  ;;  %v10727_v47 = vmul.f32 %v17783_v33, %v10685_v34  ;;  %v10728_v17 = vmul.f32 %v17779_v24, %v10686_v19  ;;  %v14373_v63 = vld [vmem:[%s14949_s1 + $0xd0] sm:$0xff]   ;;  %v14376_v19 = vld [vmem:[%s14949_s1 + $0x58] sm:$0xff]  }
0x1056   : > { %v10825_v52 = vcombine.low %v10817_v57, %v10824_v14  ;;  %v10729_v35 = vmul.f32 %v17787_v20, %v10687_v26  ;;  %v10730_v9 = vmul.f32 %v17776_v39, %v10688_v12  ;;  %v10731_v41 = vmul.f32 %v17783_v33, %v10689_v11  ;;  %v14366_v39 = vld [vmem:[%s14949_s1] sm:$0xff]   ;;  %v14374_v32 = vld [vmem:[%s14949_s1 + $0x10] sm:$0xff]   ;;  %v14377_v26 = vld [vmem:[%s14949_s1 + $0xd8] sm:$0xff]  }
0x1057   : > { %v10732_v18 = vmul.f32 %v17779_v24, %v10690_v36  ;;  %v10733_v21 = vmul.f32 %v17787_v20, %v10691_v56  ;;  %v10768_v60 = vadd.f32 %v17790_v61, %v10726_v1  ;;  %v10769_v37 = vadd.f32 %v17805_v62, %v10727_v47  ;;  %v14375_v34 = vld [vmem:[%s14949_s1 + $0x90] sm:$0xff]   ;;  %v14378_v12 = vld [vmem:[%s14949_s1 + $0x18] sm:$0xff]   ;;  %v14380_v14 = vld [vmem:[%s14949_s1 + $0x60] sm:$0xff]  }
0x1058   : > { %v10864_v16 = vpack.c.bf16 %v10825_v52, %v10808_v38  ;;  %v10770_v51 = vadd.f32 %v17793_v53, %v10728_v17  ;;  %v10771_v27 = vadd.f32 %v17809_v23, %v10729_v35  ;;  %v10772_v22 = vadd.f32 %v17790_v61, %v10730_v9  ;;  %v14371_v38 = vld [vmem:[%s14949_s1 + $0x88] sm:$0xff]   ;;  %v14379_v57 = vld [vmem:[%s14949_s1 + $0x98] sm:$0xff]   ;;  %v14381_v11 = vld [vmem:[%s14949_s1 + $0xe0] sm:$0xff]  }
0x1059   : > { %v10773_v33 = vadd.f32 %v17805_v62, %v10731_v41  ;;  %v10774_v59 = vadd.f32 %v17793_v53, %v10732_v18  ;;  %v10775_v24 = vadd.f32 %v17809_v23, %v10733_v21  ;;  %v10826_v20 = vcombine.low %v10768_v60, %v10769_v37  ;;  %v14370_v23 = vld [vmem:[%s14949_s1 + $0x8] sm:$0xff]   ;;  %v14382_v36 = vld [vmem:[%s14949_s1 + $0x20] sm:$0xff]   ;;  %v14388_v35 = vld [vmem:[%s14949_s1 + $0x70] sm:$0xff]  }
0x105a   : > { %11113 = vmatmul.mubr.bf16.vlgmr.msra.gmra.mrb[12].mxu0 %v10864_v16  ;;  %11166 = vmatmul.mubr.bf16.vlgmr.msra.gmra.mrb[4].mxu1 %v10864_v16  ;;  %v10827_v2 = vcombine.low %v10770_v51, %v10771_v27  ;;  %v14383_v56 = vld [vmem:[%s14949_s1 + $0xa0] sm:$0xff]   ;;  %v14384_v1 = vld [vmem:[%s14949_s1 + $0x68] sm:$0xff]   ;;  %v14389_v9 = vld [vmem:[%s14949_s1 + $0xf0] sm:$0xff]  }
0x105b   : > { %11122 = vmatprep.mubr.bf16.mxu0 %v18428_v29  ;;  %11175 = vmatprep.mubr.bf16.mxu1 %v18428_v29  ;;  %v10834_v61 = vrot.slane %v10826_v20, %v18429_v55  ;;  %v10843_v45 = vcombine.low %v10772_v22, %v10773_v33  ;;  %v10844_v62 = vcombine.low %v10774_v59, %v10775_v24  ;;  %v14385_v47 = vld [vmem:[%s14949_s1 + $0xe8] sm:$0xff]   ;;  %v14390_v41 = vld [vmem:[%s14949_s1 + $0x30] sm:$0xff]   ;;  %v14392_v21 = vld [vmem:[%s14949_s1 + $0x78] sm:$0xff]  }
0x105c   : > { %v10841_v53 = vrot.slane %v10827_v2, %v18429_v55  ;;  %13120 = vmatpush3.bf16.msra.mxu0 %v14366_v39  ;;  %13148 = vmatpush3.bf16.msra.mxu1 %v14367_v50  ;;  %v14386_v17 = vld [vmem:[%s14949_s1 + $0x28] sm:$0xff]   ;;  %v14391_v18 = vld [vmem:[%s14949_s1 + $0xb0] sm:$0xff]   ;;  %v14393_v60 = vld [vmem:[%s14949_s1 + $0xf8] sm:$0xff]  }
0x105d   : > { %v10851_v25 = vrot.slane %v10843_v45, %v18429_v55  ;;  %v10858_v29 = vrot.slane %v10844_v62, %v18429_v55  ;;  %13121 = vmatprep.subr.bf16.mxu0 %v14368_v15  ;;  %13149 = vmatprep.subr.bf16.mxu1 %v14369_v13  ;;  %v14387_v52 = vld [vmem:[%s14949_s1 + $0xa8] sm:$0xff]   ;;  %v14394_v37 = vld [vmem:[%s14949_s1 + $0x38] sm:$0xff]   ;;  %v10898_v51 = vld [vmem:[%s14944_s17] sm:$0xf] }
0x105e   : > { %v10842_v28 = vcombine.low %v10834_v61, %v10841_v53  ;;  %v14395_v16 = vld [vmem:[%s14949_s1 + $0xb8] sm:$0xff]   ;;  %v18437_v27 = vld [vmem:[#allocation10_spill] sm:$0xff] }
0x105f   : > { %v10859_v30 = vcombine.low %v10851_v25, %v10858_v29  ;;  %v10914_v22 = vsub.s32 3, %v18437_v27  ;;  %v18438_v39 = vsub.s32 0, %v18437_v27  ;;  %v18439_v33 = vsub.s32 2, %v18437_v27 }
0x1060   : > { %13122 = vmatpush3.bf16.msra.mxu0 %v14370_v23  ;;  %13150 = vmatpush3.bf16.msra.mxu1 %v14371_v38  ;;  %v18440_v24 = vsub.s32 1, %v18437_v27 }
0x1061   : > { %v10865_v0 = vpack.c.bf16 %v10859_v30, %v10842_v28  ;;  %13123 = vmatprep.subr.bf16.mxu0 %v14372_v31  ;;  %13151 = vmatprep.subr.bf16.mxu1 %v14373_v63  ;;  %v10903_v50 = vrot.slane %v10898_v51, %v18438_v39  ;;  %v10911_v59 = vrot.slane %v10898_v51, %v18439_v33 }
0x1062   : > { %v10907_v20 = vrot.slane %v10898_v51, %v18440_v24  ;;  %v10915_v15 = vrot.slane %v10898_v51, %v10914_v22 }
0x1063   : > { %11123 = vmatmul.mubr.bf16.gmra.mrb[16].mxu0 %v10865_v0  ;;  %11176 = vmatmul.mubr.bf16.gmra.mrb[8].mxu1 %v10865_v0 }
0x1064   : > { %13124 = vmatpush3.bf16.msra.mxu0 %v14374_v32  ;;  %13152 = vmatpush3.bf16.msra.mxu1 %v14375_v34 }
0x1065   : > { %13125 = vmatprep.subr.bf16.mxu0 %v14376_v19  ;;  %13153 = vmatprep.subr.bf16.mxu1 %v14377_v26 }
0x1068   : > { %13126 = vmatpush3.bf16.msra.mxu0 %v14378_v12  ;;  %13154 = vmatpush3.bf16.msra.mxu1 %v14379_v57 }
0x1069   : > { %13127 = vmatprep.subr.bf16.mxu0 %v14380_v14  ;;  %13155 = vmatprep.subr.bf16.mxu1 %v14381_v11 }
0x106c   : > { %13128 = vmatpush3.bf16.msra.mxu0 %v14382_v36  ;;  %13156 = vmatpush3.bf16.msra.mxu1 %v14383_v56 }
0x106d   : > { %13129 = vmatprep.subr.bf16.mxu0 %v14384_v1  ;;  %13157 = vmatprep.subr.bf16.mxu1 %v14385_v47 }
0x1070   : > { %13130 = vmatpush3.bf16.msra.mxu0 %v14386_v17  ;;  %13158 = vmatpush3.bf16.msra.mxu1 %v14387_v52 }
0x1071   : > { %13131 = vmatprep.subr.bf16.mxu0 %v14388_v35  ;;  %13159 = vmatprep.subr.bf16.mxu1 %v14389_v9 }
0x1074   : > { %13132 = vmatpush3.bf16.msra.mxu0 %v14390_v41  ;;  %13160 = vmatpush3.bf16.msra.mxu1 %v14391_v18 }
0x1075   : > { %13133 = vmatprep.subr.bf16.mxu0 %v14392_v21  ;;  %13161 = vmatprep.subr.bf16.mxu1 %v14393_v60 }
0x1078   : > { %13134 = vmatpush3.bf16.msra.mxu0 %v14394_v37  ;;  %13162 = vmatpush3.bf16.msra.mxu1 %v14395_v16 }
0x112d   : > { %v11114_v13 = vpop.f32.mrb[12].mxu0  ;;  %v11167_v2 = vpop.f32.mrb[4].mxu1 }
0x112e   : > { %v11115_v61 = vadd.f32 %v11114_v13, %v10903_v50  ;;  %v11168_v45 = vadd.f32 %v11167_v2, %v10911_v59  ;;  %v11116_v62 = vpop.f32.mrb[13].mxu0  ;;  %v11169_v53 = vpop.f32.mrb[5].mxu1 }
0x112f   : > { %v11117_v23 = vadd.f32 %v11116_v62, %v10907_v20  ;;  %v11170_v38 = vadd.f32 %v11169_v53, %v10915_v15  ;;  %v11118_v25 = vpop.f32.mrb[14].mxu0  ;;  %v11171_v29 = vpop.f32.mrb[6].mxu1 }
0x1130   : > { %v11202_v28 = vmul.f32 0.70710677, %v11115_v61  ;;  %v11204_v30 = vmul.f32 0.70710677, %v11168_v45  ;;  %v11119_v63 = vadd.f32 %v11118_v25, %v10903_v50  ;;  %v11172_v32 = vadd.f32 %v11171_v29, %v10911_v59  ;;  %v11120_v34 = vpop.f32.mrb[15].mxu0  ;;  %v11173_v19 = vpop.f32.mrb[7].mxu1 }
0x1131   : > { %v11203_v0 = vmul.f32 0.70710677, %v11117_v23  ;;  %v11205_v31 = vmul.f32 0.70710677, %v11170_v38  ;;  %v11121_v26 = vadd.f32 %v11120_v34, %v10907_v20  ;;  %v17915_v12 = vadd.f32 %v11173_v19, %v10915_v15 }
0x1132   : > { %14668 = verf.f32 %v11202_v28  ;;  %v11206_v57 = vmul.f32 0.70710677, %v11119_v63  ;;  %v11208_v14 = vmul.f32 0.70710677, %v11172_v32  ;;  %v11186_v29 = vmul.f32 0.5, %v11115_v61 }
0x1133   : > { %14670 = verf.f32 %v11204_v30  ;;  %v11207_v11 = vmul.f32 0.70710677, %v11121_v26  ;;  %v11209_v36 = vmul.f32 0.70710677, %v17915_v12  ;;  %v11188_v28 = vmul.f32 0.5, %v11168_v45 }
0x1134   : > { %14672 = verf.f32 %v11203_v0 }
0x1135   : > { %14674 = verf.f32 %v11205_v31 }
0x1136   : > { %14676 = verf.f32 %v11206_v57  ;;  %v11124_v56 = vpop.f32.mrb[16].mxu0  ;;  %v11177_v1 = vpop.f32.mrb[8].mxu1 }
0x1137   : > { %14678 = verf.f32 %v11208_v14  ;;  %v17918_v47 = vadd.f32 %v11124_v56, %v10903_v50  ;;  %v17920_v17 = vadd.f32 %v11177_v1, %v10911_v59  ;;  %v11126_v52 = vpop.f32.mrb[17].mxu0  ;;  %v11179_v35 = vpop.f32.mrb[9].mxu1 }
0x1138   : > { %14680 = verf.f32 %v11207_v11  ;;  %v17922_v9 = vadd.f32 %v11126_v52, %v10907_v20  ;;  %v17924_v41 = vadd.f32 %v11179_v35, %v10915_v15  ;;  %v11128_v18 = vpop.f32.mrb[18].mxu0  ;;  %v11181_v21 = vpop.f32.mrb[10].mxu1  ;;  %v11191_v52 = vmul.f32 0.5, %v11121_v26 }
0x1139   : > { %14682 = verf.f32 %v11209_v36  ;;  %v11210_v60 = vmul.f32 0.70710677, %v17918_v47  ;;  %v11130_v37 = vpop.f32.mrb[19].mxu0  ;;  %v11183_v16 = vpop.f32.mrb[11].mxu1  ;;  %v11212_v51 = vmul.f32 0.70710677, %v17920_v17  ;;  %v11129_v39 = vadd.f32 %v11128_v18, %v10903_v50 }
0x113a   : > { %v11211_v27 = vmul.f32 0.70710677, %v17922_v9  ;;  %v11213_v22 = vmul.f32 0.70710677, %v17924_v41  ;;  %v17930_v33 = vadd.f32 %v11181_v21, %v10911_v59  ;;  %v17932_v13 = vadd.f32 %v11130_v37, %v10907_v20 }
0x113b   : > { %14684 = verf.f32 %v11210_v60  ;;  %v11214_v62 = vmul.f32 0.70710677, %v11129_v39  ;;  %v17934_v53 = vadd.f32 %v11183_v16, %v10915_v15  ;;  %v11187_v50 = vmul.f32 0.5, %v11117_v23 }
0x113c   : > { %v14669_v24 = vpop.eup %14668  ;;  %14686 = verf.f32 %v11212_v51  ;;  %v11216_v30 = vmul.f32 0.70710677, %v17930_v33  ;;  %v11189_v59 = vmul.f32 0.5, %v11170_v38  ;;  %v11190_v20 = vmul.f32 0.5, %v11119_v63 }
0x113d   : > { %v14671_v2 = vpop.eup %14670  ;;  %14688 = verf.f32 %v11211_v27  ;;  %v11234_v31 = vadd.f32 1.0, %v14669_v24  ;;  %v11215_v57 = vmul.f32 0.70710677, %v17932_v13  ;;  %v11192_v36 = vmul.f32 0.5, %v11172_v32 }
0x113e   : > { %v14673_v25 = vpop.eup %14672  ;;  %14690 = verf.f32 %v11213_v22  ;;  %v11236_v19 = vadd.f32 1.0, %v14671_v2  ;;  %v11217_v61 = vmul.f32 0.70710677, %v17934_v53  ;;  %v11193_v60 = vmul.f32 0.5, %v17915_v12 }
0x113f   : > { %v14675_v0 = vpop.eup %14674  ;;  %14692 = verf.f32 %v11214_v62  ;;  %v11235_v15 = vadd.f32 1.0, %v14673_v25  ;;  %v11250_v38 = vmul.f32 %v11234_v31, %v11186_v29  ;;  %v11194_v12 = vmul.f32 0.5, %v17918_v47 }
0x1140   : > { %v14677_v34 = vpop.eup %14676  ;;  %14694 = verf.f32 %v11216_v30  ;;  %v11237_v56 = vadd.f32 1.0, %v14675_v0  ;;  %v11252_v63 = vmul.f32 %v11236_v19, %v11188_v28  ;;  %v11198_v19 = vmul.f32 0.5, %v11129_v39 }
0x1141   : > { %v14679_v14 = vpop.eup %14678  ;;  %v11238_v11 = vadd.f32 1.0, %v14677_v34  ;;  %14696 = verf.f32 %v11215_v57  ;;  %v11251_v51 = vmul.f32 %v11235_v15, %v11187_v50  ;;  %v11196_v50 = vmul.f32 0.5, %v17920_v17 }
0x1142   : > { %v14681_v45 = vpop.eup %14680  ;;  %v11240_v1 = vadd.f32 1.0, %v14679_v14  ;;  %14698 = verf.f32 %v11217_v61  ;;  %v11253_v24 = vmul.f32 %v11237_v56, %v11189_v59  ;;  %v11200_v57 = vmul.f32 0.5, %v17930_v33 }
0x1143   : > { %v14683_v23 = vpop.eup %14682  ;;  %v11254_v35 = vmul.f32 %v11238_v11, %v11190_v20  ;;  %v11239_v18 = vadd.f32 1.0, %v14681_v45  ;;  %v11199_v39 = vmul.f32 0.5, %v17932_v13  ;;  %v11201_v33 = vmul.f32 0.5, %v17934_v53 }
0x1144   : > { %v11256_v21 = vmul.f32 %v11240_v1, %v11192_v36  ;;  %v11241_v37 = vadd.f32 1.0, %v14683_v23  ;;  %v11195_v36 = vmul.f32 0.5, %v17922_v9  ;;  %v11197_v23 = vmul.f32 0.5, %v17924_v41  ;;  %v12802_v41 = vld [vmem:[%s698_s21] ss:$0 sm:$0xff] }
0x1145   : > { %v14685_v16 = vpop.eup %14684  ;;  %v11266_v32 = vpack.c.bf16 %v11254_v35, %v11250_v38  ;;  %v11255_v27 = vmul.f32 %v11239_v18, %v11191_v52 }
0x1146   : > { %v14687_v22 = vpop.eup %14686  ;;  %v11268_v2 = vpack.c.bf16 %v11256_v21, %v11252_v63  ;;  %v11257_v62 = vmul.f32 %v11241_v37, %v11193_v60  ;;  %v11242_v29 = vadd.f32 1.0, %v14685_v16 }
0x1147   : > { %v14689_v26 = vpop.eup %14688  ;;  %v11267_v25 = vpack.c.bf16 %v11255_v27, %v11251_v51  ;;  %v11244_v34 = vadd.f32 1.0, %v14687_v22 }
0x1148   : > { %v14691_v30 = vpop.eup %14690  ;;  %v11269_v0 = vpack.c.bf16 %v11257_v62, %v11253_v24  ;;  %v11243_v59 = vadd.f32 1.0, %v14689_v26  ;;  %v11258_v11 = vmul.f32 %v11242_v29, %v11194_v12 }
0x1149   : > { %v14693_v31 = vpop.eup %14692  ;;  %11569 = vmatprep.mubr.bf16.mxu0 %v11267_v25  ;;  %v11245_v61 = vadd.f32 1.0, %v14691_v30  ;;  %v11260_v1 = vmul.f32 %v11244_v34, %v11196_v50 }
0x114a   : > { %v14695_v28 = vpop.eup %14694  ;;  %v11246_v20 = vadd.f32 1.0, %v14693_v31  ;;  %11618 = vmatprep.mubr.bf16.mxu1 %v11269_v0  ;;  %11570 = vmatmul.mubr.bf16.vlgmr.msra.gmra.mrb[20].mxu0 %v11266_v32  ;;  %v11259_v35 = vmul.f32 %v11243_v59, %v11195_v36 }
0x114b   : > { %v11248_v14 = vadd.f32 1.0, %v14695_v28  ;;  %11619 = vmatmul.mubr.bf16.vlgmr.msra.gmra.mrb[12].mxu1 %v11268_v2  ;;  %v14697_v15 = vpop.eup %14696  ;;  %v11261_v21 = vmul.f32 %v11245_v61, %v11197_v23 }
0x114c   : > { %v11262_v45 = vmul.f32 %v11246_v20, %v11198_v19  ;;  %v14699_v56 = vpop.eup %14698  ;;  %v11247_v52 = vadd.f32 1.0, %v14697_v15 }
0x114d   : > { %v11264_v47 = vmul.f32 %v11248_v14, %v11200_v57  ;;  %v11249_v38 = vadd.f32 1.0, %v14699_v56 }
0x114e   : > { %v11270_v17 = vpack.c.bf16 %v11262_v45, %v11258_v11  ;;  %v11263_v63 = vmul.f32 %v11247_v52, %v11199_v39 }
0x114f   : > { %v11272_v18 = vpack.c.bf16 %v11264_v47, %v11260_v1  ;;  %v11265_v9 = vmul.f32 %v11249_v38, %v11201_v33 }
0x1150   : > { %v11271_v60 = vpack.c.bf16 %v11263_v63, %v11259_v35 }
0x1151   : > { %v11273_v37 = vpack.c.bf16 %v11265_v9, %v11261_v21 }
0x1152   : > { %11577 = vmatprep.mubr.bf16.mxu0 %v11271_v60 }
0x1153   : > { %11626 = vmatprep.mubr.bf16.mxu1 %v11273_v37  ;;  %11578 = vmatmul.mubr.bf16.gmra.mrb[24].mxu0 %v11270_v17 }
0x1154   : > { %11627 = vmatmul.mubr.bf16.gmra.mrb[16].mxu1 %v11272_v18 }
0x121d   : > { %v13135_v13 = vpop.f32.mrb[20].mxu0 }
0x121e   : > { %v13163_v16 = vpop.f32.mrb[12].mxu1  ;;  %v13136_v53 = vpop.f32.mrb[21].mxu0 }
0x121f   : > { %v13137_v51 = vadd.f32 %v13136_v53, %v13135_v13  ;;  %v13164_v32 = vpop.f32.mrb[13].mxu1  ;;  %v13138_v27 = vpop.f32.mrb[22].mxu0 }
0x1220   : > { %v13165_v22 = vadd.f32 %v13164_v32, %v13163_v16  ;;  %v13166_v24 = vpop.f32.mrb[14].mxu1  ;;  %v13139_v2 = vpop.f32.mrb[23].mxu0 }
0x1221   : > { %v11572_v62 = vadd.f32 %v13137_v51, %v12802_v41  ;;  %v13140_v26 = vadd.f32 %v13139_v2, %v13138_v27  ;;  %v13167_v25 = vpop.f32.mrb[15].mxu1 }
0x1222   : > { %v13168_v30 = vadd.f32 %v13167_v25, %v13166_v24 }
0x1223   : > { %v11621_v29 = vadd.f32 %v13165_v22, %v11572_v62  ;;  %v11575_v0 = vadd.f32 %v13140_v26, %v12802_v41 }
0x1225   : > { %v11639_v31 = vcombine.high %v11621_v29, %v11621_v29  ;;  %v11646_v34 = vrot.slane %v11621_v29, %v18429_v55  ;;  %v11624_v28 = vadd.f32 %v13168_v30, %v11575_v0  ;;  %v18442_v30 = vld [vmem:[#allocation11_spill] sm:$0xff] (!%p12835_p8) }
0x1226   : > { %v13141_v59 = vpop.f32.mrb[24].mxu0 }
0x1227   : > { %v11653_v12 = vrot.slane %v11639_v31, %v18429_v55  ;;  %v11654_v19 = vcombine.high %v11646_v34, %v11646_v34  ;;  %v17955_v20 = vadd.f32 %v11646_v34, %v17567_v8  ;;  %v11656_v50 = vcombine.high %v11624_v28, %v11624_v28  ;;  %v13169_v14 = vpop.f32.mrb[16].mxu1  ;;  %v13142_v15 = vpop.f32.mrb[25].mxu0 }
0x1228   : > { %v11663_v57 = vrot.slane %v11624_v28, %v18429_v55  ;;  %v13170_v56 = vpop.f32.mrb[17].mxu1  ;;  %v13144_v8 = vpop.f32.mrb[26].mxu0  ;;  %v13143_v39 = vadd.f32 %v13142_v15, %v13141_v59 }
0x1229   : > { %v11655_v11 = vcombine.high %v11653_v12, %v11653_v12  ;;  %v17959_v36 = vadd.f32 %v11654_v19, %v17561_v7  ;;  %v17962_v61 = vadd.f32 %v11653_v12, %v17575_v4  ;;  %11739 = vst [vmem:[#allocation2] sm:$0x3] %v17955_v20  ;;  %v11670_v45 = vrot.slane %v11656_v50, %v18429_v55  ;;  %v13172_v23 = vpop.f32.mrb[18].mxu1  ;;  %v13145_v17 = vpop.f32.mrb[27].mxu0 }
0x122a   : > { %v11671_v1 = vcombine.high %v11663_v57, %v11663_v57  ;;  %v17967_v47 = vadd.f32 %v11663_v57, %v17600_v10  ;;  %v13171_v52 = vadd.f32 %v13170_v56, %v13169_v14  ;;  %v13146_v38 = vadd.f32 %v13145_v17, %v13144_v8  ;;  %v13173_v35 = vpop.f32.mrb[19].mxu1  ;;  %v18445_v17 = vld [vmem:[#allocation14_spill] sm:$0xff] (!%p12835_p8) }
0x122b   : > { %v17970_v7 = vadd.f32 %v11655_v11, %v17569_v54  ;;  %11740 = vst [vmem:[#allocation2 + $0x2] sm:$0x3] %v17959_v36  ;;  %11741 = vst [vmem:[#allocation2 + $0x4] sm:$0x3] %v17962_v61  ;;  %v11672_v4 = vcombine.high %v11670_v45, %v11670_v45  ;;  %v17975_v33 = vadd.f32 %v11670_v45, %v17612_v49 }
0x122c   : > { %v17978_v10 = vadd.f32 %v11671_v1, %v17603_v5  ;;  %11743 = vst [vmem:[#allocation2 + $0x8] sm:$0x3] %v17967_v47  ;;  %v11580_v18 = vadd.f32 %v13143_v39, %v12802_v41  ;;  %v13174_v63 = vadd.f32 %v13173_v35, %v13172_v23  ;;  %v11583_v21 = vadd.f32 %v13146_v38, %v12802_v41  ;;  %v18443_v1 = vld [vmem:[#allocation12_spill] sm:$0xff] (!%p12835_p8)  ;;  %v18446_v38 = vld [vmem:[#allocation15_spill] sm:$0xff] (!%p12835_p8) }
0x122d   : > { %11742 = vst [vmem:[#allocation2 + $0x6] sm:$0x3] %v17970_v7  ;;  %v17983_v54 = vadd.f32 %v11672_v4, %v17614_v42  ;;  %11745 = vst [vmem:[#allocation2 + $0xc] sm:$0x3] %v17975_v33 }
0x122e   : > { %11744 = vst [vmem:[#allocation2 + $0xa] sm:$0x3] %v17978_v10  ;;  %v11629_v49 = vadd.f32 %v13171_v52, %v11580_v18  ;;  %v11632_v9 = vadd.f32 %v13174_v63, %v11583_v21  ;;  %v18444_v52 = vld [vmem:[#allocation13_spill] sm:$0xff] (!%p12835_p8) }
0x122f   : > { %11746 = vst [vmem:[#allocation2 + $0xe] sm:$0x3] %v17983_v54 }
0x1230   : > { %v11673_v5 = vcombine.high %v11629_v49, %v11629_v49  ;;  %v11680_v60 = vrot.slane %v11629_v49, %v18429_v55  ;;  %v11690_v37 = vcombine.high %v11632_v9, %v11632_v9  ;;  %v11697_v13 = vrot.slane %v11632_v9, %v18429_v55 }
0x1232   : > { %v11687_v16 = vrot.slane %v11673_v5, %v18429_v55  ;;  %v11688_v53 = vcombine.high %v11680_v60, %v11680_v60  ;;  %v17992_v42 = vadd.f32 %v11680_v60, %v17558_v58  ;;  %v11704_v41 = vrot.slane %v11690_v37, %v18429_v55  ;;  %11758 = sbr.rel (%p12835_p8) target bundleno = 5008 (0x1390), region = 88 }
0x1233   : > { %v11705_v51 = vcombine.high %v11697_v13, %v11697_v13  ;;  %v17996_v32 = vadd.f32 %v11697_v13, %v17606_v46  ;;  %v11795_v46 = vcombine.low (!%p12835_p8), %v17975_v33, %v17983_v54 }
0x1234   : > { %v11689_v27 = vcombine.high %v11687_v16, %v11687_v16  ;;  %v11732_v22 = vadd.f32 %v11688_v53, %v17564_v48  ;;  %v18000_v24 = vadd.f32 %v11687_v16, %v17580_v6  ;;  %11747 = vst [vmem:[#allocation2 + $0x10] sm:$0x3] %v17992_v42  ;;  %v11706_v2 = vcombine.high %v11704_v41, %v11704_v41 }
0x1235   : > { %v18004_v62 = vadd.f32 %v11705_v51, %v17591_v43  ;;  %v18007_v58 = vadd.f32 %v11704_v41, %v17584_v40  ;;  %11751 = vst [vmem:[#allocation2 + $0x18] sm:$0x3] %v17996_v32  ;;  %v11777_v6 = vcombine.low (!%p12835_p8), %v17955_v20, %v17959_v36  ;;  %v11794_v43 = vcombine.low (!%p12835_p8), %v17967_v47, %v17978_v10 }
0x1236   : > { %v11734_v55 = vadd.f32 %v11689_v27, %v17572_v3  ;;  %11748 = vst [vmem:[#allocation2 + $0x12] sm:$0x3] %v11732_v22  ;;  %11749 = vst [vmem:[#allocation2 + $0x14] sm:$0x3] %v18000_v24  ;;  %v18013_v48 = vadd.f32 %v11706_v2, %v17586_v44  ;;  %v11778_v3 = vcombine.low (!%p12835_p8), %v17962_v61, %v17970_v7 }
0x1237   : > { %11752 = vst [vmem:[#allocation2 + $0x1a] sm:$0x3] %v18004_v62  ;;  %11753 = vst [vmem:[#allocation2 + $0x1c] sm:$0x3] %v18007_v58  ;;  %v11811_v40 = vcombine.low (!%p12835_p8), %v17992_v42, %v11732_v22  ;;  %v11828_v26 = vcombine.low (!%p12835_p8), %v17996_v32, %v18004_v62  ;;  %v11785_v29 = vrot.slane (!%p12835_p8), %v11777_v6, %v18442_v30 }
0x1238   : > { %11750 = vst [vmem:[#allocation2 + $0x16] sm:$0x3] %v11734_v55  ;;  %11754 = vst [vmem:[#allocation2 + $0x1e] sm:$0x3] %v18013_v48  ;;  %v11812_v44 = vcombine.low (!%p12835_p8), %v18000_v24, %v11734_v55  ;;  %v11829_v25 = vcombine.low (!%p12835_p8), %v18007_v58, %v18013_v48  ;;  %v11792_v0 = vrot.slane (!%p12835_p8), %v11778_v3, %v18442_v30 }
0x1239   : > { %v11819_v31 = vrot.slane %v11811_v40, %v18442_v30  ;;  %v11802_v28 = vrot.slane %v11794_v43, %v18442_v30  ;;  %v11809_v12 = vrot.slane %v11795_v46, %v18442_v30  ;;  %v11836_v19 = vrot.slane %v11828_v26, %v18442_v30 }
0x123a   : > { %v11826_v34 = vrot.slane %v11812_v44, %v18442_v30  ;;  %v11843_v50 = vrot.slane %v11829_v25, %v18442_v30  ;;  %v11793_v59 = vcombine.low %v11785_v29, %v11792_v0 }
0x123b   : > { %v11810_v14 = vcombine.low %v11802_v28, %v11809_v12 }
0x123c   : > { %v11827_v57 = vcombine.low %v11819_v31, %v11826_v34  ;;  %11849 = vadd.xlane.f32.xlu0 %v11793_v59  ;;  %v11844_v15 = vcombine.low %v11836_v19, %v11843_v50 }
0x123e   : > { %11853 = vadd.xlane.f32.xlu1 %v11827_v57 }
0x1240   : > { %11851 = vadd.xlane.f32.xlu0 %v11810_v14 }
0x1242   : > { %11855 = vadd.xlane.f32.xlu1 %v11844_v15 }
0x12c9   : > { %v11850_v11 = vpop.xlane.xlu0 %11849 }
0x12ca   : > { %v11857_v56 = vmul.f32 0.0078125, %v11850_v11 }
0x12cb   : > { %v11854_v45 = vpop.xlane.xlu1 %11853 }
0x12cc   : > { %v11859_v8 = vmul.f32 0.0078125, %v11854_v45  ;;  %v11871_v39 = vrot.slane %v11857_v56, %v18443_v1  ;;  %v11878_v23 = vrot.slane %v11857_v56, %v18444_v52  ;;  %v11885_v4 = vrot.slane %v11857_v56, %v18445_v17 }
0x12cd   : > { %v11892_v35 = vrot.slane %v11857_v56, %v18446_v38  ;;  %v11852_v18 = vpop.xlane.xlu0 %11851 }
0x12ce   : > { %v11927_v21 = vrot.slane %v11859_v8, %v18443_v1  ;;  %v11934_v49 = vrot.slane %v11859_v8, %v18444_v52  ;;  %v11941_v9 = vrot.slane %v11859_v8, %v18445_v17  ;;  %v11948_v5 = vrot.slane %v11859_v8, %v18446_v38 }
0x12cf   : > { %v11856_v63 = vpop.xlane.xlu1 %11855  ;;  %v11858_v60 = vmul.f32 0.0078125, %v11852_v18  ;;  %v18050_v13 = vsub.f32 %v17955_v20, %v11871_v39  ;;  %v18053_v16 = vsub.f32 %v17959_v36, %v11878_v23  ;;  %v18056_v53 = vsub.f32 %v17962_v61, %v11885_v4 }
0x12d0   : > { %v11860_v37 = vmul.f32 0.0078125, %v11856_v63  ;;  %v18059_v41 = vsub.f32 %v17970_v7, %v11892_v35  ;;  %v18062_v51 = vsub.f32 %v17992_v42, %v11927_v21  ;;  %v18064_v27 = vsub.f32 %v11732_v22, %v11934_v49 }
0x12d1   : > { %v12009_v2 = vmul.f32 %v18050_v13, %v18050_v13  ;;  %v12010_v20 = vmul.f32 %v18053_v16, %v18053_v16  ;;  %v18071_v36 = vsub.f32 %v18000_v24, %v11941_v9  ;;  %v18073_v6 = vsub.f32 %v11734_v55, %v11948_v5 }
0x12d2   : > { %v12011_v61 = vmul.f32 %v18056_v53, %v18056_v53  ;;  %v12012_v7 = vmul.f32 %v18059_v41, %v18059_v41  ;;  %v12017_v42 = vmul.f32 %v18062_v51, %v18062_v51  ;;  %v12018_v22 = vmul.f32 %v18064_v27, %v18064_v27 }
0x12d3   : > { %v12041_v3 = vcombine.low %v12009_v2, %v12010_v20  ;;  %v12019_v40 = vmul.f32 %v18071_v36, %v18071_v36  ;;  %v12020_v24 = vmul.f32 %v18073_v6, %v18073_v6  ;;  %v11899_v55 = vrot.slane %v11858_v60, %v18443_v1 }
0x12d4   : > { %v12042_v44 = vcombine.low %v12011_v61, %v12012_v7  ;;  %v12075_v43 = vcombine.low %v12017_v42, %v12018_v22  ;;  %v11906_v46 = vrot.slane %v11858_v60, %v18444_v52  ;;  %v11913_v26 = vrot.slane %v11858_v60, %v18445_v17  ;;  %v12836_v42 = vld [vmem:[%s18447_s23] ss:$0 sm:$0xff] }
0x12d5   : > { %v12049_v25 = vrot.slane %v12041_v3, %v18442_v30  ;;  %v12076_v29 = vcombine.low %v12019_v40, %v12020_v24  ;;  %v11920_v0 = vrot.slane %v11858_v60, %v18446_v38  ;;  %v18093_v31 = vsub.f32 %v17967_v47, %v11899_v55  ;;  %v12837_v40 = vld [vmem:[%s18448_s18] ss:$0 sm:$0xff] }
0x12d6   : > { %v12056_v34 = vrot.slane %v12042_v44, %v18442_v30  ;;  %v12083_v28 = vrot.slane %v12075_v43, %v18442_v30  ;;  %v18098_v12 = vsub.f32 %v17978_v10, %v11906_v46  ;;  %v18101_v19 = vsub.f32 %v17975_v33, %v11913_v26 }
0x12d7   : > { %v12090_v50 = vrot.slane %v12076_v29, %v18442_v30  ;;  %v18105_v59 = vsub.f32 %v17983_v54, %v11920_v0  ;;  %v12013_v57 = vmul.f32 %v18093_v31, %v18093_v31  ;;  %v11955_v47 = vrot.slane %v11860_v37, %v18443_v1 }
0x12d8   : > { %v12057_v14 = vcombine.low %v12049_v25, %v12056_v34  ;;  %v12014_v15 = vmul.f32 %v18098_v12, %v18098_v12  ;;  %v12015_v10 = vmul.f32 %v18101_v19, %v18101_v19  ;;  %v11962_v33 = vrot.slane %v11860_v37, %v18444_v52 }
0x12d9   : > { %v12016_v11 = vmul.f32 %v18105_v59, %v18105_v59  ;;  %v11969_v54 = vrot.slane %v11860_v37, %v18445_v17  ;;  %v11976_v45 = vrot.slane %v11860_v37, %v18446_v38  ;;  %v12091_v56 = vcombine.low %v12083_v28, %v12090_v50 }
0x12da   : > { %12113 = vadd.xlane.f32.xlu0 %v12057_v14  ;;  %v12058_v8 = vcombine.low %v12013_v57, %v12014_v15  ;;  %v18120_v39 = vsub.f32 %v17996_v32, %v11955_v47  ;;  %v18123_v23 = vsub.f32 %v18004_v62, %v11962_v33  ;;  %v12286_v24 = vcombine.high %v12836_v42, %v12836_v42 }
0x12db   : > { %v12059_v4 = vcombine.low %v12015_v10, %v12016_v11  ;;  %v18126_v35 = vsub.f32 %v18007_v58, %v11969_v54  ;;  %v18129_v18 = vsub.f32 %v18013_v48, %v11976_v45  ;;  %v12328_v46 = vcombine.high %v12837_v40, %v12837_v40 }
0x12dc   : > { %v12066_v63 = vrot.slane %v12058_v8, %v18442_v30  ;;  %v12021_v21 = vmul.f32 %v18120_v39, %v18120_v39  ;;  %v12022_v49 = vmul.f32 %v18123_v23, %v18123_v23  ;;  %v18150_v25 = vrot.slane %v12836_v42, %v18442_v30 }
0x12dd   : > { %v12073_v32 = vrot.slane %v12059_v4, %v18442_v30  ;;  %v12023_v62 = vmul.f32 %v18126_v35, %v18126_v35  ;;  %v12024_v58 = vmul.f32 %v18129_v18, %v18129_v18  ;;  %v18153_v29 = vrot.slane %v12286_v24, %v18442_v30 }
0x12de   : > { %12117 = vadd.xlane.f32.xlu0 %v12091_v56  ;;  %v12092_v9 = vcombine.low %v12021_v21, %v12022_v49  ;;  %v18156_v28 = vrot.slane %v12837_v40, %v18442_v30  ;;  %v18159_v50 = vrot.slane %v12328_v46, %v18442_v30  ;;  %v18163_v14 = vcombine.high %v18150_v25, %v18150_v25 }
0x12df   : > { %v12074_v48 = vcombine.low %v12066_v63, %v12073_v32  ;;  %v12093_v5 = vcombine.low %v12023_v62, %v12024_v58  ;;  %v18167_v15 = vcombine.high %v18153_v29, %v18153_v29 }
0x12e0   : > { %v12100_v60 = vrot.slane %v12092_v9, %v18442_v30  ;;  %v18179_v45 = vcombine.high %v18159_v50, %v18159_v50 }
0x12e1   : > { %12115 = vadd.xlane.f32.xlu1 %v12074_v48  ;;  %v12107_v37 = vrot.slane %v12093_v5, %v18442_v30  ;;  %v18175_v30 = vcombine.high %v18156_v28, %v18156_v28 }
0x12e3   : > { %v12108_v2 = vcombine.low %v12100_v60, %v12107_v37 }
0x12e5   : > { %12119 = vadd.xlane.f32.xlu1 %v12108_v2 }
0x1367   : > { %v12114_v20 = vpop.xlane.xlu0 %12113 }
0x1368   : > { %v12121_v61 = vmul.f32 0.0078125, %v12114_v20 }
0x136a   : > { %v12125_v7 = vadd.f32 1e-05, %v12121_v61 }
0x136b   : > { %v12118_v22 = vpop.xlane.xlu0 %12117 }
0x136c   : > { %14716 = vrsqrt.f32 %v12125_v7  ;;  %v12123_v3 = vmul.f32 0.0078125, %v12118_v22 }
0x136e   : > { %v12116_v55 = vpop.xlane.xlu1 %12115  ;;  %v12127_v44 = vadd.f32 1e-05, %v12123_v3 }
0x136f   : > { %v12122_v43 = vmul.f32 0.0078125, %v12116_v55 }
0x1370   : > { %14718 = vrsqrt.f32 %v12127_v44 }
0x1371   : > { %v12126_v26 = vadd.f32 1e-05, %v12122_v43 }
0x1372   : > { %v12120_v0 = vpop.xlane.xlu1 %12119 }
0x1373   : > { %14720 = vrsqrt.f32 %v12126_v26  ;;  %v12124_v34 = vmul.f32 0.0078125, %v12120_v0 }
0x1375   : > { %v12128_v57 = vadd.f32 1e-05, %v12124_v34 }
0x1376   : > { %v14717_v47 = vpop.eup %14716 }
0x1377   : > { %v12143_v10 = vrot.slane %v14717_v47, %v18443_v1  ;;  %v12150_v33 = vrot.slane %v14717_v47, %v18444_v52  ;;  %v12157_v11 = vrot.slane %v14717_v47, %v18445_v17  ;;  %v12164_v54 = vrot.slane %v14717_v47, %v18446_v38 }
0x1378   : > { %14722 = vrsqrt.f32 %v12128_v57 }
0x1379   : > { %v12265_v56 = vmul.f32 %v12143_v10, %v18050_v13  ;;  %v12266_v8 = vmul.f32 %v12150_v33, %v18053_v16  ;;  %v12267_v4 = vmul.f32 %v12157_v11, %v18056_v53  ;;  %v12268_v63 = vmul.f32 %v12164_v54, %v18059_v41 }
0x137a   : > { %v14719_v21 = vpop.eup %14718 }
0x137b   : > { %v12307_v49 = vmul.f32 %v18150_v25, %v12265_v56  ;;  %v12308_v32 = vmul.f32 %v18163_v14, %v12266_v8  ;;  %v12309_v62 = vmul.f32 %v18153_v29, %v12267_v4  ;;  %v12310_v58 = vmul.f32 %v18167_v15, %v12268_v63 }
0x137c   : > { %v12199_v13 = vrot.slane %v14719_v21, %v18443_v1  ;;  %v12206_v16 = vrot.slane %v14719_v21, %v18444_v52  ;;  %v12213_v53 = vrot.slane %v14719_v21, %v18445_v17  ;;  %v12220_v41 = vrot.slane %v14719_v21, %v18446_v38 }
0x137d   : > { %v14721_v9 = vpop.eup %14720  ;;  %v12349_v48 = vadd.f32 %v18156_v28, %v12307_v49  ;;  %v12350_v5 = vadd.f32 %v18175_v30, %v12308_v32  ;;  %v12351_v60 = vadd.f32 %v18159_v50, %v12309_v62  ;;  %v12352_v37 = vadd.f32 %v18179_v45, %v12310_v58 }
0x137e   : > { %v12171_v2 = vrot.slane %v14721_v9, %v18443_v1  ;;  %v12178_v20 = vrot.slane %v14721_v9, %v18444_v52  ;;  %v12185_v61 = vrot.slane %v14721_v9, %v18445_v17  ;;  %v12192_v7 = vrot.slane %v14721_v9, %v18446_v38 }
0x137f   : > { %12365 = vst [vmem:[%s14958_s5] sm:$0x3] %v12349_v48  ;;  %12366 = vst [vmem:[%s14958_s5 + $0x2] sm:$0x3] %v12350_v5  ;;  %v12273_v42 = vmul.f32 %v12199_v13, %v18062_v51  ;;  %v12274_v22 = vmul.f32 %v12206_v16, %v18064_v27  ;;  %v12275_v3 = vmul.f32 %v12213_v53, %v18071_v36 }
0x1380   : > { %12367 = vst [vmem:[%s14958_s5 + $0x4] sm:$0x3] %v12351_v60  ;;  %12368 = vst [vmem:[%s14958_s5 + $0x6] sm:$0x3] %v12352_v37  ;;  %v12276_v40 = vmul.f32 %v12220_v41, %v18073_v6  ;;  %v12269_v24 = vmul.f32 %v12171_v2, %v18093_v31  ;;  %v12270_v55 = vmul.f32 %v12178_v20, %v18098_v12 }
0x1381   : > { %v12271_v44 = vmul.f32 %v12185_v61, %v18101_v19  ;;  %v12272_v43 = vmul.f32 %v12192_v7, %v18105_v59  ;;  %v12315_v46 = vmul.f32 %v18150_v25, %v12273_v42  ;;  %v12316_v26 = vmul.f32 %v18163_v14, %v12274_v22 }
0x1382   : > { %v12317_v51 = vmul.f32 %v18153_v29, %v12275_v3  ;;  %v12318_v27 = vmul.f32 %v18167_v15, %v12276_v40  ;;  %v14723_v36 = vpop.eup %14722  ;;  %v12311_v6 = vmul.f32 %v18150_v25, %v12269_v24  ;;  %v12312_v31 = vmul.f32 %v18163_v14, %v12270_v55 }
0x1383   : > { %v12313_v12 = vmul.f32 %v18153_v29, %v12271_v44  ;;  %v12314_v19 = vmul.f32 %v18167_v15, %v12272_v43  ;;  %v12357_v59 = vadd.f32 %v18156_v28, %v12315_v46  ;;  %v12358_v0 = vadd.f32 %v18175_v30, %v12316_v26 }
0x1384   : > { %v12359_v34 = vadd.f32 %v18159_v50, %v12317_v51  ;;  %v12360_v57 = vadd.f32 %v18179_v45, %v12318_v27  ;;  %v12353_v47 = vadd.f32 %v18156_v28, %v12311_v6  ;;  %v12354_v10 = vadd.f32 %v18175_v30, %v12312_v31 }
0x1385   : > { %v12355_v33 = vadd.f32 %v18159_v50, %v12313_v12  ;;  %v12356_v11 = vadd.f32 %v18179_v45, %v12314_v19  ;;  %12373 = vst [vmem:[%s14958_s5 + $0x10] sm:$0x3] %v12357_v59  ;;  %12374 = vst [vmem:[%s14958_s5 + $0x12] sm:$0x3] %v12358_v0  ;;  %v12227_v54 = vrot.slane %v14723_v36, %v18443_v1 }
0x1386   : > { %12375 = vst [vmem:[%s14958_s5 + $0x14] sm:$0x3] %v12359_v34  ;;  %12376 = vst [vmem:[%s14958_s5 + $0x16] sm:$0x3] %v12360_v57  ;;  %v12234_v56 = vrot.slane %v14723_v36, %v18444_v52  ;;  %v12241_v8 = vrot.slane %v14723_v36, %v18445_v17  ;;  %v12248_v4 = vrot.slane %v14723_v36, %v18446_v38 }
0x1387   : > { %12369 = vst [vmem:[%s14958_s5 + $0x8] sm:$0x3] %v12353_v47  ;;  %12370 = vst [vmem:[%s14958_s5 + $0xa] sm:$0x3] %v12354_v10  ;;  %v12277_v63 = vmul.f32 %v12227_v54, %v18120_v39 }
0x1388   : > { %12371 = vst [vmem:[%s14958_s5 + $0xc] sm:$0x3] %v12355_v33  ;;  %12372 = vst [vmem:[%s14958_s5 + $0xe] sm:$0x3] %v12356_v11  ;;  %v12278_v21 = vmul.f32 %v12234_v56, %v18123_v23  ;;  %v12279_v1 = vmul.f32 %v12241_v8, %v18126_v35  ;;  %v12280_v52 = vmul.f32 %v12248_v4, %v18129_v18 }
0x1389   : > { %v12319_v17 = vmul.f32 %v18150_v25, %v12277_v63 }
0x138a   : > { %v12320_v38 = vmul.f32 %v18163_v14, %v12278_v21  ;;  %v12321_v49 = vmul.f32 %v18153_v29, %v12279_v1  ;;  %v12322_v32 = vmul.f32 %v18167_v15, %v12280_v52 }
0x138b   : > { %v12361_v62 = vadd.f32 %v18156_v28, %v12319_v17 }
0x138c   : > { %v12362_v58 = vadd.f32 %v18175_v30, %v12320_v38  ;;  %v12363_v39 = vadd.f32 %v18159_v50, %v12321_v49  ;;  %v12364_v23 = vadd.f32 %v18179_v45, %v12322_v32 }
0x138d   : > { %12377 = vst [vmem:[%s14958_s5 + $0x18] sm:$0x3] %v12361_v62 }
0x138e   : > { %12378 = vst [vmem:[%s14958_s5 + $0x1a] sm:$0x3] %v12362_v58  ;;  %12379 = vst [vmem:[%s14958_s5 + $0x1c] sm:$0x3] %v12363_v39 }
0x138f   : > { %12380 = vst [vmem:[%s14958_s5 + $0x1e] sm:$0x3] %v12364_v23 }
0x1390 PF: > { %s18449_s27 = sld [smem:[#allocation7_spill]]  ;;  %s18450_s18 = sld [smem:[#allocation5_spill]] }
0x1391   : > { %s18451_s19 = sld [smem:[#allocation6_spill]]  ;;  %s18452_s20 = sld [smem:[#allocation8_spill]] }
0x1392   : > { %s18453_s21 = sld [smem:[#allocation9_spill]] }
0x1396   : > { %s25_s22 = sadd.s32 1, %s18449_s27  }
0x1397   : > { %p22_p9 = scmp.ge.s32.totalorder %s25_s22, 6  }
0x1399   :  { %24 = sbr.rel (!%p22_p9) target bundleno = 9 (0x9), region = 154 }

</bundles_post_ra>
